<compile_context>
chip_gen: v5e
topology: v5e:2x2
jax: 0.10.0
libtpu: 0.0.40
codegen_flags: <defaults>
</compile_context>

<pallas_src>
import functools

import jax
import jax.numpy as jnp
from jax.experimental import pallas as pl
from jax.experimental.pallas import tpu as pltpu


def _round_up(n, m):
    return ((n + m - 1) // m) * m


def lstm_fc_kernel(T, Bp, Hp, unroll_static,
                   x_ref, wih0, wblk, b0, b1, wfc, bfc,
                   out_ref,
                   xp_ref, hcat_ref):
    """Whole 2-layer LSTM recurrence + FC head in one kernel invocation.

    x_ref:    (T*Bp, F)  time-major, rows grouped by time step.
    wih0:     (F, 4Hp)   layer-0 input weights (gate-padded).
    wblk:     (2Hp, 8Hp) block matrix [[whh0, wih1_T], [0, whh1_T]].
    b0, b1:   (1, 4Hp)   combined biases (b_ih + b_hh), gate-padded.
    wfc, bfc: (Hp, Cp), (1, Cp) head weights (lane-dense padded).
    xp_ref:   (T*Bp, 4Hp) VMEM scratch for the hoisted input projection.
    hcat_ref: (Bp, 2Hp)   VMEM scratch holding [h0 | h1].
    """
    f32 = jnp.float32
    H4 = 4 * Hp

    # ---- prologue: hoisted layer-0 input projection (one big MXU matmul) ----
    xp_ref[...] = (jnp.dot(x_ref[...], wih0[...], preferred_element_type=f32)
                   + b0[...])                                    # (T*Bp, 4Hp)

    # Hoisted loads / broadcasts (kept out of the T-step serial path).
    wblk_v = wblk[...]                                           # (2Hp, 8Hp)
    b1_b = jnp.broadcast_to(b1[...], (Bp, H4))                   # (Bp, 4Hp)

    hcat_ref[...] = jnp.zeros((Bp, 2 * Hp), f32)                 # h0 = h1 = 0

    def act(g, c):
        # PyTorch gate order [i, f, g, o]; Hp is a multiple of 128 so each gate
        # slice is a whole lane group (free vreg view, no masked selects).
        i = jax.nn.sigmoid(g[:, 0 * Hp:1 * Hp])
        f = jax.nn.sigmoid(g[:, 1 * Hp:2 * Hp])
        gg = jnp.tanh(g[:, 2 * Hp:3 * Hp])
        o = jax.nn.sigmoid(g[:, 3 * Hp:4 * Hp])
        c_new = f * c + i * gg
        h_new = o * jnp.tanh(c_new)
        return h_new, c_new

    def step(t, carry):
        rec0, c0, c1 = carry
        if unroll_static:
            start = t * Bp                                       # static offset
        else:
            start = pl.multiple_of(t * Bp, Bp)                   # dynamic offset
        # layer 0: hoisted input projection + recurrent term produced by the
        # previous step's fused dot.
        g0 = xp_ref[pl.ds(start, Bp), :] + rec0                  # (Bp, 4Hp)
        h0, c0 = act(g0, c0)
        hcat_ref[:, 0:Hp] = h0                                   # update h0 half
        # fused dot: [h0(t) | h1(t-1)] @ [[whh0, wih1],[0, whh1]]  -> one push
        big = jnp.dot(hcat_ref[...], wblk_v,
                      preferred_element_type=f32)                # (Bp, 8Hp)
        rec0 = big[:, 0:H4]                                      # for step t+1
        g1 = big[:, H4:2 * H4] + b1_b                            # layer-1 gates
        h1, c1 = act(g1, c1)
        hcat_ref[:, Hp:2 * Hp] = h1                              # update h1 half
        return rec0, c0, c1

    zeros_bh = jnp.zeros((Bp, Hp), f32)
    carry = (jnp.zeros((Bp, H4), f32), zeros_bh, zeros_bh)
    if unroll_static:
        # Small T: fully unrolled, maximum LLO scheduler visibility.
        for t in range(T):
            carry = step(t, carry)
    else:
        # Production T: bound vreg live ranges / instruction memory.
        carry = jax.lax.fori_loop(0, T, step, carry, unroll=4)

    # ---- FC head on the final layer-1 hidden state (lane-dense store) ----
    h1_final = hcat_ref[:, Hp:2 * Hp]                            # (Bp, Hp)
    out_ref[...] = (jnp.dot(h1_final, wfc[...], preferred_element_type=f32)
                    + bfc[...])


def pack_params(params):
    """One-time layout transform of raw (PyTorch-equivalent) params.

    Pads each gate block and the hidden dim to a multiple of 128 lanes (exact
    zeros), builds the fused block matrix for the per-step dot, and pads the
    head to a lane-dense output slab.
    """
    H = params["whh0_T"].shape[0]
    C = params["wfc_T"].shape[1]
    Hp = _round_up(H, 128)
    Cp = _round_up(C, 128)
    f32 = jnp.float32

    def pad_gate_cols(w):                     # (..., 4H) -> (..., 4Hp)
        lead = w.shape[:-1]
        w4 = w.reshape(*lead, 4, H)
        w4 = jnp.pad(w4, [(0, 0)] * len(lead) + [(0, 0), (0, Hp - H)])
        return w4.reshape(*lead, 4 * Hp).astype(f32)

    def pad_rows(w):                          # (H, ...) -> (Hp, ...)
        return jnp.pad(w, ((0, Hp - H),) + ((0, 0),) * (w.ndim - 1))

    wih0p = pad_gate_cols(params["wih0_T"])                       # (F, 4Hp)
    whh0p = pad_gate_cols(pad_rows(params["whh0_T"]))             # (Hp, 4Hp)
    wih1p = pad_gate_cols(pad_rows(params["wih1_T"]))             # (Hp, 4Hp)
    whh1p = pad_gate_cols(pad_rows(params["whh1_T"]))             # (Hp, 4Hp)

    # Block matrix for the fused per-step dot:
    #   [h0(t) | h1(t-1)] @ [[whh0, wih1_T], [0, whh1_T]]
    wblk = jnp.concatenate(
        [jnp.concatenate([whh0p, wih1p], axis=1),
         jnp.concatenate([jnp.zeros((Hp, 4 * Hp), f32), whh1p], axis=1)],
        axis=0)                                                   # (2Hp, 8Hp)

    return {
        "Hp": Hp, "Cp": Cp,
        "wih0p": wih0p,
        "wblk": wblk,
        "b0p": pad_gate_cols(params["b0"]),                       # (1, 4Hp)
        "b1p": pad_gate_cols(params["b1"]),                       # (1, 4Hp)
        "wfcp": jnp.pad(params["wfc_T"].astype(f32),
                        ((0, Hp - H), (0, Cp - C))),              # (Hp, Cp)
        "bfcp": jnp.pad(params["bfc"].astype(f32),
                        ((0, 0), (0, Cp - C))),                   # (1, Cp)
    }


def deepfake_lstm_forward(x, params):
    """x: (B, T, F) batch_first (PyTorch convention). Returns (B, num_classes)."""
    B, T, F = x.shape
    C = params["wfc_T"].shape[1]

    pk = pack_params(params)          # NOTE: in production pack once at load.
    Hp, Cp = pk["Hp"], pk["Cp"]
    Bp = _round_up(B, 8)              # fill f32 sublanes

    # Pad batch, go time-major, flatten so the layer-0 projection is one matmul.
    xb = jnp.pad(x.astype(jnp.float32), ((0, Bp - B), (0, 0), (0, 0)))
    x_flat = jnp.transpose(xb, (1, 0, 2)).reshape(T * Bp, F)

    unroll_static = T <= 32
    kernel = functools.partial(lstm_fc_kernel, T, Bp, Hp, unroll_static)
    vmem = lambda: pl.BlockSpec(memory_space=pltpu.MemorySpace.VMEM)

    out_p = pl.pallas_call(
        kernel,
        out_shape=jax.ShapeDtypeStruct((Bp, Cp), jnp.float32),
        in_specs=[vmem() for _ in range(7)],   # whole arrays resident in VMEM
        out_specs=vmem(),
        scratch_shapes=[
            pltpu.VMEM((T * Bp, 4 * Hp), jnp.float32),   # hoisted projection
            pltpu.VMEM((Bp, 2 * Hp), jnp.float32),       # persistent [h0 | h1]
        ],
    )(x_flat, pk["wih0p"], pk["wblk"], pk["b0p"], pk["b1p"],
      pk["wfcp"], pk["bfcp"])

    return out_p[:B, :C]


def ref_forward(x, p):
    """Pure-JAX reference of the PyTorch forward (for correctness check)."""
    B, T, F = x.shape
    H = p["whh0_T"].shape[0]

    def cell(xin, h, c, wih_T, whh_T, b):
        g = xin @ wih_T + h @ whh_T + b
        i = jax.nn.sigmoid(g[:, :H])
        f = jax.nn.sigmoid(g[:, H:2 * H])
        gg = jnp.tanh(g[:, 2 * H:3 * H])
        o = jax.nn.sigmoid(g[:, 3 * H:])
        c2 = f * c + i * gg
        return o * jnp.tanh(c2), c2

    def step(carry, x_t):
        h0, c0, h1, c1 = carry
        h0n, c0n = cell(x_t, h0, c0, p["wih0_T"], p["whh0_T"], p["b0"])
        h1n, c1n = cell(h0n, h1, c1, p["wih1_T"], p["whh1_T"], p["b1"])
        return (h0n, c0n, h1n, c1n), None

    init = tuple(jnp.zeros((B, H), jnp.float32) for _ in range(4))
    (h0, c0, h1, c1), _ = jax.lax.scan(step, init, jnp.transpose(x, (1, 0, 2)))
    return h1 @ p["wfc_T"] + p["bfc"]


def init_params(key, feature_dim, hidden_dim, num_classes):
    """Deterministic synthetic params matching nn.LSTM(F, H, 2) + nn.Linear(H, C)."""
    H, F, C = hidden_dim, feature_dim, num_classes
    ks = jax.random.split(key, 12)
    s = 1.0 / jnp.sqrt(jnp.float32(H))
    u = lambda k, shape: jax.random.uniform(k, shape, jnp.float32, -s, s)

    wih0 = u(ks[0], (4 * H, F))
    whh0 = u(ks[1], (4 * H, H))
    bih0 = u(ks[2], (4 * H,))
    bhh0 = u(ks[3], (4 * H,))
    wih1 = u(ks[4], (4 * H, H))
    whh1 = u(ks[5], (4 * H, H))
    bih1 = u(ks[6], (4 * H,))
    bhh1 = u(ks[7], (4 * H,))
    wfc = u(ks[8], (C, H))
    bfc = u(ks[9], (C,))

    return {
        "wih0_T": wih0.T, "whh0_T": whh0.T, "b0": (bih0 + bhh0)[None, :],
        "wih1_T": wih1.T, "whh1_T": whh1.T, "b1": (bih1 + bhh1)[None, :],
        "wfc_T": wfc.T, "bfc": bfc[None, :],
    }


if __name__ == "__main__":
    # Small shapes consistent with the module: (B, T, feature_dim), hidden_dim, classes.
    B, T, F, H, C = 2, 8, 32, 32, 2

    key = jax.random.PRNGKey(0)
    k_x, k_p = jax.random.split(key)
    x = jax.random.normal(k_x, (B, T, F), jnp.float32)
    params = init_params(k_p, feature_dim=F, hidden_dim=H, num_classes=C)

    out = deepfake_lstm_forward(x, params)
    out = jax.block_until_ready(out)

    ref = jax.block_until_ready(ref_forward(x, params))
    assert out.shape == (B, C)
    assert jnp.allclose(out, ref, atol=2e-5, rtol=2e-5), (out, ref)

    print("KERNEL_OK")
</pallas_src>

<mosaic_0001>
module attributes {stable_mosaic.version = 11 : i64} {
  func.func @lstm_fc_kernel(%arg0: memref<64x32xf32, #tpu.memory_space<vmem>>, %arg1: memref<32x512xf32, #tpu.memory_space<vmem>>, %arg2: memref<256x1024xf32, #tpu.memory_space<vmem>>, %arg3: memref<1x512xf32, #tpu.memory_space<vmem>>, %arg4: memref<1x512xf32, #tpu.memory_space<vmem>>, %arg5: memref<128x128xf32, #tpu.memory_space<vmem>>, %arg6: memref<1x128xf32, #tpu.memory_space<vmem>>, %arg7: memref<8x128xf32, #tpu.memory_space<vmem>>, %arg8: memref<64x512xf32, #tpu.memory_space<vmem>>, %arg9: memref<8x256xf32, #tpu.memory_space<vmem>>) attributes {dimension_semantics = [], scalar_prefetch = 0 : i64, scratch_operands = 2 : i64, tpu.core_type = #tpu.core_type<tc>} {
    %c0 = arith.constant 0 : index
    %c0_0 = arith.constant 0 : index
    %0 = vector.load %arg0[%c0, %c0_0] : memref<64x32xf32, #tpu.memory_space<vmem>>, vector<64x32xf32>
    %c0_1 = arith.constant 0 : index
    %c0_2 = arith.constant 0 : index
    %1 = vector.load %arg1[%c0_1, %c0_2] : memref<32x512xf32, #tpu.memory_space<vmem>>, vector<32x512xf32>
    %cst = arith.constant dense<0.000000e+00> : vector<64x512xf32>
    %2 = tpu.matmul %0, %1, %cst {dimension_numbers = #tpu.dot_dimension_numbers<[1], [0], [0], [1], [0, 0, 1, 1], [], []>} : vector<64x32xf32>, vector<32x512xf32>, vector<64x512xf32> -> vector<64x512xf32>
    %c0_3 = arith.constant 0 : index
    %c0_4 = arith.constant 0 : index
    %3 = vector.load %arg3[%c0_3, %c0_4] : memref<1x512xf32, #tpu.memory_space<vmem>>, vector<1x512xf32>
    %4 = vector.broadcast %3 : vector<1x512xf32> to vector<64x512xf32>
    %5 = arith.addf %2, %4 : vector<64x512xf32>
    %c0_5 = arith.constant 0 : index
    %c0_6 = arith.constant 0 : index
    %6 = vector.load %arg8[%c0_5, %c0_6] : memref<64x512xf32, #tpu.memory_space<vmem>>, vector<64x512xf32>
    tpu.vector_store %arg8[%c0_5, %c0_6], %5 {strides = array<i32>} : memref<64x512xf32, #tpu.memory_space<vmem>>, vector<64x512xf32>,
    %c0_7 = arith.constant 0 : index
    %c0_8 = arith.constant 0 : index
    %7 = vector.load %arg2[%c0_7, %c0_8] : memref<256x1024xf32, #tpu.memory_space<vmem>>, vector<256x1024xf32>
    %c0_9 = arith.constant 0 : index
    %c0_10 = arith.constant 0 : index
    %8 = vector.load %arg4[%c0_9, %c0_10] : memref<1x512xf32, #tpu.memory_space<vmem>>, vector<1x512xf32>
    %9 = vector.shape_cast %8 : vector<1x512xf32> to vector<1x512xf32>
    %10 = vector.broadcast %9 : vector<1x512xf32> to vector<8x512xf32>
    %cst_11 = arith.constant 0.000000e+00 : f32
    %11 = vector.broadcast %cst_11 : f32 to vector<8x256xf32>
    %c0_12 = arith.constant 0 : index
    %c0_13 = arith.constant 0 : index
    %12 = vector.load %arg9[%c0_12, %c0_13] : memref<8x256xf32, #tpu.memory_space<vmem>>, vector<8x256xf32>
    tpu.vector_store %arg9[%c0_12, %c0_13], %11 {strides = array<i32>} : memref<8x256xf32, #tpu.memory_space<vmem>>, vector<8x256xf32>,
    %cst_14 = arith.constant 0.000000e+00 : f32
    %13 = vector.broadcast %cst_14 : f32 to vector<8x128xf32>
    %cst_15 = arith.constant 0.000000e+00 : f32
    %14 = vector.broadcast %cst_15 : f32 to vector<8x512xf32>
    %c0_16 = arith.constant 0 : index
    %c0_17 = arith.constant 0 : index
    %15 = vector.load %arg8[%c0_16, %c0_17] : memref<64x512xf32, #tpu.memory_space<vmem>>, vector<8x512xf32>
    %16 = arith.addf %15, %14 : vector<8x512xf32>
    %17 = vector.extract_strided_slice %16 {offsets = [0, 0], sizes = [8, 128], strides = [1, 1]} : vector<8x512xf32> to vector<8x128xf32>
    %18 = arith.negf %17 : vector<8x128xf32>
    %19 = math.exp %18 : vector<8x128xf32>
    %cst_18 = arith.constant 1.000000e+00 : f32
    %20 = vector.broadcast %cst_18 : f32 to vector<8x128xf32>
    %21 = arith.addf %20, %19 : vector<8x128xf32>
    %22 = arith.divf %20, %21 : vector<8x128xf32>
    %23 = vector.extract_strided_slice %16 {offsets = [0, 128], sizes = [8, 128], strides = [1, 1]} : vector<8x512xf32> to vector<8x128xf32>
    %24 = arith.negf %23 : vector<8x128xf32>
    %25 = math.exp %24 : vector<8x128xf32>
    %cst_19 = arith.constant 1.000000e+00 : f32
    %26 = vector.broadcast %cst_19 : f32 to vector<8x128xf32>
    %27 = arith.addf %26, %25 : vector<8x128xf32>
    %28 = arith.divf %26, %27 : vector<8x128xf32>
    %29 = vector.extract_strided_slice %16 {offsets = [0, 256], sizes = [8, 128], strides = [1, 1]} : vector<8x512xf32> to vector<8x128xf32>
    %30 = math.tanh %29 : vector<8x128xf32>
    %31 = vector.extract_strided_slice %16 {offsets = [0, 384], sizes = [8, 128], strides = [1, 1]} : vector<8x512xf32> to vector<8x128xf32>
    %32 = arith.negf %31 : vector<8x128xf32>
    %33 = math.exp %32 : vector<8x128xf32>
    %cst_20 = arith.constant 1.000000e+00 : f32
    %34 = vector.broadcast %cst_20 : f32 to vector<8x128xf32>
    %35 = arith.addf %34, %33 : vector<8x128xf32>
    %36 = arith.divf %34, %35 : vector<8x128xf32>
    %37 = arith.mulf %28, %13 : vector<8x128xf32>
    %38 = arith.mulf %22, %30 : vector<8x128xf32>
    %39 = arith.addf %37, %38 : vector<8x128xf32>
    %40 = math.tanh %39 : vector<8x128xf32>
    %41 = arith.mulf %36, %40 : vector<8x128xf32>
    %c0_21 = arith.constant 0 : index
    %c0_22 = arith.constant 0 : index
    %42 = vector.load %arg9[%c0_21, %c0_22] : memref<8x256xf32, #tpu.memory_space<vmem>>, vector<8x128xf32>
    tpu.vector_store %arg9[%c0_21, %c0_22], %41 {strides = array<i32>} : memref<8x256xf32, #tpu.memory_space<vmem>>, vector<8x128xf32>,
    %c0_23 = arith.constant 0 : index
    %c0_24 = arith.constant 0 : index
    %43 = vector.load %arg9[%c0_23, %c0_24] : memref<8x256xf32, #tpu.memory_space<vmem>>, vector<8x256xf32>
    %cst_25 = arith.constant dense<0.000000e+00> : vector<8x1024xf32>
    %44 = tpu.matmul %43, %7, %cst_25 {dimension_numbers = #tpu.dot_dimension_numbers<[1], [0], [0], [1], [0, 0, 1, 1], [], []>} : vector<8x256xf32>, vector<256x1024xf32>, vector<8x1024xf32> -> vector<8x1024xf32>
    %45 = vector.extract_strided_slice %44 {offsets = [0, 0], sizes = [8, 512], strides = [1, 1]} : vector<8x1024xf32> to vector<8x512xf32>
    %46 = vector.extract_strided_slice %44 {offsets = [0, 512], sizes = [8, 512], strides = [1, 1]} : vector<8x1024xf32> to vector<8x512xf32>
    %47 = arith.addf %46, %10 : vector<8x512xf32>
    %48 = vector.extract_strided_slice %47 {offsets = [0, 0], sizes = [8, 128], strides = [1, 1]} : vector<8x512xf32> to vector<8x128xf32>
    %49 = arith.negf %48 : vector<8x128xf32>
    %50 = math.exp %49 : vector<8x128xf32>
    %cst_26 = arith.constant 1.000000e+00 : f32
    %51 = vector.broadcast %cst_26 : f32 to vector<8x128xf32>
    %52 = arith.addf %51, %50 : vector<8x128xf32>
    %53 = arith.divf %51, %52 : vector<8x128xf32>
    %54 = vector.extract_strided_slice %47 {offsets = [0, 128], sizes = [8, 128], strides = [1, 1]} : vector<8x512xf32> to vector<8x128xf32>
    %55 = arith.negf %54 : vector<8x128xf32>
    %56 = math.exp %55 : vector<8x128xf32>
    %cst_27 = arith.constant 1.000000e+00 : f32
    %57 = vector.broadcast %cst_27 : f32 to vector<8x128xf32>
    %58 = arith.addf %57, %56 : vector<8x128xf32>
    %59 = arith.divf %57, %58 : vector<8x128xf32>
    %60 = vector.extract_strided_slice %47 {offsets = [0, 256], sizes = [8, 128], strides = [1, 1]} : vector<8x512xf32> to vector<8x128xf32>
    %61 = math.tanh %60 : vector<8x128xf32>
    %62 = vector.extract_strided_slice %47 {offsets = [0, 384], sizes = [8, 128], strides = [1, 1]} : vector<8x512xf32> to vector<8x128xf32>
    %63 = arith.negf %62 : vector<8x128xf32>
    %64 = math.exp %63 : vector<8x128xf32>
    %cst_28 = arith.constant 1.000000e+00 : f32
    %65 = vector.broadcast %cst_28 : f32 to vector<8x128xf32>
    %66 = arith.addf %65, %64 : vector<8x128xf32>
    %67 = arith.divf %65, %66 : vector<8x128xf32>
    %68 = arith.mulf %59, %13 : vector<8x128xf32>
    %69 = arith.mulf %53, %61 : vector<8x128xf32>
    %70 = arith.addf %68, %69 : vector<8x128xf32>
    %71 = math.tanh %70 : vector<8x128xf32>
    %72 = arith.mulf %67, %71 : vector<8x128xf32>
    %c0_29 = arith.constant 0 : index
    %c128 = arith.constant 128 : index
    %73 = vector.load %arg9[%c0_29, %c128] : memref<8x256xf32, #tpu.memory_space<vmem>>, vector<8x128xf32>
    tpu.vector_store %arg9[%c0_29, %c128], %72 {strides = array<i32>} : memref<8x256xf32, #tpu.memory_space<vmem>>, vector<8x128xf32>,
    %c8 = arith.constant 8 : index
    %c0_30 = arith.constant 0 : index
    %74 = vector.load %arg8[%c8, %c0_30] : memref<64x512xf32, #tpu.memory_space<vmem>>, vector<8x512xf32>
    %75 = arith.addf %74, %45 : vector<8x512xf32>
    %76 = vector.extract_strided_slice %75 {offsets = [0, 0], sizes = [8, 128], strides = [1, 1]} : vector<8x512xf32> to vector<8x128xf32>
    %77 = arith.negf %76 : vector<8x128xf32>
    %78 = math.exp %77 : vector<8x128xf32>
    %cst_31 = arith.constant 1.000000e+00 : f32
    %79 = vector.broadcast %cst_31 : f32 to vector<8x128xf32>
    %80 = arith.addf %79, %78 : vector<8x128xf32>
    %81 = arith.divf %79, %80 : vector<8x128xf32>
    %82 = vector.extract_strided_slice %75 {offsets = [0, 128], sizes = [8, 128], strides = [1, 1]} : vector<8x512xf32> to vector<8x128xf32>
    %83 = arith.negf %82 : vector<8x128xf32>
    %84 = math.exp %83 : vector<8x128xf32>
    %cst_32 = arith.constant 1.000000e+00 : f32
    %85 = vector.broadcast %cst_32 : f32 to vector<8x128xf32>
    %86 = arith.addf %85, %84 : vector<8x128xf32>
    %87 = arith.divf %85, %86 : vector<8x128xf32>
    %88 = vector.extract_strided_slice %75 {offsets = [0, 256], sizes = [8, 128], strides = [1, 1]} : vector<8x512xf32> to vector<8x128xf32>
    %89 = math.tanh %88 : vector<8x128xf32>
    %90 = vector.extract_strided_slice %75 {offsets = [0, 384], sizes = [8, 128], strides = [1, 1]} : vector<8x512xf32> to vector<8x128xf32>
    %91 = arith.negf %90 : vector<8x128xf32>
    %92 = math.exp %91 : vector<8x128xf32>
    %cst_33 = arith.constant 1.000000e+00 : f32
    %93 = vector.broadcast %cst_33 : f32 to vector<8x128xf32>
    %94 = arith.addf %93, %92 : vector<8x128xf32>
    %95 = arith.divf %93, %94 : vector<8x128xf32>
    %96 = arith.mulf %87, %39 : vector<8x128xf32>
    %97 = arith.mulf %81, %89 : vector<8x128xf32>
    %98 = arith.addf %96, %97 : vector<8x128xf32>
    %99 = math.tanh %98 : vector<8x128xf32>
    %100 = arith.mulf %95, %99 : vector<8x128xf32>
    %c0_34 = arith.constant 0 : index
    %c0_35 = arith.constant 0 : index
    %101 = vector.load %arg9[%c0_34, %c0_35] : memref<8x256xf32, #tpu.memory_space<vmem>>, vector<8x128xf32>
    tpu.vector_store %arg9[%c0_34, %c0_35], %100 {strides = array<i32>} : memref<8x256xf32, #tpu.memory_space<vmem>>, vector<8x128xf32>,
    %c0_36 = arith.constant 0 : index
    %c0_37 = arith.constant 0 : index
    %102 = vector.load %arg9[%c0_36, %c0_37] : memref<8x256xf32, #tpu.memory_space<vmem>>, vector<8x256xf32>
    %cst_38 = arith.constant dense<0.000000e+00> : vector<8x1024xf32>
    %103 = tpu.matmul %102, %7, %cst_38 {dimension_numbers = #tpu.dot_dimension_numbers<[1], [0], [0], [1], [0, 0, 1, 1], [], []>} : vector<8x256xf32>, vector<256x1024xf32>, vector<8x1024xf32> -> vector<8x1024xf32>
    %104 = vector.extract_strided_slice %103 {offsets = [0, 0], sizes = [8, 512], strides = [1, 1]} : vector<8x1024xf32> to vector<8x512xf32>
    %105 = vector.extract_strided_slice %103 {offsets = [0, 512], sizes = [8, 512], strides = [1, 1]} : vector<8x1024xf32> to vector<8x512xf32>
    %106 = arith.addf %105, %10 : vector<8x512xf32>
    %107 = vector.extract_strided_slice %106 {offsets = [0, 0], sizes = [8, 128], strides = [1, 1]} : vector<8x512xf32> to vector<8x128xf32>
    %108 = arith.negf %107 : vector<8x128xf32>
    %109 = math.exp %108 : vector<8x128xf32>
    %cst_39 = arith.constant 1.000000e+00 : f32
    %110 = vector.broadcast %cst_39 : f32 to vector<8x128xf32>
    %111 = arith.addf %110, %109 : vector<8x128xf32>
    %112 = arith.divf %110, %111 : vector<8x128xf32>
    %113 = vector.extract_strided_slice %106 {offsets = [0, 128], sizes = [8, 128], strides = [1, 1]} : vector<8x512xf32> to vector<8x128xf32>
    %114 = arith.negf %113 : vector<8x128xf32>
    %115 = math.exp %114 : vector<8x128xf32>
    %cst_40 = arith.constant 1.000000e+00 : f32
    %116 = vector.broadcast %cst_40 : f32 to vector<8x128xf32>
    %117 = arith.addf %116, %115 : vector<8x128xf32>
    %118 = arith.divf %116, %117 : vector<8x128xf32>
    %119 = vector.extract_strided_slice %106 {offsets = [0, 256], sizes = [8, 128], strides = [1, 1]} : vector<8x512xf32> to vector<8x128xf32>
    %120 = math.tanh %119 : vector<8x128xf32>
    %121 = vector.extract_strided_slice %106 {offsets = [0, 384], sizes = [8, 128], strides = [1, 1]} : vector<8x512xf32> to vector<8x128xf32>
    %122 = arith.negf %121 : vector<8x128xf32>
    %123 = math.exp %122 : vector<8x128xf32>
    %cst_41 = arith.constant 1.000000e+00 : f32
    %124 = vector.broadcast %cst_41 : f32 to vector<8x128xf32>
    %125 = arith.addf %124, %123 : vector<8x128xf32>
    %126 = arith.divf %124, %125 : vector<8x128xf32>
    %127 = arith.mulf %118, %70 : vector<8x128xf32>
    %128 = arith.mulf %112, %120 : vector<8x128xf32>
    %129 = arith.addf %127, %128 : vector<8x128xf32>
    %130 = math.tanh %129 : vector<8x128xf32>
    %131 = arith.mulf %126, %130 : vector<8x128xf32>
    %c0_42 = arith.constant 0 : index
    %c128_43 = arith.constant 128 : index
    %132 = vector.load %arg9[%c0_42, %c128_43] : memref<8x256xf32, #tpu.memory_space<vmem>>, vector<8x128xf32>
    tpu.vector_store %arg9[%c0_42, %c128_43], %131 {strides = array<i32>} : memref<8x256xf32, #tpu.memory_space<vmem>>, vector<8x128xf32>,
    %c16 = arith.constant 16 : index
    %c0_44 = arith.constant 0 : index
    %133 = vector.load %arg8[%c16, %c0_44] : memref<64x512xf32, #tpu.memory_space<vmem>>, vector<8x512xf32>
    %134 = arith.addf %133, %104 : vector<8x512xf32>
    %135 = vector.extract_strided_slice %134 {offsets = [0, 0], sizes = [8, 128], strides = [1, 1]} : vector<8x512xf32> to vector<8x128xf32>
    %136 = arith.negf %135 : vector<8x128xf32>
    %137 = math.exp %136 : vector<8x128xf32>
    %cst_45 = arith.constant 1.000000e+00 : f32
    %138 = vector.broadcast %cst_45 : f32 to vector<8x128xf32>
    %139 = arith.addf %138, %137 : vector<8x128xf32>
    %140 = arith.divf %138, %139 : vector<8x128xf32>
    %141 = vector.extract_strided_slice %134 {offsets = [0, 128], sizes = [8, 128], strides = [1, 1]} : vector<8x512xf32> to vector<8x128xf32>
    %142 = arith.negf %141 : vector<8x128xf32>
    %143 = math.exp %142 : vector<8x128xf32>
    %cst_46 = arith.constant 1.000000e+00 : f32
    %144 = vector.broadcast %cst_46 : f32 to vector<8x128xf32>
    %145 = arith.addf %144, %143 : vector<8x128xf32>
    %146 = arith.divf %144, %145 : vector<8x128xf32>
    %147 = vector.extract_strided_slice %134 {offsets = [0, 256], sizes = [8, 128], strides = [1, 1]} : vector<8x512xf32> to vector<8x128xf32>
    %148 = math.tanh %147 : vector<8x128xf32>
    %149 = vector.extract_strided_slice %134 {offsets = [0, 384], sizes = [8, 128], strides = [1, 1]} : vector<8x512xf32> to vector<8x128xf32>
    %150 = arith.negf %149 : vector<8x128xf32>
    %151 = math.exp %150 : vector<8x128xf32>
    %cst_47 = arith.constant 1.000000e+00 : f32
    %152 = vector.broadcast %cst_47 : f32 to vector<8x128xf32>
    %153 = arith.addf %152, %151 : vector<8x128xf32>
    %154 = arith.divf %152, %153 : vector<8x128xf32>
    %155 = arith.mulf %146, %98 : vector<8x128xf32>
    %156 = arith.mulf %140, %148 : vector<8x128xf32>
    %157 = arith.addf %155, %156 : vector<8x128xf32>
    %158 = math.tanh %157 : vector<8x128xf32>
    %159 = arith.mulf %154, %158 : vector<8x128xf32>
    %c0_48 = arith.constant 0 : index
    %c0_49 = arith.constant 0 : index
    %160 = vector.load %arg9[%c0_48, %c0_49] : memref<8x256xf32, #tpu.memory_space<vmem>>, vector<8x128xf32>
    tpu.vector_store %arg9[%c0_48, %c0_49], %159 {strides = array<i32>} : memref<8x256xf32, #tpu.memory_space<vmem>>, vector<8x128xf32>,
    %c0_50 = arith.constant 0 : index
    %c0_51 = arith.constant 0 : index
    %161 = vector.load %arg9[%c0_50, %c0_51] : memref<8x256xf32, #tpu.memory_space<vmem>>, vector<8x256xf32>
    %cst_52 = arith.constant dense<0.000000e+00> : vector<8x1024xf32>
    %162 = tpu.matmul %161, %7, %cst_52 {dimension_numbers = #tpu.dot_dimension_numbers<[1], [0], [0], [1], [0, 0, 1, 1], [], []>} : vector<8x256xf32>, vector<256x1024xf32>, vector<8x1024xf32> -> vector<8x1024xf32>
    %163 = vector.extract_strided_slice %162 {offsets = [0, 0], sizes = [8, 512], strides = [1, 1]} : vector<8x1024xf32> to vector<8x512xf32>
    %164 = vector.extract_strided_slice %162 {offsets = [0, 512], sizes = [8, 512], strides = [1, 1]} : vector<8x1024xf32> to vector<8x512xf32>
    %165 = arith.addf %164, %10 : vector<8x512xf32>
    %166 = vector.extract_strided_slice %165 {offsets = [0, 0], sizes = [8, 128], strides = [1, 1]} : vector<8x512xf32> to vector<8x128xf32>
    %167 = arith.negf %166 : vector<8x128xf32>
    %168 = math.exp %167 : vector<8x128xf32>
    %cst_53 = arith.constant 1.000000e+00 : f32
    %169 = vector.broadcast %cst_53 : f32 to vector<8x128xf32>
    %170 = arith.addf %169, %168 : vector<8x128xf32>
    %171 = arith.divf %169, %170 : vector<8x128xf32>
    %172 = vector.extract_strided_slice %165 {offsets = [0, 128], sizes = [8, 128], strides = [1, 1]} : vector<8x512xf32> to vector<8x128xf32>
    %173 = arith.negf %172 : vector<8x128xf32>
    %174 = math.exp %173 : vector<8x128xf32>
    %cst_54 = arith.constant 1.000000e+00 : f32
    %175 = vector.broadcast %cst_54 : f32 to vector<8x128xf32>
    %176 = arith.addf %175, %174 : vector<8x128xf32>
    %177 = arith.divf %175, %176 : vector<8x128xf32>
    %178 = vector.extract_strided_slice %165 {offsets = [0, 256], sizes = [8, 128], strides = [1, 1]} : vector<8x512xf32> to vector<8x128xf32>
    %179 = math.tanh %178 : vector<8x128xf32>
    %180 = vector.extract_strided_slice %165 {offsets = [0, 384], sizes = [8, 128], strides = [1, 1]} : vector<8x512xf32> to vector<8x128xf32>
    %181 = arith.negf %180 : vector<8x128xf32>
    %182 = math.exp %181 : vector<8x128xf32>
    %cst_55 = arith.constant 1.000000e+00 : f32
    %183 = vector.broadcast %cst_55 : f32 to vector<8x128xf32>
    %184 = arith.addf %183, %182 : vector<8x128xf32>
    %185 = arith.divf %183, %184 : vector<8x128xf32>
    %186 = arith.mulf %177, %129 : vector<8x128xf32>
    %187 = arith.mulf %171, %179 : vector<8x128xf32>
    %188 = arith.addf %186, %187 : vector<8x128xf32>
    %189 = math.tanh %188 : vector<8x128xf32>
    %190 = arith.mulf %185, %189 : vector<8x128xf32>
    %c0_56 = arith.constant 0 : index
    %c128_57 = arith.constant 128 : index
    %191 = vector.load %arg9[%c0_56, %c128_57] : memref<8x256xf32, #tpu.memory_space<vmem>>, vector<8x128xf32>
    tpu.vector_store %arg9[%c0_56, %c128_57], %190 {strides = array<i32>} : memref<8x256xf32, #tpu.memory_space<vmem>>, vector<8x128xf32>,
    %c24 = arith.constant 24 : index
    %c0_58 = arith.constant 0 : index
    %192 = vector.load %arg8[%c24, %c0_58] : memref<64x512xf32, #tpu.memory_space<vmem>>, vector<8x512xf32>
    %193 = arith.addf %192, %163 : vector<8x512xf32>
    %194 = vector.extract_strided_slice %193 {offsets = [0, 0], sizes = [8, 128], strides = [1, 1]} : vector<8x512xf32> to vector<8x128xf32>
    %195 = arith.negf %194 : vector<8x128xf32>
    %196 = math.exp %195 : vector<8x128xf32>
    %cst_59 = arith.constant 1.000000e+00 : f32
    %197 = vector.broadcast %cst_59 : f32 to vector<8x128xf32>
    %198 = arith.addf %197, %196 : vector<8x128xf32>
    %199 = arith.divf %197, %198 : vector<8x128xf32>
    %200 = vector.extract_strided_slice %193 {offsets = [0, 128], sizes = [8, 128], strides = [1, 1]} : vector<8x512xf32> to vector<8x128xf32>
    %201 = arith.negf %200 : vector<8x128xf32>
    %202 = math.exp %201 : vector<8x128xf32>
    %cst_60 = arith.constant 1.000000e+00 : f32
    %203 = vector.broadcast %cst_60 : f32 to vector<8x128xf32>
    %204 = arith.addf %203, %202 : vector<8x128xf32>
    %205 = arith.divf %203, %204 : vector<8x128xf32>
    %206 = vector.extract_strided_slice %193 {offsets = [0, 256], sizes = [8, 128], strides = [1, 1]} : vector<8x512xf32> to vector<8x128xf32>
    %207 = math.tanh %206 : vector<8x128xf32>
    %208 = vector.extract_strided_slice %193 {offsets = [0, 384], sizes = [8, 128], strides = [1, 1]} : vector<8x512xf32> to vector<8x128xf32>
    %209 = arith.negf %208 : vector<8x128xf32>
    %210 = math.exp %209 : vector<8x128xf32>
    %cst_61 = arith.constant 1.000000e+00 : f32
    %211 = vector.broadcast %cst_61 : f32 to vector<8x128xf32>
    %212 = arith.addf %211, %210 : vector<8x128xf32>
    %213 = arith.divf %211, %212 : vector<8x128xf32>
    %214 = arith.mulf %205, %157 : vector<8x128xf32>
    %215 = arith.mulf %199, %207 : vector<8x128xf32>
    %216 = arith.addf %214, %215 : vector<8x128xf32>
    %217 = math.tanh %216 : vector<8x128xf32>
    %218 = arith.mulf %213, %217 : vector<8x128xf32>
    %c0_62 = arith.constant 0 : index
    %c0_63 = arith.constant 0 : index
    %219 = vector.load %arg9[%c0_62, %c0_63] : memref<8x256xf32, #tpu.memory_space<vmem>>, vector<8x128xf32>
    tpu.vector_store %arg9[%c0_62, %c0_63], %218 {strides = array<i32>} : memref<8x256xf32, #tpu.memory_space<vmem>>, vector<8x128xf32>,
    %c0_64 = arith.constant 0 : index
    %c0_65 = arith.constant 0 : index
    %220 = vector.load %arg9[%c0_64, %c0_65] : memref<8x256xf32, #tpu.memory_space<vmem>>, vector<8x256xf32>
    %cst_66 = arith.constant dense<0.000000e+00> : vector<8x1024xf32>
    %221 = tpu.matmul %220, %7, %cst_66 {dimension_numbers = #tpu.dot_dimension_numbers<[1], [0], [0], [1], [0, 0, 1, 1], [], []>} : vector<8x256xf32>, vector<256x1024xf32>, vector<8x1024xf32> -> vector<8x1024xf32>
    %222 = vector.extract_strided_slice %221 {offsets = [0, 0], sizes = [8, 512], strides = [1, 1]} : vector<8x1024xf32> to vector<8x512xf32>
    %223 = vector.extract_strided_slice %221 {offsets = [0, 512], sizes = [8, 512], strides = [1, 1]} : vector<8x1024xf32> to vector<8x512xf32>
    %224 = arith.addf %223, %10 : vector<8x512xf32>
    %225 = vector.extract_strided_slice %224 {offsets = [0, 0], sizes = [8, 128], strides = [1, 1]} : vector<8x512xf32> to vector<8x128xf32>
    %226 = arith.negf %225 : vector<8x128xf32>
    %227 = math.exp %226 : vector<8x128xf32>
    %cst_67 = arith.constant 1.000000e+00 : f32
    %228 = vector.broadcast %cst_67 : f32 to vector<8x128xf32>
    %229 = arith.addf %228, %227 : vector<8x128xf32>
    %230 = arith.divf %228, %229 : vector<8x128xf32>
    %231 = vector.extract_strided_slice %224 {offsets = [0, 128], sizes = [8, 128], strides = [1, 1]} : vector<8x512xf32> to vector<8x128xf32>
    %232 = arith.negf %231 : vector<8x128xf32>
    %233 = math.exp %232 : vector<8x128xf32>
    %cst_68 = arith.constant 1.000000e+00 : f32
    %234 = vector.broadcast %cst_68 : f32 to vector<8x128xf32>
    %235 = arith.addf %234, %233 : vector<8x128xf32>
    %236 = arith.divf %234, %235 : vector<8x128xf32>
    %237 = vector.extract_strided_slice %224 {offsets = [0, 256], sizes = [8, 128], strides = [1, 1]} : vector<8x512xf32> to vector<8x128xf32>
    %238 = math.tanh %237 : vector<8x128xf32>
    %239 = vector.extract_strided_slice %224 {offsets = [0, 384], sizes = [8, 128], strides = [1, 1]} : vector<8x512xf32> to vector<8x128xf32>
    %240 = arith.negf %239 : vector<8x128xf32>
    %241 = math.exp %240 : vector<8x128xf32>
    %cst_69 = arith.constant 1.000000e+00 : f32
    %242 = vector.broadcast %cst_69 : f32 to vector<8x128xf32>
    %243 = arith.addf %242, %241 : vector<8x128xf32>
    %244 = arith.divf %242, %243 : vector<8x128xf32>
    %245 = arith.mulf %236, %188 : vector<8x128xf32>
    %246 = arith.mulf %230, %238 : vector<8x128xf32>
    %247 = arith.addf %245, %246 : vector<8x128xf32>
    %248 = math.tanh %247 : vector<8x128xf32>
    %249 = arith.mulf %244, %248 : vector<8x128xf32>
    %c0_70 = arith.constant 0 : index
    %c128_71 = arith.constant 128 : index
    %250 = vector.load %arg9[%c0_70, %c128_71] : memref<8x256xf32, #tpu.memory_space<vmem>>, vector<8x128xf32>
    tpu.vector_store %arg9[%c0_70, %c128_71], %249 {strides = array<i32>} : memref<8x256xf32, #tpu.memory_space<vmem>>, vector<8x128xf32>,
    %c32 = arith.constant 32 : index
    %c0_72 = arith.constant 0 : index
    %251 = vector.load %arg8[%c32, %c0_72] : memref<64x512xf32, #tpu.memory_space<vmem>>, vector<8x512xf32>
    %252 = arith.addf %251, %222 : vector<8x512xf32>
    %253 = vector.extract_strided_slice %252 {offsets = [0, 0], sizes = [8, 128], strides = [1, 1]} : vector<8x512xf32> to vector<8x128xf32>
    %254 = arith.negf %253 : vector<8x128xf32>
    %255 = math.exp %254 : vector<8x128xf32>
    %cst_73 = arith.constant 1.000000e+00 : f32
    %256 = vector.broadcast %cst_73 : f32 to vector<8x128xf32>
    %257 = arith.addf %256, %255 : vector<8x128xf32>
    %258 = arith.divf %256, %257 : vector<8x128xf32>
    %259 = vector.extract_strided_slice %252 {offsets = [0, 128], sizes = [8, 128], strides = [1, 1]} : vector<8x512xf32> to vector<8x128xf32>
    %260 = arith.negf %259 : vector<8x128xf32>
    %261 = math.exp %260 : vector<8x128xf32>
    %cst_74 = arith.constant 1.000000e+00 : f32
    %262 = vector.broadcast %cst_74 : f32 to vector<8x128xf32>
    %263 = arith.addf %262, %261 : vector<8x128xf32>
    %264 = arith.divf %262, %263 : vector<8x128xf32>
    %265 = vector.extract_strided_slice %252 {offsets = [0, 256], sizes = [8, 128], strides = [1, 1]} : vector<8x512xf32> to vector<8x128xf32>
    %266 = math.tanh %265 : vector<8x128xf32>
    %267 = vector.extract_strided_slice %252 {offsets = [0, 384], sizes = [8, 128], strides = [1, 1]} : vector<8x512xf32> to vector<8x128xf32>
    %268 = arith.negf %267 : vector<8x128xf32>
    %269 = math.exp %268 : vector<8x128xf32>
    %cst_75 = arith.constant 1.000000e+00 : f32
    %270 = vector.broadcast %cst_75 : f32 to vector<8x128xf32>
    %271 = arith.addf %270, %269 : vector<8x128xf32>
    %272 = arith.divf %270, %271 : vector<8x128xf32>
    %273 = arith.mulf %264, %216 : vector<8x128xf32>
    %274 = arith.mulf %258, %266 : vector<8x128xf32>
    %275 = arith.addf %273, %274 : vector<8x128xf32>
    %276 = math.tanh %275 : vector<8x128xf32>
    %277 = arith.mulf %272, %276 : vector<8x128xf32>
    %c0_76 = arith.constant 0 : index
    %c0_77 = arith.constant 0 : index
    %278 = vector.load %arg9[%c0_76, %c0_77] : memref<8x256xf32, #tpu.memory_space<vmem>>, vector<8x128xf32>
    tpu.vector_store %arg9[%c0_76, %c0_77], %277 {strides = array<i32>} : memref<8x256xf32, #tpu.memory_space<vmem>>, vector<8x128xf32>,
    %c0_78 = arith.constant 0 : index
    %c0_79 = arith.constant 0 : index
    %279 = vector.load %arg9[%c0_78, %c0_79] : memref<8x256xf32, #tpu.memory_space<vmem>>, vector<8x256xf32>
    %cst_80 = arith.constant dense<0.000000e+00> : vector<8x1024xf32>
    %280 = tpu.matmul %279, %7, %cst_80 {dimension_numbers = #tpu.dot_dimension_numbers<[1], [0], [0], [1], [0, 0, 1, 1], [], []>} : vector<8x256xf32>, vector<256x1024xf32>, vector<8x1024xf32> -> vector<8x1024xf32>
    %281 = vector.extract_strided_slice %280 {offsets = [0, 0], sizes = [8, 512], strides = [1, 1]} : vector<8x1024xf32> to vector<8x512xf32>
    %282 = vector.extract_strided_slice %280 {offsets = [0, 512], sizes = [8, 512], strides = [1, 1]} : vector<8x1024xf32> to vector<8x512xf32>
    %283 = arith.addf %282, %10 : vector<8x512xf32>
    %284 = vector.extract_strided_slice %283 {offsets = [0, 0], sizes = [8, 128], strides = [1, 1]} : vector<8x512xf32> to vector<8x128xf32>
    %285 = arith.negf %284 : vector<8x128xf32>
    %286 = math.exp %285 : vector<8x128xf32>
    %cst_81 = arith.constant 1.000000e+00 : f32
    %287 = vector.broadcast %cst_81 : f32 to vector<8x128xf32>
    %288 = arith.addf %287, %286 : vector<8x128xf32>
    %289 = arith.divf %287, %288 : vector<8x128xf32>
    %290 = vector.extract_strided_slice %283 {offsets = [0, 128], sizes = [8, 128], strides = [1, 1]} : vector<8x512xf32> to vector<8x128xf32>
    %291 = arith.negf %290 : vector<8x128xf32>
    %292 = math.exp %291 : vector<8x128xf32>
    %cst_82 = arith.constant 1.000000e+00 : f32
    %293 = vector.broadcast %cst_82 : f32 to vector<8x128xf32>
    %294 = arith.addf %293, %292 : vector<8x128xf32>
    %295 = arith.divf %293, %294 : vector<8x128xf32>
    %296 = vector.extract_strided_slice %283 {offsets = [0, 256], sizes = [8, 128], strides = [1, 1]} : vector<8x512xf32> to vector<8x128xf32>
    %297 = math.tanh %296 : vector<8x128xf32>
    %298 = vector.extract_strided_slice %283 {offsets = [0, 384], sizes = [8, 128], strides = [1, 1]} : vector<8x512xf32> to vector<8x128xf32>
    %299 = arith.negf %298 : vector<8x128xf32>
    %300 = math.exp %299 : vector<8x128xf32>
    %cst_83 = arith.constant 1.000000e+00 : f32
    %301 = vector.broadcast %cst_83 : f32 to vector<8x128xf32>
    %302 = arith.addf %301, %300 : vector<8x128xf32>
    %303 = arith.divf %301, %302 : vector<8x128xf32>
    %304 = arith.mulf %295, %247 : vector<8x128xf32>
    %305 = arith.mulf %289, %297 : vector<8x128xf32>
    %306 = arith.addf %304, %305 : vector<8x128xf32>
    %307 = math.tanh %306 : vector<8x128xf32>
    %308 = arith.mulf %303, %307 : vector<8x128xf32>
    %c0_84 = arith.constant 0 : index
    %c128_85 = arith.constant 128 : index
    %309 = vector.load %arg9[%c0_84, %c128_85] : memref<8x256xf32, #tpu.memory_space<vmem>>, vector<8x128xf32>
    tpu.vector_store %arg9[%c0_84, %c128_85], %308 {strides = array<i32>} : memref<8x256xf32, #tpu.memory_space<vmem>>, vector<8x128xf32>,
    %c40 = arith.constant 40 : index
    %c0_86 = arith.constant 0 : index
    %310 = vector.load %arg8[%c40, %c0_86] : memref<64x512xf32, #tpu.memory_space<vmem>>, vector<8x512xf32>
    %311 = arith.addf %310, %281 : vector<8x512xf32>
    %312 = vector.extract_strided_slice %311 {offsets = [0, 0], sizes = [8, 128], strides = [1, 1]} : vector<8x512xf32> to vector<8x128xf32>
    %313 = arith.negf %312 : vector<8x128xf32>
    %314 = math.exp %313 : vector<8x128xf32>
    %cst_87 = arith.constant 1.000000e+00 : f32
    %315 = vector.broadcast %cst_87 : f32 to vector<8x128xf32>
    %316 = arith.addf %315, %314 : vector<8x128xf32>
    %317 = arith.divf %315, %316 : vector<8x128xf32>
    %318 = vector.extract_strided_slice %311 {offsets = [0, 128], sizes = [8, 128], strides = [1, 1]} : vector<8x512xf32> to vector<8x128xf32>
    %319 = arith.negf %318 : vector<8x128xf32>
    %320 = math.exp %319 : vector<8x128xf32>
    %cst_88 = arith.constant 1.000000e+00 : f32
    %321 = vector.broadcast %cst_88 : f32 to vector<8x128xf32>
    %322 = arith.addf %321, %320 : vector<8x128xf32>
    %323 = arith.divf %321, %322 : vector<8x128xf32>
    %324 = vector.extract_strided_slice %311 {offsets = [0, 256], sizes = [8, 128], strides = [1, 1]} : vector<8x512xf32> to vector<8x128xf32>
    %325 = math.tanh %324 : vector<8x128xf32>
    %326 = vector.extract_strided_slice %311 {offsets = [0, 384], sizes = [8, 128], strides = [1, 1]} : vector<8x512xf32> to vector<8x128xf32>
    %327 = arith.negf %326 : vector<8x128xf32>
    %328 = math.exp %327 : vector<8x128xf32>
    %cst_89 = arith.constant 1.000000e+00 : f32
    %329 = vector.broadcast %cst_89 : f32 to vector<8x128xf32>
    %330 = arith.addf %329, %328 : vector<8x128xf32>
    %331 = arith.divf %329, %330 : vector<8x128xf32>
    %332 = arith.mulf %323, %275 : vector<8x128xf32>
    %333 = arith.mulf %317, %325 : vector<8x128xf32>
    %334 = arith.addf %332, %333 : vector<8x128xf32>
    %335 = math.tanh %334 : vector<8x128xf32>
    %336 = arith.mulf %331, %335 : vector<8x128xf32>
    %c0_90 = arith.constant 0 : index
    %c0_91 = arith.constant 0 : index
    %337 = vector.load %arg9[%c0_90, %c0_91] : memref<8x256xf32, #tpu.memory_space<vmem>>, vector<8x128xf32>
    tpu.vector_store %arg9[%c0_90, %c0_91], %336 {strides = array<i32>} : memref<8x256xf32, #tpu.memory_space<vmem>>, vector<8x128xf32>,
    %c0_92 = arith.constant 0 : index
    %c0_93 = arith.constant 0 : index
    %338 = vector.load %arg9[%c0_92, %c0_93] : memref<8x256xf32, #tpu.memory_space<vmem>>, vector<8x256xf32>
    %cst_94 = arith.constant dense<0.000000e+00> : vector<8x1024xf32>
    %339 = tpu.matmul %338, %7, %cst_94 {dimension_numbers = #tpu.dot_dimension_numbers<[1], [0], [0], [1], [0, 0, 1, 1], [], []>} : vector<8x256xf32>, vector<256x1024xf32>, vector<8x1024xf32> -> vector<8x1024xf32>
    %340 = vector.extract_strided_slice %339 {offsets = [0, 0], sizes = [8, 512], strides = [1, 1]} : vector<8x1024xf32> to vector<8x512xf32>
    %341 = vector.extract_strided_slice %339 {offsets = [0, 512], sizes = [8, 512], strides = [1, 1]} : vector<8x1024xf32> to vector<8x512xf32>
    %342 = arith.addf %341, %10 : vector<8x512xf32>
    %343 = vector.extract_strided_slice %342 {offsets = [0, 0], sizes = [8, 128], strides = [1, 1]} : vector<8x512xf32> to vector<8x128xf32>
    %344 = arith.negf %343 : vector<8x128xf32>
    %345 = math.exp %344 : vector<8x128xf32>
    %cst_95 = arith.constant 1.000000e+00 : f32
    %346 = vector.broadcast %cst_95 : f32 to vector<8x128xf32>
    %347 = arith.addf %346, %345 : vector<8x128xf32>
    %348 = arith.divf %346, %347 : vector<8x128xf32>
    %349 = vector.extract_strided_slice %342 {offsets = [0, 128], sizes = [8, 128], strides = [1, 1]} : vector<8x512xf32> to vector<8x128xf32>
    %350 = arith.negf %349 : vector<8x128xf32>
    %351 = math.exp %350 : vector<8x128xf32>
    %cst_96 = arith.constant 1.000000e+00 : f32
    %352 = vector.broadcast %cst_96 : f32 to vector<8x128xf32>
    %353 = arith.addf %352, %351 : vector<8x128xf32>
    %354 = arith.divf %352, %353 : vector<8x128xf32>
    %355 = vector.extract_strided_slice %342 {offsets = [0, 256], sizes = [8, 128], strides = [1, 1]} : vector<8x512xf32> to vector<8x128xf32>
    %356 = math.tanh %355 : vector<8x128xf32>
    %357 = vector.extract_strided_slice %342 {offsets = [0, 384], sizes = [8, 128], strides = [1, 1]} : vector<8x512xf32> to vector<8x128xf32>
    %358 = arith.negf %357 : vector<8x128xf32>
    %359 = math.exp %358 : vector<8x128xf32>
    %cst_97 = arith.constant 1.000000e+00 : f32
    %360 = vector.broadcast %cst_97 : f32 to vector<8x128xf32>
    %361 = arith.addf %360, %359 : vector<8x128xf32>
    %362 = arith.divf %360, %361 : vector<8x128xf32>
    %363 = arith.mulf %354, %306 : vector<8x128xf32>
    %364 = arith.mulf %348, %356 : vector<8x128xf32>
    %365 = arith.addf %363, %364 : vector<8x128xf32>
    %366 = math.tanh %365 : vector<8x128xf32>
    %367 = arith.mulf %362, %366 : vector<8x128xf32>
    %c0_98 = arith.constant 0 : index
    %c128_99 = arith.constant 128 : index
    %368 = vector.load %arg9[%c0_98, %c128_99] : memref<8x256xf32, #tpu.memory_space<vmem>>, vector<8x128xf32>
    tpu.vector_store %arg9[%c0_98, %c128_99], %367 {strides = array<i32>} : memref<8x256xf32, #tpu.memory_space<vmem>>, vector<8x128xf32>,
    %c48 = arith.constant 48 : index
    %c0_100 = arith.constant 0 : index
    %369 = vector.load %arg8[%c48, %c0_100] : memref<64x512xf32, #tpu.memory_space<vmem>>, vector<8x512xf32>
    %370 = arith.addf %369, %340 : vector<8x512xf32>
    %371 = vector.extract_strided_slice %370 {offsets = [0, 0], sizes = [8, 128], strides = [1, 1]} : vector<8x512xf32> to vector<8x128xf32>
    %372 = arith.negf %371 : vector<8x128xf32>
    %373 = math.exp %372 : vector<8x128xf32>
    %cst_101 = arith.constant 1.000000e+00 : f32
    %374 = vector.broadcast %cst_101 : f32 to vector<8x128xf32>
    %375 = arith.addf %374, %373 : vector<8x128xf32>
    %376 = arith.divf %374, %375 : vector<8x128xf32>
    %377 = vector.extract_strided_slice %370 {offsets = [0, 128], sizes = [8, 128], strides = [1, 1]} : vector<8x512xf32> to vector<8x128xf32>
    %378 = arith.negf %377 : vector<8x128xf32>
    %379 = math.exp %378 : vector<8x128xf32>
    %cst_102 = arith.constant 1.000000e+00 : f32
    %380 = vector.broadcast %cst_102 : f32 to vector<8x128xf32>
    %381 = arith.addf %380, %379 : vector<8x128xf32>
    %382 = arith.divf %380, %381 : vector<8x128xf32>
    %383 = vector.extract_strided_slice %370 {offsets = [0, 256], sizes = [8, 128], strides = [1, 1]} : vector<8x512xf32> to vector<8x128xf32>
    %384 = math.tanh %383 : vector<8x128xf32>
    %385 = vector.extract_strided_slice %370 {offsets = [0, 384], sizes = [8, 128], strides = [1, 1]} : vector<8x512xf32> to vector<8x128xf32>
    %386 = arith.negf %385 : vector<8x128xf32>
    %387 = math.exp %386 : vector<8x128xf32>
    %cst_103 = arith.constant 1.000000e+00 : f32
    %388 = vector.broadcast %cst_103 : f32 to vector<8x128xf32>
    %389 = arith.addf %388, %387 : vector<8x128xf32>
    %390 = arith.divf %388, %389 : vector<8x128xf32>
    %391 = arith.mulf %382, %334 : vector<8x128xf32>
    %392 = arith.mulf %376, %384 : vector<8x128xf32>
    %393 = arith.addf %391, %392 : vector<8x128xf32>
    %394 = math.tanh %393 : vector<8x128xf32>
    %395 = arith.mulf %390, %394 : vector<8x128xf32>
    %c0_104 = arith.constant 0 : index
    %c0_105 = arith.constant 0 : index
    %396 = vector.load %arg9[%c0_104, %c0_105] : memref<8x256xf32, #tpu.memory_space<vmem>>, vector<8x128xf32>
    tpu.vector_store %arg9[%c0_104, %c0_105], %395 {strides = array<i32>} : memref<8x256xf32, #tpu.memory_space<vmem>>, vector<8x128xf32>,
    %c0_106 = arith.constant 0 : index
    %c0_107 = arith.constant 0 : index
    %397 = vector.load %arg9[%c0_106, %c0_107] : memref<8x256xf32, #tpu.memory_space<vmem>>, vector<8x256xf32>
    %cst_108 = arith.constant dense<0.000000e+00> : vector<8x1024xf32>
    %398 = tpu.matmul %397, %7, %cst_108 {dimension_numbers = #tpu.dot_dimension_numbers<[1], [0], [0], [1], [0, 0, 1, 1], [], []>} : vector<8x256xf32>, vector<256x1024xf32>, vector<8x1024xf32> -> vector<8x1024xf32>
    %399 = vector.extract_strided_slice %398 {offsets = [0, 0], sizes = [8, 512], strides = [1, 1]} : vector<8x1024xf32> to vector<8x512xf32>
    %400 = vector.extract_strided_slice %398 {offsets = [0, 512], sizes = [8, 512], strides = [1, 1]} : vector<8x1024xf32> to vector<8x512xf32>
    %401 = arith.addf %400, %10 : vector<8x512xf32>
    %402 = vector.extract_strided_slice %401 {offsets = [0, 0], sizes = [8, 128], strides = [1, 1]} : vector<8x512xf32> to vector<8x128xf32>
    %403 = arith.negf %402 : vector<8x128xf32>
    %404 = math.exp %403 : vector<8x128xf32>
    %cst_109 = arith.constant 1.000000e+00 : f32
    %405 = vector.broadcast %cst_109 : f32 to vector<8x128xf32>
    %406 = arith.addf %405, %404 : vector<8x128xf32>
    %407 = arith.divf %405, %406 : vector<8x128xf32>
    %408 = vector.extract_strided_slice %401 {offsets = [0, 128], sizes = [8, 128], strides = [1, 1]} : vector<8x512xf32> to vector<8x128xf32>
    %409 = arith.negf %408 : vector<8x128xf32>
    %410 = math.exp %409 : vector<8x128xf32>
    %cst_110 = arith.constant 1.000000e+00 : f32
    %411 = vector.broadcast %cst_110 : f32 to vector<8x128xf32>
    %412 = arith.addf %411, %410 : vector<8x128xf32>
    %413 = arith.divf %411, %412 : vector<8x128xf32>
    %414 = vector.extract_strided_slice %401 {offsets = [0, 256], sizes = [8, 128], strides = [1, 1]} : vector<8x512xf32> to vector<8x128xf32>
    %415 = math.tanh %414 : vector<8x128xf32>
    %416 = vector.extract_strided_slice %401 {offsets = [0, 384], sizes = [8, 128], strides = [1, 1]} : vector<8x512xf32> to vector<8x128xf32>
    %417 = arith.negf %416 : vector<8x128xf32>
    %418 = math.exp %417 : vector<8x128xf32>
    %cst_111 = arith.constant 1.000000e+00 : f32
    %419 = vector.broadcast %cst_111 : f32 to vector<8x128xf32>
    %420 = arith.addf %419, %418 : vector<8x128xf32>
    %421 = arith.divf %419, %420 : vector<8x128xf32>
    %422 = arith.mulf %413, %365 : vector<8x128xf32>
    %423 = arith.mulf %407, %415 : vector<8x128xf32>
    %424 = arith.addf %422, %423 : vector<8x128xf32>
    %425 = math.tanh %424 : vector<8x128xf32>
    %426 = arith.mulf %421, %425 : vector<8x128xf32>
    %c0_112 = arith.constant 0 : index
    %c128_113 = arith.constant 128 : index
    %427 = vector.load %arg9[%c0_112, %c128_113] : memref<8x256xf32, #tpu.memory_space<vmem>>, vector<8x128xf32>
    tpu.vector_store %arg9[%c0_112, %c128_113], %426 {strides = array<i32>} : memref<8x256xf32, #tpu.memory_space<vmem>>, vector<8x128xf32>,
    %c56 = arith.constant 56 : index
    %c0_114 = arith.constant 0 : index
    %428 = vector.load %arg8[%c56, %c0_114] : memref<64x512xf32, #tpu.memory_space<vmem>>, vector<8x512xf32>
    %429 = arith.addf %428, %399 : vector<8x512xf32>
    %430 = vector.extract_strided_slice %429 {offsets = [0, 0], sizes = [8, 128], strides = [1, 1]} : vector<8x512xf32> to vector<8x128xf32>
    %431 = arith.negf %430 : vector<8x128xf32>
    %432 = math.exp %431 : vector<8x128xf32>
    %cst_115 = arith.constant 1.000000e+00 : f32
    %433 = vector.broadcast %cst_115 : f32 to vector<8x128xf32>
    %434 = arith.addf %433, %432 : vector<8x128xf32>
    %435 = arith.divf %433, %434 : vector<8x128xf32>
    %436 = vector.extract_strided_slice %429 {offsets = [0, 128], sizes = [8, 128], strides = [1, 1]} : vector<8x512xf32> to vector<8x128xf32>
    %437 = arith.negf %436 : vector<8x128xf32>
    %438 = math.exp %437 : vector<8x128xf32>
    %cst_116 = arith.constant 1.000000e+00 : f32
    %439 = vector.broadcast %cst_116 : f32 to vector<8x128xf32>
    %440 = arith.addf %439, %438 : vector<8x128xf32>
    %441 = arith.divf %439, %440 : vector<8x128xf32>
    %442 = vector.extract_strided_slice %429 {offsets = [0, 256], sizes = [8, 128], strides = [1, 1]} : vector<8x512xf32> to vector<8x128xf32>
    %443 = math.tanh %442 : vector<8x128xf32>
    %444 = vector.extract_strided_slice %429 {offsets = [0, 384], sizes = [8, 128], strides = [1, 1]} : vector<8x512xf32> to vector<8x128xf32>
    %445 = arith.negf %444 : vector<8x128xf32>
    %446 = math.exp %445 : vector<8x128xf32>
    %cst_117 = arith.constant 1.000000e+00 : f32
    %447 = vector.broadcast %cst_117 : f32 to vector<8x128xf32>
    %448 = arith.addf %447, %446 : vector<8x128xf32>
    %449 = arith.divf %447, %448 : vector<8x128xf32>
    %450 = arith.mulf %441, %393 : vector<8x128xf32>
    %451 = arith.mulf %435, %443 : vector<8x128xf32>
    %452 = arith.addf %450, %451 : vector<8x128xf32>
    %453 = math.tanh %452 : vector<8x128xf32>
    %454 = arith.mulf %449, %453 : vector<8x128xf32>
    %c0_118 = arith.constant 0 : index
    %c0_119 = arith.constant 0 : index
    %455 = vector.load %arg9[%c0_118, %c0_119] : memref<8x256xf32, #tpu.memory_space<vmem>>, vector<8x128xf32>
    tpu.vector_store %arg9[%c0_118, %c0_119], %454 {strides = array<i32>} : memref<8x256xf32, #tpu.memory_space<vmem>>, vector<8x128xf32>,
    %c0_120 = arith.constant 0 : index
    %c0_121 = arith.constant 0 : index
    %456 = vector.load %arg9[%c0_120, %c0_121] : memref<8x256xf32, #tpu.memory_space<vmem>>, vector<8x256xf32>
    %cst_122 = arith.constant dense<0.000000e+00> : vector<8x1024xf32>
    %457 = tpu.matmul %456, %7, %cst_122 {dimension_numbers = #tpu.dot_dimension_numbers<[1], [0], [0], [1], [0, 0, 1, 1], [], []>} : vector<8x256xf32>, vector<256x1024xf32>, vector<8x1024xf32> -> vector<8x1024xf32>
    %458 = vector.extract_strided_slice %457 {offsets = [0, 512], sizes = [8, 512], strides = [1, 1]} : vector<8x1024xf32> to vector<8x512xf32>
    %459 = arith.addf %458, %10 : vector<8x512xf32>
    %460 = vector.extract_strided_slice %459 {offsets = [0, 0], sizes = [8, 128], strides = [1, 1]} : vector<8x512xf32> to vector<8x128xf32>
    %461 = arith.negf %460 : vector<8x128xf32>
    %462 = math.exp %461 : vector<8x128xf32>
    %cst_123 = arith.constant 1.000000e+00 : f32
    %463 = vector.broadcast %cst_123 : f32 to vector<8x128xf32>
    %464 = arith.addf %463, %462 : vector<8x128xf32>
    %465 = arith.divf %463, %464 : vector<8x128xf32>
    %466 = vector.extract_strided_slice %459 {offsets = [0, 128], sizes = [8, 128], strides = [1, 1]} : vector<8x512xf32> to vector<8x128xf32>
    %467 = arith.negf %466 : vector<8x128xf32>
    %468 = math.exp %467 : vector<8x128xf32>
    %cst_124 = arith.constant 1.000000e+00 : f32
    %469 = vector.broadcast %cst_124 : f32 to vector<8x128xf32>
    %470 = arith.addf %469, %468 : vector<8x128xf32>
    %471 = arith.divf %469, %470 : vector<8x128xf32>
    %472 = vector.extract_strided_slice %459 {offsets = [0, 256], sizes = [8, 128], strides = [1, 1]} : vector<8x512xf32> to vector<8x128xf32>
    %473 = math.tanh %472 : vector<8x128xf32>
    %474 = vector.extract_strided_slice %459 {offsets = [0, 384], sizes = [8, 128], strides = [1, 1]} : vector<8x512xf32> to vector<8x128xf32>
    %475 = arith.negf %474 : vector<8x128xf32>
    %476 = math.exp %475 : vector<8x128xf32>
    %cst_125 = arith.constant 1.000000e+00 : f32
    %477 = vector.broadcast %cst_125 : f32 to vector<8x128xf32>
    %478 = arith.addf %477, %476 : vector<8x128xf32>
    %479 = arith.divf %477, %478 : vector<8x128xf32>
    %480 = arith.mulf %471, %424 : vector<8x128xf32>
    %481 = arith.mulf %465, %473 : vector<8x128xf32>
    %482 = arith.addf %480, %481 : vector<8x128xf32>
    %483 = math.tanh %482 : vector<8x128xf32>
    %484 = arith.mulf %479, %483 : vector<8x128xf32>
    %c0_126 = arith.constant 0 : index
    %c128_127 = arith.constant 128 : index
    %485 = vector.load %arg9[%c0_126, %c128_127] : memref<8x256xf32, #tpu.memory_space<vmem>>, vector<8x128xf32>
    tpu.vector_store %arg9[%c0_126, %c128_127], %484 {strides = array<i32>} : memref<8x256xf32, #tpu.memory_space<vmem>>, vector<8x128xf32>,
    %c0_128 = arith.constant 0 : index
    %c128_129 = arith.constant 128 : index
    %486 = vector.load %arg9[%c0_128, %c128_129] : memref<8x256xf32, #tpu.memory_space<vmem>>, vector<8x128xf32>
    %c0_130 = arith.constant 0 : index
    %c0_131 = arith.constant 0 : index
    %487 = vector.load %arg5[%c0_130, %c0_131] : memref<128x128xf32, #tpu.memory_space<vmem>>, vector<128x128xf32>
    %cst_132 = arith.constant dense<0.000000e+00> : vector<8x128xf32>
    %488 = tpu.matmul %486, %487, %cst_132 {dimension_numbers = #tpu.dot_dimension_numbers<[1], [0], [0], [1], [0, 0, 1, 1], [], []>} : vector<8x128xf32>, vector<128x128xf32>, vector<8x128xf32> -> vector<8x128xf32>
    %c0_133 = arith.constant 0 : index
    %c0_134 = arith.constant 0 : index
    %489 = vector.load %arg6[%c0_133, %c0_134] : memref<1x128xf32, #tpu.memory_space<vmem>>, vector<1x128xf32>
    %490 = vector.broadcast %489 : vector<1x128xf32> to vector<8x128xf32>
    %491 = arith.addf %488, %490 : vector<8x128xf32>
    %c0_135 = arith.constant 0 : index
    %c0_136 = arith.constant 0 : index
    %492 = vector.load %arg7[%c0_135, %c0_136] : memref<8x128xf32, #tpu.memory_space<vmem>>, vector<8x128xf32>
    tpu.vector_store %arg7[%c0_135, %c0_136], %491 {strides = array<i32>} : memref<8x128xf32, #tpu.memory_space<vmem>>, vector<8x128xf32>,
    return
  }
}

</mosaic_0001>

<bundles_post_ra>
// kernel: tpu_custom_call.1
= control target key start
LH: loop header
LB: loop body
LE: loop exit
PB: predicated region body
PF: predicated region fallthrough
CT: control target
= control target key end

     0   :  { %12 = vsyncpa [#allocation5], 0  ;;  %s9629_s0 = inlined_call_operand.vmem [shape: f32[64,32], index: 0, kind: input, shape index: {}]   ;;  %s9630_s1 = inlined_call_operand.hbm [shape: f32[32,512], index: 1, kind: input, shape index: {}]   ;;  %s9631_s2 = inlined_call_operand.hbm [shape: f32[256,1024], index: 2, kind: input, shape index: {}]   ;;  %s9632_s3 = inlined_call_operand.vmem [shape: f32[1,512], index: 3, kind: input, shape index: {}]   ;;  %s9633_s4 = inlined_call_operand.vmem [shape: f32[1,512], index: 4, kind: input, shape index: {}]   ;;  %s9634_s5 = inlined_call_operand.hbm [shape: f32[128,128], index: 5, kind: input, shape index: {}]   ;;  %s9635_s6 = inlined_call_operand.vmem [shape: f32[1,128], index: 6, kind: input, shape index: {}]   ;;  %s9636_s7 = inlined_call_operand.hbm [shape: f32[8,128], index: 7, kind: output, shape index: {}]  }
   0x1   :  { %13 = vsyncpa [#allocation8], 0  ;;  %s34_s26 = sshll.u32 %s9631_s2, 4  ;;  %s35_s26 = int_to_ptr.hbm [resolvable:$true] %s34_s26 }
   0x2   :  { %14 = vsyncpa [#allocation6], 0  ;;  %s5509_s27 = smov [#allocation7]   ;;  %s21_s8 = sshll.u32 %s9630_s1, 4  ;;  %s22_s8 = int_to_ptr.hbm [resolvable:$true] %s21_s8 }
   0x3   :  { %s36_s28 = sshll.u32 %s5509_s27, 4  ;;  %s5510_s9 = smov 1024   ;;  %s37_s28 = int_to_ptr.vmem [resolvable:$true] %s36_s28 }
   0x4   :  { %s5511_s10 = smov 64   ;;  %s5512_s11 = smov [#allocation4]  }
   0x5   :  { %42 = dma.hbm_to_vmem [thread:$0]  %s35_s26, 32768, %s37_s28, [#allocation8], %s5510_s9, %s5510_s9, %s5511_s10  }
   0x6   :  { %s23_s12 = sshll.u32 %s5512_s11, 4  ;;  %s5513_s13 = smov 512   ;;  %s24_s12 = int_to_ptr.vmem [resolvable:$true] %s23_s12 }
   0x7   :  { %s5514_s14 = smov 32   ;;  %s51_s16 = sshll.u32 %s9634_s5, 4  ;;  %s52_s16 = int_to_ptr.hbm [resolvable:$true] %s51_s16 }
   0x8   :  { %29 = dma.hbm_to_vmem [thread:$0]  %s22_s8, 2048, %s24_s12, [#allocation5], %s5513_s13, %s5513_s13, %s5514_s14  }
   0x9   :  { %s5515_s17 = smov [#allocation9]   ;;  %s5516_s19 = smov 128  }
   0xa   :  { %s53_s18 = sshll.u32 %s5515_s17, 4  ;;  %s5517_s1 = smov 8   ;;  %s54_s18 = int_to_ptr.vmem [resolvable:$true] %s53_s18 }
   0xb   :  { %59 = dma.hbm_to_vmem [thread:$0]  %s52_s16, 2048, %s54_s18, [#allocation8], %s5516_s19, %s5516_s19, %s5517_s1  }
   0xc   :  { %5503 = dma.done.wait [#allocation5], 2048  }
   0xd   :  { %5504 = vsyncadd [#allocation5], 4294965248 }
   0xe   :  { %5505 = dma.done.wait [#allocation8], 34816  }
   0xf   :  { %5506 = vsyncadd [#allocation8], 4294932480  ;;  %v94_v0 = vld [vmem:[#allocation4 + $0x60] sm:$0xff]  ;;  %vm108_vm0 = vcmask 261120   ;;  %v5577_v5 = vld [vmem:[%s9629_s0 + $0x28] sm:$0xff]  ;;  %s5519_s2 = smov [#allocation10]  }
  0x10   :  { %v90_v1 = vld [vmem:[#allocation4 + $0x40] sm:$0xff]  ;;  %145 = vmatpush.msra.mxu0 %v94_v0  ;;  %4273 = vmatpush.msra.mxu1 %v94_v0  ;;  %v5582_v6 = vld [vmem:[%s9629_s0 + $0x38] sm:$0xff]  ;;  %v95_v7 = vld [vmem:[#allocation4 + $0x68] sm:$0xff]  ;;  %s4180_s15 = sshll.u32 %s5519_s2, 4  ;;  %s4182_s18 = sshll.u32 %s9636_s7, 4  ;;  %s4181_s15 = int_to_ptr.vmem [resolvable:$true] %s4180_s15  ;;  %s4183_s18 = int_to_ptr.hbm [resolvable:$true] %s4182_s18 }
  0x11   :  { %4275 = vmatpush.msra.mxu3 %v94_v0  ;;  %v86_v2 = vld [vmem:[#allocation4 + $0x20] sm:$0xff]  ;;  %4274 = vmatpush.msra.mxu2 %v94_v0  ;;  %v97_v8 = vld [vmem:[#allocation4 + $0x78] sm:$0xff]  ;;  %v91_v10 = vld [vmem:[#allocation4 + $0x48] sm:$0xff] }
  0x12   :  { %146 = vmatpush.msra.mxu0 %v90_v1  ;;  %4276 = vmatpush.msra.mxu1 %v90_v1  ;;  %v82_v3 = vld [vmem:[#allocation4] sm:$0xff]  ;;  %v93_v11 = vld [vmem:[#allocation4 + $0x58] sm:$0xff]  ;;  %v5593_v12 = vld [vmem:[%s9629_s0 + $0x30] sm:$0xff] }
  0x13   :  { %4278 = vmatpush.msra.mxu3 %v90_v1  ;;  %4277 = vmatpush.msra.mxu2 %v90_v1  ;;  %v5572_v4 = vld [vmem:[%s9629_s0] sm:$0xff]  ;;  %v87_v14 = vld [vmem:[#allocation4 + $0x28] sm:$0xff]  ;;  %v89_v15 = vld [vmem:[#allocation4 + $0x38] sm:$0xff] }
  0x14   :  { %147 = vmatpush.msra.mxu0 %v86_v2  ;;  %4279 = vmatpush.msra.mxu1 %v86_v2  ;;  %v449_v9 = vld [vmem:[#allocation7 + $0x3c0] sm:$0xff]  ;;  %v96_v16 = vld [vmem:[#allocation4 + $0x70] sm:$0xff]  ;;  %v83_v18 = vld [vmem:[#allocation4 + $0x8] sm:$0xff] }
  0x15   :  { %4281 = vmatpush.msra.mxu3 %v86_v2  ;;  %4280 = vmatpush.msra.mxu2 %v86_v2  ;;  %v441_v13 = vld [vmem:[#allocation7 + $0x380] sm:$0xff]  ;;  %v85_v19 = vld [vmem:[#allocation4 + $0x18] sm:$0xff]  ;;  %v92_v20 = vld [vmem:[#allocation4 + $0x50] sm:$0xff] }
  0x16   :  { %148 = vmatpush.msra.mxu0 %v82_v3  ;;  %4282 = vmatpush.msra.mxu1 %v82_v3  ;;  %v433_v17 = vld [vmem:[#allocation7 + $0x340] sm:$0xff]  ;;  %v578_v22 = vld [vmem:[#allocation7 + $0x7c8] sm:$0xff]  ;;  %v88_v24 = vld [vmem:[#allocation4 + $0x30] sm:$0xff] }
  0x17   :  { %4284 = vmatpush.msra.mxu3 %v82_v3  ;;  %4193 = vmatmul.msk.f32.vlgmr.msra.gmra.mxu0 %vm108_vm0, %v5572_v4  ;;  %v577_v21 = vld [vmem:[#allocation7 + $0x7c0] sm:$0xff]  ;;  %v570_v26 = vld [vmem:[#allocation7 + $0x788] sm:$0xff]  ;;  %v84_v28 = vld [vmem:[#allocation4 + $0x10] sm:$0xff] }
  0x18   :  { %4198 = vmatmul.msk.f32.vlgmr.msra.gmra.mxu1 %vm108_vm0, %v5577_v5  ;;  %4200 = vmatmul.msk.f32.vlgmr.msra.gmra.mxu3 %vm108_vm0, %v5582_v6  ;;  %v425_v23 = vld [vmem:[#allocation7 + $0x300] sm:$0xff]  ;;  %v562_v30 = vld [vmem:[#allocation7 + $0x748] sm:$0xff]  ;;  %v5613_v49 = vld [vmem:[%s9629_s0 + $0x10] sm:$0xff] }
  0x19   :  { %186 = vmatpush.msrb.mxu1 %v95_v7  ;;  %268 = vmatpush.msrb.mxu3 %v97_v8  ;;  %v569_v25 = vld [vmem:[#allocation7 + $0x780] sm:$0xff]  ;;  %v450_v31 = vld [vmem:[#allocation7 + $0x3c8] sm:$0xff]  ;;  %v5624_v2 = vld [vmem:[%s9629_s0 + $0x18] sm:$0xff] }
  0x1a   :  { %4283 = vmatpush.msra.mxu2 %v82_v3  ;;  %671 = vmatpush.msrb.mxu0 %v449_v9  ;;  %v417_v27 = vld [vmem:[#allocation7 + $0x2c0] sm:$0xff]  ;;  %v75_v33 = vld [vmem:[%s9629_s0 + $0x8] sm:$0xff] }
  0x1b   :  { %187 = vmatpush.msrb.mxu1 %v91_v10  ;;  %269 = vmatpush.msrb.mxu3 %v93_v11  ;;  %v561_v29 = vld [vmem:[#allocation7 + $0x740] sm:$0xff]  ;;  %v442_v34 = vld [vmem:[#allocation7 + $0x388] sm:$0xff] }
  0x1c   :  { %4199 = vmatmul.msk.f32.vlgmr.msra.gmra.mxu2 %vm108_vm0, %v5593_v12  ;;  %672 = vmatpush.msrb.mxu0 %v441_v13  ;;  %v553_v32 = vld [vmem:[#allocation7 + $0x700] sm:$0xff]  ;;  %v554_v35 = vld [vmem:[#allocation7 + $0x708] sm:$0xff] }
  0x1d   :  { %188 = vmatpush.msrb.mxu1 %v87_v14  ;;  %270 = vmatpush.msrb.mxu3 %v89_v15  ;;  %v545_v36 = vld [vmem:[#allocation7 + $0x6c0] sm:$0xff]  ;;  %v434_v37 = vld [vmem:[#allocation7 + $0x348] sm:$0xff] }
  0x1e   :  { %227 = vmatpush.msrb.mxu2 %v96_v16  ;;  %673 = vmatpush.msrb.mxu0 %v433_v17  ;;  %v546_v38 = vld [vmem:[#allocation7 + $0x6c8] sm:$0xff]  ;;  %v409_v41 = vld [vmem:[#allocation7 + $0x280] sm:$0xff] }
  0x1f   :  { %189 = vmatpush.msrb.mxu1 %v83_v18  ;;  %271 = vmatpush.msrb.mxu3 %v85_v19  ;;  %v426_v39 = vld [vmem:[#allocation7 + $0x308] sm:$0xff]  ;;  %v537_v42 = vld [vmem:[#allocation7 + $0x680] sm:$0xff] }
  0x20   :  { %4201 = vmatmul.msk.f32.vlgmr.msrb.gmra.mxu1 %vm108_vm0, %v5572_v4  ;;  %4217 = vmatmul.msk.f32.vlgmr.msrb.gmra.mxu3 %vm108_vm0, %v5572_v4  ;;  %v418_v40 = vld [vmem:[#allocation7 + $0x2c8] sm:$0xff]  ;;  %v401_v45 = vld [vmem:[#allocation7 + $0x240] sm:$0xff] }
  0x21   :  { %228 = vmatpush.msrb.mxu2 %v92_v20  ;;  %691 = vmatpush.msra.mxu1 %v577_v21  ;;  %v410_v43 = vld [vmem:[#allocation7 + $0x288] sm:$0xff]  ;;  %v529_v46 = vld [vmem:[#allocation7 + $0x640] sm:$0xff] }
  0x22   :  { %731 = vmatpush.msra.mxu3 %v578_v22  ;;  %674 = vmatpush.msrb.mxu0 %v425_v23  ;;  %v538_v44 = vld [vmem:[#allocation7 + $0x688] sm:$0xff]  ;;  %v393_v50 = vld [vmem:[#allocation7 + $0x200] sm:$0xff] }
  0x23   :  { %229 = vmatpush.msrb.mxu2 %v88_v24  ;;  %692 = vmatpush.msra.mxu1 %v569_v25  ;;  %v402_v47 = vld [vmem:[#allocation7 + $0x248] sm:$0xff]  ;;  %v521_v51 = vld [vmem:[#allocation7 + $0x600] sm:$0xff] }
  0x24   :  { %732 = vmatpush.msra.mxu3 %v570_v26  ;;  %675 = vmatpush.msrb.mxu0 %v417_v27  ;;  %v530_v48 = vld [vmem:[#allocation7 + $0x648] sm:$0xff]  ;;  %v385_v54 = vld [vmem:[#allocation7 + $0x1c0] sm:$0xff]  ;;  %v451_v27 = vld [vmem:[#allocation7 + $0x3d0] sm:$0xff] }
  0x25   :  { %230 = vmatpush.msrb.mxu2 %v84_v28  ;;  %693 = vmatpush.msra.mxu1 %v561_v29  ;;  %v394_v52 = vld [vmem:[#allocation7 + $0x208] sm:$0xff]  ;;  %v513_v55 = vld [vmem:[#allocation7 + $0x5c0] sm:$0xff]  ;;  %v579_v28 = vld [vmem:[#allocation7 + $0x7d0] sm:$0xff] }
  0x26   :  { %4209 = vmatmul.msk.f32.vlgmr.msrb.gmra.mxu2 %vm108_vm0, %v5572_v4  ;;  %733 = vmatpush.msra.mxu3 %v562_v30  ;;  %v522_v53 = vld [vmem:[#allocation7 + $0x608] sm:$0xff]  ;;  %v377_v58 = vld [vmem:[#allocation7 + $0x180] sm:$0xff]  ;;  %v452_v29 = vld [vmem:[#allocation7 + $0x3d8] sm:$0xff] }
  0x27   :  { %711 = vmatpush.msra.mxu2 %v450_v31  ;;  %694 = vmatpush.msra.mxu1 %v553_v32  ;;  %v386_v56 = vld [vmem:[#allocation7 + $0x1c8] sm:$0xff]  ;;  %v505_v59 = vld [vmem:[#allocation7 + $0x580] sm:$0xff]  ;;  %v580_v31 = vld [vmem:[#allocation7 + $0x7d8] sm:$0xff] }
  0x28   :  { %4202 = vmatmul.msk.f32.gmra.mxu1 %vm108_vm0, %v75_v33  ;;  %4218 = vmatmul.msk.f32.gmra.mxu3 %vm108_vm0, %v75_v33  ;;  %v514_v57 = vld [vmem:[#allocation7 + $0x5c8] sm:$0xff]  ;;  %v369_v62 = vld [vmem:[#allocation7 + $0x140] sm:$0xff]  ;;  %v443_v32 = vld [vmem:[#allocation7 + $0x390] sm:$0xff] }
  0x29   :  { %712 = vmatpush.msra.mxu2 %v442_v34  ;;  %734 = vmatpush.msra.mxu3 %v554_v35  ;;  %v378_v60 = vld [vmem:[#allocation7 + $0x188] sm:$0xff]  ;;  %v497_v63 = vld [vmem:[#allocation7 + $0x540] sm:$0xff]  ;;  %v444_v34 = vld [vmem:[#allocation7 + $0x398] sm:$0xff] }
  0x2a   :  { %695 = vmatpush.msra.mxu1 %v545_v36  ;;  %4194 = vmatmul.msk.f32.gmra.mxu0 %vm108_vm0, %v75_v33  ;;  %v506_v61 = vld [vmem:[#allocation7 + $0x588] sm:$0xff]  ;;  %v361_v3 = vld [vmem:[#allocation7 + $0x100] sm:$0xff]  ;;  %v572_v35 = vld [vmem:[#allocation7 + $0x798] sm:$0xff] }
  0x2b   :  { %713 = vmatpush.msra.mxu2 %v434_v37  ;;  %735 = vmatpush.msra.mxu3 %v546_v38  ;;  %v370_v0 = vld [vmem:[#allocation7 + $0x148] sm:$0xff]  ;;  %v489_v4 = vld [vmem:[#allocation7 + $0x500] sm:$0xff]  ;;  %v435_v36 = vld [vmem:[#allocation7 + $0x350] sm:$0xff] }
  0x2c   :  { %676 = vmatpush.msrb.mxu0 %v409_v41  ;;  %696 = vmatpush.msra.mxu1 %v537_v42  ;;  %v498_v1 = vld [vmem:[#allocation7 + $0x548] sm:$0xff]  ;;  %v353_v9 = vld [vmem:[#allocation7 + $0xc0] sm:$0xff]  ;;  %v563_v38 = vld [vmem:[#allocation7 + $0x750] sm:$0xff] }
  0x2d   :  { %714 = vmatpush.msra.mxu2 %v426_v39  ;;  %736 = vmatpush.msra.mxu3 %v538_v44  ;;  %v362_v7 = vld [vmem:[#allocation7 + $0x108] sm:$0xff]  ;;  %v481_v10 = vld [vmem:[#allocation7 + $0x4c0] sm:$0xff]  ;;  %v436_v39 = vld [vmem:[#allocation7 + $0x358] sm:$0xff] }
  0x2e   :  { %4210 = vmatmul.msk.f32.gmra.mxu2 %vm108_vm0, %v75_v33  ;;  %677 = vmatpush.msrb.mxu0 %v401_v45  ;;  %v490_v8 = vld [vmem:[#allocation7 + $0x508] sm:$0xff]  ;;  %v345_v14 = vld [vmem:[#allocation7 + $0x80] sm:$0xff]  ;;  %v571_v33 = vld [vmem:[#allocation7 + $0x790] sm:$0xff] }
  0x2f   :  { %715 = vmatpush.msra.mxu2 %v418_v40  ;;  %697 = vmatpush.msra.mxu1 %v529_v46  ;;  %v354_v11 = vld [vmem:[#allocation7 + $0xc8] sm:$0xff]  ;;  %v473_v15 = vld [vmem:[#allocation7 + $0x480] sm:$0xff]  ;;  %v564_v40 = vld [vmem:[#allocation7 + $0x758] sm:$0xff] }
  0x30   :  { %737 = vmatpush.msra.mxu3 %v530_v48  ;;  %4203 = vmatmul.msk.f32.gmra.mxu1 %vm108_vm0, %v5613_v49  ;;  %v482_v13 = vld [vmem:[#allocation7 + $0x4c8] sm:$0xff]  ;;  %v337_v18 = vld [vmem:[#allocation7 + $0x40] sm:$0xff]  ;;  %v427_v41 = vld [vmem:[#allocation7 + $0x310] sm:$0xff] }
  0x31   :  { %716 = vmatpush.msra.mxu2 %v410_v43  ;;  %4219 = vmatmul.msk.f32.gmra.mxu3 %vm108_vm0, %v5613_v49  ;;  %v346_v16 = vld [vmem:[#allocation7 + $0x88] sm:$0xff]  ;;  %v465_v19 = vld [vmem:[#allocation7 + $0x440] sm:$0xff]  ;;  %v555_v42 = vld [vmem:[#allocation7 + $0x710] sm:$0xff] }
  0x32   :  { %678 = vmatpush.msrb.mxu0 %v393_v50  ;;  %698 = vmatpush.msra.mxu1 %v521_v51  ;;  %v474_v17 = vld [vmem:[#allocation7 + $0x488] sm:$0xff]  ;;  %v5635_v22 = vld [vmem:[%s9629_s0 + $0x20] sm:$0xff]  ;;  %v428_v43 = vld [vmem:[#allocation7 + $0x318] sm:$0xff] }
  0x33   :  { %717 = vmatpush.msra.mxu2 %v402_v47  ;;  %738 = vmatpush.msra.mxu3 %v522_v53  ;;  %v338_v20 = vld [vmem:[#allocation7 + $0x48] sm:$0xff]  ;;  %v329_v23 = vld [vmem:[#allocation7] sm:$0xff]  ;;  %v556_v45 = vld [vmem:[#allocation7 + $0x718] sm:$0xff] }
  0x34   :  { %679 = vmatpush.msrb.mxu0 %v385_v54  ;;  %699 = vmatpush.msra.mxu1 %v513_v55  ;;  %v466_v21 = vld [vmem:[#allocation7 + $0x448] sm:$0xff]  ;;  %v457_v24 = vld [vmem:[#allocation7 + $0x400] sm:$0xff]  ;;  %v419_v48 = vld [vmem:[#allocation7 + $0x2d0] sm:$0xff] }
  0x35   :  { %718 = vmatpush.msra.mxu2 %v394_v52  ;;  %739 = vmatpush.msra.mxu3 %v514_v57  ;;  %v330_v25 = vld [vmem:[#allocation7 + $0x8] sm:$0xff]  ;;  %v5646_v30 = vld [vmem:[%s9632_s3] sm:$0xf]  ;;  %v547_v51 = vld [vmem:[#allocation7 + $0x6d0] sm:$0xff] }
  0x36   :  { %4211 = vmatmul.msk.f32.gmra.mxu2 %vm108_vm0, %v5613_v49  ;;  %680 = vmatpush.msrb.mxu0 %v377_v58  ;;  %v458_v26 = vld [vmem:[#allocation7 + $0x408] sm:$0xff]  ;;  %v5649_v37 = vperm.slane %v5646_v30, 0  ;;  %v420_v52 = vld [vmem:[#allocation7 + $0x2d8] sm:$0xff]  ;;  %v411_v54 = vld [vmem:[#allocation7 + $0x290] sm:$0xff]  ;;  %v5663_v57 = vperm.slane %v5646_v30, 1 }
  0x37   :  { %719 = vmatpush.msra.mxu2 %v386_v56  ;;  %700 = vmatpush.msra.mxu1 %v505_v59  ;;  %v548_v53 = vld [vmem:[#allocation7 + $0x6d8] sm:$0xff]  ;;  %v539_v55 = vld [vmem:[#allocation7 + $0x690] sm:$0xff] }
  0x38   :  { %740 = vmatpush.msra.mxu3 %v506_v61  ;;  %681 = vmatpush.msrb.mxu0 %v369_v62  ;;  %10212 = vst [vmem:[#allocation14_spill] sm:$0xff] %v5649_v37  ;;  %v412_v56 = vld [vmem:[#allocation7 + $0x298] sm:$0xff]  ;;  %v403_v58 = vld [vmem:[#allocation7 + $0x250] sm:$0xff] }
  0x39   :  { %720 = vmatpush.msra.mxu2 %v378_v60  ;;  %701 = vmatpush.msra.mxu1 %v497_v63  ;;  %10214 = vst [vmem:[#allocation16_spill] sm:$0xff] %v5663_v57  ;;  %v531_v60 = vld [vmem:[#allocation7 + $0x650] sm:$0xff]  ;;  %v404_v61 = vld [vmem:[#allocation7 + $0x258] sm:$0xff] }
  0x3a   :  { %741 = vmatpush.msra.mxu3 %v498_v1  ;;  %4204 = vmatmul.msk.f32.gmra.mxu1 %vm108_vm0, %v5624_v2  ;;  %v532_v62 = vld [vmem:[#allocation7 + $0x658] sm:$0xff] }
  0x3b   :  { %721 = vmatpush.msra.mxu2 %v370_v0  ;;  %4220 = vmatmul.msk.f32.gmra.mxu3 %vm108_vm0, %v5624_v2  ;;  %v523_v0 = vld [vmem:[#allocation7 + $0x610] sm:$0xff]  ;;  %v396_v1 = vld [vmem:[#allocation7 + $0x218] sm:$0xff] }
  0x3c   :  { %682 = vmatpush.msrb.mxu0 %v361_v3  ;;  %702 = vmatpush.msra.mxu1 %v489_v4  ;;  %v524_v4 = vld [vmem:[#allocation7 + $0x618] sm:$0xff] }
  0x3d   :  { %722 = vmatpush.msra.mxu2 %v362_v7  ;;  %742 = vmatpush.msra.mxu3 %v490_v8 }
  0x3e   :  { %4212 = vmatmul.msk.f32.gmra.mxu2 %vm108_vm0, %v5624_v2  ;;  %683 = vmatpush.msrb.mxu0 %v353_v9 }
  0x3f   :  { %703 = vmatpush.msra.mxu1 %v481_v10  ;;  %723 = vmatpush.msra.mxu2 %v354_v11  ;;  %v5671_v10 = vperm.slane %v5646_v30, 3  ;;  %v387_v11 = vld [vmem:[#allocation7 + $0x1d0] sm:$0xff] }
  0x40   :  { %743 = vmatpush.msra.mxu3 %v482_v13  ;;  %684 = vmatpush.msrb.mxu0 %v345_v14  ;;  %v515_v13 = vld [vmem:[#allocation7 + $0x5d0] sm:$0xff]  ;;  %v388_v14 = vld [vmem:[#allocation7 + $0x1d8] sm:$0xff] }
  0x41   :  { %704 = vmatpush.msra.mxu1 %v473_v15  ;;  %724 = vmatpush.msra.mxu2 %v346_v16  ;;  %10216 = vst [vmem:[#allocation18_spill] sm:$0xff] %v5671_v10  ;;  %v516_v15 = vld [vmem:[#allocation7 + $0x5d8] sm:$0xff]  ;;  %v379_v16 = vld [vmem:[#allocation7 + $0x190] sm:$0xff] }
  0x42   :  { %744 = vmatpush.msra.mxu3 %v474_v17  ;;  %685 = vmatpush.msrb.mxu0 %v337_v18 }
  0x43   :  { %705 = vmatpush.msra.mxu1 %v465_v19  ;;  %725 = vmatpush.msra.mxu2 %v338_v20  ;;  %v380_v19 = vld [vmem:[#allocation7 + $0x198] sm:$0xff] }
  0x44   :  { %745 = vmatpush.msra.mxu3 %v466_v21  ;;  %4205 = vmatmul.msk.f32.gmra.mxu1 %vm108_vm0, %v5635_v22  ;;  %v5687_v21 = vld [vmem:[#allocation7 + $0x598] sm:$0xff] }
  0x45   :  { %4221 = vmatmul.msk.f32.gmra.mxu3 %vm108_vm0, %v5635_v22  ;;  %686 = vmatpush.msrb.mxu0 %v329_v23  ;;  %v371_v23 = vld [vmem:[#allocation7 + $0x150] sm:$0xff] }
  0x46   :  { %4213 = vmatmul.msk.f32.gmra.mxu2 %vm108_vm0, %v5635_v22  ;;  %706 = vmatpush.msra.mxu1 %v457_v24  ;;  %v5689_v24 = vld [vmem:[#allocation7 + $0x550] sm:$0xff] }
  0x47   :  { %726 = vmatpush.msra.mxu2 %v330_v25  ;;  %746 = vmatpush.msra.mxu3 %v458_v26  ;;  %v372_v25 = vld [vmem:[#allocation7 + $0x158] sm:$0xff] }
  0x48   :  { %751 = vmatpush.msra.mxu0 %v451_v27  ;;  %771 = vmatpush.msrb.mxu1 %v579_v28  ;;  %v363_v27 = vld [vmem:[#allocation7 + $0x110] sm:$0xff] }
  0x49   :  { %791 = vmatpush.msrb.mxu2 %v452_v29  ;;  %811 = vmatpush.msrb.mxu3 %v580_v31  ;;  %v5695_v28 = vld [vmem:[#allocation7 + $0x510] sm:$0xff]  ;;  %v364_v29 = vld [vmem:[#allocation7 + $0x118] sm:$0xff] }
  0x4a   :  { %752 = vmatpush.msra.mxu0 %v443_v32  ;;  %772 = vmatpush.msrb.mxu1 %v571_v33  ;;  %v5700_v32 = vld [vmem:[#allocation7 + $0x518] sm:$0xff] }
  0x4b   :  { %792 = vmatpush.msrb.mxu2 %v444_v34  ;;  %812 = vmatpush.msrb.mxu3 %v572_v35 }
  0x4c   :  { %753 = vmatpush.msra.mxu0 %v435_v36  ;;  %773 = vmatpush.msrb.mxu1 %v563_v38  ;;  %v5708_v36 = vld [vmem:[#allocation7 + $0xd0] sm:$0xff] }
  0x4d   :  { %793 = vmatpush.msrb.mxu2 %v436_v39  ;;  %813 = vmatpush.msrb.mxu3 %v564_v40  ;;  %v5713_v39 = vld [vmem:[#allocation7 + $0x4d0] sm:$0xff]  ;;  %v5715_v40 = vld [vmem:[#allocation7 + $0xd8] sm:$0xff] }
  0x4e   :  { %754 = vmatpush.msra.mxu0 %v427_v41  ;;  %774 = vmatpush.msrb.mxu1 %v555_v42  ;;  %v5719_v41 = vperm.slane %v5646_v30, 2  ;;  %v5725_v42 = vld [vmem:[#allocation7 + $0x4d8] sm:$0xff] }
  0x4f   :  { %794 = vmatpush.msrb.mxu2 %v428_v43  ;;  %814 = vmatpush.msrb.mxu3 %v556_v45  ;;  %v5727_v43 = vld [vmem:[#allocation7 + $0x90] sm:$0xff]  ;;  %v5734_v30 = vld [vmem:[#allocation7 + $0x98] sm:$0xff] }
  0x50   :  { %4195 = vmatmul.msk.f32.gmra.mxu0 %vm108_vm0, %v5613_v49  ;;  %4206 = vmatmul.msk.f32.gmra.mxu1 %vm108_vm0, %v5577_v5  ;;  %v540_v49 = vld [vmem:[#allocation7 + $0x698] sm:$0xff]  ;;  %10218 = vst [vmem:[#allocation20_spill] sm:$0xff] %v5719_v41 }
  0x51   :  { %4214 = vmatmul.msk.f32.gmra.mxu2 %vm108_vm0, %v5577_v5  ;;  %4222 = vmatmul.msk.f32.gmra.mxu3 %vm108_vm0, %v5577_v5  ;;  %v395_v5 = vld [vmem:[#allocation7 + $0x210] sm:$0xff] }
  0x52   :  { %755 = vmatpush.msra.mxu0 %v419_v48  ;;  %775 = vmatpush.msrb.mxu1 %v547_v51  ;;  %v5740_v48 = vld [vmem:[#allocation7 + $0x50] sm:$0xff] }
  0x53   :  { %795 = vmatpush.msrb.mxu2 %v420_v52  ;;  %815 = vmatpush.msrb.mxu3 %v548_v53  ;;  %v5749_v52 = vld [vmem:[#allocation7 + $0x58] sm:$0xff] }
  0x54   :  { %756 = vmatpush.msra.mxu0 %v411_v54  ;;  %776 = vmatpush.msrb.mxu1 %v539_v55  ;;  %v5754_v54 = vld [vmem:[#allocation7 + $0x458] sm:$0xff]  ;;  %v5756_v55 = vld [vmem:[#allocation7 + $0x10] sm:$0xff] }
  0x55   :  { %796 = vmatpush.msrb.mxu2 %v412_v56  ;;  %816 = vmatpush.msrb.mxu3 %v540_v49  ;;  %v5761_v56 = vld [vmem:[#allocation7 + $0x410] sm:$0xff]  ;;  %v5763_v49 = vld [vmem:[#allocation7 + $0x18] sm:$0xff] }
  0x56   :  { %757 = vmatpush.msra.mxu0 %v403_v58  ;;  %777 = vmatpush.msrb.mxu1 %v531_v60  ;;  %v5767_v60 = vld [vmem:[#allocation7 + $0x418] sm:$0xff] }
  0x57   :  { %797 = vmatpush.msrb.mxu2 %v404_v61  ;;  %817 = vmatpush.msrb.mxu3 %v532_v62 }
  0x58   :  { %758 = vmatpush.msra.mxu0 %v395_v5  ;;  %778 = vmatpush.msrb.mxu1 %v523_v0  ;;  %v581_v5 = vld [vmem:[#allocation7 + $0x7e0] sm:$0xff]  ;;  %v582_v0 = vld [vmem:[#allocation7 + $0x7e8] sm:$0xff] }
  0x59   :  { %798 = vmatpush.msrb.mxu2 %v396_v1  ;;  %818 = vmatpush.msrb.mxu3 %v524_v4  ;;  %v9637_v4 = vmov 0.0  }
  0x5a   :  { %4196 = vmatmul.msk.f32.gmra.mxu0 %vm108_vm0, %v5624_v2  ;;  %4207 = vmatmul.msk.f32.gmra.mxu1 %vm108_vm0, %v5593_v12  ;;  %v5684_v2 = vld [vmem:[#allocation7 + $0x590] sm:$0xff] }
  0x5b   :  { %4215 = vmatmul.msk.f32.gmra.mxu2 %vm108_vm0, %v5593_v12  ;;  %4223 = vmatmul.msk.f32.gmra.mxu3 %vm108_vm0, %v5593_v12  ;;  %v5692_v12 = vld [vmem:[#allocation7 + $0x558] sm:$0xff] }
  0x5c   :  { %759 = vmatpush.msra.mxu0 %v387_v11  ;;  %779 = vmatpush.msrb.mxu1 %v515_v13  ;;  %v574_v13 = vld [vmem:[#allocation7 + $0x7a8] sm:$0xff] }
  0x5d   :  { %799 = vmatpush.msrb.mxu2 %v388_v14  ;;  %819 = vmatpush.msrb.mxu3 %v516_v15  ;;  %v526_v11 = vld [vmem:[#allocation7 + $0x628] sm:$0xff] }
  0x5e   :  { %760 = vmatpush.msra.mxu0 %v379_v16  ;;  %780 = vmatpush.msrb.mxu1 %v5684_v2 }
  0x5f   :  { %800 = vmatpush.msrb.mxu2 %v380_v19  ;;  %820 = vmatpush.msrb.mxu3 %v5687_v21 }
  0x60   :  { %761 = vmatpush.msra.mxu0 %v371_v23  ;;  %781 = vmatpush.msrb.mxu1 %v5689_v24  ;;  %v566_v23 = vld [vmem:[#allocation7 + $0x768] sm:$0xff] }
  0x61   :  { %801 = vmatpush.msrb.mxu2 %v372_v25  ;;  %821 = vmatpush.msrb.mxu3 %v5692_v12 }
  0x62   :  { %762 = vmatpush.msra.mxu0 %v363_v27  ;;  %782 = vmatpush.msrb.mxu1 %v5695_v28 }
  0x63   :  { %802 = vmatpush.msrb.mxu2 %v364_v29  ;;  %822 = vmatpush.msrb.mxu3 %v5700_v32 }
  0x64   :  { %4197 = vmatmul.msk.f32.gmra.mxu0 %vm108_vm0, %v5635_v22  ;;  %4208 = vmatmul.msk.f32.gmra.mxu1 %vm108_vm0, %v5582_v6 }
  0x65   :  { %4216 = vmatmul.msk.f32.gmra.mxu2 %vm108_vm0, %v5582_v6  ;;  %4224 = vmatmul.msk.f32.gmra.mxu3 %vm108_vm0, %v5582_v6  ;;  %v5747_v6 = vld [vmem:[#allocation7 + $0x450] sm:$0xff] }
  0x66   :  { %763 = vmatpush.msra.mxu0 %v5708_v36  ;;  %783 = vmatpush.msrb.mxu1 %v5713_v39 }
  0x67   :  { %803 = vmatpush.msrb.mxu2 %v5715_v40  ;;  %823 = vmatpush.msrb.mxu3 %v5725_v42 }
  0x68   :  { %764 = vmatpush.msra.mxu0 %v5727_v43 }
  0x69   :  { %804 = vmatpush.msrb.mxu2 %v5734_v30 }
  0x6a   :  { %765 = vmatpush.msra.mxu0 %v5740_v48 }
  0x6b   :  { %805 = vmatpush.msrb.mxu2 %v5749_v52 }
  0x6c   :  { %766 = vmatpush.msra.mxu0 %v5756_v55  ;;  %707 = vmatmul.f32.vlgmr.msra.gmra.mxu1 %v9637_v4 }
  0x6d   :  { %806 = vmatpush.msrb.mxu2 %v5763_v49  ;;  %747 = vmatmul.f32.vlgmr.msra.gmra.mxu3 %v9637_v4 }
  0x94   :  { %v150_v44 = vpop.f32.mrf.mxu0 }
  0x95   :  { %v151_v46 = vadd.f32 %v150_v44, %v5649_v37  ;;  %v5652_v47 = vpop.f32.mrf.mxu1  ;;  %v5732_v44 = vld [vmem:[#allocation7 + $0x490] sm:$0xff] }
  0x96   :  { %10213 = vst [vmem:[#allocation15_spill] sm:$0xff] %v5652_v47  ;;  %784 = vmatpush.msrb.mxu1 %v5732_v44  ;;  %v544_v47 = vld [vmem:[#allocation7 + $0x6b8] sm:$0xff] }
  0x97   :  { %v4225_v50 = vmul.f32 -1.442695, %v151_v46  ;;  %v5738_v46 = vld [vmem:[#allocation7 + $0x498] sm:$0xff] }
  0x98   :  { %824 = vmatpush.msrb.mxu3 %v5738_v46  ;;  %785 = vmatpush.msrb.mxu1 %v5747_v6 }
  0x99   :  { %4297 = vpow2.f32 %v4225_v50 }
  0x9a   :  { %825 = vmatpush.msrb.mxu3 %v5754_v54  ;;  %786 = vmatpush.msrb.mxu1 %v5761_v56 }
  0x9b   :  { %v5665_v59 = vpop.f32.mrf.mxu3  ;;  %787 = vmatmul.f32.vlgmr.msrb.gmra.mxu1 %v9637_v4 }
  0x9c   :  { %10215 = vst [vmem:[#allocation17_spill] sm:$0xff] %v5665_v59  ;;  %826 = vmatpush.msrb.mxu3 %v5767_v60  ;;  %851 = vmatpush.msra.mxu1 %v581_v5  ;;  %v542_v5 = vld [vmem:[#allocation7 + $0x6a8] sm:$0xff]  ;;  %v552_v59 = vld [vmem:[#allocation7 + $0x6f8] sm:$0xff] }
  0x9d   :  { %v191_v63 = vpop.f32.mrf.mxu1  ;;  %827 = vmatmul.f32.vlgmr.msrb.gmra.mxu3 %v9637_v4 }
  0x9e   :  { %v192_v3 = vadd.f32 %v191_v63, %v5663_v57  ;;  %891 = vmatpush.msra.mxu3 %v582_v0 }
  0x9f   :  { %v4298_v7 = vpop.eup %4297  ;;  %v5680_v17 = vpop.f32.mrf.mxu2 }
  0xa0   :  { %v5668_v8 = vadd.f32 1.0, %v4298_v7  ;;  %v4226_v9 = vmul.f32 -1.442695, %v192_v3  ;;  %10217 = vst [vmem:[#allocation19_spill] sm:$0xff] %v5680_v17  ;;  %v573_v7 = vld [vmem:[#allocation7 + $0x7a0] sm:$0xff]  ;;  %892 = vmatpush.msra.mxu3 %v574_v13  ;;  %v543_v17 = vld [vmem:[#allocation7 + $0x6b0] sm:$0xff] }
  0xa1   :  { %852 = vmatpush.msra.mxu1 %v573_v7  ;;  %v525_v7 = vld [vmem:[#allocation7 + $0x620] sm:$0xff] }
  0xa2   :  { %4299 = vrcp.f32 %v5668_v8  ;;  %vm614_vm1 = vweird.f32 %v5668_v8  ;;  %v620_v63 = vand.u32 2147483648, %v5668_v8  ;;  %v618_v3 = vand.u32 2147483647, %v5668_v8  ;;  %893 = vmatpush.msra.mxu3 %v566_v23  ;;  %v517_v13 = vld [vmem:[#allocation7 + $0x5e0] sm:$0xff] }
  0xa3   :  { %4301 = vpow2.f32 %v4226_v9  ;;  %v273_v18 = vpop.f32.mrf.mxu3 }
  0xa4   :  { %v274_v20 = vadd.f32 %v273_v18, %v5671_v10  ;;  %vm619_vm6 = vcmp.eq.f32.partialorder %v618_v3, 8.507059e+37 }
  0xa6   :  { %v4227_v26 = vmul.f32 -1.442695, %v274_v20  ;;  %v621_v20 = vor.u32 1.1754944e-38, %v620_v63 }
  0xa8   :  { %v5697_v31 = vpop.eup %4299  ;;  %4303 = vpow2.f32 %v4227_v26  ;;  %v557_v26 = vld [vmem:[#allocation7 + $0x720] sm:$0xff] }
  0xa9   :  { %v4302_v33 = vpop.eup %4301  ;;  %v610_v34 = vmul.f32 %v5697_v31, %v5668_v8  ;;  %v232_v22 = vpop.f32.mrf.mxu2  ;;  %vm615_vm2 = vweird.f32 %v5697_v31  ;;  %v565_v8 = vld [vmem:[#allocation7 + $0x760] sm:$0xff] }
  0xaa   :  { %v5705_v35 = vadd.f32 1.0, %v4302_v33  ;;  %v233_v53 = vadd.f32 %v232_v22, %v5719_v41  ;;  %vm5786_vm3 = vmor %vm614_vm1, %vm615_vm2  ;;  %853 = vmatpush.msra.mxu1 %v565_v8  ;;  %v549_v22 = vld [vmem:[#allocation7 + $0x6e0] sm:$0xff] }
  0xab   :  { %v611_v38 = vsub.f32 1.0, %v610_v34  ;;  %v558_v34 = vld [vmem:[#allocation7 + $0x728] sm:$0xff]  ;;  %v509_v8 = vld [vmem:[#allocation7 + $0x5a0] sm:$0xff] }
  0xac   :  { %4305 = vrcp.f32 %v5705_v35  ;;  %v639_v9 = vand.u32 2147483648, %v5705_v35  ;;  %v637_v18 = vand.u32 2147483647, %v5705_v35  ;;  %vm633_vm5 = vweird.f32 %v5705_v35  ;;  %854 = vmatpush.msra.mxu1 %v557_v26  ;;  %894 = vmatpush.msra.mxu3 %v558_v34  ;;  %v5817_v26 = vld [vmem:[#allocation7 + $0x3e8] sm:$0xff] }
  0xad   :  { %v612_v51 = vmul.f32 %v5697_v31, %v611_v38  ;;  %v494_v34 = vld [vmem:[#allocation7 + $0x528] sm:$0xff] }
  0xae   :  { %v4304_v45 = vpop.eup %4303  ;;  %v640_v29 = vor.u32 1.1754944e-38, %v639_v9  ;;  %vm638_vm8 = vcmp.eq.f32.partialorder %v637_v18, 8.507059e+37  ;;  %855 = vmatpush.msra.mxu1 %v549_v22  ;;  %v5829_v22 = vld [vmem:[#allocation7 + $0x368] sm:$0xff] }
  0xaf   :  { %v5742_v50 = vadd.f32 1.0, %v4304_v45  ;;  %v613_v62 = vadd.f32 %v5697_v31, %v612_v51 }
  0xb1   :  { %4307 = vrcp.f32 %v5742_v50  ;;  %v617_v16 = vsel %vm5786_vm3, %v5697_v31, %v613_v62  ;;  %v541_v62 = vld [vmem:[#allocation7 + $0x6a0] sm:$0xff]  ;;  %v659_v3 = vand.u32 2147483648, %v5742_v50  ;;  %vm653_vm10 = vweird.f32 %v5742_v50 }
  0xb2   :  { %v4306_v58 = vpop.eup %4305  ;;  %4309 = vtanh.f32 %v233_v53  ;;  %v622_v33 = vsel %vm619_vm6, %v621_v20, %v617_v16  ;;  %856 = vmatpush.msra.mxu1 %v541_v62  ;;  %v657_v9 = vand.u32 2147483647, %v5742_v50  ;;  %v518_v16 = vld [vmem:[#allocation7 + $0x5e8] sm:$0xff] }
  0xb3   :  { %v629_v61 = vmul.f32 %v4306_v58, %v5705_v35  ;;  %vm634_vm4 = vweird.f32 %v4306_v58  ;;  %v550_v35 = vld [vmem:[#allocation7 + $0x6e8] sm:$0xff]  ;;  %v660_v18 = vor.u32 1.1754944e-38, %v659_v3  ;;  %v469_v3 = vld [vmem:[#allocation7 + $0x460] sm:$0xff] }
  0xb4   :  { %vm635_vm7 = vmor %vm633_vm5, %vm634_vm4  ;;  %895 = vmatpush.msra.mxu3 %v550_v35  ;;  %vm658_vm12 = vcmp.eq.f32.partialorder %v657_v9, 8.507059e+37  ;;  %v5833_v35 = vld [vmem:[#allocation7 + $0x320] sm:$0xff]  ;;  %v5841_v62 = vld [vmem:[#allocation7 + $0x2e8] sm:$0xff] }
  0xb5   :  { %v630_v1 = vsub.f32 1.0, %v629_v61  ;;  %v5853_v9 = vld [vmem:[#allocation7 + $0x260] sm:$0xff] }
  0xb6   :  { %896 = vmatpush.msra.mxu3 %v542_v5  ;;  %v477_v5 = vld [vmem:[#allocation7 + $0x4a0] sm:$0xff] }
  0xb7   :  { %v5791_v14 = vpop.eup %4307  ;;  %v631_v15 = vmul.f32 %v4306_v58, %v630_v1  ;;  %v534_v1 = vld [vmem:[#allocation7 + $0x668] sm:$0xff] }
  0xb8   :  { %v649_v19 = vmul.f32 %v5791_v14, %v5742_v50  ;;  %v4310_v27 = vpop.eup %4309  ;;  %vm654_vm9 = vweird.f32 %v5791_v14  ;;  %897 = vmatpush.msra.mxu3 %v534_v1  ;;  %v5815_v50 = vld [vmem:[#allocation7 + $0x3e0] sm:$0xff]  ;;  %v5849_v1 = vld [vmem:[#allocation7 + $0x2a8] sm:$0xff] }
  0xb9   :  { %v632_v25 = vadd.f32 %v4306_v58, %v631_v15  ;;  %v664_v61 = vmul.f32 %v4310_v27, %v622_v33  ;;  %vm655_vm11 = vmor %vm653_vm10, %vm654_vm9  ;;  %v502_v27 = vld [vmem:[#allocation7 + $0x568] sm:$0xff]  ;;  %v493_v33 = vld [vmem:[#allocation7 + $0x520] sm:$0xff] }
  0xba   :  { %v650_v31 = vsub.f32 1.0, %v649_v19  ;;  %898 = vmatpush.msra.mxu3 %v526_v11  ;;  %v510_v19 = vld [vmem:[#allocation7 + $0x5a8] sm:$0xff] }
  0xbb   :  { %v636_v38 = vsel %vm635_vm7, %v4306_v58, %v632_v25  ;;  %v533_v58 = vld [vmem:[#allocation7 + $0x660] sm:$0xff]  ;;  %v5855_v11 = vld [vmem:[#allocation7 + $0x268] sm:$0xff] }
  0xbc   :  { %v651_v45 = vmul.f32 %v5791_v14, %v650_v31  ;;  %v641_v51 = vsel %vm638_vm8, %v640_v29, %v636_v38  ;;  %857 = vmatpush.msra.mxu1 %v533_v58  ;;  %899 = vmatpush.msra.mxu3 %v518_v16  ;;  %v5821_v29 = vld [vmem:[#allocation7 + $0x3a0] sm:$0xff]  ;;  %v5823_v31 = vld [vmem:[#allocation7 + $0x3a8] sm:$0xff] }
  0xbd   :  { %v663_v53 = vmul.f32 0.0, %v641_v51  ;;  %v5827_v38 = vld [vmem:[#allocation7 + $0x360] sm:$0xff]  ;;  %v486_v51 = vld [vmem:[#allocation7 + $0x4e8] sm:$0xff] }
  0xbe   :  { %v652_v0 = vadd.f32 %v5791_v14, %v651_v45  ;;  %858 = vmatpush.msra.mxu1 %v525_v7  ;;  %900 = vmatpush.msra.mxu3 %v510_v19  ;;  %v485_v45 = vld [vmem:[#allocation7 + $0x4e0] sm:$0xff]  ;;  %v478_v58 = vld [vmem:[#allocation7 + $0x4a8] sm:$0xff] }
  0xbf   :  { %v5804_v63 = vadd.f32 %v664_v61, %v663_v53  ;;  %v5835_v53 = vld [vmem:[#allocation7 + $0x328] sm:$0xff]  ;;  %v5839_v61 = vld [vmem:[#allocation7 + $0x2e0] sm:$0xff] }
  0xc0   :  { %v656_v15 = vsel %vm655_vm11, %v5791_v14, %v652_v0  ;;  %859 = vmatpush.msra.mxu1 %v517_v13  ;;  %v501_v14 = vld [vmem:[#allocation7 + $0x560] sm:$0xff]  ;;  %901 = vmatpush.msra.mxu3 %v502_v27  ;;  %v470_v7 = vld [vmem:[#allocation7 + $0x468] sm:$0xff] }
  0xc1   :  { %4311 = vtanh.f32 %v5804_v63  ;;  %v661_v23 = vsel %vm658_vm12, %v660_v18, %v656_v15  ;;  %v5847_v0 = vld [vmem:[#allocation7 + $0x2a0] sm:$0xff]  ;;  %v462_v15 = vld [vmem:[#allocation7 + $0x428] sm:$0xff] }
  0xc2   :  { %860 = vmatpush.msra.mxu1 %v509_v8  ;;  %902 = vmatpush.msra.mxu3 %v494_v34  ;;  %v461_v13 = vld [vmem:[#allocation7 + $0x420] sm:$0xff]  ;;  %v5861_v18 = vld [vmem:[#allocation7 + $0x228] sm:$0xff]  ;;  %v576_v34 = vld [vmem:[#allocation7 + $0x7b8] sm:$0xff] }
  0xc3   :  { %v5859_v16 = vld [vmem:[#allocation7 + $0x220] sm:$0xff]  ;;  %v5867_v19 = vld [vmem:[#allocation7 + $0x1e8] sm:$0xff] }
  0xc4   :  { %861 = vmatpush.msra.mxu1 %v501_v14  ;;  %903 = vmatpush.msra.mxu3 %v486_v51  ;;  %v5865_v8 = vld [vmem:[#allocation7 + $0x1e0] sm:$0xff]  ;;  %v5873_v27 = vld [vmem:[#allocation7 + $0x1a8] sm:$0xff] }
  0xc5   :  { %v5871_v14 = vld [vmem:[#allocation7 + $0x1a0] sm:$0xff]  ;;  %v5881_v51 = vld [vmem:[#allocation7 + $0x168] sm:$0xff] }
  0xc6   :  { %862 = vmatpush.msra.mxu1 %v493_v33  ;;  %904 = vmatpush.msra.mxu3 %v478_v58  ;;  %v575_v33 = vld [vmem:[#allocation7 + $0x7b0] sm:$0xff]  ;;  %v568_v58 = vld [vmem:[#allocation7 + $0x778] sm:$0xff] }
  0xc7   :  { %v4312_v20 = vpop.eup %4311 }
  0xc8   :  { %v5813_v25 = vmul.f32 %v4312_v20, %v661_v23  ;;  %863 = vmatpush.msra.mxu1 %v485_v45  ;;  %905 = vmatpush.msra.mxu3 %v470_v7  ;;  %v583_v20 = vld [vmem:[#allocation7 + $0x7f0] sm:$0xff]  ;;  %v584_v23 = vld [vmem:[#allocation7 + $0x7f8] sm:$0xff]  ;;  %v5879_v45 = vld [vmem:[#allocation7 + $0x160] sm:$0xff] }
  0xc9   :  { %v5887_v7 = vld [vmem:[#allocation7 + $0x128] sm:$0xff] }
  0xca   :  { %687 = vmatmul.f32.vlgmr.msrb.gmra.mxu0 %v5813_v25  ;;  %727 = vmatmul.f32.vlgmr.msra.gmra.mxu2 %v5813_v25  ;;  %10222 = vst [vmem:[#allocation22_spill] sm:$0xff] %v5887_v7 }
  0xcb   :  { %831 = vmatpush.msrb.mxu0 %v5815_v50  ;;  %871 = vmatpush.msra.mxu2 %v5817_v26 }
  0xcc   :  { %864 = vmatpush.msra.mxu1 %v477_v5  ;;  %906 = vmatpush.msra.mxu3 %v462_v15  ;;  %v567_v5 = vld [vmem:[#allocation7 + $0x770] sm:$0xff]  ;;  %v560_v15 = vld [vmem:[#allocation7 + $0x738] sm:$0xff] }
  0xcd   :  { %832 = vmatpush.msrb.mxu0 %v5821_v29  ;;  %872 = vmatpush.msra.mxu2 %v5823_v31 }
  0xce   :  { %865 = vmatpush.msra.mxu1 %v469_v3  ;;  %907 = vmatmul.f32.vlgmr.msra.gmra.mxu3 %v9637_v4  ;;  %v5885_v3 = vld [vmem:[#allocation7 + $0x120] sm:$0xff] }
  0xcf   :  { %833 = vmatpush.msrb.mxu0 %v5827_v38  ;;  %873 = vmatpush.msra.mxu2 %v5829_v22  ;;  %10221 = vst [vmem:[#allocation21_spill] sm:$0xff] %v5885_v3 }
  0xd0   :  { %866 = vmatpush.msra.mxu1 %v461_v13  ;;  %971 = vmatpush.msrb.mxu3 %v584_v23  ;;  %v559_v13 = vld [vmem:[#allocation7 + $0x730] sm:$0xff]  ;;  %v5893_v23 = vld [vmem:[#allocation7 + $0xe8] sm:$0xff] }
  0xd1   :  { %834 = vmatpush.msrb.mxu0 %v5833_v35  ;;  %874 = vmatpush.msra.mxu2 %v5835_v53  ;;  %10224 = vst [vmem:[#allocation24_spill] sm:$0xff] %v5893_v23 }
  0xd2   :  { %767 = vmatmul.f32.vlgmr.msra.gmra.mxu0 %v5813_v25  ;;  %807 = vmatmul.f32.vlgmr.msrb.gmra.mxu2 %v5813_v25 }
  0xd3   :  { %835 = vmatpush.msrb.mxu0 %v5839_v61  ;;  %875 = vmatpush.msra.mxu2 %v5841_v62 }
  0xd4   :  { %867 = vmatmul.f32.vlgmr.msra.gmra.mxu1 %v9637_v4  ;;  %972 = vmatpush.msrb.mxu3 %v576_v34  ;;  %v551_v4 = vld [vmem:[#allocation7 + $0x6f0] sm:$0xff]  ;;  %v5899_v34 = vld [vmem:[#allocation7 + $0xa8] sm:$0xff] }
  0xd5   :  { %836 = vmatpush.msrb.mxu0 %v5847_v0  ;;  %876 = vmatpush.msra.mxu2 %v5849_v1  ;;  %10226 = vst [vmem:[#allocation26_spill] sm:$0xff] %v5899_v34 }
  0xd6   :  { %931 = vmatpush.msrb.mxu1 %v583_v20  ;;  %v5891_v20 = vld [vmem:[#allocation7 + $0xe0] sm:$0xff]  ;;  %973 = vmatpush.msrb.mxu3 %v568_v58  ;;  %v5905_v58 = vld [vmem:[#allocation7 + $0x68] sm:$0xff] }
  0xd7   :  { %837 = vmatpush.msrb.mxu0 %v5853_v9  ;;  %877 = vmatpush.msra.mxu2 %v5855_v11  ;;  %10223 = vst [vmem:[#allocation23_spill] sm:$0xff] %v5891_v20 }
  0xd8   :  { %932 = vmatpush.msrb.mxu1 %v575_v33  ;;  %v5897_v33 = vld [vmem:[#allocation7 + $0xa0] sm:$0xff]  ;;  %974 = vmatpush.msrb.mxu3 %v560_v15  ;;  %10228 = vst [vmem:[#allocation28_spill] sm:$0xff] %v5905_v58  ;;  %v5911_v15 = vld [vmem:[#allocation7 + $0x28] sm:$0xff] }
  0xd9   :  { %838 = vmatpush.msrb.mxu0 %v5859_v16  ;;  %878 = vmatpush.msra.mxu2 %v5861_v18  ;;  %10225 = vst [vmem:[#allocation25_spill] sm:$0xff] %v5897_v33 }
  0xda   :  { %933 = vmatpush.msrb.mxu1 %v567_v5  ;;  %v5903_v5 = vld [vmem:[#allocation7 + $0x60] sm:$0xff]  ;;  %975 = vmatpush.msrb.mxu3 %v552_v59  ;;  %10230 = vst [vmem:[#allocation30_spill] sm:$0xff] %v5911_v15  ;;  %v527_v59 = vld [vmem:[#allocation7 + $0x630] sm:$0xff] }
  0xdb   :  { %839 = vmatpush.msrb.mxu0 %v5865_v8  ;;  %879 = vmatpush.msra.mxu2 %v5867_v19  ;;  %10227 = vst [vmem:[#allocation27_spill] sm:$0xff] %v5903_v5 }
  0xdc   :  { %934 = vmatpush.msrb.mxu1 %v559_v13  ;;  %v5909_v13 = vld [vmem:[#allocation7 + $0x20] sm:$0xff]  ;;  %976 = vmatpush.msrb.mxu3 %v544_v47  ;;  %v5923_v47 = vld [vmem:[#allocation7 + $0x3b0] sm:$0xff] }
  0xdd   :  { %840 = vmatpush.msrb.mxu0 %v5871_v14  ;;  %880 = vmatpush.msra.mxu2 %v5873_v27  ;;  %10229 = vst [vmem:[#allocation29_spill] sm:$0xff] %v5909_v13 }
  0xde   :  { %935 = vmatpush.msrb.mxu1 %v551_v4  ;;  %v5917_v4 = vld [vmem:[#allocation7 + $0x3f8] sm:$0xff]  ;;  %10233 = vst [vmem:[#allocation33_spill] sm:$0xff] %v5923_v47 }
  0xdf   :  { %841 = vmatpush.msrb.mxu0 %v5879_v45  ;;  %881 = vmatpush.msra.mxu2 %v5881_v51  ;;  %10232 = vst [vmem:[#allocation32_spill] sm:$0xff] %v5917_v4 }
  0xe0   :  { %936 = vmatpush.msrb.mxu1 %v543_v17  ;;  %v5925_v17 = vld [vmem:[#allocation7 + $0x3b8] sm:$0xff] }
  0xe1   :  { %842 = vmatpush.msrb.mxu0 %v5885_v3  ;;  %882 = vmatpush.msra.mxu2 %v5887_v7  ;;  %v535_v7 = vld [vmem:[#allocation7 + $0x670] sm:$0xff]  ;;  %v536_v3 = vld [vmem:[#allocation7 + $0x678] sm:$0xff]  ;;  %10234 = vst [vmem:[#allocation34_spill] sm:$0xff] %v5925_v17 }
  0xe2   :  { %937 = vmatpush.msrb.mxu1 %v535_v7  ;;  %977 = vmatpush.msrb.mxu3 %v536_v3  ;;  %v519_v7 = vld [vmem:[#allocation7 + $0x5f0] sm:$0xff]  ;;  %v520_v3 = vld [vmem:[#allocation7 + $0x5f8] sm:$0xff] }
  0xe3   :  { %843 = vmatpush.msrb.mxu0 %v5891_v20  ;;  %883 = vmatpush.msra.mxu2 %v5893_v23  ;;  %v5915_v23 = vld [vmem:[#allocation7 + $0x3f0] sm:$0xff]  ;;  %v5937_v20 = vld [vmem:[#allocation7 + $0x338] sm:$0xff] }
  0xe4   :  { %10231 = vst [vmem:[#allocation31_spill] sm:$0xff] %v5915_v23  ;;  %938 = vmatpush.msrb.mxu1 %v527_v59  ;;  %v5941_v59 = vld [vmem:[#allocation7 + $0x2f0] sm:$0xff] }
  0xe5   :  { %844 = vmatpush.msrb.mxu0 %v5897_v33  ;;  %884 = vmatpush.msra.mxu2 %v5899_v34  ;;  %v528_v34 = vld [vmem:[#allocation7 + $0x638] sm:$0xff]  ;;  %v5935_v33 = vld [vmem:[#allocation7 + $0x330] sm:$0xff]  ;;  %10238 = vst [vmem:[#allocation38_spill] sm:$0xff] %v5937_v20 }
  0xe6   :  { %978 = vmatpush.msrb.mxu3 %v528_v34  ;;  %10237 = vst [vmem:[#allocation37_spill] sm:$0xff] %v5935_v33  ;;  %939 = vmatpush.msrb.mxu1 %v519_v7  ;;  %v5943_v34 = vld [vmem:[#allocation7 + $0x2f8] sm:$0xff]  ;;  %v5947_v7 = vld [vmem:[#allocation7 + $0x2b0] sm:$0xff] }
  0xe7   :  { %845 = vmatpush.msrb.mxu0 %v5903_v5  ;;  %885 = vmatpush.msra.mxu2 %v5905_v58  ;;  %v5929_v58 = vld [vmem:[#allocation7 + $0x370] sm:$0xff]  ;;  %v512_v5 = vld [vmem:[#allocation7 + $0x5b8] sm:$0xff]  ;;  %10239 = vst [vmem:[#allocation39_spill] sm:$0xff] %v5941_v59 }
  0xe8   :  { %10235 = vst [vmem:[#allocation35_spill] sm:$0xff] %v5929_v58  ;;  %979 = vmatpush.msrb.mxu3 %v520_v3  ;;  %v5949_v3 = vld [vmem:[#allocation7 + $0x2b8] sm:$0xff] }
  0xe9   :  { %846 = vmatpush.msrb.mxu0 %v5909_v13  ;;  %886 = vmatpush.msra.mxu2 %v5911_v15  ;;  %v5931_v13 = vld [vmem:[#allocation7 + $0x378] sm:$0xff]  ;;  %v511_v15 = vld [vmem:[#allocation7 + $0x5b0] sm:$0xff]  ;;  %10240 = vst [vmem:[#allocation40_spill] sm:$0xff] %v5943_v34 }
  0xea   :  { %847 = vmatmul.f32.vlgmr.msrb.gmra.mxu0 %v5813_v25  ;;  %887 = vmatmul.f32.vlgmr.msra.gmra.mxu2 %v5813_v25  ;;  %10236 = vst [vmem:[#allocation36_spill] sm:$0xff] %v5931_v13 }
  0xeb   :  { %911 = vmatpush.msra.mxu0 %v5915_v23  ;;  %951 = vmatpush.msrb.mxu2 %v5917_v4  ;;  %v503_v4 = vld [vmem:[#allocation7 + $0x570] sm:$0xff]  ;;  %v504_v23 = vld [vmem:[#allocation7 + $0x578] sm:$0xff]  ;;  %10241 = vst [vmem:[#allocation41_spill] sm:$0xff] %v5947_v7 }
  0xec   :  { %940 = vmatpush.msrb.mxu1 %v511_v15  ;;  %980 = vmatpush.msrb.mxu3 %v512_v5  ;;  %10242 = vst [vmem:[#allocation42_spill] sm:$0xff] %v5949_v3  ;;  %v5953_v15 = vld [vmem:[#allocation7 + $0x270] sm:$0xff]  ;;  %v5955_v5 = vld [vmem:[#allocation7 + $0x278] sm:$0xff] }
  0xed   :  { %912 = vmatpush.msra.mxu0 %v5923_v47  ;;  %952 = vmatpush.msrb.mxu2 %v5925_v17  ;;  %v495_v17 = vld [vmem:[#allocation7 + $0x530] sm:$0xff]  ;;  %v496_v47 = vld [vmem:[#allocation7 + $0x538] sm:$0xff]  ;;  %10243 = vst [vmem:[#allocation43_spill] sm:$0xff] %v5955_v5 }
  0xee   :  { %941 = vmatpush.msrb.mxu1 %v503_v4  ;;  %981 = vmatpush.msrb.mxu3 %v504_v23  ;;  %v5959_v4 = vld [vmem:[#allocation7 + $0x230] sm:$0xff]  ;;  %v5961_v23 = vld [vmem:[#allocation7 + $0x238] sm:$0xff] }
  0xef   :  { %913 = vmatpush.msra.mxu0 %v5929_v58  ;;  %953 = vmatpush.msrb.mxu2 %v5931_v13  ;;  %v487_v13 = vld [vmem:[#allocation7 + $0x4f0] sm:$0xff]  ;;  %v488_v58 = vld [vmem:[#allocation7 + $0x4f8] sm:$0xff]  ;;  %10244 = vst [vmem:[#allocation44_spill] sm:$0xff] %v5959_v4 }
  0xf0   :  { %942 = vmatpush.msrb.mxu1 %v495_v17  ;;  %982 = vmatpush.msrb.mxu3 %v496_v47  ;;  %10245 = vst [vmem:[#allocation45_spill] sm:$0xff] %v5961_v23  ;;  %v5965_v17 = vld [vmem:[#allocation7 + $0x1f0] sm:$0xff]  ;;  %v5967_v47 = vld [vmem:[#allocation7 + $0x1f8] sm:$0xff] }
  0xf1   :  { %914 = vmatpush.msra.mxu0 %v5935_v33  ;;  %954 = vmatpush.msrb.mxu2 %v5937_v20  ;;  %v479_v20 = vld [vmem:[#allocation7 + $0x4b0] sm:$0xff]  ;;  %v480_v33 = vld [vmem:[#allocation7 + $0x4b8] sm:$0xff]  ;;  %10246 = vst [vmem:[#allocation46_spill] sm:$0xff] %v5965_v17 }
  0xf2   :  { %943 = vmatpush.msrb.mxu1 %v487_v13  ;;  %983 = vmatpush.msrb.mxu3 %v488_v58  ;;  %10247 = vst [vmem:[#allocation47_spill] sm:$0xff] %v5967_v47  ;;  %v5971_v13 = vld [vmem:[#allocation7 + $0x1b0] sm:$0xff]  ;;  %v5973_v58 = vld [vmem:[#allocation7 + $0x1b8] sm:$0xff] }
  0xf3   :  { %915 = vmatpush.msra.mxu0 %v5941_v59  ;;  %955 = vmatpush.msrb.mxu2 %v5943_v34  ;;  %v471_v34 = vld [vmem:[#allocation7 + $0x470] sm:$0xff]  ;;  %v472_v59 = vld [vmem:[#allocation7 + $0x478] sm:$0xff]  ;;  %10248 = vst [vmem:[#allocation48_spill] sm:$0xff] %v5971_v13 }
  0xf4   :  { %944 = vmatpush.msrb.mxu1 %v479_v20  ;;  %984 = vmatpush.msrb.mxu3 %v480_v33  ;;  %10249 = vst [vmem:[#allocation49_spill] sm:$0xff] %v5973_v58  ;;  %v5979_v20 = vld [vmem:[#allocation7 + $0x178] sm:$0xff]  ;;  %v5983_v33 = vld [vmem:[#allocation7 + $0x130] sm:$0xff] }
  0xf5   :  { %916 = vmatpush.msra.mxu0 %v5947_v7  ;;  %956 = vmatpush.msrb.mxu2 %v5949_v3  ;;  %v463_v3 = vld [vmem:[#allocation7 + $0x430] sm:$0xff]  ;;  %v464_v7 = vld [vmem:[#allocation7 + $0x438] sm:$0xff]  ;;  %10251 = vst [vmem:[#allocation51_spill] sm:$0xff] %v5979_v20 }
  0xf6   :  { %945 = vmatpush.msrb.mxu1 %v471_v34  ;;  %985 = vmatpush.msrb.mxu3 %v472_v59  ;;  %10252 = vst [vmem:[#allocation52_spill] sm:$0xff] %v5983_v33  ;;  %v10254_v34 = vmov 0.0   ;;  %v5991_v59 = vpop.f32.mrf.mxu1 }
  0xf7   :  { %917 = vmatpush.msra.mxu0 %v5953_v15  ;;  %957 = vmatpush.msrb.mxu2 %v5955_v5  ;;  %v5977_v5 = vld [vmem:[#allocation7 + $0x170] sm:$0xff] }
  0xf8   :  { %10250 = vst [vmem:[#allocation50_spill] sm:$0xff] %v5977_v5  ;;  %946 = vmatpush.msrb.mxu1 %v463_v3  ;;  %986 = vmatpush.msrb.mxu3 %v464_v7  ;;  %v5993_v3 = vld [vmem:[#allocation7 + $0xf0] sm:$0xff]  ;;  %v5995_v7 = vld [vmem:[#allocation7 + $0xf8] sm:$0xff] }
  0xf9   :  { %918 = vmatpush.msra.mxu0 %v5959_v4  ;;  %958 = vmatpush.msrb.mxu2 %v5961_v23  ;;  %v5985_v23 = vld [vmem:[#allocation7 + $0x138] sm:$0xff]  ;;  %10255 = vst [vmem:[#allocation54_spill] sm:$0xff] %v5993_v3  ;;  %v6019_v4 = vpop.f32.mrf.mxu2 }
  0xfa   :  { %10253 = vst [vmem:[#allocation53_spill] sm:$0xff] %v5985_v23  ;;  %947 = vmatmul.f32.vlgmr.msrb.gmra.mxu1 %v10254_v34  ;;  %987 = vmatmul.f32.vlgmr.msrb.gmra.mxu3 %v10254_v34  ;;  %v6001_v34 = vld [vmem:[#allocation7 + $0xb8] sm:$0xff] }
  0xfb   :  { %919 = vmatpush.msra.mxu0 %v5965_v17  ;;  %959 = vmatpush.msrb.mxu2 %v5967_v47  ;;  %10256 = vst [vmem:[#allocation55_spill] sm:$0xff] %v5995_v7  ;;  %v5999_v47 = vld [vmem:[#allocation7 + $0xb0] sm:$0xff]  ;;  %v6005_v17 = vpop.f32.mrf.mxu3 }
  0xfc   :  { %10257 = vst [vmem:[#allocation56_spill] sm:$0xff] %v6001_v34 }
  0xfd   :  { %920 = vmatpush.msra.mxu0 %v5971_v13  ;;  %960 = vmatpush.msrb.mxu2 %v5973_v58  ;;  %v4553_v13 = vld [vmem:[#allocation7 + $0x7c0] sm:$0xff]  ;;  %v4554_v58 = vld [vmem:[#allocation7 + $0x7c8] sm:$0xff] }
  0xfe   :  { %1153 = vmatpush.msra.mxu1 %v4553_v13  ;;  %1193 = vmatpush.msra.mxu3 %v4554_v58  ;;  %v6007_v13 = vld [vmem:[#allocation7 + $0x70] sm:$0xff]  ;;  %v6009_v58 = vld [vmem:[#allocation7 + $0x78] sm:$0xff] }
  0xff   :  { %921 = vmatpush.msra.mxu0 %v5977_v5  ;;  %961 = vmatpush.msrb.mxu2 %v5979_v20  ;;  %v4555_v5 = vld [vmem:[#allocation7 + $0x780] sm:$0xff]  ;;  %v4556_v20 = vld [vmem:[#allocation7 + $0x788] sm:$0xff]  ;;  %10258 = vst [vmem:[#allocation57_spill] sm:$0xff] %v6009_v58 }
 0x100   :  { %1154 = vmatpush.msra.mxu1 %v4555_v5  ;;  %1194 = vmatpush.msra.mxu3 %v4556_v20  ;;  %v6013_v5 = vld [vmem:[#allocation7 + $0x30] sm:$0xff]  ;;  %v6015_v20 = vld [vmem:[#allocation7 + $0x38] sm:$0xff] }
 0x101   :  { %922 = vmatpush.msra.mxu0 %v5983_v33  ;;  %962 = vmatpush.msrb.mxu2 %v5985_v23  ;;  %v4557_v33 = vld [vmem:[#allocation7 + $0x740] sm:$0xff]  ;;  %v4558_v23 = vld [vmem:[#allocation7 + $0x748] sm:$0xff]  ;;  %10259 = vst [vmem:[#allocation58_spill] sm:$0xff] %v6013_v5 }
 0x102   :  { %1155 = vmatpush.msra.mxu1 %v4557_v33  ;;  %1195 = vmatpush.msra.mxu3 %v4558_v23  ;;  %10260 = vst [vmem:[#allocation59_spill] sm:$0xff] %v6015_v20  ;;  %v4561_v33 = vld [vmem:[#allocation7 + $0x6c0] sm:$0xff]  ;;  %v4562_v23 = vld [vmem:[#allocation7 + $0x6c8] sm:$0xff] }
 0x103   :  { %923 = vmatpush.msra.mxu0 %v5993_v3  ;;  %963 = vmatpush.msrb.mxu2 %v5995_v7  ;;  %v4559_v3 = vld [vmem:[#allocation7 + $0x700] sm:$0xff]  ;;  %v4560_v7 = vld [vmem:[#allocation7 + $0x708] sm:$0xff] }
 0x104   :  { %1156 = vmatpush.msra.mxu1 %v4559_v3  ;;  %1196 = vmatpush.msra.mxu3 %v4560_v7  ;;  %v6027_v3 = vld [vmem:[#allocation7 + $0x3c0] sm:$0xff]  ;;  %v6030_v7 = vld [vmem:[#allocation7 + $0x3c8] sm:$0xff] }
 0x105   :  { %924 = vmatpush.msra.mxu0 %v5999_v47  ;;  %964 = vmatpush.msrb.mxu2 %v6001_v34  ;;  %v6023_v34 = vpop.f32.mrf.mxu1  ;;  %10262 = vst [vmem:[#allocation61_spill] sm:$0xff] %v6027_v3 }
 0x106   :  { %1157 = vmatpush.msra.mxu1 %v4561_v33  ;;  %1197 = vmatpush.msra.mxu3 %v4562_v23  ;;  %10261 = vst [vmem:[#allocation60_spill] sm:$0xff] %v6023_v34  ;;  %v4565_v33 = vld [vmem:[#allocation7 + $0x680] sm:$0xff]  ;;  %v4566_v23 = vld [vmem:[#allocation7 + $0x688] sm:$0xff] }
 0x107   :  { %925 = vmatpush.msra.mxu0 %v6007_v13  ;;  %965 = vmatpush.msrb.mxu2 %v6009_v58  ;;  %10263 = vst [vmem:[#allocation62_spill] sm:$0xff] %v6030_v7  ;;  %v6038_v34 = vld [vmem:[#allocation7 + $0x388] sm:$0xff]  ;;  %v6041_v58 = vld [vmem:[#allocation7 + $0x340] sm:$0xff] }
 0x108   :  { %1158 = vmatpush.msra.mxu1 %v4565_v33  ;;  %1198 = vmatpush.msra.mxu3 %v4566_v23  ;;  %10266 = vst [vmem:[#allocation65_spill] sm:$0xff] %v6038_v34  ;;  %v6044_v33 = vld [vmem:[#allocation7 + $0x348] sm:$0xff]  ;;  %v4573_v23 = vld [vmem:[#allocation7 + $0x600] sm:$0xff] }
 0x109   :  { %926 = vmatpush.msra.mxu0 %v6013_v5  ;;  %966 = vmatpush.msrb.mxu2 %v6015_v20  ;;  %v6033_v5 = vpop.f32.mrf.mxu3  ;;  %v6035_v20 = vld [vmem:[#allocation7 + $0x380] sm:$0xff]  ;;  %10267 = vst [vmem:[#allocation66_spill] sm:$0xff] %v6041_v58 }
 0x10a   :  { %927 = vmatmul.f32.vlgmr.msra.gmra.mxu0 %v5813_v25  ;;  %967 = vmatmul.f32.vlgmr.msrb.gmra.mxu2 %v5813_v25  ;;  %10264 = vst [vmem:[#allocation63_spill] sm:$0xff] %v6033_v5  ;;  %v4569_v25 = vld [vmem:[#allocation7 + $0x640] sm:$0xff]  ;;  %v4574_v5 = vld [vmem:[#allocation7 + $0x608] sm:$0xff] }
 0x10b   :  { %1133 = vmatpush.msrb.mxu0 %v6027_v3  ;;  %1173 = vmatpush.msra.mxu2 %v6030_v7  ;;  %10265 = vst [vmem:[#allocation64_spill] sm:$0xff] %v6035_v20  ;;  %v4570_v3 = vld [vmem:[#allocation7 + $0x648] sm:$0xff]  ;;  %v6049_v7 = vld [vmem:[#allocation7 + $0x300] sm:$0xff] }
 0x10c   :  { %1159 = vmatpush.msra.mxu1 %v4569_v25  ;;  %1199 = vmatpush.msra.mxu3 %v4570_v3  ;;  %10268 = vst [vmem:[#allocation67_spill] sm:$0xff] %v6044_v33  ;;  %v6052_v25 = vld [vmem:[#allocation7 + $0x308] sm:$0xff]  ;;  %v4577_v3 = vld [vmem:[#allocation7 + $0x5c0] sm:$0xff] }
 0x10d   :  { %1134 = vmatpush.msrb.mxu0 %v6035_v20  ;;  %1174 = vmatpush.msra.mxu2 %v6038_v34  ;;  %v6047_v20 = vpop.f32.mrf.mxu2  ;;  %10270 = vst [vmem:[#allocation69_spill] sm:$0xff] %v6049_v7  ;;  %v6055_v34 = vpop.f32.mrf.mxu1 }
 0x10e   :  { %1160 = vmatpush.msra.mxu1 %v4573_v23  ;;  %1200 = vmatpush.msra.mxu3 %v4574_v5  ;;  %10269 = vst [vmem:[#allocation68_spill] sm:$0xff] %v6047_v20  ;;  %v6060_v5 = vld [vmem:[#allocation7 + $0x2c8] sm:$0xff]  ;;  %v4581_v23 = vld [vmem:[#allocation7 + $0x580] sm:$0xff] }
 0x10f   :  { %1135 = vmatpush.msrb.mxu0 %v6041_v58  ;;  %1175 = vmatpush.msra.mxu2 %v6044_v33  ;;  %10271 = vst [vmem:[#allocation70_spill] sm:$0xff] %v6052_v25  ;;  %v4578_v58 = vld [vmem:[#allocation7 + $0x5c8] sm:$0xff]  ;;  %v6057_v33 = vld [vmem:[#allocation7 + $0x2c0] sm:$0xff] }
 0x110   :  { %1161 = vmatpush.msra.mxu1 %v4577_v3  ;;  %1201 = vmatpush.msra.mxu3 %v4578_v58  ;;  %10272 = vst [vmem:[#allocation71_spill] sm:$0xff] %v6055_v34  ;;  %v4582_v20 = vld [vmem:[#allocation7 + $0x588] sm:$0xff]  ;;  %v4585_v58 = vld [vmem:[#allocation7 + $0x540] sm:$0xff] }
 0x111   :  { %1136 = vmatpush.msrb.mxu0 %v6049_v7  ;;  %1176 = vmatpush.msra.mxu2 %v6052_v25  ;;  %10273 = vst [vmem:[#allocation72_spill] sm:$0xff] %v6057_v33  ;;  %v6063_v7 = vld [vmem:[#allocation7 + $0x280] sm:$0xff]  ;;  %v6066_v3 = vld [vmem:[#allocation7 + $0x288] sm:$0xff] }
 0x112   :  { %1162 = vmatpush.msra.mxu1 %v4581_v23  ;;  %1202 = vmatpush.msra.mxu3 %v4582_v20  ;;  %10274 = vst [vmem:[#allocation73_spill] sm:$0xff] %v6063_v7  ;;  %v4586_v34 = vld [vmem:[#allocation7 + $0x548] sm:$0xff]  ;;  %v6071_v25 = vld [vmem:[#allocation7 + $0x240] sm:$0xff] }
 0x113   :  { %1137 = vmatpush.msrb.mxu0 %v6057_v33  ;;  %1177 = vmatpush.msra.mxu2 %v6060_v5  ;;  %10275 = vst [vmem:[#allocation74_spill] sm:$0xff] %v6066_v3  ;;  %v6069_v33 = vpop.f32.mrf.mxu3  ;;  %v6074_v23 = vld [vmem:[#allocation7 + $0x248] sm:$0xff]  ;;  %v6077_v20 = vld [vmem:[#allocation7 + $0x500] sm:$0xff] }
 0x114   :  { %1163 = vmatpush.msra.mxu1 %v4585_v58  ;;  %1203 = vmatpush.msra.mxu3 %v4586_v34  ;;  %10276 = vst [vmem:[#allocation75_spill] sm:$0xff] %v6069_v33  ;;  %v6083_v58 = vld [vmem:[#allocation7 + $0x200] sm:$0xff]  ;;  %v6086_v34 = vld [vmem:[#allocation7 + $0x208] sm:$0xff] }
 0x115   :  { %1138 = vmatpush.msrb.mxu0 %v6063_v7  ;;  %1178 = vmatpush.msra.mxu2 %v6066_v3  ;;  %10277 = vst [vmem:[#allocation76_spill] sm:$0xff] %v6071_v25  ;;  %v6080_v7 = vld [vmem:[#allocation7 + $0x508] sm:$0xff]  ;;  %v6089_v33 = vld [vmem:[#allocation7 + $0x4c0] sm:$0xff] }
 0x116   :  { %10278 = vst [vmem:[#allocation77_spill] sm:$0xff] %v6074_v23  ;;  %1164 = vmatpush.msra.mxu1 %v6077_v20  ;;  %1204 = vmatpush.msra.mxu3 %v6080_v7  ;;  %v6142_v3 = vld [vmem:[#allocation7 + $0x108] sm:$0xff] }
 0x117   :  { %1139 = vmatpush.msrb.mxu0 %v6071_v25  ;;  %1179 = vmatpush.msra.mxu2 %v6074_v23  ;;  %10279 = vst [vmem:[#allocation78_spill] sm:$0xff] %v6077_v20  ;;  %v6092_v23 = vld [vmem:[#allocation7 + $0x4c8] sm:$0xff]  ;;  %v6095_v20 = vpop.f32.mrf.mxu2  ;;  %v6097_v25 = vld [vmem:[#allocation7 + $0x1c0] sm:$0xff] }
 0x118   :  { %10280 = vst [vmem:[#allocation79_spill] sm:$0xff] %v6080_v7  ;;  %1165 = vmatpush.msra.mxu1 %v6089_v33  ;;  %1205 = vmatpush.msra.mxu3 %v6092_v23  ;;  %v6100_v7 = vld [vmem:[#allocation7 + $0x1c8] sm:$0xff] }
 0x119   :  { %10281 = vst [vmem:[#allocation80_spill] sm:$0xff] %v6083_v58  ;;  %1140 = vmatpush.msrb.mxu0 %v6083_v58  ;;  %1180 = vmatpush.msra.mxu2 %v6086_v34  ;;  %v6103_v58 = vld [vmem:[#allocation7 + $0x480] sm:$0xff] }
 0x11a   :  { %10282 = vst [vmem:[#allocation81_spill] sm:$0xff] %v6086_v34  ;;  %1166 = vmatpush.msra.mxu1 %v6103_v58  ;;  %v6106_v34 = vld [vmem:[#allocation7 + $0x488] sm:$0xff] }
 0x11b   :  { %10283 = vst [vmem:[#allocation82_spill] sm:$0xff] %v6089_v33  ;;  %1141 = vmatpush.msrb.mxu0 %v6097_v25  ;;  %1181 = vmatpush.msra.mxu2 %v6100_v7  ;;  %v6109_v33 = vpop.f32.mrf.mxu1 }
 0x11c   :  { %10284 = vst [vmem:[#allocation83_spill] sm:$0xff] %v6092_v23  ;;  %1206 = vmatpush.msra.mxu3 %v6106_v34  ;;  %v6111_v23 = vld [vmem:[#allocation7 + $0x180] sm:$0xff] }
 0x11d   :  { %10285 = vst [vmem:[#allocation84_spill] sm:$0xff] %v6095_v20  ;;  %1142 = vmatpush.msrb.mxu0 %v6111_v23  ;;  %v6114_v20 = vld [vmem:[#allocation7 + $0x188] sm:$0xff] }
 0x11e   :  { %10286 = vst [vmem:[#allocation85_spill] sm:$0xff] %v6097_v25  ;;  %1182 = vmatpush.msra.mxu2 %v6114_v20  ;;  %v6117_v25 = vld [vmem:[#allocation7 + $0x440] sm:$0xff] }
 0x11f   :  { %10287 = vst [vmem:[#allocation86_spill] sm:$0xff] %v6100_v7  ;;  %1167 = vmatpush.msra.mxu1 %v6117_v25  ;;  %v6120_v7 = vld [vmem:[#allocation7 + $0x448] sm:$0xff] }
 0x120   :  { %10288 = vst [vmem:[#allocation87_spill] sm:$0xff] %v6103_v58  ;;  %1207 = vmatpush.msra.mxu3 %v6120_v7  ;;  %v6123_v58 = vpop.f32.mrf.mxu0 }
 0x121   :  { %10289 = vst [vmem:[#allocation88_spill] sm:$0xff] %v6106_v34  ;;  %v6125_v34 = vld [vmem:[#allocation7 + $0x140] sm:$0xff] }
 0x122   :  { %10290 = vst [vmem:[#allocation89_spill] sm:$0xff] %v6109_v33  ;;  %1143 = vmatpush.msrb.mxu0 %v6125_v34  ;;  %v6128_v33 = vld [vmem:[#allocation7 + $0x148] sm:$0xff] }
 0x123   :  { %10291 = vst [vmem:[#allocation90_spill] sm:$0xff] %v6111_v23  ;;  %1183 = vmatpush.msra.mxu2 %v6128_v33  ;;  %v6131_v23 = vld [vmem:[#allocation7 + $0x400] sm:$0xff] }
 0x124   :  { %10292 = vst [vmem:[#allocation91_spill] sm:$0xff] %v6114_v20  ;;  %1168 = vmatpush.msra.mxu1 %v6131_v23  ;;  %v6134_v20 = vld [vmem:[#allocation7 + $0x408] sm:$0xff] }
 0x125   :  { %10293 = vst [vmem:[#allocation92_spill] sm:$0xff] %v6117_v25  ;;  %1208 = vmatpush.msra.mxu3 %v6134_v20  ;;  %v6137_v25 = vpop.f32.mrf.mxu3  ;;  %1184 = vmatpush.msra.mxu2 %v6142_v3 }
 0x126   :  { %10294 = vst [vmem:[#allocation93_spill] sm:$0xff] %v6120_v7  ;;  %v6139_v7 = vld [vmem:[#allocation7 + $0x100] sm:$0xff] }
 0x127   :  { %10295 = vst [vmem:[#allocation94_spill] sm:$0xff] %v6125_v34  ;;  %1144 = vmatpush.msrb.mxu0 %v6139_v7  ;;  %v6145_v34 = vld [vmem:[#allocation7 + $0x7d0] sm:$0xff] }
 0x128   :  { %10296 = vst [vmem:[#allocation95_spill] sm:$0xff] %v6128_v33  ;;  %1233 = vmatpush.msrb.mxu1 %v6145_v34  ;;  %v6148_v33 = vld [vmem:[#allocation7 + $0x7d8] sm:$0xff] }
 0x129   :  { %10297 = vst [vmem:[#allocation96_spill] sm:$0xff] %v6131_v23  ;;  %1273 = vmatpush.msrb.mxu3 %v6148_v33  ;;  %v6151_v23 = vld [vmem:[#allocation7 + $0xc0] sm:$0xff] }
 0x12a   :  { %10298 = vst [vmem:[#allocation97_spill] sm:$0xff] %v6134_v20  ;;  %1145 = vmatpush.msrb.mxu0 %v6151_v23  ;;  %v6157_v20 = vld [vmem:[#allocation7 + $0x790] sm:$0xff] }
 0x12b   :  { %10299 = vst [vmem:[#allocation98_spill] sm:$0xff] %v6137_v25  ;;  %v6154_v25 = vld [vmem:[#allocation7 + $0xc8] sm:$0xff]  ;;  %1234 = vmatpush.msrb.mxu1 %v6157_v20 }
 0x12c   :  { %10300 = vst [vmem:[#allocation99_spill] sm:$0xff] %v6139_v7  ;;  %1185 = vmatpush.msra.mxu2 %v6154_v25  ;;  %v6165_v7 = vld [vmem:[#allocation7 + $0x80] sm:$0xff] }
 0x12d   :  { %10301 = vst [vmem:[#allocation100_spill] sm:$0xff] %v6142_v3  ;;  %v6160_v3 = vld [vmem:[#allocation7 + $0x798] sm:$0xff]  ;;  %1146 = vmatpush.msrb.mxu0 %v6165_v7 }
 0x12e   :  { %10302 = vst [vmem:[#allocation101_spill] sm:$0xff] %v6145_v34  ;;  %1274 = vmatpush.msrb.mxu3 %v6160_v3  ;;  %v6163_v34 = vpop.f32.mrf.mxu2 }
 0x12f   :  { %10303 = vst [vmem:[#allocation102_spill] sm:$0xff] %v6148_v33  ;;  %v6168_v33 = vld [vmem:[#allocation7 + $0x88] sm:$0xff] }
 0x130   :  { %10304 = vst [vmem:[#allocation103_spill] sm:$0xff] %v6151_v23  ;;  %1186 = vmatpush.msra.mxu2 %v6168_v33  ;;  %v6171_v23 = vld [vmem:[#allocation7 + $0x750] sm:$0xff] }
 0x131   :  { %10305 = vst [vmem:[#allocation104_spill] sm:$0xff] %v6154_v25  ;;  %1235 = vmatpush.msrb.mxu1 %v6171_v23  ;;  %v6174_v25 = vld [vmem:[#allocation7 + $0x758] sm:$0xff] }
 0x132   :  { %10306 = vst [vmem:[#allocation105_spill] sm:$0xff] %v6157_v20  ;;  %1275 = vmatpush.msrb.mxu3 %v6174_v25  ;;  %v6177_v20 = vpop.f32.mrf.mxu1 }
 0x133   :  { %10307 = vst [vmem:[#allocation106_spill] sm:$0xff] %v6160_v3  ;;  %v6179_v3 = vld [vmem:[#allocation7 + $0x40] sm:$0xff] }
 0x134   :  { %10308 = vst [vmem:[#allocation107_spill] sm:$0xff] %v6163_v34  ;;  %1147 = vmatpush.msrb.mxu0 %v6179_v3  ;;  %v6182_v34 = vld [vmem:[#allocation7 + $0x48] sm:$0xff] }
 0x135   :  { %10309 = vst [vmem:[#allocation108_spill] sm:$0xff] %v6165_v7  ;;  %1187 = vmatpush.msra.mxu2 %v6182_v34  ;;  %v6185_v7 = vld [vmem:[#allocation7 + $0x710] sm:$0xff] }
 0x136   :  { %10310 = vst [vmem:[#allocation109_spill] sm:$0xff] %v6168_v33  ;;  %1236 = vmatpush.msrb.mxu1 %v6185_v7  ;;  %v6188_v33 = vld [vmem:[#allocation7 + $0x718] sm:$0xff] }
 0x137   :  { %10311 = vst [vmem:[#allocation110_spill] sm:$0xff] %v6171_v23  ;;  %1276 = vmatpush.msrb.mxu3 %v6188_v33  ;;  %v6191_v23 = vpop.f32.mrf.mxu0 }
 0x138   :  { %10312 = vst [vmem:[#allocation111_spill] sm:$0xff] %v6174_v25  ;;  %v6193_v25 = vld [vmem:[#allocation7] sm:$0xff] }
 0x139   :  { %10313 = vst [vmem:[#allocation112_spill] sm:$0xff] %v6177_v20  ;;  %1148 = vmatpush.msrb.mxu0 %v6193_v25  ;;  %v6196_v20 = vld [vmem:[#allocation7 + $0x8] sm:$0xff] }
 0x13a   :  { %10314 = vst [vmem:[#allocation113_spill] sm:$0xff] %v6179_v3  ;;  %1188 = vmatpush.msra.mxu2 %v6196_v20  ;;  %v6199_v3 = vld [vmem:[#allocation7 + $0x3d0] sm:$0xff] }
 0x13b   :  { %10315 = vst [vmem:[#allocation114_spill] sm:$0xff] %v6182_v34  ;;  %1213 = vmatpush.msra.mxu0 %v6199_v3  ;;  %v6202_v34 = vld [vmem:[#allocation7 + $0x3d8] sm:$0xff] }
 0x13c   :  { %10316 = vst [vmem:[#allocation115_spill] sm:$0xff] %v6185_v7  ;;  %1253 = vmatpush.msrb.mxu2 %v6202_v34  ;;  %v6205_v7 = vpop.f32.mrf.mxu3 }
 0x13d   :  { %10317 = vst [vmem:[#allocation116_spill] sm:$0xff] %v6188_v33  ;;  %v6207_v33 = vld [vmem:[#allocation7 + $0x6d0] sm:$0xff] }
 0x13e   :  { %10318 = vst [vmem:[#allocation117_spill] sm:$0xff] %v6191_v23  ;;  %1237 = vmatpush.msrb.mxu1 %v6207_v33  ;;  %v6210_v23 = vld [vmem:[#allocation7 + $0x6d8] sm:$0xff] }
 0x13f   :  { %10319 = vst [vmem:[#allocation118_spill] sm:$0xff] %v6193_v25  ;;  %1277 = vmatpush.msrb.mxu3 %v6210_v23  ;;  %v6213_v25 = vld [vmem:[#allocation7 + $0x390] sm:$0xff] }
 0x140   :  { %10320 = vst [vmem:[#allocation119_spill] sm:$0xff] %v6196_v20  ;;  %1214 = vmatpush.msra.mxu0 %v6213_v25  ;;  %v6216_v20 = vld [vmem:[#allocation7 + $0x398] sm:$0xff] }
 0x141   :  { %10321 = vst [vmem:[#allocation120_spill] sm:$0xff] %v6199_v3  ;;  %1254 = vmatpush.msrb.mxu2 %v6216_v20  ;;  %v6219_v3 = vld [vmem:[#allocation7 + $0x690] sm:$0xff] }
 0x142   :  { %10322 = vst [vmem:[#allocation121_spill] sm:$0xff] %v6202_v34  ;;  %1238 = vmatpush.msrb.mxu1 %v6219_v3  ;;  %v6233_v34 = vld [vmem:[#allocation7 + $0x650] sm:$0xff] }
 0x143   :  { %10323 = vst [vmem:[#allocation122_spill] sm:$0xff] %v6205_v7  ;;  %v6222_v7 = vld [vmem:[#allocation7 + $0x698] sm:$0xff] }
 0x144   :  { %10324 = vst [vmem:[#allocation123_spill] sm:$0xff] %v6207_v33  ;;  %1278 = vmatpush.msrb.mxu3 %v6222_v7  ;;  %v6225_v33 = vld [vmem:[#allocation7 + $0x350] sm:$0xff]  ;;  %1239 = vmatpush.msrb.mxu1 %v6233_v34 }
 0x145   :  { %10325 = vst [vmem:[#allocation124_spill] sm:$0xff] %v6210_v23  ;;  %1215 = vmatpush.msra.mxu0 %v6225_v33  ;;  %v6228_v23 = vld [vmem:[#allocation7 + $0x358] sm:$0xff] }
 0x146   :  { %10326 = vst [vmem:[#allocation125_spill] sm:$0xff] %v6213_v25  ;;  %1255 = vmatpush.msrb.mxu2 %v6228_v23  ;;  %v6231_v25 = vpop.f32.mrf.mxu2 }
 0x147   :  { %10327 = vst [vmem:[#allocation126_spill] sm:$0xff] %v6216_v20  ;;  %v6236_v20 = vld [vmem:[#allocation7 + $0x658] sm:$0xff] }
 0x148   :  { %10328 = vst [vmem:[#allocation127_spill] sm:$0xff] %v6219_v3  ;;  %1279 = vmatpush.msrb.mxu3 %v6236_v20  ;;  %v6239_v3 = vld [vmem:[#allocation7 + $0x310] sm:$0xff] }
 0x149   :  { %10329 = vst [vmem:[#allocation128_spill] sm:$0xff] %v6222_v7  ;;  %1216 = vmatpush.msra.mxu0 %v6239_v3  ;;  %v6242_v7 = vld [vmem:[#allocation7 + $0x318] sm:$0xff] }
 0x14a   :  { %10330 = vst [vmem:[#allocation129_spill] sm:$0xff] %v6225_v33  ;;  %1256 = vmatpush.msrb.mxu2 %v6242_v7  ;;  %v6245_v33 = vpop.f32.mrf.mxu1 }
 0x14b   :  { %10331 = vst [vmem:[#allocation130_spill] sm:$0xff] %v6228_v23  ;;  %v6247_v23 = vld [vmem:[#allocation7 + $0x610] sm:$0xff] }
 0x14c   :  { %10332 = vst [vmem:[#allocation131_spill] sm:$0xff] %v6231_v25  ;;  %1240 = vmatpush.msrb.mxu1 %v6247_v23  ;;  %v6250_v25 = vld [vmem:[#allocation7 + $0x618] sm:$0xff] }
 0x14d   :  { %10333 = vst [vmem:[#allocation132_spill] sm:$0xff] %v6233_v34  ;;  %1280 = vmatpush.msrb.mxu3 %v6250_v25  ;;  %v6253_v34 = vld [vmem:[#allocation7 + $0x2d0] sm:$0xff] }
 0x14e   :  { %10334 = vst [vmem:[#allocation133_spill] sm:$0xff] %v6236_v20  ;;  %1217 = vmatpush.msra.mxu0 %v6253_v34  ;;  %v6256_v20 = vld [vmem:[#allocation7 + $0x2d8] sm:$0xff] }
 0x14f   :  { %10335 = vst [vmem:[#allocation134_spill] sm:$0xff] %v6239_v3  ;;  %1257 = vmatpush.msrb.mxu2 %v6256_v20  ;;  %v6259_v3 = vpop.f32.mrf.mxu0 }
 0x150   :  { %10336 = vst [vmem:[#allocation135_spill] sm:$0xff] %v6242_v7  ;;  %v6261_v7 = vld [vmem:[#allocation7 + $0x5d0] sm:$0xff] }
 0x151   :  { %10337 = vst [vmem:[#allocation136_spill] sm:$0xff] %v6245_v33  ;;  %1241 = vmatpush.msrb.mxu1 %v6261_v7  ;;  %v6264_v33 = vld [vmem:[#allocation7 + $0x5d8] sm:$0xff] }
 0x152   :  { %10338 = vst [vmem:[#allocation137_spill] sm:$0xff] %v6247_v23  ;;  %1281 = vmatpush.msrb.mxu3 %v6264_v33  ;;  %v6267_v23 = vld [vmem:[#allocation7 + $0x290] sm:$0xff] }
 0x153   :  { %10339 = vst [vmem:[#allocation138_spill] sm:$0xff] %v6250_v25  ;;  %1218 = vmatpush.msra.mxu0 %v6267_v23  ;;  %v6270_v25 = vld [vmem:[#allocation7 + $0x298] sm:$0xff]  ;;  %1242 = vmatpush.msrb.mxu1 %v5684_v2  ;;  %v6291_v2 = vpop.f32.mrf.mxu2 }
 0x154   :  { %10340 = vst [vmem:[#allocation139_spill] sm:$0xff] %v6253_v34  ;;  %1258 = vmatpush.msrb.mxu2 %v6270_v25  ;;  %v6273_v34 = vpop.f32.mrf.mxu3  ;;  %1282 = vmatpush.msrb.mxu3 %v5687_v21  ;;  %v6295_v21 = vld [vmem:[#allocation7 + $0x1d0] sm:$0xff] }
 0x155   :  { %10341 = vst [vmem:[#allocation140_spill] sm:$0xff] %v6259_v3  ;;  %v6277_v3 = vld [vmem:[#allocation7 + $0x250] sm:$0xff]  ;;  %1243 = vmatpush.msrb.mxu1 %v5689_v24  ;;  %v6298_v24 = vld [vmem:[#allocation7 + $0x1d8] sm:$0xff] }
 0x156   :  { %10342 = vst [vmem:[#allocation141_spill] sm:$0xff] %v6261_v7  ;;  %1219 = vmatpush.msra.mxu0 %v6277_v3  ;;  %v6280_v7 = vld [vmem:[#allocation7 + $0x258] sm:$0xff]  ;;  %1283 = vmatpush.msrb.mxu3 %v5692_v12  ;;  %v6301_v12 = vpop.f32.mrf.mxu1 }
 0x157   :  { %10343 = vst [vmem:[#allocation142_spill] sm:$0xff] %v6264_v33  ;;  %1259 = vmatpush.msrb.mxu2 %v6280_v7  ;;  %v6285_v33 = vld [vmem:[#allocation7 + $0x210] sm:$0xff]  ;;  %1244 = vmatpush.msrb.mxu1 %v5695_v28  ;;  %v6308_v28 = vld [vmem:[#allocation7 + $0x198] sm:$0xff] }
 0x158   :  { %10344 = vst [vmem:[#allocation143_spill] sm:$0xff] %v6273_v34  ;;  %1220 = vmatpush.msra.mxu0 %v6285_v33  ;;  %v6288_v34 = vld [vmem:[#allocation7 + $0x218] sm:$0xff]  ;;  %1284 = vmatpush.msrb.mxu3 %v5700_v32  ;;  %v6311_v32 = vpop.f32.mrf.mxu0 }
 0x159   :  { %10345 = vst [vmem:[#allocation144_spill] sm:$0xff] %v6288_v34  ;;  %1260 = vmatpush.msrb.mxu2 %v6288_v34  ;;  %1245 = vmatpush.msrb.mxu1 %v5713_v39  ;;  %v6305_v34 = vld [vmem:[#allocation7 + $0x190] sm:$0xff]  ;;  %v6318_v39 = vld [vmem:[#allocation7 + $0x158] sm:$0xff] }
 0x15a   :  { %10346 = vst [vmem:[#allocation145_spill] sm:$0xff] %v6291_v2  ;;  %1221 = vmatpush.msra.mxu0 %v6295_v21  ;;  %1285 = vmatpush.msrb.mxu3 %v5725_v42  ;;  %v6315_v2 = vld [vmem:[#allocation7 + $0x150] sm:$0xff] }
 0x15b   :  { %1261 = vmatpush.msrb.mxu2 %v6298_v24  ;;  %10347 = vst [vmem:[#allocation146_spill] sm:$0xff] %v6301_v12  ;;  %1246 = vmatpush.msrb.mxu1 %v5732_v44  ;;  %v6325_v12 = vld [vmem:[#allocation7 + $0x110] sm:$0xff]  ;;  %v6328_v44 = vld [vmem:[#allocation7 + $0x118] sm:$0xff] }
 0x15c   :  { %1222 = vmatpush.msra.mxu0 %v6305_v34  ;;  %10348 = vst [vmem:[#allocation147_spill] sm:$0xff] %v6311_v32  ;;  %1286 = vmatpush.msrb.mxu3 %v5738_v46  ;;  %v6321_v42 = vpop.f32.mrf.mxu3  ;;  %v6335_v46 = vpop.f32.mrf.mxu2 }
 0x15d   :  { %1262 = vmatpush.msrb.mxu2 %v6308_v28  ;;  %10349 = vst [vmem:[#allocation148_spill] sm:$0xff] %v6315_v2  ;;  %1247 = vmatpush.msrb.mxu1 %v5747_v6 }
 0x15e   :  { %1223 = vmatpush.msra.mxu0 %v6315_v2  ;;  %10350 = vst [vmem:[#allocation149_spill] sm:$0xff] %v6318_v39  ;;  %1287 = vmatpush.msrb.mxu3 %v5754_v54  ;;  %v708_v6 = vpop.f32.mrf.mxu1 }
 0x15f   :  { %1263 = vmatpush.msrb.mxu2 %v6318_v39  ;;  %10351 = vst [vmem:[#allocation150_spill] sm:$0xff] %v6321_v42  ;;  %1248 = vmatpush.msrb.mxu1 %v5761_v56  ;;  %v154_v56 = vadd.f32 %v6123_v58, %v5649_v37 }
 0x160   :  { %10352 = vst [vmem:[#allocation151_spill] sm:$0xff] %v6325_v12  ;;  %1224 = vmatpush.msra.mxu0 %v6325_v12  ;;  %1288 = vmatpush.msrb.mxu3 %v5767_v60  ;;  %v688_v54 = vpop.f32.mrf.mxu0 }
 0x161   :  { %10353 = vst [vmem:[#allocation152_spill] sm:$0xff] %v6328_v44  ;;  %1264 = vmatpush.msrb.mxu2 %v6328_v44  ;;  %v709_v60 = vadd.f32 %v708_v6, %v688_v54 }
 0x162   :  { %1225 = vmatpush.msra.mxu0 %v5708_v36  ;;  %10354 = vst [vmem:[#allocation153_spill] sm:$0xff] %v6335_v46 }
 0x163   :  { %1265 = vmatpush.msrb.mxu2 %v5715_v40  ;;  %v1063_v40 = vadd.f32 %v709_v60, %v154_v56 }
 0x164   :  { %1226 = vmatpush.msra.mxu0 %v5727_v43  ;;  %v748_v36 = vpop.f32.mrf.mxu3  ;;  %v728_v43 = vpop.f32.mrf.mxu2 }
 0x165   :  { %1266 = vmatpush.msrb.mxu2 %v5734_v30  ;;  %v4231_v46 = vmul.f32 -1.442695, %v1063_v40  ;;  %v195_v30 = vadd.f32 %v5991_v59, %v5663_v57 }
 0x166   :  { %1227 = vmatpush.msra.mxu0 %v5740_v48  ;;  %v749_v48 = vadd.f32 %v748_v36, %v728_v43  ;;  %v788_v59 = vpop.f32.mrf.mxu1 }
 0x167   :  { %1267 = vmatpush.msrb.mxu2 %v5749_v52  ;;  %4313 = vpow2.f32 %v4231_v46 }
 0x168   :  { %1228 = vmatpush.msra.mxu0 %v5756_v55  ;;  %v1064_v42 = vadd.f32 %v749_v48, %v195_v30  ;;  %v277_v55 = vadd.f32 %v6005_v17, %v5671_v10  ;;  %v768_v37 = vpop.f32.mrf.mxu0 }
 0x169   :  { %1268 = vmatpush.msrb.mxu2 %v5763_v49  ;;  %v789_v36 = vadd.f32 %v788_v59, %v768_v37 }
 0x16a   :  { %v4232_v52 = vmul.f32 -1.442695, %v1064_v42 }
 0x16c   :  { %v828_v32 = vpop.f32.mrf.mxu3  ;;  %4315 = vpow2.f32 %v4232_v52  ;;  %v808_v6 = vpop.f32.mrf.mxu2 }
 0x16d   :  { %v4314_v44 = vpop.eup %4313  ;;  %v829_v49 = vadd.f32 %v828_v32, %v808_v6 }
 0x16e   :  { %v1070_v58 = vadd.f32 1.0, %v4314_v44  ;;  %v236_v44 = vadd.f32 %v6019_v4, %v5719_v41  ;;  %v868_v37 = vpop.f32.mrf.mxu1 }
 0x16f   :  { %v1066_v54 = vadd.f32 %v829_v49, %v277_v55  ;;  %v6354_v49 = vld [vmem:[%s9633_s4] sm:$0xf] }
 0x170   :  { %4317 = vrcp.f32 %v1070_v58  ;;  %v1065_v32 = vadd.f32 %v789_v36, %v236_v44  ;;  %vm1076_vm14 = vweird.f32 %v1070_v58  ;;  %v848_v36 = vpop.f32.mrf.mxu0 }
 0x171   :  { %v4233_v60 = vmul.f32 -1.442695, %v1066_v54  ;;  %v1082_v54 = vand.u32 2147483648, %v1070_v58 }
 0x172   :  { %v4316_v56 = vpop.eup %4315 }
 0x173   :  { %v1089_v40 = vadd.f32 1.0, %v4316_v56  ;;  %4319 = vpow2.f32 %v4233_v60  ;;  %v1080_v60 = vand.u32 2147483647, %v1070_v58 }
 0x174   :  { %v908_v12 = vpop.f32.mrf.mxu3 }
 0x175   :  { %4321 = vrcp.f32 %v1089_v40  ;;  %v1101_v4 = vand.u32 2147483648, %v1089_v40  ;;  %vm1095_vm1 = vweird.f32 %v1089_v40  ;;  %vm1081_vm2 = vcmp.eq.f32.partialorder %v1080_v60, 8.507059e+37 }
 0x176   :  { %v4318_v46 = vpop.eup %4317 }
 0x177   :  { %v1072_v42 = vmul.f32 %v4318_v46, %v1070_v58  ;;  %vm1077_vm13 = vweird.f32 %v4318_v46  ;;  %v1102_v10 = vor.u32 1.1754944e-38, %v1101_v4 }
 0x178   :  { %vm6356_vm15 = vmor %vm1076_vm14, %vm1077_vm13 }
 0x179   :  { %v1073_v43 = vsub.f32 1.0, %v1072_v42  ;;  %v4320_v30 = vpop.eup %4319  ;;  %v1099_v42 = vand.u32 2147483647, %v1089_v40 }
 0x17a   :  { %v1109_v52 = vadd.f32 1.0, %v4320_v30 }
 0x17b   :  { %v1074_v48 = vmul.f32 %v4318_v46, %v1073_v43  ;;  %v4322_v17 = vpop.eup %4321  ;;  %v6361_v43 = vperm.slane %v6354_v49, 0  ;;  %vm1100_vm4 = vcmp.eq.f32.partialorder %v1099_v42, 8.507059e+37 }
 0x17c   :  { %v1091_v6 = vmul.f32 %v4322_v17, %v1089_v40  ;;  %4323 = vrcp.f32 %v1109_v52  ;;  %vm1096_vm0 = vweird.f32 %v4322_v17  ;;  %v1121_v42 = vand.u32 2147483648, %v1109_v52 }
 0x17d   :  { %v1075_v55 = vadd.f32 %v4318_v46, %v1074_v48  ;;  %4325 = vtanh.f32 %v1065_v32  ;;  %10357 = vst [vmem:[#allocation154_spill] sm:$0xff] %v6361_v43  ;;  %v869_v48 = vadd.f32 %v868_v37, %v848_v36  ;;  %vm1097_vm3 = vmor %vm1095_vm1, %vm1096_vm0  ;;  %v6366_v32 = vperm.slane %v6354_v49, 1 }
 0x17e   :  { %v1092_v56 = vsub.f32 1.0, %v1091_v6  ;;  %v1083_v6 = vor.u32 1.1754944e-38, %v1082_v54  ;;  %vm1115_vm6 = vweird.f32 %v1109_v52 }
 0x17f   :  { %v1079_v30 = vsel %vm6356_vm15, %v4318_v46, %v1075_v55  ;;  %10358 = vst [vmem:[#allocation155_spill] sm:$0xff] %v6366_v32  ;;  %v991_v2 = vadd.f32 %v869_v48, %v6361_v43  ;;  %v888_v55 = vpop.f32.mrf.mxu2 }
 0x180   :  { %v1093_v44 = vmul.f32 %v4322_v17, %v1092_v56  ;;  %v1084_v57 = vsel %vm1081_vm2, %v1083_v6, %v1079_v30  ;;  %v909_v60 = vadd.f32 %v908_v12, %v888_v55 }
 0x182   :  { %v1094_v58 = vadd.f32 %v4322_v17, %v1093_v44  ;;  %v4324_v41 = vpop.eup %4323  ;;  %v4228_v44 = vmul.f32 -1.442695, %v991_v2  ;;  %v992_v30 = vadd.f32 %v909_v60, %v6366_v32  ;;  %v10368_v60 = vld [vmem:[#allocation28_spill] sm:$0xff] }
 0x183   :  { %v1111_v56 = vmul.f32 %v4324_v41, %v1109_v52  ;;  %v4326_v59 = vpop.eup %4325  ;;  %vm1116_vm5 = vweird.f32 %v4324_v41 }
 0x184   :  { %v1098_v39 = vsel %vm1097_vm3, %v4322_v17, %v1094_v58  ;;  %v1126_v54 = vmul.f32 %v4326_v59, %v1084_v57  ;;  %v4229_v48 = vmul.f32 -1.442695, %v992_v30  ;;  %vm1117_vm7 = vmor %vm1115_vm6, %vm1116_vm5  ;;  %v1122_v57 = vor.u32 1.1754944e-38, %v1121_v42  ;;  %v10364_v59 = vld [vmem:[#allocation24_spill] sm:$0xff]  ;;  %v6489_v42 = vld [vmem:[#allocation7 + $0x7e0] sm:$0xff] }
 0x185   :  { %v1103_v46 = vsel %vm1100_vm4, %v1102_v10, %v1098_v39  ;;  %v1112_v37 = vsub.f32 1.0, %v1111_v56  ;;  %v1119_v10 = vand.u32 2147483647, %v1109_v52 }
 0x186   :  { %v1125_v40 = vmul.f32 %v1103_v46, %v5804_v63 }
 0x187   :  { %v1113_v4 = vmul.f32 %v4324_v41, %v1112_v37  ;;  %vm1120_vm8 = vcmp.eq.f32.partialorder %v1119_v10, 8.507059e+37  ;;  %v10367_v37 = vld [vmem:[#allocation27_spill] sm:$0xff]  ;;  %v10374_v10 = vld [vmem:[#allocation30_spill] sm:$0xff] }
 0x188   :  { %v6370_v36 = vadd.f32 %v1126_v54, %v1125_v40 }
 0x189   :  { %v1114_v17 = vadd.f32 %v4324_v41, %v1113_v4 }
 0x18a   :  { %4327 = vtanh.f32 %v6370_v36 }
 0x18b   :  { %4329 = vpow2.f32 %v4228_v44  ;;  %v1118_v63 = vsel %vm1117_vm7, %v4324_v41, %v1114_v17 }
 0x18c   :  { %4331 = vpow2.f32 %v4229_v48  ;;  %v1123_v39 = vsel %vm1120_vm8, %v1122_v57, %v1118_v63  ;;  %v10373_v48 = vld [vmem:[#allocation29_spill] sm:$0xff] }
 0x190   :  { %v4328_v12 = vpop.eup %4327 }
 0x191   :  { %v6374_v6 = vmul.f32 %v4328_v12, %v1123_v39  ;;  %v4330_v2 = vpop.eup %4329 }
 0x192   :  { %v4332_v58 = vpop.eup %4331  ;;  %v6380_v52 = vadd.f32 1.0, %v4330_v2 }
 0x193   :  { %1149 = vmatmul.f32.vlgmr.msrb.gmra.mxu0 %v6374_v6  ;;  %1189 = vmatmul.f32.vlgmr.msra.gmra.mxu2 %v6374_v6  ;;  %v6382_v41 = vadd.f32 1.0, %v4332_v58 }
 0x194   :  { %1293 = vmatpush.msrb.mxu0 %v5815_v50  ;;  %1333 = vmatpush.msra.mxu2 %v5817_v26  ;;  %4333 = vrcp.f32 %v6380_v52  ;;  %vm1004_vm11 = vweird.f32 %v6380_v52  ;;  %v1010_v54 = vand.u32 2147483648, %v6380_v52  ;;  %v1008_v44 = vand.u32 2147483647, %v6380_v52 }
 0x195   :  { %4335 = vrcp.f32 %v6382_v41  ;;  %v1029_v40 = vand.u32 2147483648, %v6382_v41  ;;  %vm1023_vm12 = vweird.f32 %v6382_v41  ;;  %v1027_v30 = vand.u32 2147483647, %v6382_v41 }
 0x196   :  { %1294 = vmatpush.msrb.mxu0 %v5821_v29  ;;  %1334 = vmatpush.msra.mxu2 %v5823_v31  ;;  %v948_v29 = vpop.f32.mrf.mxu1  ;;  %v1011_v58 = vor.u32 1.1754944e-38, %v1010_v54  ;;  %vm1009_vm15 = vcmp.eq.f32.partialorder %v1008_v44, 8.507059e+37 }
 0x197   :  { %v1030_v2 = vor.u32 1.1754944e-38, %v1029_v40  ;;  %vm1028_vm0 = vcmp.eq.f32.partialorder %v1027_v30, 8.507059e+37 }
 0x198   :  { %1295 = vmatpush.msrb.mxu0 %v5827_v38  ;;  %1335 = vmatpush.msra.mxu2 %v5829_v22  ;;  %v928_v22 = vpop.f32.mrf.mxu0 }
 0x19a   :  { %1296 = vmatpush.msrb.mxu0 %v5833_v35  ;;  %1336 = vmatpush.msra.mxu2 %v5835_v53  ;;  %v6398_v50 = vpop.eup %4333  ;;  %v988_v35 = vpop.f32.mrf.mxu3  ;;  %v6411_v53 = vperm.slane %v6354_v49, 3 }
 0x19b   :  { %1229 = vmatmul.f32.vlgmr.msra.gmra.mxu0 %v6374_v6  ;;  %1269 = vmatmul.f32.vlgmr.msrb.gmra.mxu2 %v6374_v6  ;;  %v6400_v26 = vpop.eup %4335  ;;  %v1000_v31 = vmul.f32 %v6398_v50, %v6380_v52  ;;  %vm1005_vm9 = vweird.f32 %v6398_v50  ;;  %v10375_v52 = vld [vmem:[#allocation31_spill] sm:$0xff] }
 0x19c   :  { %1297 = vmatpush.msrb.mxu0 %v5839_v61  ;;  %1337 = vmatpush.msra.mxu2 %v5841_v62  ;;  %v1019_v38 = vmul.f32 %v6400_v26, %v6382_v41  ;;  %10359 = vst [vmem:[#allocation156_spill] sm:$0xff] %v6411_v53  ;;  %v968_v61 = vpop.f32.mrf.mxu2  ;;  %v6416_v62 = vperm.slane %v6354_v49, 2  ;;  %v10362_v49 = vld [vmem:[#allocation22_spill] sm:$0xff]  ;;  %vm1024_vm10 = vweird.f32 %v6400_v26  ;;  %vm6442_vm13 = vmor %vm1004_vm11, %vm1005_vm9  ;;  %v10376_v41 = vld [vmem:[#allocation32_spill] sm:$0xff] }
 0x19d   :  { %vm6448_vm14 = vmor %vm1023_vm12, %vm1024_vm10 }
 0x19e   :  { %1298 = vmatpush.msrb.mxu0 %v5847_v0  ;;  %1338 = vmatpush.msra.mxu2 %v5849_v1  ;;  %10360 = vst [vmem:[#allocation157_spill] sm:$0xff] %v6416_v62  ;;  %v949_v0 = vadd.f32 %v948_v29, %v928_v22  ;;  %v989_v1 = vadd.f32 %v988_v35, %v968_v61  ;;  %v10379_v22 = vld [vmem:[#allocation35_spill] sm:$0xff]  ;;  %v10380_v35 = vld [vmem:[#allocation36_spill] sm:$0xff] }
 0x1a0   :  { %1299 = vmatpush.msrb.mxu0 %v5853_v9  ;;  %1339 = vmatpush.msra.mxu2 %v5855_v11  ;;  %v1001_v9 = vsub.f32 1.0, %v1000_v31  ;;  %v1020_v11 = vsub.f32 1.0, %v1019_v38  ;;  %v10377_v31 = vld [vmem:[#allocation33_spill] sm:$0xff] }
 0x1a2   :  { %1300 = vmatpush.msrb.mxu0 %v5859_v16  ;;  %1340 = vmatpush.msra.mxu2 %v5861_v18  ;;  %v994_v16 = vadd.f32 %v989_v1, %v6411_v53  ;;  %v993_v18 = vadd.f32 %v949_v0, %v6416_v62  ;;  %v1021_v56 = vmul.f32 %v6400_v26, %v1020_v11  ;;  %v10381_v0 = vld [vmem:[#allocation37_spill] sm:$0xff]  ;;  %v10382_v1 = vld [vmem:[#allocation38_spill] sm:$0xff] }
 0x1a4   :  { %1301 = vmatpush.msrb.mxu0 %v5865_v8  ;;  %1341 = vmatpush.msra.mxu2 %v5867_v19  ;;  %v4230_v8 = vmul.f32 -1.442695, %v994_v16  ;;  %v10361_v19 = vld [vmem:[#allocation21_spill] sm:$0xff]  ;;  %v1022_v55 = vadd.f32 %v6400_v26, %v1021_v56  ;;  %v10386_v56 = vld [vmem:[#allocation42_spill] sm:$0xff] }
 0x1a6   :  { %1302 = vmatpush.msrb.mxu0 %v5871_v14  ;;  %1342 = vmatpush.msra.mxu2 %v5873_v27  ;;  %v1002_v14 = vmul.f32 %v6398_v50, %v1001_v9  ;;  %4337 = vpow2.f32 %v4230_v8  ;;  %v10363_v27 = vld [vmem:[#allocation23_spill] sm:$0xff]  ;;  %v1026_v57 = vsel %vm6448_vm14, %v6400_v26, %v1022_v55  ;;  %v10378_v26 = vld [vmem:[#allocation34_spill] sm:$0xff]  ;;  %v10384_v8 = vld [vmem:[#allocation40_spill] sm:$0xff] }
 0x1a7   :  { %4339 = vtanh.f32 %v993_v18  ;;  %v1031_v29 = vsel %vm1028_vm0, %v1030_v2, %v1026_v57  ;;  %v10383_v18 = vld [vmem:[#allocation39_spill] sm:$0xff]  ;;  %v10389_v55 = vld [vmem:[#allocation45_spill] sm:$0xff] }
 0x1a8   :  { %1303 = vmatpush.msrb.mxu0 %v5879_v45  ;;  %1343 = vmatpush.msra.mxu2 %v5881_v51  ;;  %v10365_v45 = vld [vmem:[#allocation25_spill] sm:$0xff]  ;;  %v10366_v51 = vld [vmem:[#allocation26_spill] sm:$0xff]  ;;  %v1003_v46 = vadd.f32 %v6398_v50, %v1002_v14  ;;  %v1053_v61 = vmul.f32 0.0, %v1031_v29 }
 0x1a9   :  { %v6497_v57 = vld [vmem:[#allocation7 + $0x7a0] sm:$0xff] }
 0x1aa   :  { %1304 = vmatpush.msrb.mxu0 %v10361_v19  ;;  %1344 = vmatpush.msra.mxu2 %v10362_v49  ;;  %v1007_v63 = vsel %vm6442_vm13, %v6398_v50, %v1003_v46  ;;  %v10385_v49 = vld [vmem:[#allocation41_spill] sm:$0xff]  ;;  %v10388_v46 = vld [vmem:[#allocation44_spill] sm:$0xff] }
 0x1ab   :  { %v1012_v50 = vsel %vm1009_vm15, %v1011_v58, %v1007_v63  ;;  %v10395_v63 = vld [vmem:[#allocation51_spill] sm:$0xff]  ;;  %v10397_v2 = vld [vmem:[#allocation53_spill] sm:$0xff] }
 0x1ac   :  { %1305 = vmatpush.msrb.mxu0 %v10363_v27  ;;  %1345 = vmatpush.msra.mxu2 %v10364_v59  ;;  %v4338_v17 = vpop.eup %4337  ;;  %v6505_v58 = vld [vmem:[#allocation7 + $0x760] sm:$0xff] }
 0x1ad   :  { %v1037_v12 = vadd.f32 1.0, %v4338_v17  ;;  %v4340_v39 = vpop.eup %4339  ;;  %v10393_v17 = vld [vmem:[#allocation49_spill] sm:$0xff] }
 0x1ae   :  { %1306 = vmatpush.msrb.mxu0 %v10365_v45  ;;  %1346 = vmatpush.msra.mxu2 %v10366_v51  ;;  %v1054_v38 = vmul.f32 %v4340_v39, %v1012_v50  ;;  %v10387_v45 = vld [vmem:[#allocation43_spill] sm:$0xff]  ;;  %v10396_v39 = vld [vmem:[#allocation52_spill] sm:$0xff]  ;;  %v6513_v29 = vld [vmem:[#allocation7 + $0x720] sm:$0xff] }
 0x1af   :  { %4341 = vrcp.f32 %v1037_v12  ;;  %v1049_v14 = vand.u32 2147483648, %v1037_v12  ;;  %v1047_v59 = vand.u32 2147483647, %v1037_v12  ;;  %vm1043_vm2 = vweird.f32 %v1037_v12  ;;  %v10399_v50 = vld [vmem:[#allocation55_spill] sm:$0xff] }
 0x1b0   :  { %1307 = vmatpush.msrb.mxu0 %v10367_v37  ;;  %1347 = vmatpush.msra.mxu2 %v10368_v60  ;;  %v6470_v11 = vadd.f32 %v1054_v38, %v1053_v61  ;;  %v10390_v37 = vld [vmem:[#allocation46_spill] sm:$0xff]  ;;  %v10391_v60 = vld [vmem:[#allocation47_spill] sm:$0xff]  ;;  %v6523_v38 = vld [vmem:[#allocation7 + $0x6e0] sm:$0xff] }
 0x1b1   :  { %v1050_v40 = vor.u32 1.1754944e-38, %v1049_v14  ;;  %vm1048_vm4 = vcmp.eq.f32.partialorder %v1047_v59, 8.507059e+37  ;;  %v6531_v61 = vld [vmem:[#allocation7 + $0x6a0] sm:$0xff]  ;;  %v6560_v14 = vld [vmem:[#allocation7 + $0x5e8] sm:$0xff]  ;;  %v10409_v59 = vld [vmem:[#allocation67_spill] sm:$0xff] }
 0x1b2   :  { %1308 = vmatpush.msrb.mxu0 %v10373_v48  ;;  %1348 = vmatpush.msra.mxu2 %v10374_v10  ;;  %4343 = vtanh.f32 %v6470_v11  ;;  %v6492_v48 = vld [vmem:[#allocation7 + $0x7e8] sm:$0xff] }
 0x1b3   :  { %1309 = vmatmul.f32.vlgmr.msrb.gmra.mxu0 %v6374_v6  ;;  %1349 = vmatmul.f32.vlgmr.msra.gmra.mxu2 %v6374_v6  ;;  %v10394_v10 = vld [vmem:[#allocation50_spill] sm:$0xff] }
 0x1b4   :  { %1373 = vmatpush.msra.mxu0 %v10375_v52  ;;  %1413 = vmatpush.msrb.mxu2 %v10376_v41  ;;  %v6508_v52 = vld [vmem:[#allocation7 + $0x768] sm:$0xff] }
 0x1b5   :  { %v4342_v9 = vpop.eup %4341  ;;  %v10398_v41 = vld [vmem:[#allocation54_spill] sm:$0xff] }
 0x1b6   :  { %1374 = vmatpush.msra.mxu0 %v10377_v31  ;;  %1414 = vmatpush.msrb.mxu2 %v10378_v26  ;;  %v1039_v16 = vmul.f32 %v4342_v9, %v1037_v12  ;;  %vm1044_vm1 = vweird.f32 %v4342_v9  ;;  %v6500_v12 = vld [vmem:[#allocation7 + $0x7a8] sm:$0xff]  ;;  %v10400_v26 = vld [vmem:[#allocation56_spill] sm:$0xff] }
 0x1b7   :  { %vm1045_vm3 = vmor %vm1043_vm2, %vm1044_vm1  ;;  %v6516_v31 = vld [vmem:[#allocation7 + $0x728] sm:$0xff] }
 0x1b8   :  { %1375 = vmatpush.msra.mxu0 %v10379_v22  ;;  %1415 = vmatpush.msrb.mxu2 %v10380_v35  ;;  %v1040_v19 = vsub.f32 1.0, %v1039_v16  ;;  %v4344_v4 = vpop.eup %4343  ;;  %v6526_v22 = vld [vmem:[#allocation7 + $0x6e8] sm:$0xff]  ;;  %v10401_v35 = vld [vmem:[#allocation57_spill] sm:$0xff] }
 0x1b9   :  { %v10404_v16 = vld [vmem:[#allocation61_spill] sm:$0xff] }
 0x1ba   :  { %1376 = vmatpush.msra.mxu0 %v10381_v0  ;;  %1416 = vmatpush.msrb.mxu2 %v10382_v1  ;;  %v1041_v27 = vmul.f32 %v4342_v9, %v1040_v19  ;;  %v10402_v0 = vld [vmem:[#allocation58_spill] sm:$0xff]  ;;  %v10403_v1 = vld [vmem:[#allocation59_spill] sm:$0xff] }
 0x1bb   :  { %v6552_v19 = vld [vmem:[#allocation7 + $0x628] sm:$0xff] }
 0x1bc   :  { %1377 = vmatpush.msra.mxu0 %v10383_v18  ;;  %1417 = vmatpush.msrb.mxu2 %v10384_v8  ;;  %v1042_v51 = vadd.f32 %v4342_v9, %v1041_v27  ;;  %v10405_v18 = vld [vmem:[#allocation62_spill] sm:$0xff]  ;;  %v6549_v8 = vld [vmem:[#allocation7 + $0x620] sm:$0xff] }
 0x1bd   :  { %v10408_v27 = vld [vmem:[#allocation66_spill] sm:$0xff] }
 0x1be   :  { %1378 = vmatpush.msra.mxu0 %v10385_v49  ;;  %1418 = vmatpush.msrb.mxu2 %v10386_v56  ;;  %v1046_v54 = vsel %vm1045_vm3, %v4342_v9, %v1042_v51  ;;  %v6541_v9 = vld [vmem:[#allocation7 + $0x660] sm:$0xff]  ;;  %v6568_v51 = vld [vmem:[#allocation7 + $0x5a8] sm:$0xff] }
 0x1bf   :  { %v1051_v44 = vsel %vm1048_vm4, %v1050_v40, %v1046_v54  ;;  %v10407_v49 = vld [vmem:[#allocation65_spill] sm:$0xff]  ;;  %v6576_v54 = vld [vmem:[#allocation7 + $0x568] sm:$0xff] }
 0x1c0   :  { %1379 = vmatpush.msra.mxu0 %v5953_v15  ;;  %1419 = vmatpush.msrb.mxu2 %v10387_v45  ;;  %v6483_v30 = vmul.f32 %v4344_v4, %v1051_v44  ;;  %v10392_v15 = vld [vmem:[#allocation48_spill] sm:$0xff]  ;;  %v6557_v56 = vld [vmem:[#allocation7 + $0x5e0] sm:$0xff]  ;;  %v6584_v4 = vld [vmem:[#allocation7 + $0x528] sm:$0xff] }
 0x1c1   :  { %v6565_v45 = vld [vmem:[#allocation7 + $0x5a0] sm:$0xff] }
 0x1c2   :  { %1380 = vmatpush.msra.mxu0 %v10388_v46  ;;  %1420 = vmatpush.msrb.mxu2 %v10389_v55  ;;  %v10410_v46 = vld [vmem:[#allocation69_spill] sm:$0xff]  ;;  %v10411_v55 = vld [vmem:[#allocation70_spill] sm:$0xff] }
 0x1c3   :  { %1169 = vmatmul.f32.vlgmr.msra.gmra.mxu1 %v6483_v30  ;;  %1209 = vmatmul.f32.vlgmr.msra.gmra.mxu3 %v6483_v30  ;;  %v6573_v40 = vld [vmem:[#allocation7 + $0x560] sm:$0xff] }
 0x1c4   :  { %1381 = vmatpush.msra.mxu0 %v10390_v37  ;;  %1421 = vmatpush.msrb.mxu2 %v10391_v60  ;;  %v10412_v37 = vld [vmem:[#allocation72_spill] sm:$0xff]  ;;  %v6581_v60 = vld [vmem:[#allocation7 + $0x520] sm:$0xff] }
 0x1c5   :  { %1313 = vmatpush.msra.mxu1 %v6489_v42  ;;  %1353 = vmatpush.msra.mxu3 %v6492_v48  ;;  %v10413_v44 = vld [vmem:[#allocation73_spill] sm:$0xff] }
 0x1c6   :  { %1382 = vmatpush.msra.mxu0 %v10392_v15  ;;  %1422 = vmatpush.msrb.mxu2 %v10393_v17  ;;  %v10414_v15 = vld [vmem:[#allocation74_spill] sm:$0xff]  ;;  %v6589_v17 = vld [vmem:[#allocation7 + $0x4e0] sm:$0xff] }
 0x1c7   :  { %1314 = vmatpush.msra.mxu1 %v6497_v57  ;;  %1354 = vmatpush.msra.mxu3 %v6500_v12 }
 0x1c8   :  { %1383 = vmatpush.msra.mxu0 %v10394_v10  ;;  %1423 = vmatpush.msrb.mxu2 %v10395_v63  ;;  %v6592_v10 = vld [vmem:[#allocation7 + $0x4e8] sm:$0xff]  ;;  %v10416_v63 = vld [vmem:[#allocation77_spill] sm:$0xff] }
 0x1c9   :  { %1315 = vmatpush.msra.mxu1 %v6505_v58  ;;  %1355 = vmatpush.msra.mxu3 %v6508_v52 }
 0x1ca   :  { %1384 = vmatpush.msra.mxu0 %v10396_v39  ;;  %1424 = vmatpush.msrb.mxu2 %v10397_v2  ;;  %v6597_v39 = vld [vmem:[#allocation7 + $0x4a0] sm:$0xff]  ;;  %v6600_v2 = vld [vmem:[#allocation7 + $0x4a8] sm:$0xff] }
 0x1cb   :  { %1316 = vmatpush.msra.mxu1 %v6513_v29  ;;  %1356 = vmatpush.msra.mxu3 %v6516_v31 }
 0x1cc   :  { %1385 = vmatpush.msra.mxu0 %v10398_v41  ;;  %1425 = vmatpush.msrb.mxu2 %v10399_v50  ;;  %v10417_v41 = vld [vmem:[#allocation80_spill] sm:$0xff]  ;;  %v10418_v50 = vld [vmem:[#allocation81_spill] sm:$0xff] }
 0x1cd   :  { %1249 = vmatmul.f32.vlgmr.msrb.gmra.mxu1 %v6483_v30  ;;  %1289 = vmatmul.f32.vlgmr.msrb.gmra.mxu3 %v6483_v30 }
 0x1ce   :  { %1386 = vmatpush.msra.mxu0 %v5999_v47  ;;  %1426 = vmatpush.msrb.mxu2 %v10400_v26  ;;  %v6534_v47 = vld [vmem:[#allocation7 + $0x6a8] sm:$0xff]  ;;  %v6605_v26 = vld [vmem:[#allocation7 + $0x460] sm:$0xff] }
 0x1cf   :  { %1317 = vmatpush.msra.mxu1 %v6523_v38  ;;  %1357 = vmatpush.msra.mxu3 %v6526_v22 }
 0x1d0   :  { %1387 = vmatpush.msra.mxu0 %v6007_v13  ;;  %1427 = vmatpush.msrb.mxu2 %v10401_v35  ;;  %v6544_v13 = vld [vmem:[#allocation7 + $0x668] sm:$0xff] }
 0x1d1   :  { %1318 = vmatpush.msra.mxu1 %v6531_v61  ;;  %1358 = vmatpush.msra.mxu3 %v6534_v47  ;;  %v6608_v35 = vld [vmem:[#allocation7 + $0x468] sm:$0xff] }
 0x1d2   :  { %1388 = vmatpush.msra.mxu0 %v10402_v0  ;;  %1428 = vmatpush.msrb.mxu2 %v10403_v1  ;;  %v10419_v0 = vld [vmem:[#allocation85_spill] sm:$0xff]  ;;  %v10420_v1 = vld [vmem:[#allocation86_spill] sm:$0xff] }
 0x1d3   :  { %1389 = vmatmul.f32.vlgmr.msra.gmra.mxu0 %v6374_v6  ;;  %1429 = vmatmul.f32.vlgmr.msrb.gmra.mxu2 %v6374_v6  ;;  %v10406_v6 = vld [vmem:[#allocation64_spill] sm:$0xff] }
 0x1d4   :  { %1319 = vmatpush.msra.mxu1 %v6541_v9  ;;  %1359 = vmatpush.msra.mxu3 %v6544_v13 }
 0x1d5   :  { %1595 = vmatpush.msrb.mxu0 %v10404_v16  ;;  %1635 = vmatpush.msra.mxu2 %v10405_v18  ;;  %v6613_v16 = vld [vmem:[#allocation7 + $0x420] sm:$0xff]  ;;  %v6616_v18 = vld [vmem:[#allocation7 + $0x428] sm:$0xff] }
 0x1d6   :  { %1320 = vmatpush.msra.mxu1 %v6549_v8  ;;  %1360 = vmatpush.msra.mxu3 %v6552_v19 }
 0x1d7   :  { %1596 = vmatpush.msrb.mxu0 %v10406_v6  ;;  %1636 = vmatpush.msra.mxu2 %v10407_v49  ;;  %v6621_v6 = vld [vmem:[#allocation7 + $0x7f0] sm:$0xff]  ;;  %v6624_v49 = vld [vmem:[#allocation7 + $0x7f8] sm:$0xff] }
 0x1d8   :  { %1321 = vmatpush.msra.mxu1 %v6557_v56  ;;  %1361 = vmatpush.msra.mxu3 %v6560_v14  ;;  %10421 = vst [vmem:[#allocation21_spill] sm:$0xff] %v6624_v49 }
 0x1d9   :  { %1597 = vmatpush.msrb.mxu0 %v10408_v27  ;;  %1637 = vmatpush.msra.mxu2 %v10409_v59  ;;  %v10422_v27 = vld [vmem:[#allocation90_spill] sm:$0xff]  ;;  %v10423_v59 = vld [vmem:[#allocation91_spill] sm:$0xff] }
 0x1da   :  { %1322 = vmatpush.msra.mxu1 %v6565_v45  ;;  %1362 = vmatpush.msra.mxu3 %v6568_v51 }
 0x1db   :  { %1598 = vmatpush.msrb.mxu0 %v10410_v46  ;;  %1638 = vmatpush.msra.mxu2 %v10411_v55  ;;  %v6629_v46 = vld [vmem:[#allocation7 + $0x7b0] sm:$0xff]  ;;  %v6632_v55 = vld [vmem:[#allocation7 + $0x7b8] sm:$0xff] }
 0x1dc   :  { %1323 = vmatpush.msra.mxu1 %v6573_v40  ;;  %1363 = vmatpush.msra.mxu3 %v6576_v54  ;;  %10424 = vst [vmem:[#allocation22_spill] sm:$0xff] %v6629_v46 }
 0x1dd   :  { %1599 = vmatpush.msrb.mxu0 %v10412_v37  ;;  %1639 = vmatpush.msra.mxu2 %v6060_v5  ;;  %v10415_v5 = vld [vmem:[#allocation76_spill] sm:$0xff]  ;;  %10425 = vst [vmem:[#allocation23_spill] sm:$0xff] %v6632_v55  ;;  %v10426_v37 = vld [vmem:[#allocation94_spill] sm:$0xff] }
 0x1de   :  { %1324 = vmatpush.msra.mxu1 %v6581_v60  ;;  %1364 = vmatpush.msra.mxu3 %v6584_v4 }
 0x1df   :  { %1600 = vmatpush.msrb.mxu0 %v10413_v44  ;;  %1640 = vmatpush.msra.mxu2 %v10414_v15  ;;  %v10427_v44 = vld [vmem:[#allocation95_spill] sm:$0xff] }
 0x1e0   :  { %1325 = vmatpush.msra.mxu1 %v6589_v17  ;;  %1365 = vmatpush.msra.mxu3 %v6592_v10  ;;  %v6637_v15 = vld [vmem:[#allocation7 + $0x770] sm:$0xff] }
 0x1e1   :  { %1601 = vmatpush.msrb.mxu0 %v10415_v5  ;;  %1641 = vmatpush.msra.mxu2 %v10416_v63  ;;  %10428 = vst [vmem:[#allocation24_spill] sm:$0xff] %v6637_v15  ;;  %v6640_v5 = vld [vmem:[#allocation7 + $0x778] sm:$0xff]  ;;  %v10430_v63 = vld [vmem:[#allocation99_spill] sm:$0xff] }
 0x1e2   :  { %1326 = vmatpush.msra.mxu1 %v6597_v39  ;;  %1366 = vmatpush.msra.mxu3 %v6600_v2  ;;  %10429 = vst [vmem:[#allocation25_spill] sm:$0xff] %v6640_v5 }
 0x1e3   :  { %1602 = vmatpush.msrb.mxu0 %v10417_v41  ;;  %1642 = vmatpush.msra.mxu2 %v10418_v50  ;;  %v10431_v41 = vld [vmem:[#allocation100_spill] sm:$0xff]  ;;  %v6645_v50 = vld [vmem:[#allocation7 + $0x730] sm:$0xff] }
 0x1e4   :  { %1327 = vmatpush.msra.mxu1 %v6605_v26  ;;  %1367 = vmatpush.msra.mxu3 %v6608_v35  ;;  %10432 = vst [vmem:[#allocation26_spill] sm:$0xff] %v6645_v50 }
 0x1e5   :  { %1603 = vmatpush.msrb.mxu0 %v10419_v0  ;;  %1643 = vmatpush.msra.mxu2 %v10420_v1  ;;  %v6648_v0 = vld [vmem:[#allocation7 + $0x738] sm:$0xff]  ;;  %v10434_v1 = vld [vmem:[#allocation103_spill] sm:$0xff] }
 0x1e6   :  { %1328 = vmatpush.msra.mxu1 %v6613_v16  ;;  %1368 = vmatpush.msra.mxu3 %v6616_v18  ;;  %10433 = vst [vmem:[#allocation27_spill] sm:$0xff] %v6648_v0 }
 0x1e7   :  { %1329 = vmatmul.f32.vlgmr.msra.gmra.mxu1 %v6483_v30  ;;  %1369 = vmatmul.f32.vlgmr.msra.gmra.mxu3 %v6483_v30 }
 0x1e8   :  { %1393 = vmatpush.msrb.mxu1 %v6621_v6  ;;  %1433 = vmatpush.msrb.mxu3 %v6624_v49 }
 0x1e9   :  { %1604 = vmatpush.msrb.mxu0 %v10422_v27  ;;  %1644 = vmatpush.msra.mxu2 %v10423_v59  ;;  %v10435_v27 = vld [vmem:[#allocation104_spill] sm:$0xff]  ;;  %v6653_v59 = vld [vmem:[#allocation7 + $0x6f0] sm:$0xff] }
 0x1ea   :  { %1394 = vmatpush.msrb.mxu1 %v6629_v46  ;;  %1434 = vmatpush.msrb.mxu3 %v6632_v55  ;;  %10436 = vst [vmem:[#allocation28_spill] sm:$0xff] %v6653_v59 }
 0x1eb   :  { %1605 = vmatpush.msrb.mxu0 %v10426_v37  ;;  %1645 = vmatpush.msra.mxu2 %v10427_v44  ;;  %v6656_v37 = vld [vmem:[#allocation7 + $0x6f8] sm:$0xff] }
 0x1ec   :  { %1395 = vmatpush.msrb.mxu1 %v6637_v15  ;;  %1435 = vmatpush.msrb.mxu3 %v6640_v5  ;;  %10437 = vst [vmem:[#allocation29_spill] sm:$0xff] %v6656_v37  ;;  %v10438_v44 = vld [vmem:[#allocation108_spill] sm:$0xff] }
 0x1ed   :  { %1606 = vmatpush.msrb.mxu0 %v10430_v63  ;;  %1646 = vmatpush.msra.mxu2 %v10431_v41  ;;  %v10439_v63 = vld [vmem:[#allocation109_spill] sm:$0xff]  ;;  %v6661_v41 = vld [vmem:[#allocation7 + $0x6b0] sm:$0xff] }
 0x1ee   :  { %1396 = vmatpush.msrb.mxu1 %v6645_v50  ;;  %1436 = vmatpush.msrb.mxu3 %v6648_v0  ;;  %10440 = vst [vmem:[#allocation30_spill] sm:$0xff] %v6661_v41  ;;  %v6664_v0 = vld [vmem:[#allocation7 + $0x6b8] sm:$0xff] }
 0x1ef   :  { %1607 = vmatpush.msrb.mxu0 %v10434_v1  ;;  %1647 = vmatpush.msra.mxu2 %v10435_v27  ;;  %10441 = vst [vmem:[#allocation31_spill] sm:$0xff] %v6664_v0  ;;  %v10442_v1 = vld [vmem:[#allocation113_spill] sm:$0xff]  ;;  %v10443_v27 = vld [vmem:[#allocation114_spill] sm:$0xff] }
 0x1f0   :  { %1397 = vmatpush.msrb.mxu1 %v6653_v59  ;;  %1437 = vmatpush.msrb.mxu3 %v6656_v37  ;;  %v6669_v59 = vld [vmem:[#allocation7 + $0x670] sm:$0xff]  ;;  %v6672_v37 = vld [vmem:[#allocation7 + $0x678] sm:$0xff] }
 0x1f1   :  { %1608 = vmatpush.msrb.mxu0 %v10438_v44  ;;  %1648 = vmatpush.msra.mxu2 %v10439_v63  ;;  %10444 = vst [vmem:[#allocation32_spill] sm:$0xff] %v6669_v59  ;;  %v10446_v44 = vld [vmem:[#allocation118_spill] sm:$0xff]  ;;  %v10447_v63 = vld [vmem:[#allocation119_spill] sm:$0xff] }
 0x1f2   :  { %1398 = vmatpush.msrb.mxu1 %v6661_v41  ;;  %1438 = vmatpush.msrb.mxu3 %v6664_v0  ;;  %10445 = vst [vmem:[#allocation33_spill] sm:$0xff] %v6672_v37  ;;  %v6677_v41 = vld [vmem:[#allocation7 + $0x630] sm:$0xff]  ;;  %v6680_v0 = vld [vmem:[#allocation7 + $0x638] sm:$0xff] }
 0x1f3   :  { %1609 = vmatpush.msrb.mxu0 %v10442_v1  ;;  %1649 = vmatpush.msra.mxu2 %v10443_v27  ;;  %10448 = vst [vmem:[#allocation34_spill] sm:$0xff] %v6677_v41  ;;  %v10450_v1 = vld [vmem:[#allocation120_spill] sm:$0xff]  ;;  %v10451_v27 = vld [vmem:[#allocation121_spill] sm:$0xff] }
 0x1f4   :  { %1399 = vmatpush.msrb.mxu1 %v6669_v59  ;;  %1439 = vmatpush.msrb.mxu3 %v6672_v37  ;;  %10449 = vst [vmem:[#allocation35_spill] sm:$0xff] %v6680_v0  ;;  %v6685_v59 = vld [vmem:[#allocation7 + $0x5f0] sm:$0xff]  ;;  %v6688_v37 = vld [vmem:[#allocation7 + $0x5f8] sm:$0xff] }
 0x1f5   :  { %1610 = vmatpush.msrb.mxu0 %v10446_v44  ;;  %1650 = vmatpush.msra.mxu2 %v10447_v63  ;;  %10452 = vst [vmem:[#allocation36_spill] sm:$0xff] %v6685_v59  ;;  %v10454_v44 = vld [vmem:[#allocation125_spill] sm:$0xff]  ;;  %v10455_v63 = vld [vmem:[#allocation126_spill] sm:$0xff] }
 0x1f6   :  { %1400 = vmatpush.msrb.mxu1 %v6677_v41  ;;  %1440 = vmatpush.msrb.mxu3 %v6680_v0  ;;  %10453 = vst [vmem:[#allocation37_spill] sm:$0xff] %v6688_v37  ;;  %v6693_v41 = vld [vmem:[#allocation7 + $0x5b0] sm:$0xff]  ;;  %v6696_v0 = vld [vmem:[#allocation7 + $0x5b8] sm:$0xff] }
 0x1f7   :  { %1675 = vmatpush.msra.mxu0 %v10450_v1  ;;  %1715 = vmatpush.msrb.mxu2 %v10451_v27  ;;  %10456 = vst [vmem:[#allocation38_spill] sm:$0xff] %v6693_v41  ;;  %v10458_v1 = vld [vmem:[#allocation129_spill] sm:$0xff]  ;;  %v10459_v27 = vld [vmem:[#allocation130_spill] sm:$0xff] }
 0x1f8   :  { %1401 = vmatpush.msrb.mxu1 %v6685_v59  ;;  %1441 = vmatpush.msrb.mxu3 %v6688_v37  ;;  %10457 = vst [vmem:[#allocation39_spill] sm:$0xff] %v6696_v0  ;;  %v6701_v59 = vld [vmem:[#allocation7 + $0x570] sm:$0xff]  ;;  %v6704_v37 = vld [vmem:[#allocation7 + $0x578] sm:$0xff] }
 0x1f9   :  { %1676 = vmatpush.msra.mxu0 %v10454_v44  ;;  %1716 = vmatpush.msrb.mxu2 %v10455_v63  ;;  %10460 = vst [vmem:[#allocation40_spill] sm:$0xff] %v6701_v59  ;;  %v10462_v44 = vld [vmem:[#allocation134_spill] sm:$0xff]  ;;  %v10463_v63 = vld [vmem:[#allocation135_spill] sm:$0xff] }
 0x1fa   :  { %1402 = vmatpush.msrb.mxu1 %v6693_v41  ;;  %1442 = vmatpush.msrb.mxu3 %v6696_v0  ;;  %10461 = vst [vmem:[#allocation41_spill] sm:$0xff] %v6704_v37  ;;  %v6709_v41 = vld [vmem:[#allocation7 + $0x530] sm:$0xff]  ;;  %v6712_v0 = vld [vmem:[#allocation7 + $0x538] sm:$0xff] }
 0x1fb   :  { %1677 = vmatpush.msra.mxu0 %v10458_v1  ;;  %1717 = vmatpush.msrb.mxu2 %v10459_v27  ;;  %10464 = vst [vmem:[#allocation42_spill] sm:$0xff] %v6709_v41  ;;  %v10466_v1 = vld [vmem:[#allocation139_spill] sm:$0xff] }
 0x1fc   :  { %1403 = vmatpush.msrb.mxu1 %v6701_v59  ;;  %1443 = vmatpush.msrb.mxu3 %v6704_v37  ;;  %10465 = vst [vmem:[#allocation43_spill] sm:$0xff] %v6712_v0  ;;  %v6717_v27 = vld [vmem:[#allocation7 + $0x4f0] sm:$0xff]  ;;  %v6720_v37 = vld [vmem:[#allocation7 + $0x4f8] sm:$0xff] }
 0x1fd   :  { %1678 = vmatpush.msra.mxu0 %v10462_v44  ;;  %1718 = vmatpush.msrb.mxu2 %v10463_v63  ;;  %10467 = vst [vmem:[#allocation44_spill] sm:$0xff] %v6717_v27  ;;  %v6725_v44 = vld [vmem:[#allocation7 + $0x4b0] sm:$0xff]  ;;  %v6728_v63 = vld [vmem:[#allocation7 + $0x4b8] sm:$0xff] }
 0x1fe   :  { %1404 = vmatpush.msrb.mxu1 %v6709_v41  ;;  %1444 = vmatpush.msrb.mxu3 %v6712_v0  ;;  %10468 = vst [vmem:[#allocation45_spill] sm:$0xff] %v6720_v37  ;;  %v10557_v0 = vld [vmem:[#allocation63_spill] sm:$0xff] }
 0x1ff   :  { %1679 = vmatpush.msra.mxu0 %v10466_v1  ;;  %1719 = vmatpush.msrb.mxu2 %v6256_v20  ;;  %10469 = vst [vmem:[#allocation46_spill] sm:$0xff] %v6725_v44  ;;  %v6733_v20 = vld [vmem:[#allocation7 + $0x470] sm:$0xff]  ;;  %v6736_v1 = vld [vmem:[#allocation7 + $0x478] sm:$0xff] }
 0x200   :  { %1405 = vmatpush.msrb.mxu1 %v6717_v27  ;;  %1445 = vmatpush.msrb.mxu3 %v6720_v37  ;;  %10470 = vst [vmem:[#allocation47_spill] sm:$0xff] %v6728_v63 }
 0x201   :  { %1680 = vmatpush.msra.mxu0 %v6267_v23  ;;  %1720 = vmatpush.msrb.mxu2 %v6270_v25  ;;  %10471 = vst [vmem:[#allocation48_spill] sm:$0xff] %v6733_v20  ;;  %v10473_v25 = vld [vmem:[#allocation144_spill] sm:$0xff]  ;;  %v6741_v23 = vld [vmem:[#allocation7 + $0x430] sm:$0xff] }
 0x202   :  { %1406 = vmatpush.msrb.mxu1 %v6725_v44  ;;  %1446 = vmatpush.msrb.mxu3 %v6728_v63  ;;  %10472 = vst [vmem:[#allocation49_spill] sm:$0xff] %v6736_v1  ;;  %v6744_v63 = vld [vmem:[#allocation7 + $0x438] sm:$0xff] }
 0x203   :  { %1681 = vmatpush.msra.mxu0 %v6277_v3  ;;  %1721 = vmatpush.msrb.mxu2 %v6280_v7  ;;  %10474 = vst [vmem:[#allocation50_spill] sm:$0xff] %v6741_v23  ;;  %v6751_v7 = vld [vmem:[#allocation7 + $0x7c0] sm:$0xff] }
 0x204   :  { %1407 = vmatpush.msrb.mxu1 %v6733_v20  ;;  %1447 = vmatpush.msrb.mxu3 %v6736_v1  ;;  %10475 = vst [vmem:[#allocation51_spill] sm:$0xff] %v6744_v63  ;;  %v6759_v3 = vld [vmem:[#allocation7 + $0x780] sm:$0xff]  ;;  %v6913_v1 = vld [vmem:[#allocation7 + $0x410] sm:$0xff] }
 0x205   :  { %1682 = vmatpush.msra.mxu0 %v6285_v33  ;;  %1722 = vmatpush.msrb.mxu2 %v10473_v25  ;;  %10476 = vst [vmem:[#allocation52_spill] sm:$0xff] %v6751_v7  ;;  %v6754_v33 = vld [vmem:[#allocation7 + $0x7c8] sm:$0xff]  ;;  %v6767_v25 = vld [vmem:[#allocation7 + $0x740] sm:$0xff] }
 0x206   :  { %1408 = vmatpush.msrb.mxu1 %v6741_v23  ;;  %1448 = vmatpush.msrb.mxu3 %v6744_v63  ;;  %10477 = vst [vmem:[#allocation53_spill] sm:$0xff] %v6754_v33  ;;  %v10517_v63 = vld [vmem:[#allocation93_spill] sm:$0xff] }
 0x207   :  { %1409 = vmatmul.f32.vlgmr.msrb.gmra.mxu1 %v6483_v30  ;;  %1449 = vmatmul.f32.vlgmr.msrb.gmra.mxu3 %v6483_v30  ;;  %10478 = vst [vmem:[#allocation54_spill] sm:$0xff] %v6759_v3  ;;  %v6762_v30 = vld [vmem:[#allocation7 + $0x788] sm:$0xff]  ;;  %v10519_v23 = vld [vmem:[#allocation97_spill] sm:$0xff] }
 0x208   :  { %1683 = vmatpush.msra.mxu0 %v6295_v21  ;;  %1723 = vmatpush.msrb.mxu2 %v6298_v24  ;;  %10479 = vst [vmem:[#allocation55_spill] sm:$0xff] %v6762_v30  ;;  %v10480_v21 = vld [vmem:[#allocation148_spill] sm:$0xff]  ;;  %v10481_v24 = vld [vmem:[#allocation149_spill] sm:$0xff] }
 0x209   :  { %1615 = vmatpush.msra.mxu1 %v6751_v7  ;;  %1655 = vmatpush.msra.mxu3 %v6754_v33  ;;  %10482 = vst [vmem:[#allocation56_spill] sm:$0xff] %v6767_v25  ;;  %v6770_v33 = vld [vmem:[#allocation7 + $0x748] sm:$0xff]  ;;  %v10515_v7 = vld [vmem:[#allocation88_spill] sm:$0xff] }
 0x20a   :  { %1684 = vmatpush.msra.mxu0 %v6305_v34  ;;  %1724 = vmatpush.msrb.mxu2 %v6308_v28  ;;  %10483 = vst [vmem:[#allocation57_spill] sm:$0xff] %v6770_v33  ;;  %v10484_v34 = vld [vmem:[#allocation151_spill] sm:$0xff]  ;;  %v10485_v28 = vld [vmem:[#allocation152_spill] sm:$0xff] }
 0x20b   :  { %1616 = vmatpush.msra.mxu1 %v6759_v3  ;;  %1656 = vmatpush.msra.mxu3 %v6762_v30  ;;  %v6775_v3 = vld [vmem:[#allocation7 + $0x700] sm:$0xff]  ;;  %v6778_v30 = vld [vmem:[#allocation7 + $0x708] sm:$0xff]  ;;  %10552 = vst [vmem:[#allocation126_spill] sm:$0xff] %v6913_v1 }
 0x20c   :  { %1685 = vmatpush.msra.mxu0 %v10480_v21  ;;  %1725 = vmatpush.msrb.mxu2 %v10481_v24  ;;  %10486 = vst [vmem:[#allocation58_spill] sm:$0xff] %v6775_v3  ;;  %v6781_v21 = vld [vmem:[#allocation7 + $0xd0] sm:$0xff]  ;;  %v6784_v24 = vld [vmem:[#allocation7 + $0xd8] sm:$0xff] }
 0x20d   :  { %1617 = vmatpush.msra.mxu1 %v6767_v25  ;;  %1657 = vmatpush.msra.mxu3 %v6770_v33  ;;  %10487 = vst [vmem:[#allocation59_spill] sm:$0xff] %v6778_v30  ;;  %v6787_v33 = vld [vmem:[#allocation7 + $0x6c0] sm:$0xff]  ;;  %v10513_v25 = vld [vmem:[#allocation83_spill] sm:$0xff] }
 0x20e   :  { %1686 = vmatpush.msra.mxu0 %v10484_v34  ;;  %1726 = vmatpush.msrb.mxu2 %v10485_v28  ;;  %10488 = vst [vmem:[#allocation61_spill] sm:$0xff] %v6781_v21  ;;  %v6790_v34 = vld [vmem:[#allocation7 + $0x6c8] sm:$0xff]  ;;  %v6793_v28 = vld [vmem:[#allocation7 + $0x90] sm:$0xff] }
 0x20f   :  { %1618 = vmatpush.msra.mxu1 %v6775_v3  ;;  %1658 = vmatpush.msra.mxu3 %v6778_v30  ;;  %10489 = vst [vmem:[#allocation62_spill] sm:$0xff] %v6784_v24  ;;  %v6796_v30 = vld [vmem:[#allocation7 + $0x98] sm:$0xff]  ;;  %v10511_v3 = vld [vmem:[#allocation79_spill] sm:$0xff] }
 0x210   :  { %1687 = vmatpush.msra.mxu0 %v6781_v21  ;;  %1727 = vmatpush.msrb.mxu2 %v6784_v24  ;;  %10490 = vst [vmem:[#allocation64_spill] sm:$0xff] %v6787_v33  ;;  %v6799_v21 = vld [vmem:[#allocation7 + $0x680] sm:$0xff]  ;;  %v6802_v24 = vld [vmem:[#allocation7 + $0x688] sm:$0xff] }
 0x211   :  { %1619 = vmatpush.msra.mxu1 %v6787_v33  ;;  %10491 = vst [vmem:[#allocation65_spill] sm:$0xff] %v6790_v34  ;;  %1659 = vmatpush.msra.mxu3 %v6790_v34  ;;  %v6805_v33 = vld [vmem:[#allocation7 + $0x50] sm:$0xff]  ;;  %v6808_v34 = vld [vmem:[#allocation7 + $0x58] sm:$0xff] }
 0x212   :  { %10492 = vst [vmem:[#allocation66_spill] sm:$0xff] %v6793_v28  ;;  %1688 = vmatpush.msra.mxu0 %v6793_v28  ;;  %1728 = vmatpush.msrb.mxu2 %v6796_v30  ;;  %v6811_v28 = vld [vmem:[#allocation7 + $0x640] sm:$0xff] }
 0x213   :  { %10493 = vst [vmem:[#allocation67_spill] sm:$0xff] %v6796_v30  ;;  %1620 = vmatpush.msra.mxu1 %v6799_v21  ;;  %1660 = vmatpush.msra.mxu3 %v6802_v24  ;;  %v6814_v30 = vld [vmem:[#allocation7 + $0x648] sm:$0xff] }
 0x214   :  { %10494 = vst [vmem:[#allocation69_spill] sm:$0xff] %v6799_v21  ;;  %1689 = vmatpush.msra.mxu0 %v6805_v33  ;;  %1729 = vmatpush.msrb.mxu2 %v6808_v34  ;;  %v6817_v21 = vld [vmem:[#allocation7 + $0x10] sm:$0xff] }
 0x215   :  { %10495 = vst [vmem:[#allocation70_spill] sm:$0xff] %v6802_v24  ;;  %1621 = vmatpush.msra.mxu1 %v6811_v28  ;;  %1661 = vmatpush.msra.mxu3 %v6814_v30  ;;  %v6820_v24 = vld [vmem:[#allocation7 + $0x18] sm:$0xff] }
 0x216   :  { %10496 = vst [vmem:[#allocation72_spill] sm:$0xff] %v6805_v33  ;;  %1690 = vmatpush.msra.mxu0 %v6817_v21  ;;  %1730 = vmatpush.msrb.mxu2 %v6820_v24  ;;  %v6823_v33 = vld [vmem:[#allocation7 + $0x600] sm:$0xff] }
 0x217   :  { %10497 = vst [vmem:[#allocation73_spill] sm:$0xff] %v6808_v34  ;;  %1622 = vmatpush.msra.mxu1 %v6823_v33  ;;  %v6826_v34 = vld [vmem:[#allocation7 + $0x608] sm:$0xff] }
 0x218   :  { %10498 = vst [vmem:[#allocation74_spill] sm:$0xff] %v6811_v28  ;;  %1662 = vmatpush.msra.mxu3 %v6826_v34  ;;  %v6829_v28 = vld [vmem:[#allocation7 + $0x5c0] sm:$0xff] }
 0x219   :  { %10499 = vst [vmem:[#allocation76_spill] sm:$0xff] %v6814_v30  ;;  %1623 = vmatpush.msra.mxu1 %v6829_v28  ;;  %v6832_v30 = vld [vmem:[#allocation7 + $0x5c8] sm:$0xff] }
 0x21a   :  { %10500 = vst [vmem:[#allocation77_spill] sm:$0xff] %v6817_v21  ;;  %1663 = vmatpush.msra.mxu3 %v6832_v30  ;;  %v6835_v21 = vld [vmem:[#allocation7 + $0x580] sm:$0xff] }
 0x21b   :  { %10501 = vst [vmem:[#allocation80_spill] sm:$0xff] %v6820_v24  ;;  %1624 = vmatpush.msra.mxu1 %v6835_v21  ;;  %v6838_v24 = vld [vmem:[#allocation7 + $0x588] sm:$0xff] }
 0x21c   :  { %10502 = vst [vmem:[#allocation81_spill] sm:$0xff] %v6823_v33  ;;  %1664 = vmatpush.msra.mxu3 %v6838_v24  ;;  %v6841_v33 = vld [vmem:[#allocation7 + $0x540] sm:$0xff] }
 0x21d   :  { %10503 = vst [vmem:[#allocation85_spill] sm:$0xff] %v6826_v34  ;;  %1625 = vmatpush.msra.mxu1 %v6841_v33  ;;  %v6844_v34 = vld [vmem:[#allocation7 + $0x548] sm:$0xff] }
 0x21e   :  { %10504 = vst [vmem:[#allocation86_spill] sm:$0xff] %v6829_v28  ;;  %1665 = vmatpush.msra.mxu3 %v6844_v34  ;;  %v10510_v28 = vld [vmem:[#allocation78_spill] sm:$0xff] }
 0x21f   :  { %10505 = vst [vmem:[#allocation90_spill] sm:$0xff] %v6832_v30  ;;  %1626 = vmatpush.msra.mxu1 %v10510_v28  ;;  %v10512_v30 = vld [vmem:[#allocation82_spill] sm:$0xff] }
 0x220   :  { %10506 = vst [vmem:[#allocation91_spill] sm:$0xff] %v6835_v21  ;;  %1666 = vmatpush.msra.mxu3 %v10511_v3  ;;  %v10514_v21 = vld [vmem:[#allocation87_spill] sm:$0xff]  ;;  %v10521_v28 = vld [vmem:[#allocation102_spill] sm:$0xff]  ;;  %v10522_v3 = vld [vmem:[#allocation105_spill] sm:$0xff] }
 0x221   :  { %10507 = vst [vmem:[#allocation94_spill] sm:$0xff] %v6838_v24  ;;  %1627 = vmatpush.msra.mxu1 %v10512_v30  ;;  %v10516_v24 = vld [vmem:[#allocation92_spill] sm:$0xff]  ;;  %v10523_v30 = vld [vmem:[#allocation106_spill] sm:$0xff] }
 0x222   :  { %10508 = vst [vmem:[#allocation95_spill] sm:$0xff] %v6841_v33  ;;  %1667 = vmatpush.msra.mxu3 %v10513_v25  ;;  %v10518_v33 = vld [vmem:[#allocation96_spill] sm:$0xff]  ;;  %v10524_v25 = vld [vmem:[#allocation110_spill] sm:$0xff] }
 0x223   :  { %10509 = vst [vmem:[#allocation99_spill] sm:$0xff] %v6844_v34  ;;  %1628 = vmatpush.msra.mxu1 %v10514_v21  ;;  %v10520_v34 = vld [vmem:[#allocation101_spill] sm:$0xff]  ;;  %v10525_v21 = vld [vmem:[#allocation111_spill] sm:$0xff] }
 0x224   :  { %1668 = vmatpush.msra.mxu3 %v10515_v7  ;;  %v10526_v7 = vld [vmem:[#allocation115_spill] sm:$0xff] }
 0x225   :  { %1629 = vmatpush.msra.mxu1 %v10516_v24  ;;  %v10527_v24 = vld [vmem:[#allocation116_spill] sm:$0xff] }
 0x226   :  { %1669 = vmatpush.msra.mxu3 %v10517_v63  ;;  %v10528_v63 = vld [vmem:[#allocation123_spill] sm:$0xff] }
 0x227   :  { %1630 = vmatpush.msra.mxu1 %v10518_v33  ;;  %v10529_v33 = vld [vmem:[#allocation124_spill] sm:$0xff] }
 0x228   :  { %1670 = vmatpush.msra.mxu3 %v10519_v23  ;;  %v10530_v23 = vld [vmem:[#allocation127_spill] sm:$0xff] }
 0x229   :  { %1695 = vmatpush.msrb.mxu1 %v10520_v34  ;;  %v10531_v34 = vld [vmem:[#allocation128_spill] sm:$0xff] }
 0x22a   :  { %1735 = vmatpush.msrb.mxu3 %v10521_v28  ;;  %v10532_v28 = vld [vmem:[#allocation132_spill] sm:$0xff] }
 0x22b   :  { %1696 = vmatpush.msrb.mxu1 %v10522_v3  ;;  %v10533_v3 = vld [vmem:[#allocation133_spill] sm:$0xff] }
 0x22c   :  { %1736 = vmatpush.msrb.mxu3 %v10523_v30  ;;  %v10534_v30 = vld [vmem:[#allocation137_spill] sm:$0xff] }
 0x22d   :  { %1697 = vmatpush.msrb.mxu1 %v10524_v25  ;;  %v10535_v25 = vld [vmem:[#allocation138_spill] sm:$0xff] }
 0x22e   :  { %1737 = vmatpush.msrb.mxu3 %v10525_v21  ;;  %v10536_v21 = vld [vmem:[#allocation141_spill] sm:$0xff] }
 0x22f   :  { %1698 = vmatpush.msrb.mxu1 %v10526_v7  ;;  %v10537_v7 = vld [vmem:[#allocation142_spill] sm:$0xff] }
 0x230   :  { %1738 = vmatpush.msrb.mxu3 %v10527_v24  ;;  %v6875_v24 = vld [vmem:[#allocation7 + $0x590] sm:$0xff] }
 0x231   :  { %1699 = vmatpush.msrb.mxu1 %v10528_v63  ;;  %10538 = vst [vmem:[#allocation100_spill] sm:$0xff] %v6875_v24  ;;  %v6878_v63 = vld [vmem:[#allocation7 + $0x598] sm:$0xff] }
 0x232   :  { %1739 = vmatpush.msrb.mxu3 %v10529_v33  ;;  %10539 = vst [vmem:[#allocation103_spill] sm:$0xff] %v6878_v63  ;;  %v6881_v33 = vld [vmem:[#allocation7 + $0x550] sm:$0xff] }
 0x233   :  { %1700 = vmatpush.msrb.mxu1 %v10530_v23  ;;  %10540 = vst [vmem:[#allocation104_spill] sm:$0xff] %v6881_v33  ;;  %v6884_v23 = vld [vmem:[#allocation7 + $0x558] sm:$0xff] }
 0x234   :  { %1740 = vmatpush.msrb.mxu3 %v10531_v34  ;;  %10541 = vst [vmem:[#allocation108_spill] sm:$0xff] %v6884_v23  ;;  %v6887_v34 = vld [vmem:[#allocation7 + $0x510] sm:$0xff] }
 0x235   :  { %1701 = vmatpush.msrb.mxu1 %v10532_v28  ;;  %10542 = vst [vmem:[#allocation109_spill] sm:$0xff] %v6887_v34  ;;  %v6890_v28 = vld [vmem:[#allocation7 + $0x518] sm:$0xff] }
 0x236   :  { %1741 = vmatpush.msrb.mxu3 %v10533_v3  ;;  %10543 = vst [vmem:[#allocation113_spill] sm:$0xff] %v6890_v28  ;;  %v6893_v3 = vld [vmem:[#allocation7 + $0x4d0] sm:$0xff] }
 0x237   :  { %1702 = vmatpush.msrb.mxu1 %v10534_v30  ;;  %10544 = vst [vmem:[#allocation114_spill] sm:$0xff] %v6893_v3  ;;  %v6896_v30 = vld [vmem:[#allocation7 + $0x4d8] sm:$0xff] }
 0x238   :  { %1742 = vmatpush.msrb.mxu3 %v10535_v25  ;;  %10545 = vst [vmem:[#allocation118_spill] sm:$0xff] %v6896_v30  ;;  %v1150_v25 = vpop.f32.mrf.mxu0 }
 0x239   :  { %1703 = vmatpush.msrb.mxu1 %v10536_v21 }
 0x23a   :  { %1743 = vmatpush.msrb.mxu3 %v10537_v7  ;;  %v6899_v7 = vld [vmem:[#allocation7 + $0x490] sm:$0xff] }
 0x23b   :  { %1704 = vmatpush.msrb.mxu1 %v6875_v24  ;;  %10546 = vst [vmem:[#allocation119_spill] sm:$0xff] %v6899_v7  ;;  %v6907_v24 = vld [vmem:[#allocation7 + $0x450] sm:$0xff] }
 0x23c   :  { %1744 = vmatpush.msrb.mxu3 %v6878_v63  ;;  %10550 = vst [vmem:[#allocation121_spill] sm:$0xff] %v6907_v24 }
 0x23d   :  { %1705 = vmatpush.msrb.mxu1 %v6881_v33 }
 0x23e   :  { %1745 = vmatpush.msrb.mxu3 %v6884_v23  ;;  %v6902_v23 = vld [vmem:[#allocation7 + $0x498] sm:$0xff] }
 0x23f   :  { %1706 = vmatpush.msrb.mxu1 %v6887_v34  ;;  %10547 = vst [vmem:[#allocation120_spill] sm:$0xff] %v6902_v23  ;;  %v10548_v34 = vld [vmem:[#allocation14_spill] sm:$0xff] }
 0x240   :  { %1746 = vmatpush.msrb.mxu3 %v6890_v28  ;;  %v1170_v21 = vpop.f32.mrf.mxu1  ;;  %v10549_v28 = vld [vmem:[#allocation117_spill] sm:$0xff] }
 0x241   :  { %1707 = vmatpush.msrb.mxu1 %v6893_v3  ;;  %v157_v33 = vadd.f32 %v10549_v28, %v10548_v34  ;;  %v1171_v63 = vadd.f32 %v1170_v21, %v1150_v25  ;;  %v6910_v3 = vld [vmem:[#allocation7 + $0x458] sm:$0xff]  ;;  %v1190_v28 = vpop.f32.mrf.mxu2 }
 0x242   :  { %1747 = vmatpush.msrb.mxu3 %v6896_v30  ;;  %10551 = vst [vmem:[#allocation125_spill] sm:$0xff] %v6910_v3  ;;  %v10554_v21 = vld [vmem:[#allocation16_spill] sm:$0xff] }
 0x243   :  { %1708 = vmatpush.msrb.mxu1 %v6899_v7  ;;  %v1525_v30 = vadd.f32 %v1171_v63, %v157_v33  ;;  %v6916_v7 = vld [vmem:[#allocation7 + $0x418] sm:$0xff] }
 0x244   :  { %1748 = vmatpush.msrb.mxu3 %v6902_v23  ;;  %10553 = vst [vmem:[#allocation129_spill] sm:$0xff] %v6916_v7  ;;  %v10555_v34 = vld [vmem:[#allocation60_spill] sm:$0xff] }
 0x245   :  { %1709 = vmatpush.msrb.mxu1 %v6907_v24  ;;  %v4237_v23 = vmul.f32 -1.442695, %v1525_v30  ;;  %v198_v20 = vadd.f32 %v10555_v34, %v10554_v21 }
 0x246   :  { %1749 = vmatpush.msrb.mxu3 %v6910_v3  ;;  %v1210_v25 = vpop.f32.mrf.mxu3 }
 0x247   :  { %1710 = vmatpush.msrb.mxu1 %v6913_v1  ;;  %4345 = vpow2.f32 %v4237_v23  ;;  %v1211_v24 = vadd.f32 %v1210_v25, %v1190_v28  ;;  %v10556_v1 = vld [vmem:[#allocation18_spill] sm:$0xff]  ;;  %v1230_v23 = vpop.f32.mrf.mxu0 }
 0x248   :  { %1750 = vmatpush.msrb.mxu3 %v6916_v7  ;;  %v280_v41 = vadd.f32 %v10557_v0, %v10556_v1 }
 0x249   :  { %v1526_v44 = vadd.f32 %v1211_v24, %v198_v20  ;;  %v1270_v27 = vpop.f32.mrf.mxu2  ;;  %v10559_v24 = vld [vmem:[#allocation68_spill] sm:$0xff] }
 0x24a   :  { %v1250_v5 = vpop.f32.mrf.mxu1 }
 0x24b   :  { %v4238_v37 = vmul.f32 -1.442695, %v1526_v44  ;;  %v1251_v44 = vadd.f32 %v1250_v5, %v1230_v23 }
 0x24d   :  { %v4346_v3 = vpop.eup %4345  ;;  %4347 = vpow2.f32 %v4238_v37  ;;  %v10558_v37 = vld [vmem:[#allocation20_spill] sm:$0xff] }
 0x24e   :  { %v1532_v63 = vadd.f32 1.0, %v4346_v3  ;;  %v239_v3 = vadd.f32 %v10559_v24, %v10558_v37 }
 0x250   :  { %v1290_v33 = vpop.f32.mrf.mxu3  ;;  %4349 = vrcp.f32 %v1532_v63  ;;  %v1527_v25 = vadd.f32 %v1251_v44, %v239_v3  ;;  %vm1538_vm6 = vweird.f32 %v1532_v63 }
 0x251   :  { %v1291_v7 = vadd.f32 %v1290_v33, %v1270_v27 }
 0x253   :  { %v4348_v30 = vpop.eup %4347  ;;  %v1528_v59 = vadd.f32 %v1291_v7, %v280_v41  ;;  %v1544_v41 = vand.u32 2147483648, %v1532_v63 }
 0x254   :  { %v1551_v50 = vadd.f32 1.0, %v4348_v30  ;;  %v1542_v30 = vand.u32 2147483647, %v1532_v63 }
 0x255   :  { %v4239_v15 = vmul.f32 -1.442695, %v1528_v59  ;;  %v1545_v44 = vor.u32 1.1754944e-38, %v1544_v41  ;;  %v1350_v41 = vpop.f32.mrf.mxu2 }
 0x256   :  { %v4350_v34 = vpop.eup %4349  ;;  %4351 = vrcp.f32 %v1551_v50  ;;  %v1563_v1 = vand.u32 2147483648, %v1551_v50  ;;  %vm1557_vm9 = vweird.f32 %v1551_v50  ;;  %vm1543_vm10 = vcmp.eq.f32.partialorder %v1542_v30, 8.507059e+37 }
 0x257   :  { %v1534_v20 = vmul.f32 %v4350_v34, %v1532_v63  ;;  %4353 = vpow2.f32 %v4239_v15  ;;  %vm1539_vm5 = vweird.f32 %v4350_v34 }
 0x258   :  { %4355 = vtanh.f32 %v1527_v25  ;;  %vm6925_vm7 = vmor %vm1538_vm6, %vm1539_vm5 }
 0x259   :  { %v1535_v28 = vsub.f32 1.0, %v1534_v20  ;;  %v1561_v20 = vand.u32 2147483647, %v1551_v50 }
 0x25b   :  { %v1536_v21 = vmul.f32 %v4350_v34, %v1535_v28  ;;  %v1564_v28 = vor.u32 1.1754944e-38, %v1563_v1  ;;  %vm1562_vm12 = vcmp.eq.f32.partialorder %v1561_v20, 8.507059e+37 }
 0x25c   :  { %v4352_v55 = vpop.eup %4351 }
 0x25d   :  { %v4354_v0 = vpop.eup %4353  ;;  %v1553_v27 = vmul.f32 %v4352_v55, %v1551_v50  ;;  %v1537_v33 = vadd.f32 %v4350_v34, %v1536_v21  ;;  %vm1558_vm8 = vweird.f32 %v4352_v55  ;;  %v1310_v21 = vpop.f32.mrf.mxu0 }
 0x25e   :  { %v1571_v7 = vadd.f32 1.0, %v4354_v0  ;;  %vm1559_vm11 = vmor %vm1557_vm9, %vm1558_vm8  ;;  %v4356_v0 = vpop.eup %4355 }
 0x25f   :  { %v1554_v59 = vsub.f32 1.0, %v1553_v27  ;;  %v1541_v23 = vsel %vm6925_vm7, %v4350_v34, %v1537_v33 }
 0x260   :  { %4357 = vrcp.f32 %v1571_v7  ;;  %v1546_v25 = vsel %vm1543_vm10, %v1545_v44, %v1541_v23  ;;  %v1583_v1 = vand.u32 2147483648, %v1571_v7  ;;  %vm1577_vm14 = vweird.f32 %v1571_v7 }
 0x261   :  { %v1555_v5 = vmul.f32 %v4352_v55, %v1554_v59  ;;  %v1588_v15 = vmul.f32 %v4356_v0, %v1546_v25  ;;  %v6941_v25 = vld [vmem:[#allocation7 + $0x3e0] sm:$0xff] }
 0x262   :  { %v6947_v0 = vld [vmem:[#allocation7 + $0x3a0] sm:$0xff] }
 0x263   :  { %v1556_v3 = vadd.f32 %v4352_v55, %v1555_v5 }
 0x264   :  { %v1330_v24 = vpop.f32.mrf.mxu1 }
 0x265   :  { %v1331_v63 = vadd.f32 %v1330_v24, %v1310_v21  ;;  %v1560_v27 = vsel %vm1559_vm11, %v4352_v55, %v1556_v3  ;;  %v1581_v21 = vand.u32 2147483647, %v1571_v7  ;;  %v1584_v3 = vor.u32 1.1754944e-38, %v1583_v1  ;;  %v6976_v1 = vld [vmem:[#allocation7 + $0x2e8] sm:$0xff] }
 0x266   :  { %v4358_v37 = vpop.eup %4357  ;;  %v1565_v59 = vsel %vm1562_vm12, %v1564_v28, %v1560_v27  ;;  %v6950_v27 = vld [vmem:[#allocation7 + $0x3a8] sm:$0xff]  ;;  %10566 = vst [vmem:[#allocation144_spill] sm:$0xff] %v6976_v1 }
 0x267   :  { %v1587_v46 = vmul.f32 %v1565_v59, %v6370_v36  ;;  %v1573_v34 = vmul.f32 %v4358_v37, %v1571_v7  ;;  %v1453_v33 = vadd.f32 %v1331_v63, %v6361_v43  ;;  %vm1578_vm13 = vweird.f32 %v4358_v37  ;;  %v6944_v7 = vld [vmem:[#allocation7 + $0x3e8] sm:$0xff] }
 0x268   :  { %vm1579_vm15 = vmor %vm1577_vm14, %vm1578_vm13  ;;  %vm1582_vm0 = vcmp.eq.f32.partialorder %v1581_v21, 8.507059e+37  ;;  %v6988_v21 = vld [vmem:[#allocation7 + $0x268] sm:$0xff] }
 0x269   :  { %v6933_v50 = vadd.f32 %v1588_v15, %v1587_v46  ;;  %v1574_v30 = vsub.f32 1.0, %v1573_v34  ;;  %v4234_v23 = vmul.f32 -1.442695, %v1453_v33  ;;  %v6957_v34 = vld [vmem:[#allocation7 + $0x360] sm:$0xff]  ;;  %v6960_v33 = vld [vmem:[#allocation7 + $0x368] sm:$0xff]  ;;  %10570 = vst [vmem:[#allocation152_spill] sm:$0xff] %v6988_v21 }
 0x26a   :  { %v1370_v49 = vpop.f32.mrf.mxu3  ;;  %10562 = vst [vmem:[#allocation130_spill] sm:$0xff] %v6960_v33 }
 0x26b   :  { %v1371_v5 = vadd.f32 %v1370_v49, %v1350_v41  ;;  %4359 = vtanh.f32 %v6933_v50  ;;  %v1575_v55 = vmul.f32 %v4358_v37, %v1574_v30  ;;  %v6963_v41 = vld [vmem:[#allocation7 + $0x320] sm:$0xff]  ;;  %v6966_v30 = vld [vmem:[#allocation7 + $0x328] sm:$0xff] }
 0x26c   :  { %4361 = vpow2.f32 %v4234_v23  ;;  %10563 = vst [vmem:[#allocation134_spill] sm:$0xff] %v6963_v41  ;;  %v6982_v23 = vld [vmem:[#allocation7 + $0x2a8] sm:$0xff] }
 0x26d   :  { %v1454_v20 = vadd.f32 %v1371_v5, %v6366_v32  ;;  %v1576_v36 = vadd.f32 %v4358_v37, %v1575_v55  ;;  %10564 = vst [vmem:[#allocation135_spill] sm:$0xff] %v6966_v30  ;;  %v6973_v5 = vld [vmem:[#allocation7 + $0x2e0] sm:$0xff] }
 0x26e   :  { %10565 = vst [vmem:[#allocation139_spill] sm:$0xff] %v6973_v5  ;;  %v6979_v55 = vld [vmem:[#allocation7 + $0x2a0] sm:$0xff] }
 0x26f   :  { %v4235_v44 = vmul.f32 -1.442695, %v1454_v20  ;;  %v1580_v24 = vsel %vm1579_vm15, %v4358_v37, %v1576_v36  ;;  %10567 = vst [vmem:[#allocation148_spill] sm:$0xff] %v6979_v55  ;;  %v6985_v20 = vld [vmem:[#allocation7 + $0x260] sm:$0xff] }
 0x270   :  { %v1585_v49 = vsel %vm1582_vm0, %v1584_v3, %v1580_v24  ;;  %10568 = vst [vmem:[#allocation149_spill] sm:$0xff] %v6982_v23  ;;  %v6995_v24 = vld [vmem:[#allocation7 + $0x220] sm:$0xff]  ;;  %v6998_v3 = vld [vmem:[#allocation7 + $0x228] sm:$0xff] }
 0x271   :  { %4363 = vpow2.f32 %v4235_v44  ;;  %v4360_v46 = vpop.eup %4359  ;;  %10569 = vst [vmem:[#allocation151_spill] sm:$0xff] %v6985_v20 }
 0x272   :  { %v6937_v63 = vmul.f32 %v4360_v46, %v1585_v49  ;;  %v4362_v28 = vpop.eup %4361  ;;  %10571 = vst [vmem:[#allocation78_spill] sm:$0xff] %v6995_v24  ;;  %v7001_v46 = vld [vmem:[#allocation7 + $0x1e0] sm:$0xff]  ;;  %v7004_v49 = vld [vmem:[#allocation7 + $0x1e8] sm:$0xff] }
 0x273   :  { %v6953_v59 = vadd.f32 1.0, %v4362_v28  ;;  %10572 = vst [vmem:[#allocation79_spill] sm:$0xff] %v6998_v3 }
 0x274   :  { %1611 = vmatmul.f32.vlgmr.msrb.gmra.mxu0 %v6937_v63  ;;  %1651 = vmatmul.f32.vlgmr.msra.gmra.mxu2 %v6937_v63  ;;  %10573 = vst [vmem:[#allocation82_spill] sm:$0xff] %v7001_v46 }
 0x275   :  { %1755 = vmatpush.msrb.mxu0 %v6941_v25  ;;  %1795 = vmatpush.msra.mxu2 %v6944_v7  ;;  %4365 = vrcp.f32 %v6953_v59  ;;  %10574 = vst [vmem:[#allocation83_spill] sm:$0xff] %v7004_v49  ;;  %vm1466_vm3 = vweird.f32 %v6953_v59 }
 0x277   :  { %v4364_v37 = vpop.eup %4363  ;;  %1756 = vmatpush.msrb.mxu0 %v6947_v0  ;;  %1796 = vmatpush.msra.mxu2 %v6950_v27 }
 0x278   :  { %v6955_v15 = vadd.f32 1.0, %v4364_v37 }
 0x279   :  { %1757 = vmatpush.msrb.mxu0 %v6957_v34  ;;  %1797 = vmatpush.msra.mxu2 %v6960_v33  ;;  %v7024_v33 = vld [vmem:[#allocation7 + $0x120] sm:$0xff] }
 0x27a   :  { %4367 = vrcp.f32 %v6955_v15  ;;  %10578 = vst [vmem:[#allocation93_spill] sm:$0xff] %v7024_v33  ;;  %vm1485_vm4 = vweird.f32 %v6955_v15 }
 0x27b   :  { %1758 = vmatpush.msrb.mxu0 %v6963_v41  ;;  %1798 = vmatpush.msra.mxu2 %v6966_v30  ;;  %v6991_v36 = vpop.eup %4365 }
 0x27c   :  { %1691 = vmatmul.f32.vlgmr.msra.gmra.mxu0 %v6937_v63  ;;  %1731 = vmatmul.f32.vlgmr.msrb.gmra.mxu2 %v6937_v63  ;;  %v1462_v28 = vmul.f32 %v6991_v36, %v6953_v59  ;;  %vm1467_vm1 = vweird.f32 %v6991_v36 }
 0x27d   :  { %1759 = vmatpush.msrb.mxu0 %v6973_v5  ;;  %1799 = vmatpush.msra.mxu2 %v6976_v1  ;;  %v7017_v1 = vld [vmem:[#allocation7 + $0x160] sm:$0xff]  ;;  %v7020_v5 = vld [vmem:[#allocation7 + $0x168] sm:$0xff]  ;;  %vm7067_vm5 = vmor %vm1466_vm3, %vm1467_vm1 }
 0x27e   :  { %10577 = vst [vmem:[#allocation92_spill] sm:$0xff] %v7020_v5  ;;  %v1463_v30 = vsub.f32 1.0, %v1462_v28 }
 0x27f   :  { %1760 = vmatpush.msrb.mxu0 %v6979_v55  ;;  %1800 = vmatpush.msra.mxu2 %v6982_v23 }
 0x280   :  { %v6993_v44 = vpop.eup %4367  ;;  %v1464_v28 = vmul.f32 %v6991_v36, %v1463_v30 }
 0x281   :  { %1761 = vmatpush.msrb.mxu0 %v6985_v20  ;;  %1801 = vmatpush.msra.mxu2 %v6988_v21  ;;  %v1481_v37 = vmul.f32 %v6993_v44, %v6955_v15  ;;  %v7011_v20 = vld [vmem:[#allocation7 + $0x1a0] sm:$0xff]  ;;  %vm1486_vm2 = vweird.f32 %v6993_v44 }
 0x282   :  { %10575 = vst [vmem:[#allocation87_spill] sm:$0xff] %v7011_v20  ;;  %vm7077_vm6 = vmor %vm1485_vm4, %vm1486_vm2 }
 0x283   :  { %1762 = vmatpush.msrb.mxu0 %v6995_v24  ;;  %1802 = vmatpush.msra.mxu2 %v6998_v3  ;;  %v1390_v24 = vpop.f32.mrf.mxu0  ;;  %v7014_v3 = vld [vmem:[#allocation7 + $0x1a8] sm:$0xff]  ;;  %v1482_v41 = vsub.f32 1.0, %v1481_v37  ;;  %v7039_v37 = vld [vmem:[#allocation7 + $0xa0] sm:$0xff] }
 0x284   :  { %v1410_v21 = vpop.f32.mrf.mxu1  ;;  %10576 = vst [vmem:[#allocation88_spill] sm:$0xff] %v7014_v3 }
 0x285   :  { %1763 = vmatpush.msrb.mxu0 %v7001_v46  ;;  %1803 = vmatpush.msra.mxu2 %v7004_v49  ;;  %v1430_v46 = vpop.f32.mrf.mxu2  ;;  %v1411_v55 = vadd.f32 %v1410_v21, %v1390_v24  ;;  %v7031_v24 = vld [vmem:[#allocation7 + $0xe0] sm:$0xff]  ;;  %10582 = vst [vmem:[#allocation102_spill] sm:$0xff] %v7039_v37 }
 0x286   :  { %10580 = vst [vmem:[#allocation97_spill] sm:$0xff] %v7031_v24 }
 0x287   :  { %1764 = vmatpush.msrb.mxu0 %v7011_v20  ;;  %1804 = vmatpush.msra.mxu2 %v7014_v3  ;;  %v7027_v3 = vld [vmem:[#allocation7 + $0x128] sm:$0xff] }
 0x288   :  { %10579 = vst [vmem:[#allocation96_spill] sm:$0xff] %v7027_v3 }
 0x289   :  { %1765 = vmatpush.msrb.mxu0 %v7017_v1  ;;  %1805 = vmatpush.msra.mxu2 %v7020_v5  ;;  %v7093_v5 = vld [vmem:[#allocation7 + $0x3b0] sm:$0xff] }
 0x28a   :  { %v1450_v23 = vpop.f32.mrf.mxu3 }
 0x28b   :  { %v1451_v49 = vadd.f32 %v1450_v23, %v1430_v46  ;;  %1766 = vmatpush.msrb.mxu0 %v7024_v33  ;;  %1806 = vmatpush.msra.mxu2 %v7027_v3  ;;  %v1455_v23 = vadd.f32 %v1411_v55, %v6416_v62  ;;  %v7034_v46 = vld [vmem:[#allocation7 + $0xe8] sm:$0xff]  ;;  %v7046_v55 = vld [vmem:[#allocation7 + $0x60] sm:$0xff] }
 0x28c   :  { %10581 = vst [vmem:[#allocation101_spill] sm:$0xff] %v7034_v46  ;;  %v7042_v3 = vld [vmem:[#allocation7 + $0xa8] sm:$0xff] }
 0x28d   :  { %v1456_v20 = vadd.f32 %v1451_v49, %v6411_v53  ;;  %1767 = vmatpush.msrb.mxu0 %v7031_v24  ;;  %1807 = vmatpush.msra.mxu2 %v7034_v46  ;;  %v1483_v49 = vmul.f32 %v6993_v44, %v1482_v41  ;;  %10583 = vst [vmem:[#allocation105_spill] sm:$0xff] %v7042_v3  ;;  %v7084_v46 = vld [vmem:[#allocation7 + $0x3f8] sm:$0xff] }
 0x28e   :  { %10584 = vst [vmem:[#allocation106_spill] sm:$0xff] %v7046_v55  ;;  %v1465_v41 = vadd.f32 %v6991_v36, %v1464_v28  ;;  %v1470_v28 = vand.u32 2147483647, %v6953_v59 }
 0x28f   :  { %v4236_v21 = vmul.f32 -1.442695, %v1456_v20  ;;  %1768 = vmatpush.msrb.mxu0 %v7039_v37  ;;  %1808 = vmatpush.msra.mxu2 %v7042_v3  ;;  %v7049_v20 = vld [vmem:[#allocation7 + $0x68] sm:$0xff]  ;;  %v1484_v30 = vadd.f32 %v6993_v44, %v1483_v49  ;;  %v7058_v3 = vld [vmem:[#allocation7 + $0x20] sm:$0xff]  ;;  %v7081_v37 = vld [vmem:[#allocation7 + $0x3f0] sm:$0xff] }
 0x290   :  { %10585 = vst [vmem:[#allocation110_spill] sm:$0xff] %v7049_v20  ;;  %vm1471_vm7 = vcmp.eq.f32.partialorder %v1470_v28, 8.507059e+37  ;;  %v7099_v49 = vld [vmem:[#allocation7 + $0x370] sm:$0xff] }
 0x291   :  { %4369 = vpow2.f32 %v4236_v21  ;;  %1769 = vmatpush.msrb.mxu0 %v7046_v55  ;;  %1809 = vmatpush.msra.mxu2 %v7049_v20  ;;  %v1491_v21 = vand.u32 2147483648, %v6955_v15  ;;  %10586 = vst [vmem:[#allocation111_spill] sm:$0xff] %v7058_v3  ;;  %v7061_v55 = vld [vmem:[#allocation7 + $0x28] sm:$0xff]  ;;  %v1489_v20 = vand.u32 2147483647, %v6955_v15  ;;  %v1488_v15 = vsel %vm7077_vm6, %v6993_v44, %v1484_v30  ;;  %v7102_v44 = vld [vmem:[#allocation7 + $0x378] sm:$0xff] }
 0x292   :  { %4371 = vtanh.f32 %v1455_v23  ;;  %v1472_v23 = vand.u32 2147483648, %v6953_v59  ;;  %10587 = vst [vmem:[#allocation115_spill] sm:$0xff] %v7061_v55  ;;  %v1469_v59 = vsel %vm7067_vm5, %v6991_v36, %v1465_v41  ;;  %v7108_v30 = vld [vmem:[#allocation7 + $0x338] sm:$0xff]  ;;  %v7120_v28 = vld [vmem:[#allocation7 + $0x2b0] sm:$0xff] }
 0x293   :  { %1770 = vmatpush.msrb.mxu0 %v7058_v3  ;;  %1810 = vmatpush.msra.mxu2 %v7061_v55  ;;  %10592 = vst [vmem:[#allocation116_spill] sm:$0xff] %v7081_v37  ;;  %v1492_v33 = vor.u32 1.1754944e-38, %v1491_v21  ;;  %vm1490_vm8 = vcmp.eq.f32.partialorder %v1489_v20, 8.507059e+37  ;;  %v7105_v55 = vld [vmem:[#allocation7 + $0x330] sm:$0xff]  ;;  %v7115_v20 = vld [vmem:[#allocation7 + $0x2f8] sm:$0xff] }
 0x294   :  { %1771 = vmatmul.f32.vlgmr.msrb.gmra.mxu0 %v6937_v63  ;;  %1811 = vmatmul.f32.vlgmr.msra.gmra.mxu2 %v6937_v63  ;;  %v1473_v53 = vor.u32 1.1754944e-38, %v1472_v23  ;;  %10594 = vst [vmem:[#allocation124_spill] sm:$0xff] %v7115_v20 }
 0x295   :  { %1835 = vmatpush.msra.mxu0 %v7081_v37  ;;  %1875 = vmatpush.msrb.mxu2 %v7084_v46  ;;  %v7096_v37 = vld [vmem:[#allocation7 + $0x3b8] sm:$0xff]  ;;  %v1493_v41 = vsel %vm1490_vm8, %v1492_v33, %v1488_v15  ;;  %v7112_v33 = vld [vmem:[#allocation7 + $0x2f0] sm:$0xff]  ;;  %10595 = vst [vmem:[#allocation127_spill] sm:$0xff] %v7120_v28 }
 0x296   :  { %v1474_v36 = vsel %vm1471_vm7, %v1473_v53, %v1469_v59  ;;  %v1515_v53 = vmul.f32 %v1493_v41, %v6470_v11  ;;  %10593 = vst [vmem:[#allocation123_spill] sm:$0xff] %v7112_v33  ;;  %v7123_v59 = vld [vmem:[#allocation7 + $0x2b8] sm:$0xff]  ;;  %v7126_v15 = vld [vmem:[#allocation7 + $0x270] sm:$0xff] }
 0x297   :  { %v4370_v3 = vpop.eup %4369  ;;  %1836 = vmatpush.msra.mxu0 %v7093_v5  ;;  %1876 = vmatpush.msrb.mxu2 %v7096_v37  ;;  %10596 = vst [vmem:[#allocation128_spill] sm:$0xff] %v7123_v59 }
 0x298   :  { %v1499_v24 = vadd.f32 1.0, %v4370_v3  ;;  %v4372_v62 = vpop.eup %4371  ;;  %10597 = vst [vmem:[#allocation132_spill] sm:$0xff] %v7126_v15 }
 0x299   :  { %1837 = vmatpush.msra.mxu0 %v7099_v49  ;;  %1877 = vmatpush.msrb.mxu2 %v7102_v44  ;;  %v1516_v3 = vmul.f32 %v4372_v62, %v1474_v36  ;;  %v7129_v36 = vld [vmem:[#allocation7 + $0x278] sm:$0xff] }
 0x29a   :  { %4373 = vrcp.f32 %v1499_v24  ;;  %10598 = vst [vmem:[#allocation133_spill] sm:$0xff] %v7129_v36  ;;  %v1511_v41 = vand.u32 2147483648, %v1499_v24  ;;  %vm1505_vm10 = vweird.f32 %v1499_v24 }
 0x29b   :  { %1838 = vmatpush.msra.mxu0 %v7105_v55  ;;  %1878 = vmatpush.msrb.mxu2 %v7108_v30  ;;  %v7118_v62 = vadd.f32 %v1516_v3, %v1515_v53  ;;  %v1509_v53 = vand.u32 2147483647, %v1499_v24 }
 0x29d   :  { %1839 = vmatpush.msra.mxu0 %v7112_v33  ;;  %1879 = vmatpush.msrb.mxu2 %v7115_v20  ;;  %4375 = vtanh.f32 %v7118_v62  ;;  %vm1510_vm12 = vcmp.eq.f32.partialorder %v1509_v53, 8.507059e+37  ;;  %v7145_v33 = vld [vmem:[#allocation7 + $0x1b0] sm:$0xff]  ;;  %v7174_v53 = vld [vmem:[#allocation7 + $0xf8] sm:$0xff] }
 0x29f   :  { %1840 = vmatpush.msra.mxu0 %v7120_v28  ;;  %1880 = vmatpush.msrb.mxu2 %v7123_v59  ;;  %v7133_v28 = vld [vmem:[#allocation7 + $0x230] sm:$0xff]  ;;  %v7136_v59 = vld [vmem:[#allocation7 + $0x238] sm:$0xff] }
 0x2a0   :  { %v4374_v21 = vpop.eup %4373  ;;  %10599 = vst [vmem:[#allocation137_spill] sm:$0xff] %v7133_v28 }
 0x2a1   :  { %v1501_v23 = vmul.f32 %v4374_v21, %v1499_v24  ;;  %1841 = vmatpush.msra.mxu0 %v7126_v15  ;;  %1881 = vmatpush.msrb.mxu2 %v7129_v36  ;;  %vm1506_vm9 = vweird.f32 %v4374_v21  ;;  %10600 = vst [vmem:[#allocation138_spill] sm:$0xff] %v7136_v59  ;;  %v7139_v15 = vld [vmem:[#allocation7 + $0x1f0] sm:$0xff]  ;;  %v7142_v36 = vld [vmem:[#allocation7 + $0x1f8] sm:$0xff] }
 0x2a2   :  { %10601 = vst [vmem:[#allocation141_spill] sm:$0xff] %v7139_v15  ;;  %vm1507_vm11 = vmor %vm1505_vm10, %vm1506_vm9 }
 0x2a3   :  { %v1502_v11 = vsub.f32 1.0, %v1501_v23  ;;  %1842 = vmatpush.msra.mxu0 %v7133_v28  ;;  %1882 = vmatpush.msrb.mxu2 %v7136_v59  ;;  %10602 = vst [vmem:[#allocation142_spill] sm:$0xff] %v7142_v36  ;;  %v7148_v28 = vld [vmem:[#allocation7 + $0x1b8] sm:$0xff]  ;;  %v4376_v24 = vpop.eup %4375 }
 0x2a5   :  { %v1503_v3 = vmul.f32 %v4374_v21, %v1502_v11  ;;  %1843 = vmatpush.msra.mxu0 %v7139_v15  ;;  %1883 = vmatpush.msrb.mxu2 %v7142_v36  ;;  %v1512_v11 = vor.u32 1.1754944e-38, %v1511_v41  ;;  %v7153_v15 = vld [vmem:[#allocation7 + $0x170] sm:$0xff]  ;;  %v7156_v36 = vld [vmem:[#allocation7 + $0x178] sm:$0xff] }
 0x2a6   :  { %v7171_v41 = vld [vmem:[#allocation7 + $0xf0] sm:$0xff] }
 0x2a7   :  { %v1504_v23 = vadd.f32 %v4374_v21, %v1503_v3  ;;  %1844 = vmatpush.msra.mxu0 %v7145_v33  ;;  %1884 = vmatpush.msrb.mxu2 %v7148_v28 }
 0x2a9   :  { %v1508_v20 = vsel %vm1507_vm11, %v4374_v21, %v1504_v23  ;;  %1845 = vmatpush.msra.mxu0 %v7153_v15  ;;  %1885 = vmatpush.msrb.mxu2 %v7156_v36  ;;  %v7163_v21 = vld [vmem:[#allocation7 + $0x130] sm:$0xff]  ;;  %v7304_v23 = vld [vmem:[#allocation7 + $0x108] sm:$0xff] }
 0x2aa   :  { %v1513_v3 = vsel %vm1510_vm12, %v1512_v11, %v1508_v20  ;;  %v7166_v20 = vld [vmem:[#allocation7 + $0x138] sm:$0xff]  ;;  %v10624_v11 = vld [vmem:[#allocation26_spill] sm:$0xff] }
 0x2ab   :  { %v7151_v59 = vmul.f32 %v4376_v24, %v1513_v3  ;;  %1846 = vmatpush.msra.mxu0 %v7163_v21  ;;  %1886 = vmatpush.msrb.mxu2 %v7166_v20  ;;  %v10625_v24 = vld [vmem:[#allocation27_spill] sm:$0xff]  ;;  %v7309_v3 = vld [vmem:[#allocation7 + $0xc0] sm:$0xff] }
 0x2ac   :  { %10626 = vst [vmem:[#allocation26_spill] sm:$0xff] %v7309_v3 }
 0x2ad   :  { %1631 = vmatmul.f32.vlgmr.msra.gmra.mxu1 %v7151_v59  ;;  %1671 = vmatmul.f32.vlgmr.msra.gmra.mxu3 %v7151_v59 }
 0x2ae   :  { %1775 = vmatpush.msra.mxu1 %v6489_v42  ;;  %1815 = vmatpush.msra.mxu3 %v6492_v48  ;;  %v7179_v42 = vld [vmem:[#allocation7 + $0xb0] sm:$0xff]  ;;  %v7182_v48 = vld [vmem:[#allocation7 + $0xb8] sm:$0xff] }
 0x2af   :  { %1847 = vmatpush.msra.mxu0 %v7171_v41  ;;  %1887 = vmatpush.msrb.mxu2 %v7174_v53 }
 0x2b0   :  { %1776 = vmatpush.msra.mxu1 %v6497_v57  ;;  %1816 = vmatpush.msra.mxu3 %v6500_v12  ;;  %v7191_v57 = vld [vmem:[#allocation7 + $0x70] sm:$0xff]  ;;  %v7194_v12 = vld [vmem:[#allocation7 + $0x78] sm:$0xff] }
 0x2b1   :  { %1848 = vmatpush.msra.mxu0 %v7179_v42  ;;  %1888 = vmatpush.msrb.mxu2 %v7182_v48 }
 0x2b2   :  { %1777 = vmatpush.msra.mxu1 %v6505_v58  ;;  %1817 = vmatpush.msra.mxu3 %v6508_v52  ;;  %v7199_v58 = vld [vmem:[#allocation7 + $0x30] sm:$0xff]  ;;  %v7202_v52 = vld [vmem:[#allocation7 + $0x38] sm:$0xff] }
 0x2b3   :  { %1849 = vmatpush.msra.mxu0 %v7191_v57  ;;  %1889 = vmatpush.msrb.mxu2 %v7194_v12 }
 0x2b4   :  { %1778 = vmatpush.msra.mxu1 %v6513_v29  ;;  %1818 = vmatpush.msra.mxu3 %v6516_v31  ;;  %v7209_v29 = vld [vmem:[#allocation7 + $0x3c0] sm:$0xff]  ;;  %v7212_v31 = vld [vmem:[#allocation7 + $0x3c8] sm:$0xff] }
 0x2b5   :  { %1711 = vmatmul.f32.vlgmr.msrb.gmra.mxu1 %v7151_v59  ;;  %1751 = vmatmul.f32.vlgmr.msrb.gmra.mxu3 %v7151_v59 }
 0x2b6   :  { %1779 = vmatpush.msra.mxu1 %v6523_v38  ;;  %1819 = vmatpush.msra.mxu3 %v6526_v22  ;;  %v7217_v38 = vld [vmem:[#allocation7 + $0x380] sm:$0xff]  ;;  %v7220_v22 = vld [vmem:[#allocation7 + $0x388] sm:$0xff] }
 0x2b7   :  { %1850 = vmatpush.msra.mxu0 %v7199_v58  ;;  %1890 = vmatpush.msrb.mxu2 %v7202_v52 }
 0x2b8   :  { %1780 = vmatpush.msra.mxu1 %v6531_v61  ;;  %1820 = vmatpush.msra.mxu3 %v6534_v47  ;;  %v7225_v61 = vld [vmem:[#allocation7 + $0x340] sm:$0xff]  ;;  %v7228_v47 = vld [vmem:[#allocation7 + $0x348] sm:$0xff] }
 0x2b9   :  { %1851 = vmatmul.f32.vlgmr.msra.gmra.mxu0 %v6937_v63  ;;  %1891 = vmatmul.f32.vlgmr.msrb.gmra.mxu2 %v6937_v63  ;;  %v7301_v63 = vld [vmem:[#allocation7 + $0x100] sm:$0xff] }
 0x2ba   :  { %1781 = vmatpush.msra.mxu1 %v6541_v9  ;;  %1821 = vmatpush.msra.mxu3 %v6544_v13  ;;  %v7233_v9 = vld [vmem:[#allocation7 + $0x300] sm:$0xff]  ;;  %v7236_v13 = vld [vmem:[#allocation7 + $0x308] sm:$0xff] }
 0x2bb   :  { %2057 = vmatpush.msrb.mxu0 %v7209_v29  ;;  %2097 = vmatpush.msra.mxu2 %v7212_v31 }
 0x2bc   :  { %1782 = vmatpush.msra.mxu1 %v6549_v8  ;;  %1822 = vmatpush.msra.mxu3 %v6552_v19  ;;  %v7241_v8 = vld [vmem:[#allocation7 + $0x2c0] sm:$0xff]  ;;  %v7244_v19 = vld [vmem:[#allocation7 + $0x2c8] sm:$0xff] }
 0x2bd   :  { %2058 = vmatpush.msrb.mxu0 %v7217_v38  ;;  %2098 = vmatpush.msra.mxu2 %v7220_v22  ;;  %10603 = vst [vmem:[#allocation117_spill] sm:$0xff] %v7241_v8 }
 0x2be   :  { %1783 = vmatpush.msra.mxu1 %v6557_v56  ;;  %1823 = vmatpush.msra.mxu3 %v6560_v14  ;;  %10604 = vst [vmem:[#allocation60_spill] sm:$0xff] %v7244_v19  ;;  %v7249_v56 = vld [vmem:[#allocation7 + $0x280] sm:$0xff]  ;;  %v7252_v14 = vld [vmem:[#allocation7 + $0x288] sm:$0xff] }
 0x2bf   :  { %2059 = vmatpush.msrb.mxu0 %v7225_v61  ;;  %2099 = vmatpush.msra.mxu2 %v7228_v47  ;;  %10605 = vst [vmem:[#allocation63_spill] sm:$0xff] %v7249_v56 }
 0x2c0   :  { %1784 = vmatpush.msra.mxu1 %v6565_v45  ;;  %1824 = vmatpush.msra.mxu3 %v6568_v51  ;;  %10606 = vst [vmem:[#allocation68_spill] sm:$0xff] %v7252_v14  ;;  %v7257_v45 = vld [vmem:[#allocation7 + $0x240] sm:$0xff]  ;;  %v7260_v51 = vld [vmem:[#allocation7 + $0x248] sm:$0xff] }
 0x2c1   :  { %2060 = vmatpush.msrb.mxu0 %v7233_v9  ;;  %2100 = vmatpush.msra.mxu2 %v7236_v13  ;;  %10607 = vst [vmem:[#allocation158_spill] sm:$0xff] %v7257_v45 }
 0x2c2   :  { %1785 = vmatpush.msra.mxu1 %v6573_v40  ;;  %1825 = vmatpush.msra.mxu3 %v6576_v54  ;;  %10608 = vst [vmem:[#allocation159_spill] sm:$0xff] %v7260_v51  ;;  %v7265_v40 = vld [vmem:[#allocation7 + $0x200] sm:$0xff]  ;;  %v7268_v54 = vld [vmem:[#allocation7 + $0x208] sm:$0xff] }
 0x2c3   :  { %2061 = vmatpush.msrb.mxu0 %v7241_v8  ;;  %2101 = vmatpush.msra.mxu2 %v7244_v19  ;;  %10609 = vst [vmem:[#allocation160_spill] sm:$0xff] %v7265_v40 }
 0x2c4   :  { %1786 = vmatpush.msra.mxu1 %v6581_v60  ;;  %1826 = vmatpush.msra.mxu3 %v6584_v4  ;;  %10610 = vst [vmem:[#allocation161_spill] sm:$0xff] %v7268_v54  ;;  %v7273_v60 = vld [vmem:[#allocation7 + $0x1c0] sm:$0xff]  ;;  %v7276_v4 = vld [vmem:[#allocation7 + $0x1c8] sm:$0xff] }
 0x2c5   :  { %2062 = vmatpush.msrb.mxu0 %v7249_v56  ;;  %2102 = vmatpush.msra.mxu2 %v7252_v14  ;;  %10611 = vst [vmem:[#allocation162_spill] sm:$0xff] %v7273_v60 }
 0x2c6   :  { %1787 = vmatpush.msra.mxu1 %v6589_v17  ;;  %1827 = vmatpush.msra.mxu3 %v6592_v10  ;;  %10612 = vst [vmem:[#allocation163_spill] sm:$0xff] %v7276_v4  ;;  %v10613_v17 = vld [vmem:[#allocation21_spill] sm:$0xff] }
 0x2c7   :  { %2063 = vmatpush.msrb.mxu0 %v7257_v45  ;;  %2103 = vmatpush.msra.mxu2 %v7260_v51  ;;  %v7285_v10 = vld [vmem:[#allocation7 + $0x180] sm:$0xff] }
 0x2c8   :  { %1788 = vmatpush.msra.mxu1 %v6597_v39  ;;  %1828 = vmatpush.msra.mxu3 %v6600_v2  ;;  %10614 = vst [vmem:[#allocation21_spill] sm:$0xff] %v7285_v10  ;;  %v7288_v39 = vld [vmem:[#allocation7 + $0x188] sm:$0xff] }
 0x2c9   :  { %2064 = vmatpush.msrb.mxu0 %v7265_v40  ;;  %2104 = vmatpush.msra.mxu2 %v7268_v54  ;;  %10615 = vst [vmem:[#allocation164_spill] sm:$0xff] %v7288_v39  ;;  %v10616_v2 = vld [vmem:[#allocation22_spill] sm:$0xff] }
 0x2ca   :  { %1789 = vmatpush.msra.mxu1 %v6605_v26  ;;  %1829 = vmatpush.msra.mxu3 %v6608_v35  ;;  %v10617_v26 = vld [vmem:[#allocation23_spill] sm:$0xff]  ;;  %v7293_v35 = vld [vmem:[#allocation7 + $0x140] sm:$0xff] }
 0x2cb   :  { %2065 = vmatpush.msrb.mxu0 %v7273_v60  ;;  %2105 = vmatpush.msra.mxu2 %v7276_v4  ;;  %10618 = vst [vmem:[#allocation22_spill] sm:$0xff] %v7293_v35  ;;  %v10756_v4 = vld [vmem:[#allocation16_spill] sm:$0xff] }
 0x2cc   :  { %1790 = vmatpush.msra.mxu1 %v6613_v16  ;;  %1830 = vmatpush.msra.mxu3 %v6616_v18  ;;  %v7296_v16 = vld [vmem:[#allocation7 + $0x148] sm:$0xff]  ;;  %v10620_v18 = vld [vmem:[#allocation24_spill] sm:$0xff] }
 0x2cd   :  { %1791 = vmatmul.f32.vlgmr.msra.gmra.mxu1 %v7151_v59  ;;  %1831 = vmatmul.f32.vlgmr.msra.gmra.mxu3 %v7151_v59  ;;  %10619 = vst [vmem:[#allocation23_spill] sm:$0xff] %v7296_v16 }
 0x2ce   :  { %1855 = vmatpush.msrb.mxu1 %v6621_v6  ;;  %1895 = vmatpush.msrb.mxu3 %v10613_v17  ;;  %v10621_v6 = vld [vmem:[#allocation25_spill] sm:$0xff]  ;;  %10622 = vst [vmem:[#allocation24_spill] sm:$0xff] %v7301_v63  ;;  %v7312_v17 = vld [vmem:[#allocation7 + $0xc8] sm:$0xff] }
 0x2cf   :  { %2066 = vmatpush.msrb.mxu0 %v7285_v10  ;;  %2106 = vmatpush.msra.mxu2 %v7288_v39  ;;  %10623 = vst [vmem:[#allocation25_spill] sm:$0xff] %v7304_v23  ;;  %v10752_v39 = vld [vmem:[#allocation121_spill] sm:$0xff] }
 0x2d0   :  { %1856 = vmatpush.msrb.mxu1 %v10616_v2  ;;  %1896 = vmatpush.msrb.mxu3 %v10617_v26  ;;  %10627 = vst [vmem:[#allocation27_spill] sm:$0xff] %v7312_v17  ;;  %v10628_v2 = vld [vmem:[#allocation28_spill] sm:$0xff]  ;;  %v10629_v26 = vld [vmem:[#allocation29_spill] sm:$0xff] }
 0x2d1   :  { %2067 = vmatpush.msrb.mxu0 %v7293_v35  ;;  %2107 = vmatpush.msra.mxu2 %v7296_v16  ;;  %v10750_v16 = vld [vmem:[#allocation14_spill] sm:$0xff] }
 0x2d2   :  { %1857 = vmatpush.msrb.mxu1 %v10620_v18  ;;  %1897 = vmatpush.msrb.mxu3 %v10621_v6  ;;  %v7317_v18 = vld [vmem:[#allocation7 + $0x80] sm:$0xff]  ;;  %v7320_v6 = vld [vmem:[#allocation7 + $0x88] sm:$0xff] }
 0x2d3   :  { %2068 = vmatpush.msrb.mxu0 %v7301_v63  ;;  %2108 = vmatpush.msra.mxu2 %v7304_v23  ;;  %10630 = vst [vmem:[#allocation28_spill] sm:$0xff] %v7317_v18  ;;  %v10695_v23 = vld [vmem:[#allocation67_spill] sm:$0xff]  ;;  %v10697_v63 = vld [vmem:[#allocation70_spill] sm:$0xff] }
 0x2d4   :  { %1858 = vmatpush.msrb.mxu1 %v10624_v11  ;;  %1898 = vmatpush.msrb.mxu3 %v10625_v24  ;;  %10631 = vst [vmem:[#allocation29_spill] sm:$0xff] %v7320_v6  ;;  %v10632_v11 = vld [vmem:[#allocation30_spill] sm:$0xff]  ;;  %v10633_v24 = vld [vmem:[#allocation31_spill] sm:$0xff] }
 0x2d5   :  { %2069 = vmatpush.msrb.mxu0 %v7309_v3  ;;  %2109 = vmatpush.msra.mxu2 %v7312_v17  ;;  %v7325_v3 = vld [vmem:[#allocation7 + $0x40] sm:$0xff]  ;;  %v7328_v17 = vld [vmem:[#allocation7 + $0x48] sm:$0xff] }
 0x2d6   :  { %1859 = vmatpush.msrb.mxu1 %v10628_v2  ;;  %1899 = vmatpush.msrb.mxu3 %v10629_v26  ;;  %10634 = vst [vmem:[#allocation30_spill] sm:$0xff] %v7325_v3  ;;  %v10636_v2 = vld [vmem:[#allocation32_spill] sm:$0xff]  ;;  %v10637_v26 = vld [vmem:[#allocation33_spill] sm:$0xff] }
 0x2d7   :  { %2070 = vmatpush.msrb.mxu0 %v7317_v18  ;;  %2110 = vmatpush.msra.mxu2 %v7320_v6  ;;  %10635 = vst [vmem:[#allocation31_spill] sm:$0xff] %v7328_v17  ;;  %v7333_v18 = vld [vmem:[#allocation7] sm:$0xff]  ;;  %v7336_v6 = vld [vmem:[#allocation7 + $0x8] sm:$0xff] }
 0x2d8   :  { %1860 = vmatpush.msrb.mxu1 %v10632_v11  ;;  %1900 = vmatpush.msrb.mxu3 %v10633_v24  ;;  %10638 = vst [vmem:[#allocation32_spill] sm:$0xff] %v7333_v18  ;;  %v10640_v11 = vld [vmem:[#allocation34_spill] sm:$0xff]  ;;  %v10641_v24 = vld [vmem:[#allocation35_spill] sm:$0xff] }
 0x2d9   :  { %2071 = vmatpush.msrb.mxu0 %v7325_v3  ;;  %2111 = vmatpush.msra.mxu2 %v7328_v17  ;;  %10639 = vst [vmem:[#allocation33_spill] sm:$0xff] %v7336_v6  ;;  %v7341_v3 = vld [vmem:[#allocation7 + $0x3d0] sm:$0xff]  ;;  %v7344_v17 = vld [vmem:[#allocation7 + $0x3d8] sm:$0xff] }
 0x2da   :  { %1861 = vmatpush.msrb.mxu1 %v10636_v2  ;;  %1901 = vmatpush.msrb.mxu3 %v10637_v26  ;;  %10642 = vst [vmem:[#allocation34_spill] sm:$0xff] %v7341_v3  ;;  %v10644_v2 = vld [vmem:[#allocation36_spill] sm:$0xff]  ;;  %v10645_v26 = vld [vmem:[#allocation37_spill] sm:$0xff] }
 0x2db   :  { %2072 = vmatpush.msrb.mxu0 %v7333_v18  ;;  %2112 = vmatpush.msra.mxu2 %v7336_v6  ;;  %10643 = vst [vmem:[#allocation35_spill] sm:$0xff] %v7344_v17  ;;  %v7349_v18 = vld [vmem:[#allocation7 + $0x390] sm:$0xff]  ;;  %v7352_v6 = vld [vmem:[#allocation7 + $0x398] sm:$0xff] }
 0x2dc   :  { %1862 = vmatpush.msrb.mxu1 %v10640_v11  ;;  %1902 = vmatpush.msrb.mxu3 %v10641_v24  ;;  %10646 = vst [vmem:[#allocation36_spill] sm:$0xff] %v7349_v18  ;;  %v10648_v11 = vld [vmem:[#allocation38_spill] sm:$0xff]  ;;  %v10649_v24 = vld [vmem:[#allocation39_spill] sm:$0xff] }
 0x2dd   :  { %2137 = vmatpush.msra.mxu0 %v7341_v3  ;;  %2177 = vmatpush.msrb.mxu2 %v7344_v17  ;;  %10647 = vst [vmem:[#allocation37_spill] sm:$0xff] %v7352_v6  ;;  %v7357_v3 = vld [vmem:[#allocation7 + $0x350] sm:$0xff]  ;;  %v7360_v17 = vld [vmem:[#allocation7 + $0x358] sm:$0xff] }
 0x2de   :  { %1863 = vmatpush.msrb.mxu1 %v10644_v2  ;;  %1903 = vmatpush.msrb.mxu3 %v10645_v26  ;;  %10650 = vst [vmem:[#allocation38_spill] sm:$0xff] %v7357_v3  ;;  %v10652_v2 = vld [vmem:[#allocation40_spill] sm:$0xff]  ;;  %v10653_v26 = vld [vmem:[#allocation41_spill] sm:$0xff] }
 0x2df   :  { %2138 = vmatpush.msra.mxu0 %v7349_v18  ;;  %2178 = vmatpush.msrb.mxu2 %v7352_v6  ;;  %10651 = vst [vmem:[#allocation39_spill] sm:$0xff] %v7360_v17  ;;  %v7365_v18 = vld [vmem:[#allocation7 + $0x310] sm:$0xff]  ;;  %v7368_v6 = vld [vmem:[#allocation7 + $0x318] sm:$0xff] }
 0x2e0   :  { %1864 = vmatpush.msrb.mxu1 %v10648_v11  ;;  %1904 = vmatpush.msrb.mxu3 %v10649_v24  ;;  %10654 = vst [vmem:[#allocation40_spill] sm:$0xff] %v7365_v18  ;;  %v10656_v11 = vld [vmem:[#allocation42_spill] sm:$0xff]  ;;  %v10657_v24 = vld [vmem:[#allocation43_spill] sm:$0xff] }
 0x2e1   :  { %2139 = vmatpush.msra.mxu0 %v7357_v3  ;;  %2179 = vmatpush.msrb.mxu2 %v7360_v17  ;;  %10655 = vst [vmem:[#allocation41_spill] sm:$0xff] %v7368_v6  ;;  %v7373_v3 = vld [vmem:[#allocation7 + $0x2d0] sm:$0xff]  ;;  %v7376_v17 = vld [vmem:[#allocation7 + $0x2d8] sm:$0xff] }
 0x2e2   :  { %1865 = vmatpush.msrb.mxu1 %v10652_v2  ;;  %1905 = vmatpush.msrb.mxu3 %v10653_v26  ;;  %10658 = vst [vmem:[#allocation42_spill] sm:$0xff] %v7373_v3  ;;  %v10660_v2 = vld [vmem:[#allocation44_spill] sm:$0xff]  ;;  %v10661_v26 = vld [vmem:[#allocation45_spill] sm:$0xff] }
 0x2e3   :  { %2140 = vmatpush.msra.mxu0 %v7365_v18  ;;  %2180 = vmatpush.msrb.mxu2 %v7368_v6  ;;  %10659 = vst [vmem:[#allocation43_spill] sm:$0xff] %v7376_v17  ;;  %v7381_v18 = vld [vmem:[#allocation7 + $0x290] sm:$0xff]  ;;  %v7384_v6 = vld [vmem:[#allocation7 + $0x298] sm:$0xff] }
 0x2e4   :  { %1866 = vmatpush.msrb.mxu1 %v10656_v11  ;;  %1906 = vmatpush.msrb.mxu3 %v10657_v24  ;;  %10662 = vst [vmem:[#allocation44_spill] sm:$0xff] %v7381_v18  ;;  %v10664_v11 = vld [vmem:[#allocation46_spill] sm:$0xff]  ;;  %v10665_v24 = vld [vmem:[#allocation47_spill] sm:$0xff] }
 0x2e5   :  { %2141 = vmatpush.msra.mxu0 %v7373_v3  ;;  %2181 = vmatpush.msrb.mxu2 %v7376_v17  ;;  %10663 = vst [vmem:[#allocation45_spill] sm:$0xff] %v7384_v6  ;;  %v7389_v3 = vld [vmem:[#allocation7 + $0x250] sm:$0xff]  ;;  %v7392_v17 = vld [vmem:[#allocation7 + $0x258] sm:$0xff] }
 0x2e6   :  { %1867 = vmatpush.msrb.mxu1 %v10660_v2  ;;  %1907 = vmatpush.msrb.mxu3 %v10661_v26  ;;  %10666 = vst [vmem:[#allocation46_spill] sm:$0xff] %v7389_v3  ;;  %v10668_v2 = vld [vmem:[#allocation48_spill] sm:$0xff]  ;;  %v10669_v26 = vld [vmem:[#allocation49_spill] sm:$0xff] }
 0x2e7   :  { %2142 = vmatpush.msra.mxu0 %v7381_v18  ;;  %2182 = vmatpush.msrb.mxu2 %v7384_v6  ;;  %10667 = vst [vmem:[#allocation47_spill] sm:$0xff] %v7392_v17  ;;  %v7397_v18 = vld [vmem:[#allocation7 + $0x210] sm:$0xff]  ;;  %v7400_v6 = vld [vmem:[#allocation7 + $0x218] sm:$0xff] }
 0x2e8   :  { %1868 = vmatpush.msrb.mxu1 %v10664_v11  ;;  %1908 = vmatpush.msrb.mxu3 %v10665_v24  ;;  %10670 = vst [vmem:[#allocation48_spill] sm:$0xff] %v7397_v18  ;;  %v10672_v11 = vld [vmem:[#allocation50_spill] sm:$0xff]  ;;  %v10673_v24 = vld [vmem:[#allocation51_spill] sm:$0xff] }
 0x2e9   :  { %2143 = vmatpush.msra.mxu0 %v7389_v3  ;;  %2183 = vmatpush.msrb.mxu2 %v7392_v17  ;;  %10671 = vst [vmem:[#allocation49_spill] sm:$0xff] %v7400_v6  ;;  %v7407_v17 = vld [vmem:[#allocation7 + $0x1d0] sm:$0xff]  ;;  %v10691_v3 = vld [vmem:[#allocation62_spill] sm:$0xff] }
 0x2ea   :  { %1869 = vmatpush.msrb.mxu1 %v10668_v2  ;;  %1909 = vmatpush.msrb.mxu3 %v10669_v26  ;;  %10674 = vst [vmem:[#allocation50_spill] sm:$0xff] %v7407_v17  ;;  %v7410_v2 = vld [vmem:[#allocation7 + $0x1d8] sm:$0xff] }
 0x2eb   :  { %2144 = vmatpush.msra.mxu0 %v7397_v18  ;;  %2184 = vmatpush.msrb.mxu2 %v7400_v6  ;;  %10675 = vst [vmem:[#allocation51_spill] sm:$0xff] %v7410_v2  ;;  %v10676_v26 = vld [vmem:[#allocation52_spill] sm:$0xff]  ;;  %v10677_v18 = vld [vmem:[#allocation53_spill] sm:$0xff]  ;;  %v7415_v6 = vld [vmem:[#allocation7 + $0x190] sm:$0xff] }
 0x2ec   :  { %1870 = vmatpush.msrb.mxu1 %v10672_v11  ;;  %1910 = vmatpush.msrb.mxu3 %v10673_v24  ;;  %10678 = vst [vmem:[#allocation52_spill] sm:$0xff] %v7415_v6  ;;  %v7418_v11 = vld [vmem:[#allocation7 + $0x198] sm:$0xff]  ;;  %v10681_v24 = vld [vmem:[#allocation55_spill] sm:$0xff] }
 0x2ed   :  { %1871 = vmatmul.f32.vlgmr.msrb.gmra.mxu1 %v7151_v59  ;;  %1911 = vmatmul.f32.vlgmr.msrb.gmra.mxu3 %v7151_v59  ;;  %10679 = vst [vmem:[#allocation53_spill] sm:$0xff] %v7418_v11  ;;  %v10680_v59 = vld [vmem:[#allocation54_spill] sm:$0xff] }
 0x2ee   :  { %2145 = vmatpush.msra.mxu0 %v7407_v17  ;;  %2185 = vmatpush.msrb.mxu2 %v7410_v2  ;;  %v7423_v17 = vld [vmem:[#allocation7 + $0x150] sm:$0xff]  ;;  %v7426_v2 = vld [vmem:[#allocation7 + $0x158] sm:$0xff] }
 0x2ef   :  { %2077 = vmatpush.msra.mxu1 %v10676_v26  ;;  %2117 = vmatpush.msra.mxu3 %v10677_v18  ;;  %10682 = vst [vmem:[#allocation54_spill] sm:$0xff] %v7423_v17  ;;  %v10684_v18 = vld [vmem:[#allocation56_spill] sm:$0xff]  ;;  %v10685_v26 = vld [vmem:[#allocation57_spill] sm:$0xff] }
 0x2f0   :  { %2146 = vmatpush.msra.mxu0 %v7415_v6  ;;  %2186 = vmatpush.msrb.mxu2 %v7418_v11  ;;  %10683 = vst [vmem:[#allocation55_spill] sm:$0xff] %v7426_v2  ;;  %v7431_v6 = vld [vmem:[#allocation7 + $0x110] sm:$0xff]  ;;  %v7434_v11 = vld [vmem:[#allocation7 + $0x118] sm:$0xff] }
 0x2f1   :  { %2078 = vmatpush.msra.mxu1 %v10680_v59  ;;  %2118 = vmatpush.msra.mxu3 %v10681_v24  ;;  %10686 = vst [vmem:[#allocation56_spill] sm:$0xff] %v7431_v6  ;;  %v10688_v59 = vld [vmem:[#allocation58_spill] sm:$0xff]  ;;  %v10689_v24 = vld [vmem:[#allocation59_spill] sm:$0xff] }
 0x2f2   :  { %2147 = vmatpush.msra.mxu0 %v7423_v17  ;;  %2187 = vmatpush.msrb.mxu2 %v7426_v2  ;;  %10687 = vst [vmem:[#allocation57_spill] sm:$0xff] %v7434_v11  ;;  %v10690_v17 = vld [vmem:[#allocation61_spill] sm:$0xff]  ;;  %v10692_v2 = vld [vmem:[#allocation64_spill] sm:$0xff] }
 0x2f3   :  { %2079 = vmatpush.msra.mxu1 %v10684_v18  ;;  %2119 = vmatpush.msra.mxu3 %v10685_v26  ;;  %v10693_v18 = vld [vmem:[#allocation65_spill] sm:$0xff]  ;;  %v10694_v26 = vld [vmem:[#allocation66_spill] sm:$0xff] }
 0x2f4   :  { %2148 = vmatpush.msra.mxu0 %v7431_v6  ;;  %2188 = vmatpush.msrb.mxu2 %v7434_v11  ;;  %v10696_v6 = vld [vmem:[#allocation69_spill] sm:$0xff]  ;;  %v10698_v11 = vld [vmem:[#allocation72_spill] sm:$0xff] }
 0x2f5   :  { %2080 = vmatpush.msra.mxu1 %v10688_v59  ;;  %2120 = vmatpush.msra.mxu3 %v10689_v24  ;;  %v10699_v59 = vld [vmem:[#allocation73_spill] sm:$0xff]  ;;  %v10700_v24 = vld [vmem:[#allocation74_spill] sm:$0xff] }
 0x2f6   :  { %2149 = vmatpush.msra.mxu0 %v10690_v17  ;;  %2189 = vmatpush.msrb.mxu2 %v10691_v3  ;;  %v10701_v17 = vld [vmem:[#allocation76_spill] sm:$0xff]  ;;  %v10702_v3 = vld [vmem:[#allocation77_spill] sm:$0xff] }
 0x2f7   :  { %2081 = vmatpush.msra.mxu1 %v10692_v2  ;;  %2121 = vmatpush.msra.mxu3 %v10693_v18  ;;  %v10703_v2 = vld [vmem:[#allocation80_spill] sm:$0xff]  ;;  %v10704_v18 = vld [vmem:[#allocation81_spill] sm:$0xff] }
 0x2f8   :  { %2150 = vmatpush.msra.mxu0 %v10694_v26  ;;  %2190 = vmatpush.msrb.mxu2 %v10695_v23  ;;  %v10705_v26 = vld [vmem:[#allocation85_spill] sm:$0xff]  ;;  %v10706_v23 = vld [vmem:[#allocation86_spill] sm:$0xff] }
 0x2f9   :  { %2082 = vmatpush.msra.mxu1 %v10696_v6  ;;  %2122 = vmatpush.msra.mxu3 %v10697_v63  ;;  %v10707_v6 = vld [vmem:[#allocation90_spill] sm:$0xff]  ;;  %v10708_v63 = vld [vmem:[#allocation91_spill] sm:$0xff] }
 0x2fa   :  { %2151 = vmatpush.msra.mxu0 %v10698_v11  ;;  %2191 = vmatpush.msrb.mxu2 %v10699_v59  ;;  %v10709_v11 = vld [vmem:[#allocation94_spill] sm:$0xff]  ;;  %v10710_v59 = vld [vmem:[#allocation95_spill] sm:$0xff] }
 0x2fb   :  { %2083 = vmatpush.msra.mxu1 %v10700_v24  ;;  %2123 = vmatpush.msra.mxu3 %v10701_v17  ;;  %v10711_v24 = vld [vmem:[#allocation99_spill] sm:$0xff]  ;;  %v7461_v17 = vld [vmem:[#allocation7 + $0x500] sm:$0xff] }
 0x2fc   :  { %2152 = vmatpush.msra.mxu0 %v10702_v3  ;;  %2192 = vmatpush.msrb.mxu2 %v10703_v2  ;;  %10712 = vst [vmem:[#allocation58_spill] sm:$0xff] %v7461_v17  ;;  %v7464_v3 = vld [vmem:[#allocation7 + $0x508] sm:$0xff]  ;;  %v7467_v2 = vld [vmem:[#allocation7 + $0x4c0] sm:$0xff] }
 0x2fd   :  { %2084 = vmatpush.msra.mxu1 %v10704_v18  ;;  %2124 = vmatpush.msra.mxu3 %v10705_v26  ;;  %10713 = vst [vmem:[#allocation59_spill] sm:$0xff] %v7464_v3  ;;  %v7470_v18 = vld [vmem:[#allocation7 + $0x4c8] sm:$0xff]  ;;  %v7473_v26 = vld [vmem:[#allocation7 + $0x480] sm:$0xff] }
 0x2fe   :  { %10714 = vst [vmem:[#allocation61_spill] sm:$0xff] %v7467_v2 }
 0x2ff   :  { %2085 = vmatpush.msra.mxu1 %v10706_v23  ;;  %2125 = vmatpush.msra.mxu3 %v10707_v6  ;;  %10715 = vst [vmem:[#allocation62_spill] sm:$0xff] %v7470_v18  ;;  %v7476_v23 = vld [vmem:[#allocation7 + $0x488] sm:$0xff]  ;;  %v7479_v6 = vld [vmem:[#allocation7 + $0x440] sm:$0xff] }
 0x300   :  { %10716 = vst [vmem:[#allocation64_spill] sm:$0xff] %v7473_v26 }
 0x301   :  { %2086 = vmatpush.msra.mxu1 %v10708_v63  ;;  %2126 = vmatpush.msra.mxu3 %v10709_v11  ;;  %10717 = vst [vmem:[#allocation65_spill] sm:$0xff] %v7476_v23  ;;  %v7482_v63 = vld [vmem:[#allocation7 + $0x448] sm:$0xff]  ;;  %v7485_v11 = vld [vmem:[#allocation7 + $0x400] sm:$0xff] }
 0x302   :  { %10718 = vst [vmem:[#allocation66_spill] sm:$0xff] %v7479_v6 }
 0x303   :  { %2087 = vmatpush.msra.mxu1 %v10710_v59  ;;  %2127 = vmatpush.msra.mxu3 %v10711_v24  ;;  %10719 = vst [vmem:[#allocation67_spill] sm:$0xff] %v7482_v63  ;;  %v7488_v59 = vld [vmem:[#allocation7 + $0x408] sm:$0xff]  ;;  %v7491_v24 = vld [vmem:[#allocation7 + $0x7d0] sm:$0xff] }
 0x304   :  { %10720 = vst [vmem:[#allocation69_spill] sm:$0xff] %v7485_v11 }
 0x305   :  { %2088 = vmatpush.msra.mxu1 %v7461_v17  ;;  %2128 = vmatpush.msra.mxu3 %v7464_v3  ;;  %10721 = vst [vmem:[#allocation70_spill] sm:$0xff] %v7488_v59  ;;  %v10747_v3 = vld [vmem:[#allocation118_spill] sm:$0xff]  ;;  %v10749_v17 = vld [vmem:[#allocation120_spill] sm:$0xff] }
 0x306   :  { %10722 = vst [vmem:[#allocation72_spill] sm:$0xff] %v7491_v24 }
 0x307   :  { %2089 = vmatpush.msra.mxu1 %v7467_v2  ;;  %2129 = vmatpush.msra.mxu3 %v7470_v18  ;;  %v10743_v18 = vld [vmem:[#allocation108_spill] sm:$0xff]  ;;  %v10745_v2 = vld [vmem:[#allocation113_spill] sm:$0xff] }
 0x309   :  { %2090 = vmatpush.msra.mxu1 %v7473_v26  ;;  %2130 = vmatpush.msra.mxu3 %v7476_v23  ;;  %v7494_v23 = vld [vmem:[#allocation7 + $0x7d8] sm:$0xff]  ;;  %v10741_v26 = vld [vmem:[#allocation103_spill] sm:$0xff] }
 0x30a   :  { %10723 = vst [vmem:[#allocation73_spill] sm:$0xff] %v7494_v23 }
 0x30b   :  { %2091 = vmatpush.msra.mxu1 %v7479_v6  ;;  %2131 = vmatpush.msra.mxu3 %v7482_v63  ;;  %v7497_v6 = vld [vmem:[#allocation7 + $0x790] sm:$0xff]  ;;  %v7500_v63 = vld [vmem:[#allocation7 + $0x798] sm:$0xff] }
 0x30c   :  { %10724 = vst [vmem:[#allocation74_spill] sm:$0xff] %v7497_v6 }
 0x30d   :  { %2092 = vmatpush.msra.mxu1 %v7485_v11  ;;  %2132 = vmatpush.msra.mxu3 %v7488_v59  ;;  %10725 = vst [vmem:[#allocation76_spill] sm:$0xff] %v7500_v63  ;;  %v7503_v11 = vld [vmem:[#allocation7 + $0x750] sm:$0xff]  ;;  %v7506_v59 = vld [vmem:[#allocation7 + $0x758] sm:$0xff] }
 0x30e   :  { %10726 = vst [vmem:[#allocation77_spill] sm:$0xff] %v7503_v11 }
 0x30f   :  { %2157 = vmatpush.msrb.mxu1 %v7491_v24  ;;  %2197 = vmatpush.msrb.mxu3 %v7494_v23  ;;  %10727 = vst [vmem:[#allocation80_spill] sm:$0xff] %v7506_v59  ;;  %v7509_v24 = vld [vmem:[#allocation7 + $0x710] sm:$0xff]  ;;  %v7512_v23 = vld [vmem:[#allocation7 + $0x718] sm:$0xff] }
 0x310   :  { %10728 = vst [vmem:[#allocation81_spill] sm:$0xff] %v7509_v24 }
 0x311   :  { %2158 = vmatpush.msrb.mxu1 %v7497_v6  ;;  %2198 = vmatpush.msrb.mxu3 %v7500_v63  ;;  %10729 = vst [vmem:[#allocation85_spill] sm:$0xff] %v7512_v23  ;;  %v7515_v6 = vld [vmem:[#allocation7 + $0x6d0] sm:$0xff]  ;;  %v7518_v63 = vld [vmem:[#allocation7 + $0x6d8] sm:$0xff] }
 0x312   :  { %10730 = vst [vmem:[#allocation86_spill] sm:$0xff] %v7515_v6 }
 0x313   :  { %2159 = vmatpush.msrb.mxu1 %v7503_v11  ;;  %2199 = vmatpush.msrb.mxu3 %v7506_v59  ;;  %10731 = vst [vmem:[#allocation90_spill] sm:$0xff] %v7518_v63  ;;  %v7521_v11 = vld [vmem:[#allocation7 + $0x690] sm:$0xff]  ;;  %v7524_v59 = vld [vmem:[#allocation7 + $0x698] sm:$0xff] }
 0x314   :  { %10732 = vst [vmem:[#allocation91_spill] sm:$0xff] %v7521_v11 }
 0x315   :  { %2160 = vmatpush.msrb.mxu1 %v7509_v24  ;;  %2200 = vmatpush.msrb.mxu3 %v7512_v23  ;;  %10733 = vst [vmem:[#allocation94_spill] sm:$0xff] %v7524_v59  ;;  %v7527_v24 = vld [vmem:[#allocation7 + $0x650] sm:$0xff]  ;;  %v7530_v23 = vld [vmem:[#allocation7 + $0x658] sm:$0xff] }
 0x316   :  { %10734 = vst [vmem:[#allocation95_spill] sm:$0xff] %v7527_v24 }
 0x317   :  { %2161 = vmatpush.msrb.mxu1 %v7515_v6  ;;  %2201 = vmatpush.msrb.mxu3 %v7518_v63  ;;  %10735 = vst [vmem:[#allocation99_spill] sm:$0xff] %v7530_v23  ;;  %v7533_v6 = vld [vmem:[#allocation7 + $0x610] sm:$0xff]  ;;  %v7536_v63 = vld [vmem:[#allocation7 + $0x618] sm:$0xff] }
 0x318   :  { %10736 = vst [vmem:[#allocation165_spill] sm:$0xff] %v7533_v6 }
 0x319   :  { %2162 = vmatpush.msrb.mxu1 %v7521_v11  ;;  %2202 = vmatpush.msrb.mxu3 %v7524_v59  ;;  %10737 = vst [vmem:[#allocation166_spill] sm:$0xff] %v7536_v63  ;;  %v7539_v11 = vld [vmem:[#allocation7 + $0x5d0] sm:$0xff]  ;;  %v7542_v59 = vld [vmem:[#allocation7 + $0x5d8] sm:$0xff] }
 0x31a   :  { %10738 = vst [vmem:[#allocation167_spill] sm:$0xff] %v7539_v11 }
 0x31b   :  { %2163 = vmatpush.msrb.mxu1 %v7527_v24  ;;  %2203 = vmatpush.msrb.mxu3 %v7530_v23  ;;  %10739 = vst [vmem:[#allocation168_spill] sm:$0xff] %v7542_v59  ;;  %v10740_v24 = vld [vmem:[#allocation100_spill] sm:$0xff] }
 0x31c   :  { %v10742_v23 = vld [vmem:[#allocation104_spill] sm:$0xff] }
 0x31d   :  { %2164 = vmatpush.msrb.mxu1 %v7533_v6  ;;  %2204 = vmatpush.msrb.mxu3 %v7536_v63  ;;  %v10744_v6 = vld [vmem:[#allocation109_spill] sm:$0xff]  ;;  %v10746_v63 = vld [vmem:[#allocation114_spill] sm:$0xff] }
 0x31f   :  { %2165 = vmatpush.msrb.mxu1 %v7539_v11  ;;  %2205 = vmatpush.msrb.mxu3 %v7542_v59  ;;  %v10748_v11 = vld [vmem:[#allocation119_spill] sm:$0xff]  ;;  %v1612_v59 = vpop.f32.mrf.mxu0 }
 0x321   :  { %2166 = vmatpush.msrb.mxu1 %v10740_v24  ;;  %2206 = vmatpush.msrb.mxu3 %v10741_v26  ;;  %v10751_v26 = vld [vmem:[#allocation140_spill] sm:$0xff] }
 0x322   :  { %v160_v35 = vadd.f32 %v10751_v26, %v10750_v16 }
 0x323   :  { %2167 = vmatpush.msrb.mxu1 %v10742_v23  ;;  %2207 = vmatpush.msrb.mxu3 %v10743_v18  ;;  %v10753_v18 = vld [vmem:[#allocation125_spill] sm:$0xff] }
 0x325   :  { %2168 = vmatpush.msrb.mxu1 %v10744_v6  ;;  %2208 = vmatpush.msrb.mxu3 %v10745_v2  ;;  %v10754_v2 = vld [vmem:[#allocation126_spill] sm:$0xff] }
 0x327   :  { %2169 = vmatpush.msrb.mxu1 %v10746_v63  ;;  %2209 = vmatpush.msrb.mxu3 %v10747_v3  ;;  %v10755_v63 = vld [vmem:[#allocation129_spill] sm:$0xff]  ;;  %v1652_v3 = vpop.f32.mrf.mxu2 }
 0x329   :  { %2170 = vmatpush.msrb.mxu1 %v10748_v11  ;;  %2210 = vmatpush.msrb.mxu3 %v10749_v17  ;;  %v10757_v17 = vld [vmem:[#allocation71_spill] sm:$0xff] }
 0x32a   :  { %v1632_v24 = vpop.f32.mrf.mxu1  ;;  %v201_v60 = vadd.f32 %v10757_v17, %v10756_v4  ;;  %v10761_v17 = vld [vmem:[#allocation84_spill] sm:$0xff] }
 0x32b   :  { %v1633_v23 = vadd.f32 %v1632_v24, %v1612_v59  ;;  %2171 = vmatpush.msrb.mxu1 %v10752_v39  ;;  %2211 = vmatpush.msrb.mxu3 %v10753_v18 }
 0x32d   :  { %v1987_v6 = vadd.f32 %v1633_v23, %v160_v35  ;;  %2172 = vmatpush.msrb.mxu1 %v10754_v2  ;;  %2212 = vmatpush.msrb.mxu3 %v10755_v63  ;;  %v10758_v35 = vld [vmem:[#allocation18_spill] sm:$0xff]  ;;  %v10759_v23 = vld [vmem:[#allocation75_spill] sm:$0xff] }
 0x32e   :  { %v283_v2 = vadd.f32 %v10759_v23, %v10758_v35 }
 0x32f   :  { %v4243_v10 = vmul.f32 -1.442695, %v1987_v6  ;;  %v1732_v39 = vpop.f32.mrf.mxu2 }
 0x330   :  { %v1672_v11 = vpop.f32.mrf.mxu3 }
 0x331   :  { %4377 = vpow2.f32 %v4243_v10  ;;  %v1673_v54 = vadd.f32 %v1672_v11, %v1652_v3  ;;  %v10760_v11 = vld [vmem:[#allocation20_spill] sm:$0xff] }
 0x332   :  { %v1712_v14 = vpop.f32.mrf.mxu1 }
 0x333   :  { %v1988_v40 = vadd.f32 %v1673_v54, %v201_v60  ;;  %v1692_v54 = vpop.f32.mrf.mxu0 }
 0x334   :  { %v1713_v60 = vadd.f32 %v1712_v14, %v1692_v54 }
 0x335   :  { %v4244_v26 = vmul.f32 -1.442695, %v1988_v40 }
 0x337   :  { %v4378_v59 = vpop.eup %4377  ;;  %4379 = vpow2.f32 %v4244_v26  ;;  %v242_v26 = vadd.f32 %v10761_v17, %v10760_v11  ;;  %v1812_v14 = vpop.f32.mrf.mxu2 }
 0x338   :  { %v1994_v24 = vadd.f32 1.0, %v4378_v59  ;;  %v1752_v18 = vpop.f32.mrf.mxu3 }
 0x339   :  { %v1753_v16 = vadd.f32 %v1752_v18, %v1732_v39  ;;  %v1989_v39 = vadd.f32 %v1713_v60, %v242_v26 }
 0x33a   :  { %4381 = vrcp.f32 %v1994_v24  ;;  %vm2000_vm14 = vweird.f32 %v1994_v24 }
 0x33b   :  { %v1990_v63 = vadd.f32 %v1753_v16, %v283_v2  ;;  %v1772_v54 = vpop.f32.mrf.mxu0 }
 0x33d   :  { %v4380_v6 = vpop.eup %4379  ;;  %v4245_v51 = vmul.f32 -1.442695, %v1990_v63  ;;  %v2006_v63 = vand.u32 2147483648, %v1994_v24 }
 0x33e   :  { %v2013_v45 = vadd.f32 1.0, %v4380_v6  ;;  %v2004_v6 = vand.u32 2147483647, %v1994_v24 }
 0x33f   :  { %4383 = vpow2.f32 %v4245_v51  ;;  %v2007_v17 = vor.u32 1.1754944e-38, %v2006_v63 }
 0x340   :  { %v4382_v10 = vpop.eup %4381  ;;  %4385 = vrcp.f32 %v2013_v45  ;;  %v2025_v35 = vand.u32 2147483648, %v2013_v45  ;;  %vm2019_vm1 = vweird.f32 %v2013_v45  ;;  %vm2005_vm2 = vcmp.eq.f32.partialorder %v2004_v6, 8.507059e+37 }
 0x341   :  { %v1996_v40 = vmul.f32 %v4382_v10, %v1994_v24  ;;  %vm2001_vm13 = vweird.f32 %v4382_v10 }
 0x342   :  { %vm7567_vm15 = vmor %vm2000_vm14, %vm2001_vm13 }
 0x343   :  { %v1997_v3 = vsub.f32 1.0, %v1996_v40 }
 0x345   :  { %v4384_v59 = vpop.eup %4383  ;;  %v1998_v4 = vmul.f32 %v4382_v10, %v1997_v3  ;;  %v2023_v3 = vand.u32 2147483647, %v2013_v45 }
 0x346   :  { %v4386_v23 = vpop.eup %4385  ;;  %v2033_v18 = vadd.f32 1.0, %v4384_v59 }
 0x347   :  { %v2015_v16 = vmul.f32 %v4386_v23, %v2013_v45  ;;  %v1999_v2 = vadd.f32 %v4382_v10, %v1998_v4  ;;  %vm2020_vm0 = vweird.f32 %v4386_v23  ;;  %vm2024_vm4 = vcmp.eq.f32.partialorder %v2023_v3, 8.507059e+37 }
 0x348   :  { %4387 = vrcp.f32 %v2033_v18  ;;  %vm2021_vm3 = vmor %vm2019_vm1, %vm2020_vm0  ;;  %vm2039_vm6 = vweird.f32 %v2033_v18  ;;  %v2043_v3 = vand.u32 2147483647, %v2033_v18 }
 0x349   :  { %v2016_v51 = vsub.f32 1.0, %v2015_v16  ;;  %4389 = vtanh.f32 %v1989_v39  ;;  %v2003_v60 = vsel %vm7567_vm15, %v4382_v10, %v1999_v2  ;;  %v2026_v16 = vor.u32 1.1754944e-38, %v2025_v35 }
 0x34a   :  { %v1792_v4 = vpop.f32.mrf.mxu1  ;;  %v2008_v11 = vsel %vm2005_vm2, %v2007_v17, %v2003_v60  ;;  %vm2044_vm8 = vcmp.eq.f32.partialorder %v2043_v3, 8.507059e+37  ;;  %v1892_v3 = vpop.f32.mrf.mxu2 }
 0x34b   :  { %v2017_v40 = vmul.f32 %v4386_v23, %v2016_v51  ;;  %v1793_v26 = vadd.f32 %v1792_v4, %v1772_v54 }
 0x34d   :  { %v2018_v59 = vadd.f32 %v4386_v23, %v2017_v40  ;;  %v1915_v8 = vadd.f32 %v1793_v26, %v6361_v43 }
 0x34e   :  { %v4388_v24 = vpop.eup %4387 }
 0x34f   :  { %v2022_v56 = vsel %vm2021_vm3, %v4386_v23, %v2018_v59  ;;  %v2035_v39 = vmul.f32 %v4388_v24, %v2033_v18  ;;  %v4390_v19 = vpop.eup %4389  ;;  %vm2040_vm5 = vweird.f32 %v4388_v24  ;;  %v4240_v35 = vmul.f32 -1.442695, %v1915_v8 }
 0x350   :  { %v2027_v51 = vsel %vm2024_vm4, %v2026_v16, %v2022_v56  ;;  %v2050_v2 = vmul.f32 %v4390_v19, %v2008_v11  ;;  %v1832_v54 = vpop.f32.mrf.mxu3  ;;  %v2045_v56 = vand.u32 2147483648, %v2033_v18  ;;  %vm2041_vm7 = vmor %vm2039_vm6, %vm2040_vm5  ;;  %v10764_v16 = vld [vmem:[#allocation130_spill] sm:$0xff] }
 0x351   :  { %v2049_v10 = vmul.f32 %v2027_v51, %v6933_v50  ;;  %v2036_v63 = vsub.f32 1.0, %v2035_v39  ;;  %v1833_v45 = vadd.f32 %v1832_v54, %v1812_v14  ;;  %v10765_v39 = vld [vmem:[#allocation134_spill] sm:$0xff]  ;;  %v10766_v51 = vld [vmem:[#allocation135_spill] sm:$0xff] }
 0x352   :  { %v2046_v19 = vor.u32 1.1754944e-38, %v2045_v56  ;;  %v10771_v14 = vld [vmem:[#allocation151_spill] sm:$0xff]  ;;  %v1852_v56 = vpop.f32.mrf.mxu0 }
 0x353   :  { %v7575_v6 = vadd.f32 %v2050_v2, %v2049_v10  ;;  %v2037_v40 = vmul.f32 %v4388_v24, %v2036_v63  ;;  %v1916_v23 = vadd.f32 %v1833_v45, %v6366_v32  ;;  %v10772_v10 = vld [vmem:[#allocation152_spill] sm:$0xff]  ;;  %v10773_v63 = vld [vmem:[#allocation78_spill] sm:$0xff]  ;;  %v10774_v54 = vld [vmem:[#allocation79_spill] sm:$0xff] }
 0x355   :  { %4391 = vtanh.f32 %v7575_v6  ;;  %v2038_v60 = vadd.f32 %v4388_v24, %v2037_v40  ;;  %v4241_v4 = vmul.f32 -1.442695, %v1916_v23  ;;  %v10775_v23 = vld [vmem:[#allocation82_spill] sm:$0xff] }
 0x356   :  { %4393 = vpow2.f32 %v4240_v35 }
 0x357   :  { %v2042_v50 = vsel %vm2041_vm7, %v4388_v24, %v2038_v60  ;;  %4395 = vpow2.f32 %v4241_v4  ;;  %v10776_v60 = vld [vmem:[#allocation83_spill] sm:$0xff] }
 0x358   :  { %v2047_v17 = vsel %vm2044_vm8, %v2046_v19, %v2042_v50  ;;  %v10777_v50 = vld [vmem:[#allocation87_spill] sm:$0xff]  ;;  %v10778_v19 = vld [vmem:[#allocation88_spill] sm:$0xff] }
 0x35b   :  { %v4392_v11 = vpop.eup %4391 }
 0x35c   :  { %v7579_v26 = vmul.f32 %v4392_v11, %v2047_v17  ;;  %v4394_v8 = vpop.eup %4393 }
 0x35d   :  { %v4396_v59 = vpop.eup %4395  ;;  %v7585_v18 = vadd.f32 1.0, %v4394_v8 }
 0x35e   :  { %2073 = vmatmul.f32.vlgmr.msrb.gmra.mxu0 %v7579_v26  ;;  %2113 = vmatmul.f32.vlgmr.msra.gmra.mxu2 %v7579_v26  ;;  %v7589_v24 = vadd.f32 1.0, %v4396_v59 }
 0x35f   :  { %2217 = vmatpush.msrb.mxu0 %v6941_v25  ;;  %2257 = vmatpush.msra.mxu2 %v6944_v7  ;;  %4397 = vrcp.f32 %v7585_v18  ;;  %v10767_v25 = vld [vmem:[#allocation139_spill] sm:$0xff]  ;;  %v10768_v7 = vld [vmem:[#allocation144_spill] sm:$0xff]  ;;  %vm1928_vm11 = vweird.f32 %v7585_v18 }
 0x360   :  { %4399 = vrcp.f32 %v7589_v24  ;;  %vm1947_vm12 = vweird.f32 %v7589_v24 }
 0x361   :  { %2218 = vmatpush.msrb.mxu0 %v6947_v0  ;;  %2258 = vmatpush.msra.mxu2 %v6950_v27  ;;  %v10769_v0 = vld [vmem:[#allocation148_spill] sm:$0xff]  ;;  %v10770_v27 = vld [vmem:[#allocation149_spill] sm:$0xff] }
 0x363   :  { %2219 = vmatpush.msrb.mxu0 %v6957_v34  ;;  %2259 = vmatpush.msra.mxu2 %v10764_v16  ;;  %v10779_v16 = vld [vmem:[#allocation92_spill] sm:$0xff] }
 0x365   :  { %2220 = vmatpush.msrb.mxu0 %v10765_v39  ;;  %2260 = vmatpush.msra.mxu2 %v10766_v51  ;;  %v7603_v34 = vpop.eup %4397  ;;  %v10780_v39 = vld [vmem:[#allocation156_spill] sm:$0xff] }
 0x366   :  { %2153 = vmatmul.f32.vlgmr.msra.gmra.mxu0 %v7579_v26  ;;  %2193 = vmatmul.f32.vlgmr.msrb.gmra.mxu2 %v7579_v26  ;;  %v7607_v2 = vpop.eup %4399  ;;  %v1924_v45 = vmul.f32 %v7603_v34, %v7585_v18  ;;  %vm1929_vm9 = vweird.f32 %v7603_v34 }
 0x367   :  { %2221 = vmatpush.msrb.mxu0 %v10767_v25  ;;  %2261 = vmatpush.msra.mxu2 %v10768_v7  ;;  %v1943_v40 = vmul.f32 %v7607_v2, %v7589_v24  ;;  %v10781_v25 = vld [vmem:[#allocation93_spill] sm:$0xff]  ;;  %v10782_v7 = vld [vmem:[#allocation96_spill] sm:$0xff]  ;;  %vm1948_vm10 = vweird.f32 %v7607_v2  ;;  %vm7641_vm13 = vmor %vm1928_vm11, %vm1929_vm9 }
 0x368   :  { %v1925_v8 = vsub.f32 1.0, %v1924_v45  ;;  %v10785_v45 = vld [vmem:[#allocation101_spill] sm:$0xff]  ;;  %vm7651_vm14 = vmor %vm1947_vm12, %vm1948_vm10 }
 0x369   :  { %2222 = vmatpush.msrb.mxu0 %v10769_v0  ;;  %2262 = vmatpush.msra.mxu2 %v10770_v27  ;;  %v1944_v59 = vsub.f32 1.0, %v1943_v40  ;;  %v10783_v0 = vld [vmem:[#allocation157_spill] sm:$0xff] }
 0x36a   :  { %v1872_v35 = vpop.f32.mrf.mxu1  ;;  %v10787_v40 = vld [vmem:[#allocation105_spill] sm:$0xff] }
 0x36b   :  { %2223 = vmatpush.msrb.mxu0 %v10771_v14  ;;  %2263 = vmatpush.msra.mxu2 %v10772_v10  ;;  %v1873_v11 = vadd.f32 %v1872_v35, %v1852_v56  ;;  %v1945_v10 = vmul.f32 %v7607_v2, %v1944_v59  ;;  %v10789_v56 = vld [vmem:[#allocation110_spill] sm:$0xff] }
 0x36d   :  { %2224 = vmatpush.msrb.mxu0 %v10773_v63  ;;  %2264 = vmatpush.msra.mxu2 %v10774_v54  ;;  %v1917_v27 = vadd.f32 %v1873_v11, %v10783_v0  ;;  %v1926_v63 = vmul.f32 %v7603_v34, %v1925_v8  ;;  %v10784_v54 = vld [vmem:[#allocation97_spill] sm:$0xff]  ;;  %v1951_v11 = vand.u32 2147483647, %v7589_v24  ;;  %v10793_v8 = vld [vmem:[#allocation115_spill] sm:$0xff] }
 0x36f   :  { %2225 = vmatpush.msrb.mxu0 %v10775_v23  ;;  %2265 = vmatpush.msra.mxu2 %v10776_v60  ;;  %v1927_v35 = vadd.f32 %v7603_v34, %v1926_v63  ;;  %v1946_v23 = vadd.f32 %v7607_v2, %v1945_v10  ;;  %v10788_v60 = vld [vmem:[#allocation106_spill] sm:$0xff]  ;;  %vm1952_vm0 = vcmp.eq.f32.partialorder %v1951_v11, 8.507059e+37 }
 0x370   :  { %v1912_v4 = vpop.f32.mrf.mxu3 }
 0x371   :  { %2226 = vmatpush.msrb.mxu0 %v10777_v50  ;;  %2266 = vmatpush.msra.mxu2 %v10778_v19  ;;  %v1913_v17 = vadd.f32 %v1912_v4, %v1892_v3  ;;  %v1953_v3 = vand.u32 2147483648, %v7589_v24  ;;  %v1934_v4 = vand.u32 2147483648, %v7585_v18  ;;  %v1932_v19 = vand.u32 2147483647, %v7585_v18  ;;  %v10806_v50 = vld [vmem:[#allocation142_spill] sm:$0xff] }
 0x372   :  { %v1931_v18 = vsel %vm7641_vm13, %v7603_v34, %v1927_v35  ;;  %v1950_v24 = vsel %vm7651_vm14, %v7607_v2, %v1946_v23  ;;  %v10803_v23 = vld [vmem:[#allocation137_spill] sm:$0xff] }
 0x373   :  { %2227 = vmatpush.msrb.mxu0 %v7017_v1  ;;  %2267 = vmatpush.msra.mxu2 %v10779_v16  ;;  %v1918_v51 = vadd.f32 %v1913_v17, %v10780_v39  ;;  %v10786_v1 = vld [vmem:[#allocation102_spill] sm:$0xff]  ;;  %v10792_v17 = vld [vmem:[#allocation111_spill] sm:$0xff]  ;;  %vm1933_vm15 = vcmp.eq.f32.partialorder %v1932_v19, 8.507059e+37 }
 0x374   :  { %v7696_v16 = vld [vmem:[#allocation7 + $0x7e8] sm:$0xff] }
 0x375   :  { %2228 = vmatpush.msrb.mxu0 %v10781_v25  ;;  %2268 = vmatpush.msra.mxu2 %v10782_v7  ;;  %v4242_v14 = vmul.f32 -1.442695, %v1918_v51  ;;  %v10796_v25 = vld [vmem:[#allocation116_spill] sm:$0xff] }
 0x377   :  { %2229 = vmatpush.msrb.mxu0 %v10784_v54  ;;  %2269 = vmatpush.msra.mxu2 %v10785_v45  ;;  %4401 = vpow2.f32 %v4242_v14  ;;  %v1935_v14 = vor.u32 1.1754944e-38, %v1934_v4  ;;  %v10797_v45 = vld [vmem:[#allocation123_spill] sm:$0xff]  ;;  %v10805_v4 = vld [vmem:[#allocation141_spill] sm:$0xff] }
 0x378   :  { %4403 = vtanh.f32 %v1917_v27  ;;  %v1954_v27 = vor.u32 1.1754944e-38, %v1953_v3 }
 0x379   :  { %2230 = vmatpush.msrb.mxu0 %v10786_v1  ;;  %2270 = vmatpush.msra.mxu2 %v10787_v40  ;;  %v1936_v34 = vsel %vm1933_vm15, %v1935_v14, %v1931_v18  ;;  %v10799_v1 = vld [vmem:[#allocation127_spill] sm:$0xff]  ;;  %v10800_v40 = vld [vmem:[#allocation128_spill] sm:$0xff]  ;;  %v7743_v18 = vld [vmem:[#allocation7 + $0x660] sm:$0xff] }
 0x37a   :  { %v1955_v10 = vsel %vm1952_vm0, %v1954_v27, %v1950_v24  ;;  %v7783_v24 = vld [vmem:[#allocation7 + $0x520] sm:$0xff]  ;;  %v10811_v27 = vld [vmem:[#allocation158_spill] sm:$0xff]  ;;  %v10812_v14 = vld [vmem:[#allocation159_spill] sm:$0xff] }
 0x37b   :  { %2231 = vmatpush.msrb.mxu0 %v10788_v60  ;;  %2271 = vmatpush.msra.mxu2 %v10789_v56  ;;  %v1977_v2 = vmul.f32 %v1955_v10, %v7118_v62  ;;  %v10801_v62 = vld [vmem:[#allocation132_spill] sm:$0xff]  ;;  %v10804_v60 = vld [vmem:[#allocation138_spill] sm:$0xff] }
 0x37c   :  { %v7802_v10 = vld [vmem:[#allocation7 + $0x4a8] sm:$0xff] }
 0x37d   :  { %2232 = vmatpush.msrb.mxu0 %v10792_v17  ;;  %2272 = vmatpush.msra.mxu2 %v10793_v8  ;;  %v4402_v59 = vpop.eup %4401 }
 0x37e   :  { %2233 = vmatmul.f32.vlgmr.msrb.gmra.mxu0 %v7579_v26  ;;  %2273 = vmatmul.f32.vlgmr.msra.gmra.mxu2 %v7579_v26  ;;  %v1961_v51 = vadd.f32 1.0, %v4402_v59  ;;  %v4404_v7 = vpop.eup %4403  ;;  %v7693_v59 = vld [vmem:[#allocation7 + $0x7e0] sm:$0xff] }
 0x37f   :  { %2297 = vmatpush.msra.mxu0 %v10796_v25  ;;  %2337 = vmatpush.msrb.mxu2 %v7084_v46  ;;  %v1978_v63 = vmul.f32 %v4404_v7, %v1936_v34  ;;  %v7791_v25 = vld [vmem:[#allocation7 + $0x4e0] sm:$0xff]  ;;  %v7794_v7 = vld [vmem:[#allocation7 + $0x4e8] sm:$0xff] }
 0x380   :  { %4405 = vrcp.f32 %v1961_v51  ;;  %v1971_v35 = vand.u32 2147483647, %v1961_v51  ;;  %vm1967_vm2 = vweird.f32 %v1961_v51  ;;  %v7799_v34 = vld [vmem:[#allocation7 + $0x4a0] sm:$0xff] }
 0x381   :  { %2298 = vmatpush.msra.mxu0 %v7093_v5  ;;  %2338 = vmatpush.msrb.mxu2 %v7096_v37  ;;  %v7672_v54 = vadd.f32 %v1978_v63, %v1977_v2  ;;  %v10798_v5 = vld [vmem:[#allocation124_spill] sm:$0xff]  ;;  %v10814_v2 = vld [vmem:[#allocation161_spill] sm:$0xff] }
 0x382   :  { %vm1972_vm4 = vcmp.eq.f32.partialorder %v1971_v35, 8.507059e+37  ;;  %v10813_v63 = vld [vmem:[#allocation160_spill] sm:$0xff] }
 0x383   :  { %2299 = vmatpush.msra.mxu0 %v7099_v49  ;;  %2339 = vmatpush.msrb.mxu2 %v7102_v44  ;;  %4407 = vtanh.f32 %v7672_v54  ;;  %v1973_v44 = vand.u32 2147483648, %v1961_v51  ;;  %v7834_v35 = vld [vmem:[#allocation7 + $0x7b8] sm:$0xff] }
 0x384   :  { %10821 = vst [vmem:[#allocation104_spill] sm:$0xff] %v7834_v35 }
 0x385   :  { %2300 = vmatpush.msra.mxu0 %v7105_v55  ;;  %2340 = vmatpush.msrb.mxu2 %v7108_v30  ;;  %v10802_v55 = vld [vmem:[#allocation133_spill] sm:$0xff]  ;;  %v1974_v3 = vor.u32 1.1754944e-38, %v1973_v44  ;;  %v7826_v44 = vld [vmem:[#allocation7 + $0x7f8] sm:$0xff] }
 0x386   :  { %v4406_v46 = vpop.eup %4405  ;;  %10817 = vst [vmem:[#allocation100_spill] sm:$0xff] %v7826_v44 }
 0x387   :  { %2301 = vmatpush.msra.mxu0 %v10797_v45  ;;  %2341 = vmatpush.msrb.mxu2 %v10798_v5  ;;  %v1963_v37 = vmul.f32 %v4406_v46, %v1961_v51  ;;  %vm1968_vm1 = vweird.f32 %v4406_v46  ;;  %v7786_v51 = vld [vmem:[#allocation7 + $0x528] sm:$0xff] }
 0x388   :  { %vm1969_vm3 = vmor %vm1967_vm2, %vm1968_vm1  ;;  %v7810_v45 = vld [vmem:[#allocation7 + $0x468] sm:$0xff] }
 0x389   :  { %2302 = vmatpush.msra.mxu0 %v10799_v1  ;;  %2342 = vmatpush.msrb.mxu2 %v10800_v40  ;;  %v1964_v49 = vsub.f32 1.0, %v1963_v37  ;;  %v4408_v11 = vpop.eup %4407  ;;  %v10815_v5 = vld [vmem:[#allocation162_spill] sm:$0xff]  ;;  %v10816_v37 = vld [vmem:[#allocation163_spill] sm:$0xff]  ;;  %v7815_v1 = vld [vmem:[#allocation7 + $0x420] sm:$0xff] }
 0x38a   :  { %v7818_v40 = vld [vmem:[#allocation7 + $0x428] sm:$0xff] }
 0x38b   :  { %2303 = vmatpush.msra.mxu0 %v10801_v62  ;;  %2343 = vmatpush.msrb.mxu2 %v10802_v55  ;;  %v1965_v30 = vmul.f32 %v4406_v46, %v1964_v49  ;;  %v7823_v49 = vld [vmem:[#allocation7 + $0x7f0] sm:$0xff]  ;;  %v10818_v62 = vld [vmem:[#allocation21_spill] sm:$0xff]  ;;  %v10819_v55 = vld [vmem:[#allocation164_spill] sm:$0xff] }
 0x38d   :  { %2304 = vmatpush.msra.mxu0 %v10803_v23  ;;  %2344 = vmatpush.msrb.mxu2 %v10804_v60  ;;  %v1966_v56 = vadd.f32 %v4406_v46, %v1965_v30  ;;  %v7831_v30 = vld [vmem:[#allocation7 + $0x7b0] sm:$0xff]  ;;  %v10822_v23 = vld [vmem:[#allocation22_spill] sm:$0xff] }
 0x38e   :  { %10820 = vst [vmem:[#allocation103_spill] sm:$0xff] %v7831_v30  ;;  %v10823_v60 = vld [vmem:[#allocation23_spill] sm:$0xff] }
 0x38f   :  { %2305 = vmatpush.msra.mxu0 %v10805_v4  ;;  %2345 = vmatpush.msrb.mxu2 %v10806_v50  ;;  %v1970_v19 = vsel %vm1969_vm3, %v4406_v46, %v1966_v56  ;;  %v7807_v46 = vld [vmem:[#allocation7 + $0x460] sm:$0xff]  ;;  %v7839_v56 = vld [vmem:[#allocation7 + $0x770] sm:$0xff]  ;;  %v10826_v4 = vld [vmem:[#allocation24_spill] sm:$0xff] }
 0x390   :  { %v1975_v17 = vsel %vm1972_vm4, %v1974_v3, %v1970_v19  ;;  %10824 = vst [vmem:[#allocation108_spill] sm:$0xff] %v7839_v56  ;;  %v7842_v3 = vld [vmem:[#allocation7 + $0x778] sm:$0xff]  ;;  %v10827_v50 = vld [vmem:[#allocation25_spill] sm:$0xff]  ;;  %v7847_v19 = vld [vmem:[#allocation7 + $0x730] sm:$0xff] }
 0x391   :  { %2306 = vmatpush.msra.mxu0 %v7145_v33  ;;  %2346 = vmatpush.msrb.mxu2 %v7148_v28  ;;  %v7687_v8 = vmul.f32 %v4408_v11, %v1975_v17  ;;  %v7701_v33 = vld [vmem:[#allocation7 + $0x7a0] sm:$0xff]  ;;  %v7704_v28 = vld [vmem:[#allocation7 + $0x7a8] sm:$0xff]  ;;  %10825 = vst [vmem:[#allocation109_spill] sm:$0xff] %v7842_v3  ;;  %v7850_v11 = vld [vmem:[#allocation7 + $0x738] sm:$0xff] }
 0x392   :  { %10828 = vst [vmem:[#allocation113_spill] sm:$0xff] %v7847_v19  ;;  %v10830_v17 = vld [vmem:[#allocation26_spill] sm:$0xff] }
 0x393   :  { %2307 = vmatpush.msra.mxu0 %v7153_v15  ;;  %2347 = vmatpush.msrb.mxu2 %v7156_v36  ;;  %v7709_v15 = vld [vmem:[#allocation7 + $0x760] sm:$0xff]  ;;  %v7712_v36 = vld [vmem:[#allocation7 + $0x768] sm:$0xff]  ;;  %10829 = vst [vmem:[#allocation114_spill] sm:$0xff] %v7850_v11 }
 0x394   :  { %2093 = vmatmul.f32.vlgmr.msra.gmra.mxu1 %v7687_v8  ;;  %2133 = vmatmul.f32.vlgmr.msra.gmra.mxu3 %v7687_v8 }
 0x395   :  { %2237 = vmatpush.msra.mxu1 %v7693_v59  ;;  %2277 = vmatpush.msra.mxu3 %v7696_v16 }
 0x396   :  { %2308 = vmatpush.msra.mxu0 %v7163_v21  ;;  %2348 = vmatpush.msrb.mxu2 %v7166_v20  ;;  %v7717_v21 = vld [vmem:[#allocation7 + $0x720] sm:$0xff]  ;;  %v7720_v20 = vld [vmem:[#allocation7 + $0x728] sm:$0xff] }
 0x397   :  { %2238 = vmatpush.msra.mxu1 %v7701_v33  ;;  %2278 = vmatpush.msra.mxu3 %v7704_v28 }
 0x398   :  { %2309 = vmatpush.msra.mxu0 %v7171_v41  ;;  %2349 = vmatpush.msrb.mxu2 %v7174_v53  ;;  %v7725_v41 = vld [vmem:[#allocation7 + $0x6e0] sm:$0xff]  ;;  %v7728_v53 = vld [vmem:[#allocation7 + $0x6e8] sm:$0xff] }
 0x399   :  { %2239 = vmatpush.msra.mxu1 %v7709_v15  ;;  %2279 = vmatpush.msra.mxu3 %v7712_v36 }
 0x39a   :  { %2310 = vmatpush.msra.mxu0 %v7179_v42  ;;  %2350 = vmatpush.msrb.mxu2 %v7182_v48  ;;  %v7733_v42 = vld [vmem:[#allocation7 + $0x6a0] sm:$0xff]  ;;  %v7736_v48 = vld [vmem:[#allocation7 + $0x6a8] sm:$0xff] }
 0x39b   :  { %2240 = vmatpush.msra.mxu1 %v7717_v21  ;;  %2280 = vmatpush.msra.mxu3 %v7720_v20 }
 0x39c   :  { %2173 = vmatmul.f32.vlgmr.msrb.gmra.mxu1 %v7687_v8  ;;  %2213 = vmatmul.f32.vlgmr.msrb.gmra.mxu3 %v7687_v8 }
 0x39d   :  { %2241 = vmatpush.msra.mxu1 %v7725_v41  ;;  %2281 = vmatpush.msra.mxu3 %v7728_v53 }
 0x39e   :  { %2311 = vmatpush.msra.mxu0 %v7191_v57  ;;  %2351 = vmatpush.msrb.mxu2 %v7194_v12  ;;  %v7746_v57 = vld [vmem:[#allocation7 + $0x668] sm:$0xff]  ;;  %v7751_v12 = vld [vmem:[#allocation7 + $0x620] sm:$0xff] }
 0x39f   :  { %2242 = vmatpush.msra.mxu1 %v7733_v42  ;;  %2282 = vmatpush.msra.mxu3 %v7736_v48 }
 0x3a0   :  { %2312 = vmatpush.msra.mxu0 %v7199_v58  ;;  %2352 = vmatpush.msrb.mxu2 %v7202_v52  ;;  %v7754_v58 = vld [vmem:[#allocation7 + $0x628] sm:$0xff]  ;;  %v7759_v52 = vld [vmem:[#allocation7 + $0x5e0] sm:$0xff] }
 0x3a1   :  { %2313 = vmatmul.f32.vlgmr.msra.gmra.mxu0 %v7579_v26  ;;  %2353 = vmatmul.f32.vlgmr.msrb.gmra.mxu2 %v7579_v26  ;;  %v7762_v26 = vld [vmem:[#allocation7 + $0x5e8] sm:$0xff] }
 0x3a2   :  { %2243 = vmatpush.msra.mxu1 %v7743_v18  ;;  %2283 = vmatpush.msra.mxu3 %v7746_v57 }
 0x3a3   :  { %2519 = vmatpush.msrb.mxu0 %v7209_v29  ;;  %2559 = vmatpush.msra.mxu2 %v7212_v31  ;;  %v7767_v29 = vld [vmem:[#allocation7 + $0x5a0] sm:$0xff]  ;;  %v7770_v31 = vld [vmem:[#allocation7 + $0x5a8] sm:$0xff] }
 0x3a4   :  { %2244 = vmatpush.msra.mxu1 %v7751_v12  ;;  %2284 = vmatpush.msra.mxu3 %v7754_v58 }
 0x3a5   :  { %2520 = vmatpush.msrb.mxu0 %v7217_v38  ;;  %2560 = vmatpush.msra.mxu2 %v7220_v22  ;;  %v7775_v38 = vld [vmem:[#allocation7 + $0x560] sm:$0xff]  ;;  %v7778_v22 = vld [vmem:[#allocation7 + $0x568] sm:$0xff] }
 0x3a6   :  { %2245 = vmatpush.msra.mxu1 %v7759_v52  ;;  %2285 = vmatpush.msra.mxu3 %v7762_v26 }
 0x3a7   :  { %2521 = vmatpush.msrb.mxu0 %v7225_v61  ;;  %2561 = vmatpush.msra.mxu2 %v7228_v47  ;;  %v10807_v61 = vld [vmem:[#allocation117_spill] sm:$0xff]  ;;  %v10808_v47 = vld [vmem:[#allocation60_spill] sm:$0xff] }
 0x3a8   :  { %2246 = vmatpush.msra.mxu1 %v7767_v29  ;;  %2286 = vmatpush.msra.mxu3 %v7770_v31 }
 0x3a9   :  { %2522 = vmatpush.msrb.mxu0 %v7233_v9  ;;  %2562 = vmatpush.msra.mxu2 %v7236_v13  ;;  %v10809_v9 = vld [vmem:[#allocation63_spill] sm:$0xff]  ;;  %v10810_v13 = vld [vmem:[#allocation68_spill] sm:$0xff] }
 0x3aa   :  { %2247 = vmatpush.msra.mxu1 %v7775_v38  ;;  %2287 = vmatpush.msra.mxu3 %v7778_v22 }
 0x3ab   :  { %2523 = vmatpush.msrb.mxu0 %v10807_v61  ;;  %2563 = vmatpush.msra.mxu2 %v10808_v47  ;;  %v10831_v61 = vld [vmem:[#allocation27_spill] sm:$0xff] }
 0x3ac   :  { %2248 = vmatpush.msra.mxu1 %v7783_v24  ;;  %2288 = vmatpush.msra.mxu3 %v7786_v51  ;;  %v7855_v47 = vld [vmem:[#allocation7 + $0x6f0] sm:$0xff] }
 0x3ad   :  { %2524 = vmatpush.msrb.mxu0 %v10809_v9  ;;  %2564 = vmatpush.msra.mxu2 %v10810_v13  ;;  %10832 = vst [vmem:[#allocation118_spill] sm:$0xff] %v7855_v47  ;;  %v7858_v9 = vld [vmem:[#allocation7 + $0x6f8] sm:$0xff] }
 0x3ae   :  { %2249 = vmatpush.msra.mxu1 %v7791_v25  ;;  %2289 = vmatpush.msra.mxu3 %v7794_v7  ;;  %10833 = vst [vmem:[#allocation119_spill] sm:$0xff] %v7858_v9  ;;  %v10834_v13 = vld [vmem:[#allocation28_spill] sm:$0xff] }
 0x3af   :  { %2525 = vmatpush.msrb.mxu0 %v10811_v27  ;;  %2565 = vmatpush.msra.mxu2 %v10812_v14  ;;  %v10835_v27 = vld [vmem:[#allocation29_spill] sm:$0xff]  ;;  %v7863_v14 = vld [vmem:[#allocation7 + $0x6b0] sm:$0xff] }
 0x3b0   :  { %2250 = vmatpush.msra.mxu1 %v7799_v34  ;;  %2290 = vmatpush.msra.mxu3 %v7802_v10  ;;  %10836 = vst [vmem:[#allocation120_spill] sm:$0xff] %v7863_v14 }
 0x3b1   :  { %2526 = vmatpush.msrb.mxu0 %v10813_v63  ;;  %2566 = vmatpush.msra.mxu2 %v10814_v2  ;;  %v7866_v63 = vld [vmem:[#allocation7 + $0x6b8] sm:$0xff]  ;;  %v10838_v2 = vld [vmem:[#allocation30_spill] sm:$0xff] }
 0x3b2   :  { %2251 = vmatpush.msra.mxu1 %v7807_v46  ;;  %2291 = vmatpush.msra.mxu3 %v7810_v45  ;;  %10837 = vst [vmem:[#allocation140_spill] sm:$0xff] %v7866_v63 }
 0x3b3   :  { %2527 = vmatpush.msrb.mxu0 %v10815_v5  ;;  %2567 = vmatpush.msra.mxu2 %v10816_v37  ;;  %v10839_v5 = vld [vmem:[#allocation31_spill] sm:$0xff] }
 0x3b4   :  { %2252 = vmatpush.msra.mxu1 %v7815_v1  ;;  %2292 = vmatpush.msra.mxu3 %v7818_v40  ;;  %v7871_v37 = vld [vmem:[#allocation7 + $0x670] sm:$0xff] }
 0x3b5   :  { %2253 = vmatmul.f32.vlgmr.msra.gmra.mxu1 %v7687_v8  ;;  %2293 = vmatmul.f32.vlgmr.msra.gmra.mxu3 %v7687_v8  ;;  %10840 = vst [vmem:[#allocation121_spill] sm:$0xff] %v7871_v37 }
 0x3b6   :  { %2317 = vmatpush.msrb.mxu1 %v7823_v49  ;;  %2357 = vmatpush.msrb.mxu3 %v7826_v44 }
 0x3b7   :  { %2528 = vmatpush.msrb.mxu0 %v10818_v62  ;;  %2568 = vmatpush.msra.mxu2 %v10819_v55  ;;  %v7874_v62 = vld [vmem:[#allocation7 + $0x678] sm:$0xff] }
 0x3b8   :  { %2318 = vmatpush.msrb.mxu1 %v7831_v30  ;;  %2358 = vmatpush.msrb.mxu3 %v7834_v35  ;;  %10841 = vst [vmem:[#allocation125_spill] sm:$0xff] %v7874_v62  ;;  %v10842_v55 = vld [vmem:[#allocation32_spill] sm:$0xff] }
 0x3b9   :  { %2529 = vmatpush.msrb.mxu0 %v10822_v23  ;;  %2569 = vmatpush.msra.mxu2 %v10823_v60  ;;  %v10843_v23 = vld [vmem:[#allocation33_spill] sm:$0xff]  ;;  %v7879_v60 = vld [vmem:[#allocation7 + $0x630] sm:$0xff] }
 0x3ba   :  { %2319 = vmatpush.msrb.mxu1 %v7839_v56  ;;  %2359 = vmatpush.msrb.mxu3 %v7842_v3  ;;  %10844 = vst [vmem:[#allocation126_spill] sm:$0xff] %v7879_v60 }
 0x3bb   :  { %2530 = vmatpush.msrb.mxu0 %v10826_v4  ;;  %2570 = vmatpush.msra.mxu2 %v10827_v50  ;;  %v7882_v4 = vld [vmem:[#allocation7 + $0x638] sm:$0xff]  ;;  %v10846_v50 = vld [vmem:[#allocation34_spill] sm:$0xff] }
 0x3bc   :  { %2320 = vmatpush.msrb.mxu1 %v7847_v19  ;;  %2360 = vmatpush.msrb.mxu3 %v7850_v11  ;;  %10845 = vst [vmem:[#allocation129_spill] sm:$0xff] %v7882_v4 }
 0x3bd   :  { %2531 = vmatpush.msrb.mxu0 %v10830_v17  ;;  %2571 = vmatpush.msra.mxu2 %v10831_v61  ;;  %v10847_v17 = vld [vmem:[#allocation35_spill] sm:$0xff] }
 0x3be   :  { %2321 = vmatpush.msrb.mxu1 %v7855_v47  ;;  %2361 = vmatpush.msrb.mxu3 %v7858_v9  ;;  %v7887_v61 = vld [vmem:[#allocation7 + $0x5f0] sm:$0xff]  ;;  %v10963_v9 = vld [vmem:[#allocation98_spill] sm:$0xff] }
 0x3bf   :  { %2532 = vmatpush.msrb.mxu0 %v10834_v13  ;;  %2572 = vmatpush.msra.mxu2 %v10835_v27  ;;  %10848 = vst [vmem:[#allocation71_spill] sm:$0xff] %v7887_v61  ;;  %v7890_v13 = vld [vmem:[#allocation7 + $0x5f8] sm:$0xff] }
 0x3c0   :  { %2322 = vmatpush.msrb.mxu1 %v7863_v14  ;;  %2362 = vmatpush.msrb.mxu3 %v7866_v63  ;;  %10849 = vst [vmem:[#allocation75_spill] sm:$0xff] %v7890_v13  ;;  %v10850_v27 = vld [vmem:[#allocation36_spill] sm:$0xff] }
 0x3c1   :  { %2533 = vmatpush.msrb.mxu0 %v10838_v2  ;;  %2573 = vmatpush.msra.mxu2 %v10839_v5  ;;  %v10851_v2 = vld [vmem:[#allocation37_spill] sm:$0xff]  ;;  %v7895_v5 = vld [vmem:[#allocation7 + $0x5b0] sm:$0xff] }
 0x3c2   :  { %2323 = vmatpush.msrb.mxu1 %v7871_v37  ;;  %2363 = vmatpush.msrb.mxu3 %v7874_v62  ;;  %10852 = vst [vmem:[#allocation84_spill] sm:$0xff] %v7895_v5 }
 0x3c3   :  { %2534 = vmatpush.msrb.mxu0 %v10842_v55  ;;  %2574 = vmatpush.msra.mxu2 %v10843_v23  ;;  %v7898_v55 = vld [vmem:[#allocation7 + $0x5b8] sm:$0xff]  ;;  %v10854_v23 = vld [vmem:[#allocation38_spill] sm:$0xff] }
 0x3c4   :  { %2324 = vmatpush.msrb.mxu1 %v7879_v60  ;;  %2364 = vmatpush.msrb.mxu3 %v7882_v4  ;;  %10853 = vst [vmem:[#allocation130_spill] sm:$0xff] %v7898_v55  ;;  %v10925_v4 = vld [vmem:[#allocation70_spill] sm:$0xff] }
 0x3c5   :  { %2599 = vmatpush.msra.mxu0 %v10846_v50  ;;  %2639 = vmatpush.msrb.mxu2 %v10847_v17  ;;  %v10855_v50 = vld [vmem:[#allocation39_spill] sm:$0xff] }
 0x3c6   :  { %2325 = vmatpush.msrb.mxu1 %v7887_v61  ;;  %2365 = vmatpush.msrb.mxu3 %v7890_v13  ;;  %v7903_v17 = vld [vmem:[#allocation7 + $0x570] sm:$0xff]  ;;  %v7906_v13 = vld [vmem:[#allocation7 + $0x578] sm:$0xff] }
 0x3c7   :  { %2600 = vmatpush.msra.mxu0 %v10850_v27  ;;  %2640 = vmatpush.msrb.mxu2 %v10851_v2  ;;  %10856 = vst [vmem:[#allocation134_spill] sm:$0xff] %v7903_v17  ;;  %v10858_v27 = vld [vmem:[#allocation40_spill] sm:$0xff]  ;;  %v10859_v2 = vld [vmem:[#allocation41_spill] sm:$0xff]  ;;  %v10923_v61 = vld [vmem:[#allocation67_spill] sm:$0xff] }
 0x3c8   :  { %2326 = vmatpush.msrb.mxu1 %v7895_v5  ;;  %2366 = vmatpush.msrb.mxu3 %v7898_v55  ;;  %10857 = vst [vmem:[#allocation135_spill] sm:$0xff] %v7906_v13  ;;  %v7911_v5 = vld [vmem:[#allocation7 + $0x530] sm:$0xff]  ;;  %v7914_v55 = vld [vmem:[#allocation7 + $0x538] sm:$0xff] }
 0x3c9   :  { %2601 = vmatpush.msra.mxu0 %v10854_v23  ;;  %2641 = vmatpush.msrb.mxu2 %v10855_v50  ;;  %10860 = vst [vmem:[#allocation139_spill] sm:$0xff] %v7911_v5  ;;  %v10862_v23 = vld [vmem:[#allocation42_spill] sm:$0xff]  ;;  %v10863_v50 = vld [vmem:[#allocation43_spill] sm:$0xff] }
 0x3ca   :  { %2327 = vmatpush.msrb.mxu1 %v7903_v17  ;;  %2367 = vmatpush.msrb.mxu3 %v7906_v13  ;;  %10861 = vst [vmem:[#allocation144_spill] sm:$0xff] %v7914_v55  ;;  %v7919_v17 = vld [vmem:[#allocation7 + $0x4f0] sm:$0xff]  ;;  %v7922_v13 = vld [vmem:[#allocation7 + $0x4f8] sm:$0xff] }
 0x3cb   :  { %2602 = vmatpush.msra.mxu0 %v10858_v27  ;;  %2642 = vmatpush.msrb.mxu2 %v10859_v2  ;;  %10864 = vst [vmem:[#allocation148_spill] sm:$0xff] %v7919_v17  ;;  %v10866_v27 = vld [vmem:[#allocation44_spill] sm:$0xff]  ;;  %v10867_v2 = vld [vmem:[#allocation45_spill] sm:$0xff] }
 0x3cc   :  { %2328 = vmatpush.msrb.mxu1 %v7911_v5  ;;  %2368 = vmatpush.msrb.mxu3 %v7914_v55  ;;  %10865 = vst [vmem:[#allocation149_spill] sm:$0xff] %v7922_v13  ;;  %v7927_v5 = vld [vmem:[#allocation7 + $0x4b0] sm:$0xff]  ;;  %v7930_v55 = vld [vmem:[#allocation7 + $0x4b8] sm:$0xff] }
 0x3cd   :  { %2603 = vmatpush.msra.mxu0 %v10862_v23  ;;  %2643 = vmatpush.msrb.mxu2 %v10863_v50  ;;  %10868 = vst [vmem:[#allocation151_spill] sm:$0xff] %v7927_v5  ;;  %v10870_v23 = vld [vmem:[#allocation46_spill] sm:$0xff]  ;;  %v10871_v50 = vld [vmem:[#allocation47_spill] sm:$0xff] }
 0x3ce   :  { %2329 = vmatpush.msrb.mxu1 %v7919_v17  ;;  %2369 = vmatpush.msrb.mxu3 %v7922_v13  ;;  %10869 = vst [vmem:[#allocation152_spill] sm:$0xff] %v7930_v55  ;;  %v7935_v17 = vld [vmem:[#allocation7 + $0x470] sm:$0xff]  ;;  %v7938_v13 = vld [vmem:[#allocation7 + $0x478] sm:$0xff] }
 0x3cf   :  { %2604 = vmatpush.msra.mxu0 %v10866_v27  ;;  %2644 = vmatpush.msrb.mxu2 %v10867_v2  ;;  %10872 = vst [vmem:[#allocation78_spill] sm:$0xff] %v7935_v17  ;;  %v10874_v27 = vld [vmem:[#allocation48_spill] sm:$0xff]  ;;  %v10875_v2 = vld [vmem:[#allocation49_spill] sm:$0xff] }
 0x3d0   :  { %2330 = vmatpush.msrb.mxu1 %v7927_v5  ;;  %2370 = vmatpush.msrb.mxu3 %v7930_v55  ;;  %10873 = vst [vmem:[#allocation79_spill] sm:$0xff] %v7938_v13  ;;  %v7943_v5 = vld [vmem:[#allocation7 + $0x430] sm:$0xff]  ;;  %v7946_v55 = vld [vmem:[#allocation7 + $0x438] sm:$0xff] }
 0x3d1   :  { %2605 = vmatpush.msra.mxu0 %v10870_v23  ;;  %2645 = vmatpush.msrb.mxu2 %v10871_v50  ;;  %10876 = vst [vmem:[#allocation82_spill] sm:$0xff] %v7943_v5  ;;  %v10878_v23 = vld [vmem:[#allocation50_spill] sm:$0xff]  ;;  %v10879_v50 = vld [vmem:[#allocation51_spill] sm:$0xff] }
 0x3d2   :  { %2331 = vmatpush.msrb.mxu1 %v7935_v17  ;;  %2371 = vmatpush.msrb.mxu3 %v7938_v13  ;;  %10877 = vst [vmem:[#allocation83_spill] sm:$0xff] %v7946_v55  ;;  %v7953_v13 = vld [vmem:[#allocation7 + $0x7c0] sm:$0xff] }
 0x3d3   :  { %2606 = vmatpush.msra.mxu0 %v10874_v27  ;;  %2646 = vmatpush.msrb.mxu2 %v10875_v2  ;;  %10880 = vst [vmem:[#allocation87_spill] sm:$0xff] %v7953_v13  ;;  %v7956_v27 = vld [vmem:[#allocation7 + $0x7c8] sm:$0xff]  ;;  %v10882_v2 = vld [vmem:[#allocation52_spill] sm:$0xff]  ;;  %v10921_v17 = vld [vmem:[#allocation65_spill] sm:$0xff] }
 0x3d4   :  { %2332 = vmatpush.msrb.mxu1 %v7943_v5  ;;  %2372 = vmatpush.msrb.mxu3 %v7946_v55  ;;  %10881 = vst [vmem:[#allocation88_spill] sm:$0xff] %v7956_v27  ;;  %v10883_v5 = vld [vmem:[#allocation53_spill] sm:$0xff] }
 0x3d5   :  { %2333 = vmatmul.f32.vlgmr.msrb.gmra.mxu1 %v7687_v8  ;;  %2373 = vmatmul.f32.vlgmr.msrb.gmra.mxu3 %v7687_v8  ;;  %v7961_v55 = vld [vmem:[#allocation7 + $0x780] sm:$0xff]  ;;  %v7964_v8 = vld [vmem:[#allocation7 + $0x788] sm:$0xff] }
 0x3d6   :  { %2607 = vmatpush.msra.mxu0 %v10878_v23  ;;  %2647 = vmatpush.msrb.mxu2 %v10879_v50  ;;  %10884 = vst [vmem:[#allocation92_spill] sm:$0xff] %v7961_v55  ;;  %v10886_v23 = vld [vmem:[#allocation54_spill] sm:$0xff]  ;;  %v10887_v50 = vld [vmem:[#allocation55_spill] sm:$0xff] }
 0x3d7   :  { %2539 = vmatpush.msra.mxu1 %v7953_v13  ;;  %2579 = vmatpush.msra.mxu3 %v7956_v27  ;;  %10885 = vst [vmem:[#allocation93_spill] sm:$0xff] %v7964_v8  ;;  %v7969_v13 = vld [vmem:[#allocation7 + $0x740] sm:$0xff]  ;;  %v7972_v27 = vld [vmem:[#allocation7 + $0x748] sm:$0xff] }
 0x3d8   :  { %2608 = vmatpush.msra.mxu0 %v10882_v2  ;;  %2648 = vmatpush.msrb.mxu2 %v10883_v5  ;;  %10888 = vst [vmem:[#allocation96_spill] sm:$0xff] %v7969_v13  ;;  %v10890_v5 = vld [vmem:[#allocation56_spill] sm:$0xff]  ;;  %v10891_v2 = vld [vmem:[#allocation57_spill] sm:$0xff] }
 0x3d9   :  { %2540 = vmatpush.msra.mxu1 %v7961_v55  ;;  %2580 = vmatpush.msra.mxu3 %v7964_v8  ;;  %10889 = vst [vmem:[#allocation97_spill] sm:$0xff] %v7972_v27  ;;  %v7977_v55 = vld [vmem:[#allocation7 + $0x700] sm:$0xff]  ;;  %v7980_v8 = vld [vmem:[#allocation7 + $0x708] sm:$0xff] }
 0x3da   :  { %2609 = vmatpush.msra.mxu0 %v10886_v23  ;;  %2649 = vmatpush.msrb.mxu2 %v10887_v50  ;;  %10892 = vst [vmem:[#allocation101_spill] sm:$0xff] %v7977_v55  ;;  %v7983_v23 = vld [vmem:[#allocation7 + $0xd0] sm:$0xff]  ;;  %v7986_v50 = vld [vmem:[#allocation7 + $0xd8] sm:$0xff] }
 0x3db   :  { %2541 = vmatpush.msra.mxu1 %v7969_v13  ;;  %2581 = vmatpush.msra.mxu3 %v7972_v27  ;;  %10893 = vst [vmem:[#allocation102_spill] sm:$0xff] %v7980_v8  ;;  %v7989_v27 = vld [vmem:[#allocation7 + $0x6c0] sm:$0xff]  ;;  %v10919_v13 = vld [vmem:[#allocation62_spill] sm:$0xff] }
 0x3dc   :  { %2610 = vmatpush.msra.mxu0 %v10890_v5  ;;  %2650 = vmatpush.msrb.mxu2 %v10891_v2  ;;  %10894 = vst [vmem:[#allocation105_spill] sm:$0xff] %v7983_v23  ;;  %v7992_v5 = vld [vmem:[#allocation7 + $0x6c8] sm:$0xff]  ;;  %v7995_v2 = vld [vmem:[#allocation7 + $0x90] sm:$0xff] }
 0x3dd   :  { %2542 = vmatpush.msra.mxu1 %v7977_v55  ;;  %2582 = vmatpush.msra.mxu3 %v7980_v8  ;;  %10895 = vst [vmem:[#allocation106_spill] sm:$0xff] %v7986_v50  ;;  %v7998_v8 = vld [vmem:[#allocation7 + $0x98] sm:$0xff]  ;;  %v10917_v55 = vld [vmem:[#allocation59_spill] sm:$0xff] }
 0x3de   :  { %2611 = vmatpush.msra.mxu0 %v7983_v23  ;;  %2651 = vmatpush.msrb.mxu2 %v7986_v50  ;;  %10896 = vst [vmem:[#allocation110_spill] sm:$0xff] %v7989_v27  ;;  %v8001_v23 = vld [vmem:[#allocation7 + $0x680] sm:$0xff]  ;;  %v8004_v50 = vld [vmem:[#allocation7 + $0x688] sm:$0xff] }
 0x3df   :  { %2543 = vmatpush.msra.mxu1 %v7989_v27  ;;  %10897 = vst [vmem:[#allocation111_spill] sm:$0xff] %v7992_v5  ;;  %2583 = vmatpush.msra.mxu3 %v7992_v5  ;;  %v8007_v27 = vld [vmem:[#allocation7 + $0x50] sm:$0xff]  ;;  %v8010_v5 = vld [vmem:[#allocation7 + $0x58] sm:$0xff] }
 0x3e0   :  { %10898 = vst [vmem:[#allocation115_spill] sm:$0xff] %v7995_v2  ;;  %2612 = vmatpush.msra.mxu0 %v7995_v2  ;;  %2652 = vmatpush.msrb.mxu2 %v7998_v8  ;;  %v8013_v2 = vld [vmem:[#allocation7 + $0x640] sm:$0xff] }
 0x3e1   :  { %10899 = vst [vmem:[#allocation116_spill] sm:$0xff] %v7998_v8  ;;  %2544 = vmatpush.msra.mxu1 %v8001_v23  ;;  %2584 = vmatpush.msra.mxu3 %v8004_v50  ;;  %v8016_v8 = vld [vmem:[#allocation7 + $0x648] sm:$0xff]  ;;  %v2114_v60 = vpop.f32.mrf.mxu2 }
 0x3e2   :  { %10900 = vst [vmem:[#allocation123_spill] sm:$0xff] %v8001_v23  ;;  %2613 = vmatpush.msra.mxu0 %v8007_v27  ;;  %2653 = vmatpush.msrb.mxu2 %v8010_v5  ;;  %v8019_v23 = vld [vmem:[#allocation7 + $0x10] sm:$0xff] }
 0x3e3   :  { %10901 = vst [vmem:[#allocation124_spill] sm:$0xff] %v8004_v50  ;;  %2545 = vmatpush.msra.mxu1 %v8013_v2  ;;  %2585 = vmatpush.msra.mxu3 %v8016_v8  ;;  %v8022_v50 = vld [vmem:[#allocation7 + $0x18] sm:$0xff] }
 0x3e4   :  { %10902 = vst [vmem:[#allocation127_spill] sm:$0xff] %v8007_v27  ;;  %2614 = vmatpush.msra.mxu0 %v8019_v23  ;;  %2654 = vmatpush.msrb.mxu2 %v8022_v50  ;;  %v8025_v27 = vld [vmem:[#allocation7 + $0x600] sm:$0xff] }
 0x3e5   :  { %10903 = vst [vmem:[#allocation128_spill] sm:$0xff] %v8010_v5  ;;  %2546 = vmatpush.msra.mxu1 %v8025_v27  ;;  %v8028_v5 = vld [vmem:[#allocation7 + $0x608] sm:$0xff] }
 0x3e6   :  { %10904 = vst [vmem:[#allocation132_spill] sm:$0xff] %v8013_v2  ;;  %2586 = vmatpush.msra.mxu3 %v8028_v5  ;;  %v8031_v2 = vld [vmem:[#allocation7 + $0x5c0] sm:$0xff] }
 0x3e7   :  { %10905 = vst [vmem:[#allocation133_spill] sm:$0xff] %v8016_v8  ;;  %2547 = vmatpush.msra.mxu1 %v8031_v2  ;;  %v8034_v8 = vld [vmem:[#allocation7 + $0x5c8] sm:$0xff] }
 0x3e8   :  { %10906 = vst [vmem:[#allocation137_spill] sm:$0xff] %v8019_v23  ;;  %2587 = vmatpush.msra.mxu3 %v8034_v8  ;;  %v8037_v23 = vld [vmem:[#allocation7 + $0x580] sm:$0xff] }
 0x3e9   :  { %10907 = vst [vmem:[#allocation138_spill] sm:$0xff] %v8022_v50  ;;  %2548 = vmatpush.msra.mxu1 %v8037_v23  ;;  %v8040_v50 = vld [vmem:[#allocation7 + $0x588] sm:$0xff] }
 0x3ea   :  { %10908 = vst [vmem:[#allocation141_spill] sm:$0xff] %v8025_v27  ;;  %2588 = vmatpush.msra.mxu3 %v8040_v50  ;;  %v8043_v27 = vld [vmem:[#allocation7 + $0x540] sm:$0xff] }
 0x3eb   :  { %10909 = vst [vmem:[#allocation142_spill] sm:$0xff] %v8028_v5  ;;  %2549 = vmatpush.msra.mxu1 %v8043_v27  ;;  %v8046_v5 = vld [vmem:[#allocation7 + $0x548] sm:$0xff] }
 0x3ec   :  { %10910 = vst [vmem:[#allocation117_spill] sm:$0xff] %v8031_v2  ;;  %2589 = vmatpush.msra.mxu3 %v8046_v5  ;;  %v10916_v2 = vld [vmem:[#allocation58_spill] sm:$0xff] }
 0x3ed   :  { %10911 = vst [vmem:[#allocation60_spill] sm:$0xff] %v8034_v8  ;;  %2550 = vmatpush.msra.mxu1 %v10916_v2  ;;  %v10918_v8 = vld [vmem:[#allocation61_spill] sm:$0xff] }
 0x3ee   :  { %10912 = vst [vmem:[#allocation63_spill] sm:$0xff] %v8037_v23  ;;  %2590 = vmatpush.msra.mxu3 %v10917_v55  ;;  %v10920_v23 = vld [vmem:[#allocation64_spill] sm:$0xff]  ;;  %v10927_v2 = vld [vmem:[#allocation73_spill] sm:$0xff]  ;;  %v10928_v55 = vld [vmem:[#allocation74_spill] sm:$0xff] }
 0x3ef   :  { %10913 = vst [vmem:[#allocation68_spill] sm:$0xff] %v8040_v50  ;;  %2551 = vmatpush.msra.mxu1 %v10918_v8  ;;  %v10922_v50 = vld [vmem:[#allocation66_spill] sm:$0xff]  ;;  %v10929_v8 = vld [vmem:[#allocation76_spill] sm:$0xff] }
 0x3f0   :  { %10914 = vst [vmem:[#allocation158_spill] sm:$0xff] %v8043_v27  ;;  %2591 = vmatpush.msra.mxu3 %v10919_v13  ;;  %v10924_v27 = vld [vmem:[#allocation69_spill] sm:$0xff] }
 0x3f1   :  { %10915 = vst [vmem:[#allocation159_spill] sm:$0xff] %v8046_v5  ;;  %2552 = vmatpush.msra.mxu1 %v10920_v23  ;;  %v10926_v5 = vld [vmem:[#allocation72_spill] sm:$0xff]  ;;  %v10930_v13 = vld [vmem:[#allocation77_spill] sm:$0xff] }
 0x3f2   :  { %2592 = vmatpush.msra.mxu3 %v10921_v17  ;;  %v10931_v23 = vld [vmem:[#allocation80_spill] sm:$0xff]  ;;  %v10932_v17 = vld [vmem:[#allocation81_spill] sm:$0xff] }
 0x3f3   :  { %2553 = vmatpush.msra.mxu1 %v10922_v50  ;;  %v10933_v50 = vld [vmem:[#allocation85_spill] sm:$0xff] }
 0x3f4   :  { %2593 = vmatpush.msra.mxu3 %v10923_v61  ;;  %v10934_v61 = vld [vmem:[#allocation86_spill] sm:$0xff] }
 0x3f5   :  { %2554 = vmatpush.msra.mxu1 %v10924_v27  ;;  %v10935_v27 = vld [vmem:[#allocation90_spill] sm:$0xff] }
 0x3f6   :  { %2594 = vmatpush.msra.mxu3 %v10925_v4  ;;  %v10936_v4 = vld [vmem:[#allocation91_spill] sm:$0xff] }
 0x3f7   :  { %2619 = vmatpush.msrb.mxu1 %v10926_v5  ;;  %v10937_v5 = vld [vmem:[#allocation94_spill] sm:$0xff] }
 0x3f8   :  { %2659 = vmatpush.msrb.mxu3 %v10927_v2  ;;  %v10938_v2 = vld [vmem:[#allocation95_spill] sm:$0xff] }
 0x3f9   :  { %2620 = vmatpush.msrb.mxu1 %v10928_v55  ;;  %v10939_v55 = vld [vmem:[#allocation99_spill] sm:$0xff] }
 0x3fa   :  { %2660 = vmatpush.msrb.mxu3 %v10929_v8  ;;  %v10940_v8 = vld [vmem:[#allocation165_spill] sm:$0xff] }
 0x3fb   :  { %2621 = vmatpush.msrb.mxu1 %v10930_v13  ;;  %v10941_v13 = vld [vmem:[#allocation166_spill] sm:$0xff] }
 0x3fc   :  { %2661 = vmatpush.msrb.mxu3 %v10931_v23  ;;  %v10942_v23 = vld [vmem:[#allocation167_spill] sm:$0xff] }
 0x3fd   :  { %2622 = vmatpush.msrb.mxu1 %v10932_v17  ;;  %v10943_v17 = vld [vmem:[#allocation168_spill] sm:$0xff] }
 0x3fe   :  { %2662 = vmatpush.msrb.mxu3 %v10933_v50  ;;  %v8077_v50 = vld [vmem:[#allocation7 + $0x590] sm:$0xff] }
 0x3ff   :  { %2623 = vmatpush.msrb.mxu1 %v10934_v61  ;;  %10944 = vst [vmem:[#allocation160_spill] sm:$0xff] %v8077_v50  ;;  %v8080_v61 = vld [vmem:[#allocation7 + $0x598] sm:$0xff] }
 0x400   :  { %2663 = vmatpush.msrb.mxu3 %v10935_v27  ;;  %10945 = vst [vmem:[#allocation161_spill] sm:$0xff] %v8080_v61  ;;  %v8083_v27 = vld [vmem:[#allocation7 + $0x550] sm:$0xff] }
 0x401   :  { %2624 = vmatpush.msrb.mxu1 %v10936_v4  ;;  %10946 = vst [vmem:[#allocation162_spill] sm:$0xff] %v8083_v27  ;;  %v8086_v4 = vld [vmem:[#allocation7 + $0x558] sm:$0xff] }
 0x402   :  { %2664 = vmatpush.msrb.mxu3 %v10937_v5  ;;  %10947 = vst [vmem:[#allocation163_spill] sm:$0xff] %v8086_v4  ;;  %v8089_v5 = vld [vmem:[#allocation7 + $0x510] sm:$0xff] }
 0x403   :  { %2625 = vmatpush.msrb.mxu1 %v10938_v2  ;;  %10948 = vst [vmem:[#allocation21_spill] sm:$0xff] %v8089_v5  ;;  %v8092_v2 = vld [vmem:[#allocation7 + $0x518] sm:$0xff] }
 0x404   :  { %2665 = vmatpush.msrb.mxu3 %v10939_v55  ;;  %10949 = vst [vmem:[#allocation164_spill] sm:$0xff] %v8092_v2  ;;  %v8095_v55 = vld [vmem:[#allocation7 + $0x4d0] sm:$0xff] }
 0x405   :  { %2626 = vmatpush.msrb.mxu1 %v10940_v8  ;;  %10950 = vst [vmem:[#allocation22_spill] sm:$0xff] %v8095_v55  ;;  %v8098_v8 = vld [vmem:[#allocation7 + $0x4d8] sm:$0xff] }
 0x406   :  { %2666 = vmatpush.msrb.mxu3 %v10941_v13  ;;  %10951 = vst [vmem:[#allocation23_spill] sm:$0xff] %v8098_v8  ;;  %v8101_v13 = vld [vmem:[#allocation7 + $0x490] sm:$0xff] }
 0x407   :  { %2627 = vmatpush.msrb.mxu1 %v10942_v23  ;;  %10952 = vst [vmem:[#allocation24_spill] sm:$0xff] %v8101_v13  ;;  %v8104_v23 = vld [vmem:[#allocation7 + $0x498] sm:$0xff] }
 0x408   :  { %2667 = vmatpush.msrb.mxu3 %v10943_v17  ;;  %10953 = vst [vmem:[#allocation25_spill] sm:$0xff] %v8104_v23  ;;  %v2074_v17 = vpop.f32.mrf.mxu0 }
 0x409   :  { %2628 = vmatpush.msrb.mxu1 %v8077_v50  ;;  %v8109_v50 = vld [vmem:[#allocation7 + $0x450] sm:$0xff] }
 0x40a   :  { %2668 = vmatpush.msrb.mxu3 %v8080_v61  ;;  %10956 = vst [vmem:[#allocation26_spill] sm:$0xff] %v8109_v50 }
 0x40b   :  { %2629 = vmatpush.msrb.mxu1 %v8083_v27 }
 0x40c   :  { %2669 = vmatpush.msrb.mxu3 %v8086_v4  ;;  %v10954_v4 = vld [vmem:[#allocation14_spill] sm:$0xff] }
 0x40d   :  { %2630 = vmatpush.msrb.mxu1 %v8089_v5 }
 0x40e   :  { %2670 = vmatpush.msrb.mxu3 %v8092_v2  ;;  %v10955_v2 = vld [vmem:[#allocation147_spill] sm:$0xff] }
 0x40f   :  { %2631 = vmatpush.msrb.mxu1 %v8095_v55  ;;  %v163_v27 = vadd.f32 %v10955_v2, %v10954_v4  ;;  %v8112_v55 = vld [vmem:[#allocation7 + $0x458] sm:$0xff]  ;;  %v10961_v4 = vld [vmem:[#allocation89_spill] sm:$0xff] }
 0x410   :  { %2671 = vmatpush.msrb.mxu3 %v8098_v8  ;;  %10957 = vst [vmem:[#allocation27_spill] sm:$0xff] %v8112_v55 }
 0x411   :  { %2632 = vmatpush.msrb.mxu1 %v8101_v13  ;;  %v2094_v5 = vpop.f32.mrf.mxu1  ;;  %v8115_v13 = vld [vmem:[#allocation7 + $0x410] sm:$0xff] }
 0x412   :  { %2672 = vmatpush.msrb.mxu3 %v8104_v23  ;;  %v2095_v61 = vadd.f32 %v2094_v5, %v2074_v17  ;;  %10958 = vst [vmem:[#allocation28_spill] sm:$0xff] %v8115_v13  ;;  %v8118_v23 = vld [vmem:[#allocation7 + $0x418] sm:$0xff] }
 0x413   :  { %2633 = vmatpush.msrb.mxu1 %v8109_v50  ;;  %10959 = vst [vmem:[#allocation29_spill] sm:$0xff] %v8118_v23  ;;  %v10960_v17 = vld [vmem:[#allocation16_spill] sm:$0xff] }
 0x414   :  { %2673 = vmatpush.msrb.mxu3 %v8112_v55  ;;  %v2449_v8 = vadd.f32 %v2095_v61, %v163_v27  ;;  %v204_v62 = vadd.f32 %v10961_v4, %v10960_v17  ;;  %v2194_v61 = vpop.f32.mrf.mxu2 }
 0x415   :  { %2634 = vmatpush.msrb.mxu1 %v8115_v13  ;;  %v10962_v13 = vld [vmem:[#allocation18_spill] sm:$0xff] }
 0x416   :  { %2674 = vmatpush.msrb.mxu3 %v8118_v23  ;;  %v4249_v2 = vmul.f32 -1.442695, %v2449_v8  ;;  %v286_v47 = vadd.f32 %v10963_v9, %v10962_v13 }
 0x417   :  { %v2134_v5 = vpop.f32.mrf.mxu3 }
 0x418   :  { %4409 = vpow2.f32 %v4249_v2  ;;  %v2135_v50 = vadd.f32 %v2134_v5, %v2114_v60 }
 0x419   :  { %v2174_v56 = vpop.f32.mrf.mxu1 }
 0x41a   :  { %v2450_v37 = vadd.f32 %v2135_v50, %v204_v62  ;;  %v2154_v62 = vpop.f32.mrf.mxu0  ;;  %v10964_v50 = vld [vmem:[#allocation20_spill] sm:$0xff] }
 0x41b   :  { %v2175_v60 = vadd.f32 %v2174_v56, %v2154_v62 }
 0x41c   :  { %v4250_v63 = vmul.f32 -1.442695, %v2450_v37  ;;  %v2274_v56 = vpop.f32.mrf.mxu2 }
 0x41e   :  { %v4410_v55 = vpop.eup %4409  ;;  %4411 = vpow2.f32 %v4250_v63 }
 0x41f   :  { %v2456_v27 = vadd.f32 1.0, %v4410_v55  ;;  %v2214_v14 = vpop.f32.mrf.mxu3  ;;  %v10965_v55 = vld [vmem:[#allocation107_spill] sm:$0xff] }
 0x420   :  { %v2215_v11 = vadd.f32 %v2214_v14, %v2194_v61  ;;  %v245_v2 = vadd.f32 %v10965_v55, %v10964_v50 }
 0x421   :  { %4413 = vrcp.f32 %v2456_v27  ;;  %vm2462_vm6 = vweird.f32 %v2456_v27 }
 0x422   :  { %v2452_v23 = vadd.f32 %v2215_v11, %v286_v47  ;;  %v2451_v14 = vadd.f32 %v2175_v60, %v245_v2  ;;  %v2234_v62 = vpop.f32.mrf.mxu0 }
 0x424   :  { %v4412_v8 = vpop.eup %4411  ;;  %v4251_v19 = vmul.f32 -1.442695, %v2452_v23  ;;  %v2468_v23 = vand.u32 2147483648, %v2456_v27 }
 0x425   :  { %v2475_v3 = vadd.f32 1.0, %v4412_v8  ;;  %v2466_v8 = vand.u32 2147483647, %v2456_v27 }
 0x426   :  { %4415 = vpow2.f32 %v4251_v19  ;;  %v2469_v55 = vor.u32 1.1754944e-38, %v2468_v23 }
 0x427   :  { %v4414_v4 = vpop.eup %4413  ;;  %4417 = vrcp.f32 %v2475_v3  ;;  %v2487_v13 = vand.u32 2147483648, %v2475_v3  ;;  %vm2481_vm9 = vweird.f32 %v2475_v3  ;;  %vm2467_vm10 = vcmp.eq.f32.partialorder %v2466_v8, 8.507059e+37 }
 0x428   :  { %v2458_v37 = vmul.f32 %v4414_v4, %v2456_v27  ;;  %vm2463_vm5 = vweird.f32 %v4414_v4 }
 0x429   :  { %vm8127_vm7 = vmor %vm2462_vm6, %vm2463_vm5 }
 0x42a   :  { %v2459_v63 = vsub.f32 1.0, %v2458_v37 }
 0x42c   :  { %v4416_v5 = vpop.eup %4415  ;;  %v2460_v17 = vmul.f32 %v4414_v4, %v2459_v63  ;;  %v2485_v63 = vand.u32 2147483647, %v2475_v3 }
 0x42d   :  { %v4418_v9 = vpop.eup %4417  ;;  %v2495_v61 = vadd.f32 1.0, %v4416_v5 }
 0x42e   :  { %v2477_v11 = vmul.f32 %v4418_v9, %v2475_v3  ;;  %v2461_v47 = vadd.f32 %v4414_v4, %v2460_v17  ;;  %vm2482_vm8 = vweird.f32 %v4418_v9  ;;  %vm2486_vm12 = vcmp.eq.f32.partialorder %v2485_v63, 8.507059e+37 }
 0x42f   :  { %4419 = vrcp.f32 %v2495_v61  ;;  %vm2483_vm11 = vmor %vm2481_vm9, %vm2482_vm8  ;;  %vm2501_vm14 = vweird.f32 %v2495_v61  ;;  %v2505_v63 = vand.u32 2147483647, %v2495_v61 }
 0x430   :  { %v2478_v19 = vsub.f32 1.0, %v2477_v11  ;;  %4421 = vtanh.f32 %v2451_v14  ;;  %v2465_v60 = vsel %vm8127_vm7, %v4414_v4, %v2461_v47  ;;  %v2488_v11 = vor.u32 1.1754944e-38, %v2487_v13 }
 0x431   :  { %v2470_v50 = vsel %vm2467_vm10, %v2469_v55, %v2465_v60  ;;  %vm2506_vm0 = vcmp.eq.f32.partialorder %v2505_v63, 8.507059e+37  ;;  %v8192_v63 = vld [vmem:[#allocation7 + $0x268] sm:$0xff] }
 0x432   :  { %v2479_v37 = vmul.f32 %v4418_v9, %v2478_v19  ;;  %v2254_v17 = vpop.f32.mrf.mxu1  ;;  %10977 = vst [vmem:[#allocation39_spill] sm:$0xff] %v8192_v63 }
 0x433   :  { %v2255_v2 = vadd.f32 %v2254_v17, %v2234_v62 }
 0x434   :  { %v2480_v5 = vadd.f32 %v4418_v9, %v2479_v37 }
 0x435   :  { %v4420_v27 = vpop.eup %4419  ;;  %v2377_v44 = vadd.f32 %v2255_v2, %v6361_v43 }
 0x436   :  { %v2484_v35 = vsel %vm2483_vm11, %v4418_v9, %v2480_v5  ;;  %v2497_v14 = vmul.f32 %v4420_v27, %v2495_v61  ;;  %v4422_v30 = vpop.eup %4421  ;;  %vm2502_vm13 = vweird.f32 %v4420_v27 }
 0x437   :  { %v2489_v19 = vsel %vm2486_vm12, %v2488_v11, %v2484_v35  ;;  %v2512_v47 = vmul.f32 %v4422_v30, %v2470_v50  ;;  %v4246_v13 = vmul.f32 -1.442695, %v2377_v44  ;;  %v2507_v35 = vand.u32 2147483648, %v2495_v61  ;;  %vm2503_vm15 = vmor %vm2501_vm14, %vm2502_vm13  ;;  %v8143_v11 = vld [vmem:[#allocation7 + $0x3e0] sm:$0xff]  ;;  %v8146_v61 = vld [vmem:[#allocation7 + $0x3e8] sm:$0xff] }
 0x438   :  { %v2511_v4 = vmul.f32 %v2489_v19, %v7575_v6  ;;  %v2498_v23 = vsub.f32 1.0, %v2497_v14  ;;  %v2294_v62 = vpop.f32.mrf.mxu3  ;;  %v8151_v14 = vld [vmem:[#allocation7 + $0x3a0] sm:$0xff]  ;;  %v8154_v19 = vld [vmem:[#allocation7 + $0x3a8] sm:$0xff] }
 0x439   :  { %v2295_v3 = vadd.f32 %v2294_v62, %v2274_v56  ;;  %v2508_v30 = vor.u32 1.1754944e-38, %v2507_v35  ;;  %v8169_v62 = vld [vmem:[#allocation7 + $0x328] sm:$0xff]  ;;  %v8189_v35 = vld [vmem:[#allocation7 + $0x260] sm:$0xff] }
 0x43a   :  { %v8135_v8 = vadd.f32 %v2512_v47, %v2511_v4  ;;  %v2499_v37 = vmul.f32 %v4420_v27, %v2498_v23  ;;  %v8159_v4 = vld [vmem:[#allocation7 + $0x360] sm:$0xff]  ;;  %v8162_v47 = vld [vmem:[#allocation7 + $0x368] sm:$0xff]  ;;  %10971 = vst [vmem:[#allocation33_spill] sm:$0xff] %v8169_v62 }
 0x43b   :  { %v2378_v9 = vadd.f32 %v2295_v3, %v6366_v32  ;;  %10968 = vst [vmem:[#allocation30_spill] sm:$0xff] %v8159_v4  ;;  %v8166_v23 = vld [vmem:[#allocation7 + $0x320] sm:$0xff] }
 0x43c   :  { %4423 = vtanh.f32 %v8135_v8  ;;  %v2500_v60 = vadd.f32 %v4420_v27, %v2499_v37  ;;  %10969 = vst [vmem:[#allocation31_spill] sm:$0xff] %v8162_v47  ;;  %v8175_v3 = vld [vmem:[#allocation7 + $0x2e0] sm:$0xff]  ;;  %v8178_v37 = vld [vmem:[#allocation7 + $0x2e8] sm:$0xff] }
 0x43d   :  { %v4247_v17 = vmul.f32 -1.442695, %v2378_v9  ;;  %4425 = vpow2.f32 %v4246_v13  ;;  %10970 = vst [vmem:[#allocation32_spill] sm:$0xff] %v8166_v23  ;;  %v8181_v13 = vld [vmem:[#allocation7 + $0x2a0] sm:$0xff]  ;;  %v8184_v9 = vld [vmem:[#allocation7 + $0x2a8] sm:$0xff] }
 0x43e   :  { %v2504_v6 = vsel %vm2503_vm15, %v4420_v27, %v2500_v60  ;;  %10972 = vst [vmem:[#allocation34_spill] sm:$0xff] %v8175_v3 }
 0x43f   :  { %4427 = vpow2.f32 %v4247_v17  ;;  %v2509_v55 = vsel %vm2506_vm0, %v2508_v30, %v2504_v6  ;;  %10973 = vst [vmem:[#allocation35_spill] sm:$0xff] %v8178_v37  ;;  %v8197_v6 = vld [vmem:[#allocation7 + $0x220] sm:$0xff]  ;;  %v8200_v30 = vld [vmem:[#allocation7 + $0x228] sm:$0xff] }
 0x440   :  { %10974 = vst [vmem:[#allocation36_spill] sm:$0xff] %v8181_v13 }
 0x441   :  { %10975 = vst [vmem:[#allocation37_spill] sm:$0xff] %v8184_v9 }
 0x442   :  { %v4424_v50 = vpop.eup %4423  ;;  %10976 = vst [vmem:[#allocation38_spill] sm:$0xff] %v8189_v35 }
 0x443   :  { %v8139_v2 = vmul.f32 %v4424_v50, %v2509_v55  ;;  %v4426_v44 = vpop.eup %4425  ;;  %10978 = vst [vmem:[#allocation40_spill] sm:$0xff] %v8197_v6 }
 0x444   :  { %v8149_v27 = vadd.f32 1.0, %v4426_v44  ;;  %10979 = vst [vmem:[#allocation41_spill] sm:$0xff] %v8200_v30 }
 0x445   :  { %2535 = vmatmul.f32.vlgmr.msrb.gmra.mxu0 %v8139_v2  ;;  %2575 = vmatmul.f32.vlgmr.msra.gmra.mxu2 %v8139_v2  ;;  %v4428_v5 = vpop.eup %4427 }
 0x446   :  { %2679 = vmatpush.msrb.mxu0 %v8143_v11  ;;  %2719 = vmatpush.msra.mxu2 %v8146_v61  ;;  %v8157_v56 = vadd.f32 1.0, %v4428_v5  ;;  %4429 = vrcp.f32 %v8149_v27  ;;  %v8207_v5 = vld [vmem:[#allocation7 + $0x1e0] sm:$0xff]  ;;  %vm2390_vm3 = vweird.f32 %v8149_v27 }
 0x447   :  { %10980 = vst [vmem:[#allocation42_spill] sm:$0xff] %v8207_v5 }
 0x448   :  { %2680 = vmatpush.msrb.mxu0 %v8151_v14  ;;  %2720 = vmatpush.msra.mxu2 %v8154_v19  ;;  %4431 = vrcp.f32 %v8157_v56  ;;  %vm2409_vm4 = vweird.f32 %v8157_v56 }
 0x44a   :  { %2681 = vmatpush.msrb.mxu0 %v8159_v4  ;;  %2721 = vmatpush.msra.mxu2 %v8162_v47  ;;  %v8226_v4 = vld [vmem:[#allocation7 + $0x120] sm:$0xff] }
 0x44b   :  { %10983 = vst [vmem:[#allocation45_spill] sm:$0xff] %v8226_v4 }
 0x44c   :  { %2682 = vmatpush.msrb.mxu0 %v8166_v23  ;;  %2722 = vmatpush.msra.mxu2 %v8169_v62  ;;  %v8187_v60 = vpop.eup %4429 }
 0x44d   :  { %2615 = vmatmul.f32.vlgmr.msra.gmra.mxu0 %v8139_v2  ;;  %2655 = vmatmul.f32.vlgmr.msrb.gmra.mxu2 %v8139_v2  ;;  %v2386_v50 = vmul.f32 %v8187_v60, %v8149_v27  ;;  %vm2391_vm1 = vweird.f32 %v8187_v60 }
 0x44e   :  { %2683 = vmatpush.msrb.mxu0 %v8175_v3  ;;  %2723 = vmatpush.msra.mxu2 %v8178_v37  ;;  %v8195_v17 = vpop.eup %4431  ;;  %vm8261_vm5 = vmor %vm2390_vm3, %vm2391_vm1 }
 0x44f   :  { %v2405_v55 = vmul.f32 %v8195_v17, %v8157_v56  ;;  %v2387_v62 = vsub.f32 1.0, %v2386_v50  ;;  %vm2410_vm2 = vweird.f32 %v8195_v17 }
 0x450   :  { %2684 = vmatpush.msrb.mxu0 %v8181_v13  ;;  %2724 = vmatpush.msra.mxu2 %v8184_v9  ;;  %v8213_v13 = vld [vmem:[#allocation7 + $0x1a0] sm:$0xff]  ;;  %vm8275_vm6 = vmor %vm2409_vm4, %vm2410_vm2 }
 0x451   :  { %10982 = vst [vmem:[#allocation44_spill] sm:$0xff] %v8213_v13  ;;  %v2406_v23 = vsub.f32 1.0, %v2405_v55  ;;  %v2388_v50 = vmul.f32 %v8187_v60, %v2387_v62  ;;  %v8235_v55 = vld [vmem:[#allocation7 + $0xe0] sm:$0xff] }
 0x452   :  { %2685 = vmatpush.msrb.mxu0 %v8189_v35  ;;  %2725 = vmatpush.msra.mxu2 %v8192_v63  ;;  %v2334_v44 = vpop.f32.mrf.mxu1  ;;  %v8210_v63 = vld [vmem:[#allocation7 + $0x1e8] sm:$0xff]  ;;  %v2354_v35 = vpop.f32.mrf.mxu2  ;;  %10985 = vst [vmem:[#allocation47_spill] sm:$0xff] %v8235_v55  ;;  %v8251_v62 = vld [vmem:[#allocation7 + $0x60] sm:$0xff] }
 0x453   :  { %10981 = vst [vmem:[#allocation43_spill] sm:$0xff] %v8210_v63 }
 0x454   :  { %2686 = vmatpush.msrb.mxu0 %v8197_v6  ;;  %2726 = vmatpush.msra.mxu2 %v8200_v30  ;;  %v2314_v6 = vpop.f32.mrf.mxu0  ;;  %v8216_v30 = vld [vmem:[#allocation7 + $0x1a8] sm:$0xff]  ;;  %10989 = vst [vmem:[#allocation51_spill] sm:$0xff] %v8251_v62 }
 0x455   :  { %v2335_v37 = vadd.f32 %v2334_v44, %v2314_v6  ;;  %v2407_v6 = vmul.f32 %v8195_v17, %v2406_v23  ;;  %v8241_v44 = vld [vmem:[#allocation7 + $0xa0] sm:$0xff] }
 0x456   :  { %2687 = vmatpush.msrb.mxu0 %v8207_v5  ;;  %2727 = vmatpush.msra.mxu2 %v8210_v63  ;;  %v8219_v5 = vld [vmem:[#allocation7 + $0x160] sm:$0xff]  ;;  %v8222_v63 = vld [vmem:[#allocation7 + $0x168] sm:$0xff]  ;;  %10987 = vst [vmem:[#allocation49_spill] sm:$0xff] %v8241_v44 }
 0x457   :  { %v2408_v23 = vadd.f32 %v8195_v17, %v2407_v6  ;;  %v2394_v6 = vand.u32 2147483647, %v8149_v27 }
 0x458   :  { %v2374_v9 = vpop.f32.mrf.mxu3  ;;  %2688 = vmatpush.msrb.mxu0 %v8213_v13  ;;  %2728 = vmatpush.msra.mxu2 %v8216_v30  ;;  %v8229_v13 = vld [vmem:[#allocation7 + $0x128] sm:$0xff] }
 0x459   :  { %v2375_v3 = vadd.f32 %v2374_v9, %v2354_v35  ;;  %10984 = vst [vmem:[#allocation46_spill] sm:$0xff] %v8229_v13  ;;  %v2379_v9 = vadd.f32 %v2335_v37, %v10783_v0  ;;  %v8254_v37 = vld [vmem:[#allocation7 + $0x68] sm:$0xff]  ;;  %vm2395_vm7 = vcmp.eq.f32.partialorder %v2394_v6, 8.507059e+37  ;;  %v8317_v6 = vld [vmem:[#allocation7 + $0x2f8] sm:$0xff] }
 0x45a   :  { %2689 = vmatpush.msrb.mxu0 %v8219_v5  ;;  %2729 = vmatpush.msra.mxu2 %v8222_v63  ;;  %10990 = vst [vmem:[#allocation52_spill] sm:$0xff] %v8254_v37 }
 0x45b   :  { %v2380_v47 = vadd.f32 %v2375_v3, %v10780_v39  ;;  %v8238_v3 = vld [vmem:[#allocation7 + $0xe8] sm:$0xff]  ;;  %11001 = vst [vmem:[#allocation59_spill] sm:$0xff] %v8317_v6 }
 0x45c   :  { %2690 = vmatpush.msrb.mxu0 %v8226_v4  ;;  %2730 = vmatpush.msra.mxu2 %v8229_v13  ;;  %10986 = vst [vmem:[#allocation48_spill] sm:$0xff] %v8238_v3  ;;  %v8244_v13 = vld [vmem:[#allocation7 + $0xa8] sm:$0xff] }
 0x45d   :  { %v4248_v35 = vmul.f32 -1.442695, %v2380_v47  ;;  %10988 = vst [vmem:[#allocation50_spill] sm:$0xff] %v8244_v13  ;;  %v2389_v47 = vadd.f32 %v8187_v60, %v2388_v50  ;;  %v8309_v50 = vld [vmem:[#allocation7 + $0x338] sm:$0xff] }
 0x45e   :  { %2691 = vmatpush.msrb.mxu0 %v8235_v55  ;;  %2731 = vmatpush.msra.mxu2 %v8238_v3  ;;  %v8290_v55 = vld [vmem:[#allocation7 + $0x3f8] sm:$0xff]  ;;  %10998 = vst [vmem:[#allocation56_spill] sm:$0xff] %v8309_v50 }
 0x45f   :  { %4433 = vpow2.f32 %v4248_v35  ;;  %v2415_v35 = vand.u32 2147483648, %v8157_v56 }
 0x460   :  { %2692 = vmatpush.msrb.mxu0 %v8241_v44  ;;  %2732 = vmatpush.msra.mxu2 %v8244_v13  ;;  %4435 = vtanh.f32 %v2379_v9  ;;  %v2396_v9 = vand.u32 2147483648, %v8149_v27  ;;  %v8267_v13 = vld [vmem:[#allocation7 + $0x20] sm:$0xff]  ;;  %v2393_v27 = vsel %vm8261_vm5, %v8187_v60, %v2389_v47  ;;  %v8293_v60 = vld [vmem:[#allocation7 + $0x3b0] sm:$0xff] }
 0x461   :  { %10993 = vst [vmem:[#allocation53_spill] sm:$0xff] %v8267_v13  ;;  %v2416_v4 = vor.u32 1.1754944e-38, %v2415_v35  ;;  %v8302_v35 = vld [vmem:[#allocation7 + $0x378] sm:$0xff] }
 0x462   :  { %2693 = vmatpush.msrb.mxu0 %v8251_v62  ;;  %2733 = vmatpush.msra.mxu2 %v8254_v37  ;;  %v2413_v62 = vand.u32 2147483647, %v8157_v56  ;;  %v8270_v37 = vld [vmem:[#allocation7 + $0x28] sm:$0xff]  ;;  %v2412_v56 = vsel %vm8275_vm6, %v8195_v17, %v2408_v23  ;;  %v2397_v39 = vor.u32 1.1754944e-38, %v2396_v9  ;;  %v8296_v17 = vld [vmem:[#allocation7 + $0x3b8] sm:$0xff]  ;;  %v8299_v23 = vld [vmem:[#allocation7 + $0x370] sm:$0xff] }
 0x463   :  { %10994 = vst [vmem:[#allocation54_spill] sm:$0xff] %v8270_v37  ;;  %v8306_v9 = vld [vmem:[#allocation7 + $0x330] sm:$0xff] }
 0x464   :  { %2694 = vmatpush.msrb.mxu0 %v8267_v13  ;;  %2734 = vmatpush.msra.mxu2 %v8270_v37  ;;  %v8287_v13 = vld [vmem:[#allocation7 + $0x3f0] sm:$0xff]  ;;  %vm2414_vm8 = vcmp.eq.f32.partialorder %v2413_v62, 8.507059e+37  ;;  %v2398_v3 = vsel %vm2395_vm7, %v2397_v39, %v2393_v27  ;;  %10997 = vst [vmem:[#allocation55_spill] sm:$0xff] %v8306_v9 }
 0x465   :  { %v4434_v44 = vpop.eup %4433  ;;  %2695 = vmatmul.f32.vlgmr.msrb.gmra.mxu0 %v8139_v2  ;;  %2735 = vmatmul.f32.vlgmr.msra.gmra.mxu2 %v8139_v2  ;;  %v8320_v27 = vld [vmem:[#allocation7 + $0x2b0] sm:$0xff] }
 0x466   :  { %v2423_v37 = vadd.f32 1.0, %v4434_v44  ;;  %2759 = vmatpush.msra.mxu0 %v8287_v13  ;;  %2799 = vmatpush.msrb.mxu2 %v8290_v55  ;;  %v4436_v0 = vpop.eup %4435  ;;  %v2417_v44 = vsel %vm2414_vm8, %v2416_v4, %v2412_v56  ;;  %v8314_v4 = vld [vmem:[#allocation7 + $0x2f0] sm:$0xff]  ;;  %11002 = vst [vmem:[#allocation61_spill] sm:$0xff] %v8320_v27  ;;  %v8323_v56 = vld [vmem:[#allocation7 + $0x2b8] sm:$0xff] }
 0x467   :  { %v2440_v47 = vmul.f32 %v4436_v0, %v2398_v3  ;;  %v2439_v62 = vmul.f32 %v2417_v44, %v7672_v54  ;;  %11000 = vst [vmem:[#allocation58_spill] sm:$0xff] %v8314_v4 }
 0x468   :  { %4437 = vrcp.f32 %v2423_v37  ;;  %2760 = vmatpush.msra.mxu0 %v8293_v60  ;;  %2800 = vmatpush.msrb.mxu2 %v8296_v17  ;;  %11003 = vst [vmem:[#allocation62_spill] sm:$0xff] %v8323_v56  ;;  %v2435_v44 = vand.u32 2147483648, %v2423_v37  ;;  %vm2429_vm10 = vweird.f32 %v2423_v37 }
 0x469   :  { %v8312_v0 = vadd.f32 %v2440_v47, %v2439_v62  ;;  %v8327_v47 = vld [vmem:[#allocation7 + $0x270] sm:$0xff]  ;;  %v8330_v62 = vld [vmem:[#allocation7 + $0x278] sm:$0xff] }
 0x46a   :  { %2761 = vmatpush.msra.mxu0 %v8299_v23  ;;  %2801 = vmatpush.msrb.mxu2 %v8302_v35  ;;  %11004 = vst [vmem:[#allocation64_spill] sm:$0xff] %v8327_v47 }
 0x46b   :  { %10999 = vst [vmem:[#allocation57_spill] sm:$0xff] %v8312_v0  ;;  %4439 = vtanh.f32 %v8312_v0  ;;  %v8345_v0 = vld [vmem:[#allocation7 + $0x1b0] sm:$0xff] }
 0x46c   :  { %2762 = vmatpush.msra.mxu0 %v8306_v9  ;;  %2802 = vmatpush.msrb.mxu2 %v8309_v50  ;;  %11005 = vst [vmem:[#allocation65_spill] sm:$0xff] %v8330_v62  ;;  %v2436_v50 = vor.u32 1.1754944e-38, %v2435_v44  ;;  %v8353_v44 = vld [vmem:[#allocation7 + $0x170] sm:$0xff] }
 0x46e   :  { %v4438_v39 = vpop.eup %4437  ;;  %2763 = vmatpush.msra.mxu0 %v8314_v4  ;;  %2803 = vmatpush.msrb.mxu2 %v8317_v6  ;;  %v2433_v4 = vand.u32 2147483647, %v2423_v37 }
 0x46f   :  { %v2425_v54 = vmul.f32 %v4438_v39, %v2423_v37  ;;  %vm2430_vm9 = vweird.f32 %v4438_v39 }
 0x470   :  { %2764 = vmatpush.msra.mxu0 %v8320_v27  ;;  %2804 = vmatpush.msrb.mxu2 %v8323_v56  ;;  %v8333_v27 = vld [vmem:[#allocation7 + $0x230] sm:$0xff]  ;;  %v8336_v56 = vld [vmem:[#allocation7 + $0x238] sm:$0xff]  ;;  %vm2431_vm11 = vmor %vm2429_vm10, %vm2430_vm9  ;;  %vm2434_vm12 = vcmp.eq.f32.partialorder %v2433_v4, 8.507059e+37 }
 0x471   :  { %v2426_v3 = vsub.f32 1.0, %v2425_v54  ;;  %11006 = vst [vmem:[#allocation66_spill] sm:$0xff] %v8333_v27  ;;  %v4440_v9 = vpop.eup %4439  ;;  %v8374_v4 = vld [vmem:[#allocation7 + $0xf8] sm:$0xff] }
 0x472   :  { %2765 = vmatpush.msra.mxu0 %v8327_v47  ;;  %2805 = vmatpush.msrb.mxu2 %v8330_v62  ;;  %v8339_v47 = vld [vmem:[#allocation7 + $0x1f0] sm:$0xff]  ;;  %v8342_v62 = vld [vmem:[#allocation7 + $0x1f8] sm:$0xff] }
 0x473   :  { %v2427_v6 = vmul.f32 %v4438_v39, %v2426_v3  ;;  %11007 = vst [vmem:[#allocation67_spill] sm:$0xff] %v8339_v47 }
 0x474   :  { %2766 = vmatpush.msra.mxu0 %v8333_v27  ;;  %2806 = vmatpush.msrb.mxu2 %v8336_v56 }
 0x475   :  { %v2428_v54 = vadd.f32 %v4438_v39, %v2427_v6  ;;  %v8348_v6 = vld [vmem:[#allocation7 + $0x1b8] sm:$0xff] }
 0x476   :  { %2767 = vmatpush.msra.mxu0 %v8339_v47  ;;  %2807 = vmatpush.msrb.mxu2 %v8342_v62  ;;  %v8356_v47 = vld [vmem:[#allocation7 + $0x178] sm:$0xff] }
 0x477   :  { %v2432_v3 = vsel %vm2431_vm11, %v4438_v39, %v2428_v54  ;;  %v8371_v39 = vld [vmem:[#allocation7 + $0xf0] sm:$0xff]  ;;  %v11030_v54 = vld [vmem:[#allocation113_spill] sm:$0xff] }
 0x478   :  { %v2437_v27 = vsel %vm2434_vm12, %v2436_v50, %v2432_v3  ;;  %2768 = vmatpush.msra.mxu0 %v8345_v0  ;;  %2808 = vmatpush.msrb.mxu2 %v8348_v6  ;;  %v8363_v50 = vld [vmem:[#allocation7 + $0x130] sm:$0xff]  ;;  %v11031_v3 = vld [vmem:[#allocation114_spill] sm:$0xff] }
 0x479   :  { %v8351_v37 = vmul.f32 %v4440_v9, %v2437_v27  ;;  %v8366_v9 = vld [vmem:[#allocation7 + $0x138] sm:$0xff]  ;;  %v8504_v27 = vld [vmem:[#allocation7 + $0x108] sm:$0xff] }
 0x47a   :  { %2769 = vmatpush.msra.mxu0 %v8353_v44  ;;  %2809 = vmatpush.msrb.mxu2 %v8356_v47  ;;  %11029 = vst [vmem:[#allocation165_spill] sm:$0xff] %v8504_v27 }
 0x47b   :  { %2555 = vmatmul.f32.vlgmr.msra.gmra.mxu1 %v8351_v37  ;;  %2595 = vmatmul.f32.vlgmr.msra.gmra.mxu3 %v8351_v37 }
 0x47c   :  { %2699 = vmatpush.msra.mxu1 %v7693_v59  ;;  %2739 = vmatpush.msra.mxu3 %v7696_v16  ;;  %v8379_v59 = vld [vmem:[#allocation7 + $0xb0] sm:$0xff]  ;;  %v8382_v16 = vld [vmem:[#allocation7 + $0xb8] sm:$0xff] }
 0x47d   :  { %2770 = vmatpush.msra.mxu0 %v8363_v50  ;;  %2810 = vmatpush.msrb.mxu2 %v8366_v9 }
 0x47e   :  { %2700 = vmatpush.msra.mxu1 %v7701_v33  ;;  %2740 = vmatpush.msra.mxu3 %v7704_v28  ;;  %v8391_v33 = vld [vmem:[#allocation7 + $0x70] sm:$0xff]  ;;  %v8394_v28 = vld [vmem:[#allocation7 + $0x78] sm:$0xff] }
 0x47f   :  { %2771 = vmatpush.msra.mxu0 %v8371_v39  ;;  %2811 = vmatpush.msrb.mxu2 %v8374_v4 }
 0x480   :  { %2701 = vmatpush.msra.mxu1 %v7709_v15  ;;  %2741 = vmatpush.msra.mxu3 %v7712_v36  ;;  %v8399_v15 = vld [vmem:[#allocation7 + $0x30] sm:$0xff]  ;;  %v8402_v36 = vld [vmem:[#allocation7 + $0x38] sm:$0xff] }
 0x481   :  { %2772 = vmatpush.msra.mxu0 %v8379_v59  ;;  %2812 = vmatpush.msrb.mxu2 %v8382_v16 }
 0x482   :  { %2702 = vmatpush.msra.mxu1 %v7717_v21  ;;  %2742 = vmatpush.msra.mxu3 %v7720_v20  ;;  %v8409_v21 = vld [vmem:[#allocation7 + $0x3c0] sm:$0xff]  ;;  %v8412_v20 = vld [vmem:[#allocation7 + $0x3c8] sm:$0xff] }
 0x483   :  { %2635 = vmatmul.f32.vlgmr.msrb.gmra.mxu1 %v8351_v37  ;;  %2675 = vmatmul.f32.vlgmr.msrb.gmra.mxu3 %v8351_v37 }
 0x484   :  { %2703 = vmatpush.msra.mxu1 %v7725_v41  ;;  %2743 = vmatpush.msra.mxu3 %v7728_v53  ;;  %v8417_v41 = vld [vmem:[#allocation7 + $0x380] sm:$0xff]  ;;  %v8420_v53 = vld [vmem:[#allocation7 + $0x388] sm:$0xff] }
 0x485   :  { %2773 = vmatpush.msra.mxu0 %v8391_v33  ;;  %2813 = vmatpush.msrb.mxu2 %v8394_v28 }
 0x486   :  { %2704 = vmatpush.msra.mxu1 %v7733_v42  ;;  %2744 = vmatpush.msra.mxu3 %v7736_v48  ;;  %v8425_v42 = vld [vmem:[#allocation7 + $0x340] sm:$0xff]  ;;  %v8428_v48 = vld [vmem:[#allocation7 + $0x348] sm:$0xff] }
 0x487   :  { %2774 = vmatpush.msra.mxu0 %v8399_v15  ;;  %2814 = vmatpush.msrb.mxu2 %v8402_v36 }
 0x488   :  { %2775 = vmatmul.f32.vlgmr.msra.gmra.mxu0 %v8139_v2  ;;  %2815 = vmatmul.f32.vlgmr.msrb.gmra.mxu2 %v8139_v2  ;;  %v8501_v2 = vld [vmem:[#allocation7 + $0x100] sm:$0xff] }
 0x489   :  { %2705 = vmatpush.msra.mxu1 %v7743_v18  ;;  %2745 = vmatpush.msra.mxu3 %v7746_v57  ;;  %v8433_v18 = vld [vmem:[#allocation7 + $0x300] sm:$0xff]  ;;  %v8436_v57 = vld [vmem:[#allocation7 + $0x308] sm:$0xff]  ;;  %11028 = vst [vmem:[#allocation99_spill] sm:$0xff] %v8501_v2 }
 0x48a   :  { %2981 = vmatpush.msrb.mxu0 %v8409_v21  ;;  %3021 = vmatpush.msra.mxu2 %v8412_v20  ;;  %11008 = vst [vmem:[#allocation69_spill] sm:$0xff] %v8436_v57 }
 0x48b   :  { %2706 = vmatpush.msra.mxu1 %v7751_v12  ;;  %2746 = vmatpush.msra.mxu3 %v7754_v58  ;;  %v8441_v12 = vld [vmem:[#allocation7 + $0x2c0] sm:$0xff]  ;;  %v8444_v58 = vld [vmem:[#allocation7 + $0x2c8] sm:$0xff] }
 0x48c   :  { %2982 = vmatpush.msrb.mxu0 %v8417_v41  ;;  %3022 = vmatpush.msra.mxu2 %v8420_v53  ;;  %11009 = vst [vmem:[#allocation70_spill] sm:$0xff] %v8441_v12 }
 0x48d   :  { %2707 = vmatpush.msra.mxu1 %v7759_v52  ;;  %2747 = vmatpush.msra.mxu3 %v7762_v26  ;;  %11010 = vst [vmem:[#allocation72_spill] sm:$0xff] %v8444_v58  ;;  %v8449_v52 = vld [vmem:[#allocation7 + $0x280] sm:$0xff]  ;;  %v8452_v26 = vld [vmem:[#allocation7 + $0x288] sm:$0xff] }
 0x48e   :  { %2983 = vmatpush.msrb.mxu0 %v8425_v42  ;;  %3023 = vmatpush.msra.mxu2 %v8428_v48  ;;  %11011 = vst [vmem:[#allocation73_spill] sm:$0xff] %v8449_v52 }
 0x48f   :  { %2708 = vmatpush.msra.mxu1 %v7767_v29  ;;  %2748 = vmatpush.msra.mxu3 %v7770_v31  ;;  %11012 = vst [vmem:[#allocation74_spill] sm:$0xff] %v8452_v26  ;;  %v8457_v29 = vld [vmem:[#allocation7 + $0x240] sm:$0xff]  ;;  %v8460_v31 = vld [vmem:[#allocation7 + $0x248] sm:$0xff] }
 0x490   :  { %2984 = vmatpush.msrb.mxu0 %v8433_v18  ;;  %3024 = vmatpush.msra.mxu2 %v8436_v57  ;;  %11013 = vst [vmem:[#allocation76_spill] sm:$0xff] %v8457_v29 }
 0x491   :  { %2709 = vmatpush.msra.mxu1 %v7775_v38  ;;  %2749 = vmatpush.msra.mxu3 %v7778_v22  ;;  %11014 = vst [vmem:[#allocation77_spill] sm:$0xff] %v8460_v31  ;;  %v8465_v38 = vld [vmem:[#allocation7 + $0x200] sm:$0xff]  ;;  %v8468_v22 = vld [vmem:[#allocation7 + $0x208] sm:$0xff] }
 0x492   :  { %2985 = vmatpush.msrb.mxu0 %v8441_v12  ;;  %3025 = vmatpush.msra.mxu2 %v8444_v58  ;;  %11015 = vst [vmem:[#allocation80_spill] sm:$0xff] %v8465_v38 }
 0x493   :  { %2710 = vmatpush.msra.mxu1 %v7783_v24  ;;  %2750 = vmatpush.msra.mxu3 %v7786_v51  ;;  %11016 = vst [vmem:[#allocation81_spill] sm:$0xff] %v8468_v22  ;;  %v8473_v24 = vld [vmem:[#allocation7 + $0x1c0] sm:$0xff]  ;;  %v8476_v51 = vld [vmem:[#allocation7 + $0x1c8] sm:$0xff] }
 0x494   :  { %2986 = vmatpush.msrb.mxu0 %v8449_v52  ;;  %3026 = vmatpush.msra.mxu2 %v8452_v26  ;;  %11017 = vst [vmem:[#allocation85_spill] sm:$0xff] %v8473_v24 }
 0x495   :  { %2711 = vmatpush.msra.mxu1 %v7791_v25  ;;  %2751 = vmatpush.msra.mxu3 %v7794_v7  ;;  %11018 = vst [vmem:[#allocation86_spill] sm:$0xff] %v8476_v51  ;;  %v11019_v25 = vld [vmem:[#allocation100_spill] sm:$0xff]  ;;  %v8485_v7 = vld [vmem:[#allocation7 + $0x180] sm:$0xff] }
 0x496   :  { %2987 = vmatpush.msrb.mxu0 %v8457_v29  ;;  %3027 = vmatpush.msra.mxu2 %v8460_v31  ;;  %11020 = vst [vmem:[#allocation90_spill] sm:$0xff] %v8485_v7 }
 0x497   :  { %2712 = vmatpush.msra.mxu1 %v7799_v34  ;;  %2752 = vmatpush.msra.mxu3 %v7802_v10  ;;  %v8488_v34 = vld [vmem:[#allocation7 + $0x188] sm:$0xff]  ;;  %v11022_v10 = vld [vmem:[#allocation103_spill] sm:$0xff] }
 0x498   :  { %2988 = vmatpush.msrb.mxu0 %v8465_v38  ;;  %3028 = vmatpush.msra.mxu2 %v8468_v22  ;;  %11021 = vst [vmem:[#allocation91_spill] sm:$0xff] %v8488_v34 }
 0x499   :  { %2713 = vmatpush.msra.mxu1 %v7807_v46  ;;  %2753 = vmatpush.msra.mxu3 %v7810_v45  ;;  %v11023_v46 = vld [vmem:[#allocation104_spill] sm:$0xff]  ;;  %v8493_v45 = vld [vmem:[#allocation7 + $0x140] sm:$0xff] }
 0x49a   :  { %2989 = vmatpush.msrb.mxu0 %v8473_v24  ;;  %3029 = vmatpush.msra.mxu2 %v8476_v51  ;;  %11024 = vst [vmem:[#allocation94_spill] sm:$0xff] %v8493_v45  ;;  %v11162_v24 = vld [vmem:[#allocation16_spill] sm:$0xff] }
 0x49b   :  { %2714 = vmatpush.msra.mxu1 %v7815_v1  ;;  %2754 = vmatpush.msra.mxu3 %v7818_v40  ;;  %v8496_v1 = vld [vmem:[#allocation7 + $0x148] sm:$0xff]  ;;  %v11026_v40 = vld [vmem:[#allocation108_spill] sm:$0xff] }
 0x49c   :  { %2715 = vmatmul.f32.vlgmr.msra.gmra.mxu1 %v8351_v37  ;;  %2755 = vmatmul.f32.vlgmr.msra.gmra.mxu3 %v8351_v37  ;;  %11025 = vst [vmem:[#allocation95_spill] sm:$0xff] %v8496_v1 }
 0x49d   :  { %2779 = vmatpush.msrb.mxu1 %v7823_v49  ;;  %2819 = vmatpush.msrb.mxu3 %v11019_v25  ;;  %v11027_v49 = vld [vmem:[#allocation109_spill] sm:$0xff] }
 0x49e   :  { %2990 = vmatpush.msrb.mxu0 %v8485_v7  ;;  %3030 = vmatpush.msra.mxu2 %v8488_v34  ;;  %v8509_v25 = vld [vmem:[#allocation7 + $0xc0] sm:$0xff]  ;;  %v11158_v7 = vld [vmem:[#allocation26_spill] sm:$0xff] }
 0x49f   :  { %2780 = vmatpush.msrb.mxu1 %v11022_v10  ;;  %2820 = vmatpush.msrb.mxu3 %v11023_v46  ;;  %11032 = vst [vmem:[#allocation166_spill] sm:$0xff] %v8509_v25  ;;  %v8512_v10 = vld [vmem:[#allocation7 + $0xc8] sm:$0xff] }
 0x4a0   :  { %2991 = vmatpush.msrb.mxu0 %v8493_v45  ;;  %3031 = vmatpush.msra.mxu2 %v8496_v1  ;;  %11033 = vst [vmem:[#allocation167_spill] sm:$0xff] %v8512_v10  ;;  %v11034_v46 = vld [vmem:[#allocation118_spill] sm:$0xff]  ;;  %v11103_v1 = vld [vmem:[#allocation124_spill] sm:$0xff] }
 0x4a1   :  { %2781 = vmatpush.msrb.mxu1 %v11026_v40  ;;  %2821 = vmatpush.msrb.mxu3 %v11027_v49  ;;  %v11035_v40 = vld [vmem:[#allocation119_spill] sm:$0xff]  ;;  %v8517_v49 = vld [vmem:[#allocation7 + $0x80] sm:$0xff]  ;;  %v11156_v45 = vld [vmem:[#allocation14_spill] sm:$0xff] }
 0x4a2   :  { %2992 = vmatpush.msrb.mxu0 %v8501_v2  ;;  %3032 = vmatpush.msra.mxu2 %v8504_v27  ;;  %11036 = vst [vmem:[#allocation168_spill] sm:$0xff] %v8517_v49  ;;  %v8520_v27 = vld [vmem:[#allocation7 + $0x88] sm:$0xff]  ;;  %v11101_v2 = vld [vmem:[#allocation116_spill] sm:$0xff] }
 0x4a3   :  { %2782 = vmatpush.msrb.mxu1 %v11030_v54  ;;  %2822 = vmatpush.msrb.mxu3 %v11031_v3  ;;  %11037 = vst [vmem:[#allocation147_spill] sm:$0xff] %v8520_v27  ;;  %v11038_v54 = vld [vmem:[#allocation120_spill] sm:$0xff] }
 0x4a4   :  { %2993 = vmatpush.msrb.mxu0 %v8509_v25  ;;  %3033 = vmatpush.msra.mxu2 %v8512_v10  ;;  %v11039_v3 = vld [vmem:[#allocation140_spill] sm:$0xff]  ;;  %v8525_v25 = vld [vmem:[#allocation7 + $0x40] sm:$0xff]  ;;  %v8528_v10 = vld [vmem:[#allocation7 + $0x48] sm:$0xff] }
 0x4a5   :  { %2783 = vmatpush.msrb.mxu1 %v11034_v46  ;;  %2823 = vmatpush.msrb.mxu3 %v11035_v40  ;;  %11040 = vst [vmem:[#allocation89_spill] sm:$0xff] %v8525_v25  ;;  %v11042_v46 = vld [vmem:[#allocation121_spill] sm:$0xff] }
 0x4a6   :  { %2994 = vmatpush.msrb.mxu0 %v8517_v49  ;;  %3034 = vmatpush.msra.mxu2 %v8520_v27  ;;  %11041 = vst [vmem:[#allocation98_spill] sm:$0xff] %v8528_v10  ;;  %v11043_v40 = vld [vmem:[#allocation125_spill] sm:$0xff]  ;;  %v8536_v27 = vld [vmem:[#allocation7 + $0x8] sm:$0xff] }
 0x4a7   :  { %2784 = vmatpush.msrb.mxu1 %v11038_v54  ;;  %2824 = vmatpush.msrb.mxu3 %v11039_v3  ;;  %v8533_v49 = vld [vmem:[#allocation7] sm:$0xff]  ;;  %11045 = vst [vmem:[#allocation100_spill] sm:$0xff] %v8536_v27  ;;  %v11046_v54 = vld [vmem:[#allocation126_spill] sm:$0xff] }
 0x4a8   :  { %2995 = vmatpush.msrb.mxu0 %v8525_v25  ;;  %3035 = vmatpush.msra.mxu2 %v8528_v10  ;;  %11044 = vst [vmem:[#allocation107_spill] sm:$0xff] %v8533_v49  ;;  %v11047_v3 = vld [vmem:[#allocation129_spill] sm:$0xff]  ;;  %v8541_v25 = vld [vmem:[#allocation7 + $0x3d0] sm:$0xff]  ;;  %v8544_v10 = vld [vmem:[#allocation7 + $0x3d8] sm:$0xff] }
 0x4a9   :  { %2785 = vmatpush.msrb.mxu1 %v11042_v46  ;;  %2825 = vmatpush.msrb.mxu3 %v11043_v40  ;;  %11048 = vst [vmem:[#allocation103_spill] sm:$0xff] %v8541_v25  ;;  %v11050_v46 = vld [vmem:[#allocation71_spill] sm:$0xff] }
 0x4aa   :  { %2996 = vmatpush.msrb.mxu0 %v8533_v49  ;;  %3036 = vmatpush.msra.mxu2 %v8536_v27  ;;  %11049 = vst [vmem:[#allocation104_spill] sm:$0xff] %v8544_v10  ;;  %v11051_v40 = vld [vmem:[#allocation75_spill] sm:$0xff]  ;;  %v8552_v27 = vld [vmem:[#allocation7 + $0x398] sm:$0xff] }
 0x4ab   :  { %2786 = vmatpush.msrb.mxu1 %v11046_v54  ;;  %2826 = vmatpush.msrb.mxu3 %v11047_v3  ;;  %v8549_v49 = vld [vmem:[#allocation7 + $0x390] sm:$0xff]  ;;  %11053 = vst [vmem:[#allocation109_spill] sm:$0xff] %v8552_v27  ;;  %v11054_v54 = vld [vmem:[#allocation84_spill] sm:$0xff]  ;;  %v11055_v3 = vld [vmem:[#allocation130_spill] sm:$0xff] }
 0x4ac   :  { %3061 = vmatpush.msra.mxu0 %v8541_v25  ;;  %3101 = vmatpush.msrb.mxu2 %v8544_v10  ;;  %11052 = vst [vmem:[#allocation108_spill] sm:$0xff] %v8549_v49  ;;  %v8557_v25 = vld [vmem:[#allocation7 + $0x350] sm:$0xff]  ;;  %v8560_v10 = vld [vmem:[#allocation7 + $0x358] sm:$0xff] }
 0x4ad   :  { %2787 = vmatpush.msrb.mxu1 %v11050_v46  ;;  %2827 = vmatpush.msrb.mxu3 %v11051_v40  ;;  %11056 = vst [vmem:[#allocation113_spill] sm:$0xff] %v8557_v25  ;;  %v11058_v46 = vld [vmem:[#allocation134_spill] sm:$0xff]  ;;  %v11059_v40 = vld [vmem:[#allocation135_spill] sm:$0xff] }
 0x4ae   :  { %3062 = vmatpush.msra.mxu0 %v8549_v49  ;;  %3102 = vmatpush.msrb.mxu2 %v8552_v27  ;;  %11057 = vst [vmem:[#allocation114_spill] sm:$0xff] %v8560_v10  ;;  %v8565_v49 = vld [vmem:[#allocation7 + $0x310] sm:$0xff]  ;;  %v8568_v27 = vld [vmem:[#allocation7 + $0x318] sm:$0xff] }
 0x4af   :  { %2788 = vmatpush.msrb.mxu1 %v11054_v54  ;;  %2828 = vmatpush.msrb.mxu3 %v11055_v3  ;;  %11060 = vst [vmem:[#allocation118_spill] sm:$0xff] %v8565_v49  ;;  %v11062_v54 = vld [vmem:[#allocation139_spill] sm:$0xff]  ;;  %v11063_v3 = vld [vmem:[#allocation144_spill] sm:$0xff] }
 0x4b0   :  { %3063 = vmatpush.msra.mxu0 %v8557_v25  ;;  %3103 = vmatpush.msrb.mxu2 %v8560_v10  ;;  %11061 = vst [vmem:[#allocation119_spill] sm:$0xff] %v8568_v27  ;;  %v8573_v25 = vld [vmem:[#allocation7 + $0x2d0] sm:$0xff]  ;;  %v8576_v10 = vld [vmem:[#allocation7 + $0x2d8] sm:$0xff] }
 0x4b1   :  { %2789 = vmatpush.msrb.mxu1 %v11058_v46  ;;  %2829 = vmatpush.msrb.mxu3 %v11059_v40  ;;  %11064 = vst [vmem:[#allocation120_spill] sm:$0xff] %v8573_v25  ;;  %v11066_v46 = vld [vmem:[#allocation148_spill] sm:$0xff]  ;;  %v11067_v40 = vld [vmem:[#allocation149_spill] sm:$0xff] }
 0x4b2   :  { %3064 = vmatpush.msra.mxu0 %v8565_v49  ;;  %3104 = vmatpush.msrb.mxu2 %v8568_v27  ;;  %11065 = vst [vmem:[#allocation140_spill] sm:$0xff] %v8576_v10  ;;  %v8581_v49 = vld [vmem:[#allocation7 + $0x290] sm:$0xff]  ;;  %v8584_v27 = vld [vmem:[#allocation7 + $0x298] sm:$0xff] }
 0x4b3   :  { %2790 = vmatpush.msrb.mxu1 %v11062_v54  ;;  %2830 = vmatpush.msrb.mxu3 %v11063_v3  ;;  %11068 = vst [vmem:[#allocation121_spill] sm:$0xff] %v8581_v49  ;;  %v11070_v54 = vld [vmem:[#allocation151_spill] sm:$0xff]  ;;  %v11071_v3 = vld [vmem:[#allocation152_spill] sm:$0xff] }
 0x4b4   :  { %3065 = vmatpush.msra.mxu0 %v8573_v25  ;;  %3105 = vmatpush.msrb.mxu2 %v8576_v10  ;;  %11069 = vst [vmem:[#allocation125_spill] sm:$0xff] %v8584_v27  ;;  %v8589_v25 = vld [vmem:[#allocation7 + $0x250] sm:$0xff]  ;;  %v8592_v10 = vld [vmem:[#allocation7 + $0x258] sm:$0xff] }
 0x4b5   :  { %2791 = vmatpush.msrb.mxu1 %v11066_v46  ;;  %2831 = vmatpush.msrb.mxu3 %v11067_v40  ;;  %11072 = vst [vmem:[#allocation126_spill] sm:$0xff] %v8589_v25  ;;  %v11074_v46 = vld [vmem:[#allocation78_spill] sm:$0xff]  ;;  %v11075_v40 = vld [vmem:[#allocation79_spill] sm:$0xff] }
 0x4b6   :  { %3066 = vmatpush.msra.mxu0 %v8581_v49  ;;  %3106 = vmatpush.msrb.mxu2 %v8584_v27  ;;  %11073 = vst [vmem:[#allocation129_spill] sm:$0xff] %v8592_v10  ;;  %v8597_v49 = vld [vmem:[#allocation7 + $0x210] sm:$0xff]  ;;  %v8600_v27 = vld [vmem:[#allocation7 + $0x218] sm:$0xff] }
 0x4b7   :  { %2792 = vmatpush.msrb.mxu1 %v11070_v54  ;;  %2832 = vmatpush.msrb.mxu3 %v11071_v3  ;;  %11076 = vst [vmem:[#allocation71_spill] sm:$0xff] %v8597_v49  ;;  %v11078_v54 = vld [vmem:[#allocation82_spill] sm:$0xff]  ;;  %v11079_v3 = vld [vmem:[#allocation83_spill] sm:$0xff] }
 0x4b8   :  { %3067 = vmatpush.msra.mxu0 %v8589_v25  ;;  %3107 = vmatpush.msrb.mxu2 %v8592_v10  ;;  %11077 = vst [vmem:[#allocation75_spill] sm:$0xff] %v8600_v27  ;;  %v8607_v10 = vld [vmem:[#allocation7 + $0x1d0] sm:$0xff]  ;;  %v11097_v25 = vld [vmem:[#allocation106_spill] sm:$0xff] }
 0x4b9   :  { %2793 = vmatpush.msrb.mxu1 %v11074_v46  ;;  %2833 = vmatpush.msrb.mxu3 %v11075_v40  ;;  %11080 = vst [vmem:[#allocation84_spill] sm:$0xff] %v8607_v10  ;;  %v8610_v46 = vld [vmem:[#allocation7 + $0x1d8] sm:$0xff]  ;;  %v11082_v40 = vld [vmem:[#allocation87_spill] sm:$0xff] }
 0x4ba   :  { %3068 = vmatpush.msra.mxu0 %v8597_v49  ;;  %3108 = vmatpush.msrb.mxu2 %v8600_v27  ;;  %11081 = vst [vmem:[#allocation130_spill] sm:$0xff] %v8610_v46  ;;  %v11083_v49 = vld [vmem:[#allocation88_spill] sm:$0xff]  ;;  %v8615_v27 = vld [vmem:[#allocation7 + $0x190] sm:$0xff] }
 0x4bb   :  { %2794 = vmatpush.msrb.mxu1 %v11078_v54  ;;  %2834 = vmatpush.msrb.mxu3 %v11079_v3  ;;  %11084 = vst [vmem:[#allocation134_spill] sm:$0xff] %v8615_v27  ;;  %v8618_v54 = vld [vmem:[#allocation7 + $0x198] sm:$0xff]  ;;  %v11087_v3 = vld [vmem:[#allocation93_spill] sm:$0xff] }
 0x4bc   :  { %2795 = vmatmul.f32.vlgmr.msrb.gmra.mxu1 %v8351_v37  ;;  %2835 = vmatmul.f32.vlgmr.msrb.gmra.mxu3 %v8351_v37  ;;  %11085 = vst [vmem:[#allocation135_spill] sm:$0xff] %v8618_v54  ;;  %v11086_v37 = vld [vmem:[#allocation92_spill] sm:$0xff] }
 0x4bd   :  { %3069 = vmatpush.msra.mxu0 %v8607_v10  ;;  %3109 = vmatpush.msrb.mxu2 %v8610_v46  ;;  %v8623_v10 = vld [vmem:[#allocation7 + $0x150] sm:$0xff]  ;;  %v8626_v46 = vld [vmem:[#allocation7 + $0x158] sm:$0xff] }
 0x4be   :  { %3001 = vmatpush.msra.mxu1 %v11082_v40  ;;  %3041 = vmatpush.msra.mxu3 %v11083_v49  ;;  %11088 = vst [vmem:[#allocation139_spill] sm:$0xff] %v8623_v10  ;;  %v11090_v49 = vld [vmem:[#allocation96_spill] sm:$0xff]  ;;  %v11091_v40 = vld [vmem:[#allocation97_spill] sm:$0xff] }
 0x4bf   :  { %3070 = vmatpush.msra.mxu0 %v8615_v27  ;;  %3110 = vmatpush.msrb.mxu2 %v8618_v54  ;;  %11089 = vst [vmem:[#allocation144_spill] sm:$0xff] %v8626_v46  ;;  %v8631_v27 = vld [vmem:[#allocation7 + $0x110] sm:$0xff]  ;;  %v8634_v54 = vld [vmem:[#allocation7 + $0x118] sm:$0xff] }
 0x4c0   :  { %3002 = vmatpush.msra.mxu1 %v11086_v37  ;;  %3042 = vmatpush.msra.mxu3 %v11087_v3  ;;  %11092 = vst [vmem:[#allocation148_spill] sm:$0xff] %v8631_v27  ;;  %v11094_v37 = vld [vmem:[#allocation101_spill] sm:$0xff]  ;;  %v11095_v3 = vld [vmem:[#allocation102_spill] sm:$0xff] }
 0x4c1   :  { %3071 = vmatpush.msra.mxu0 %v8623_v10  ;;  %3111 = vmatpush.msrb.mxu2 %v8626_v46  ;;  %11093 = vst [vmem:[#allocation149_spill] sm:$0xff] %v8634_v54  ;;  %v11096_v10 = vld [vmem:[#allocation105_spill] sm:$0xff]  ;;  %v11098_v46 = vld [vmem:[#allocation110_spill] sm:$0xff] }
 0x4c2   :  { %3003 = vmatpush.msra.mxu1 %v11090_v49  ;;  %3043 = vmatpush.msra.mxu3 %v11091_v40  ;;  %v11099_v49 = vld [vmem:[#allocation111_spill] sm:$0xff] }
 0x4c3   :  { %3072 = vmatpush.msra.mxu0 %v8631_v27  ;;  %3112 = vmatpush.msrb.mxu2 %v8634_v54  ;;  %v11100_v40 = vld [vmem:[#allocation115_spill] sm:$0xff] }
 0x4c4   :  { %3004 = vmatpush.msra.mxu1 %v11094_v37  ;;  %3044 = vmatpush.msra.mxu3 %v11095_v3  ;;  %v11102_v27 = vld [vmem:[#allocation123_spill] sm:$0xff]  ;;  %v11105_v37 = vld [vmem:[#allocation128_spill] sm:$0xff] }
 0x4c5   :  { %3073 = vmatpush.msra.mxu0 %v11096_v10  ;;  %3113 = vmatpush.msrb.mxu2 %v11097_v25  ;;  %v11104_v54 = vld [vmem:[#allocation127_spill] sm:$0xff]  ;;  %v11106_v3 = vld [vmem:[#allocation132_spill] sm:$0xff]  ;;  %v11107_v10 = vld [vmem:[#allocation133_spill] sm:$0xff] }
 0x4c6   :  { %3005 = vmatpush.msra.mxu1 %v11098_v46  ;;  %3045 = vmatpush.msra.mxu3 %v11099_v49  ;;  %v11108_v25 = vld [vmem:[#allocation137_spill] sm:$0xff]  ;;  %v11109_v46 = vld [vmem:[#allocation138_spill] sm:$0xff] }
 0x4c7   :  { %3074 = vmatpush.msra.mxu0 %v11100_v40  ;;  %3114 = vmatpush.msrb.mxu2 %v11101_v2  ;;  %v11110_v49 = vld [vmem:[#allocation141_spill] sm:$0xff]  ;;  %v11111_v40 = vld [vmem:[#allocation142_spill] sm:$0xff] }
 0x4c8   :  { %3006 = vmatpush.msra.mxu1 %v11102_v27  ;;  %3046 = vmatpush.msra.mxu3 %v11103_v1  ;;  %v11112_v2 = vld [vmem:[#allocation117_spill] sm:$0xff]  ;;  %v11113_v27 = vld [vmem:[#allocation60_spill] sm:$0xff]  ;;  %v11114_v1 = vld [vmem:[#allocation63_spill] sm:$0xff] }
 0x4c9   :  { %3075 = vmatpush.msra.mxu0 %v11104_v54  ;;  %3115 = vmatpush.msrb.mxu2 %v11105_v37  ;;  %v11115_v54 = vld [vmem:[#allocation68_spill] sm:$0xff]  ;;  %v11116_v37 = vld [vmem:[#allocation158_spill] sm:$0xff] }
 0x4ca   :  { %3007 = vmatpush.msra.mxu1 %v11106_v3  ;;  %3047 = vmatpush.msra.mxu3 %v11107_v10  ;;  %v11117_v3 = vld [vmem:[#allocation159_spill] sm:$0xff]  ;;  %v8661_v10 = vld [vmem:[#allocation7 + $0x500] sm:$0xff] }
 0x4cb   :  { %3076 = vmatpush.msra.mxu0 %v11108_v25  ;;  %3116 = vmatpush.msrb.mxu2 %v11109_v46  ;;  %11118 = vst [vmem:[#allocation151_spill] sm:$0xff] %v8661_v10  ;;  %v8664_v25 = vld [vmem:[#allocation7 + $0x508] sm:$0xff]  ;;  %v8667_v46 = vld [vmem:[#allocation7 + $0x4c0] sm:$0xff] }
 0x4cc   :  { %3008 = vmatpush.msra.mxu1 %v11110_v49  ;;  %3048 = vmatpush.msra.mxu3 %v11111_v40  ;;  %11119 = vst [vmem:[#allocation152_spill] sm:$0xff] %v8664_v25  ;;  %v8670_v49 = vld [vmem:[#allocation7 + $0x4c8] sm:$0xff]  ;;  %v8673_v40 = vld [vmem:[#allocation7 + $0x480] sm:$0xff] }
 0x4cd   :  { %11120 = vst [vmem:[#allocation78_spill] sm:$0xff] %v8667_v46 }
 0x4ce   :  { %3009 = vmatpush.msra.mxu1 %v11112_v2  ;;  %3049 = vmatpush.msra.mxu3 %v11113_v27  ;;  %11121 = vst [vmem:[#allocation79_spill] sm:$0xff] %v8670_v49  ;;  %v8676_v2 = vld [vmem:[#allocation7 + $0x488] sm:$0xff]  ;;  %v8679_v27 = vld [vmem:[#allocation7 + $0x440] sm:$0xff] }
 0x4cf   :  { %11122 = vst [vmem:[#allocation82_spill] sm:$0xff] %v8673_v40 }
 0x4d0   :  { %3010 = vmatpush.msra.mxu1 %v11114_v1  ;;  %3050 = vmatpush.msra.mxu3 %v11115_v54  ;;  %11123 = vst [vmem:[#allocation83_spill] sm:$0xff] %v8676_v2  ;;  %v8682_v1 = vld [vmem:[#allocation7 + $0x448] sm:$0xff]  ;;  %v8685_v54 = vld [vmem:[#allocation7 + $0x400] sm:$0xff] }
 0x4d1   :  { %11124 = vst [vmem:[#allocation87_spill] sm:$0xff] %v8679_v27 }
 0x4d2   :  { %3011 = vmatpush.msra.mxu1 %v11116_v37  ;;  %3051 = vmatpush.msra.mxu3 %v11117_v3  ;;  %11125 = vst [vmem:[#allocation88_spill] sm:$0xff] %v8682_v1  ;;  %v8688_v37 = vld [vmem:[#allocation7 + $0x408] sm:$0xff]  ;;  %v8691_v3 = vld [vmem:[#allocation7 + $0x7d0] sm:$0xff] }
 0x4d3   :  { %11126 = vst [vmem:[#allocation92_spill] sm:$0xff] %v8685_v54 }
 0x4d4   :  { %3012 = vmatpush.msra.mxu1 %v8661_v10  ;;  %3052 = vmatpush.msra.mxu3 %v8664_v25  ;;  %11127 = vst [vmem:[#allocation93_spill] sm:$0xff] %v8688_v37  ;;  %v11153_v25 = vld [vmem:[#allocation23_spill] sm:$0xff]  ;;  %v11155_v10 = vld [vmem:[#allocation25_spill] sm:$0xff] }
 0x4d5   :  { %11128 = vst [vmem:[#allocation96_spill] sm:$0xff] %v8691_v3 }
 0x4d6   :  { %3013 = vmatpush.msra.mxu1 %v8667_v46  ;;  %3053 = vmatpush.msra.mxu3 %v8670_v49  ;;  %v11149_v49 = vld [vmem:[#allocation163_spill] sm:$0xff]  ;;  %v11151_v46 = vld [vmem:[#allocation164_spill] sm:$0xff] }
 0x4d8   :  { %3014 = vmatpush.msra.mxu1 %v8673_v40  ;;  %3054 = vmatpush.msra.mxu3 %v8676_v2  ;;  %v8694_v2 = vld [vmem:[#allocation7 + $0x7d8] sm:$0xff]  ;;  %v11147_v40 = vld [vmem:[#allocation161_spill] sm:$0xff] }
 0x4d9   :  { %11129 = vst [vmem:[#allocation97_spill] sm:$0xff] %v8694_v2 }
 0x4da   :  { %3015 = vmatpush.msra.mxu1 %v8679_v27  ;;  %3055 = vmatpush.msra.mxu3 %v8682_v1  ;;  %v8697_v27 = vld [vmem:[#allocation7 + $0x790] sm:$0xff]  ;;  %v8700_v1 = vld [vmem:[#allocation7 + $0x798] sm:$0xff] }
 0x4db   :  { %11130 = vst [vmem:[#allocation101_spill] sm:$0xff] %v8697_v27 }
 0x4dc   :  { %3016 = vmatpush.msra.mxu1 %v8685_v54  ;;  %3056 = vmatpush.msra.mxu3 %v8688_v37  ;;  %11131 = vst [vmem:[#allocation102_spill] sm:$0xff] %v8700_v1  ;;  %v8703_v54 = vld [vmem:[#allocation7 + $0x750] sm:$0xff]  ;;  %v8706_v37 = vld [vmem:[#allocation7 + $0x758] sm:$0xff] }
 0x4dd   :  { %11132 = vst [vmem:[#allocation105_spill] sm:$0xff] %v8703_v54 }
 0x4de   :  { %3081 = vmatpush.msrb.mxu1 %v8691_v3  ;;  %3121 = vmatpush.msrb.mxu3 %v8694_v2  ;;  %11133 = vst [vmem:[#allocation106_spill] sm:$0xff] %v8706_v37  ;;  %v8709_v3 = vld [vmem:[#allocation7 + $0x710] sm:$0xff]  ;;  %v8712_v2 = vld [vmem:[#allocation7 + $0x718] sm:$0xff] }
 0x4df   :  { %11134 = vst [vmem:[#allocation110_spill] sm:$0xff] %v8709_v3 }
 0x4e0   :  { %3082 = vmatpush.msrb.mxu1 %v8697_v27  ;;  %3122 = vmatpush.msrb.mxu3 %v8700_v1  ;;  %11135 = vst [vmem:[#allocation111_spill] sm:$0xff] %v8712_v2  ;;  %v8715_v27 = vld [vmem:[#allocation7 + $0x6d0] sm:$0xff]  ;;  %v8718_v1 = vld [vmem:[#allocation7 + $0x6d8] sm:$0xff] }
 0x4e1   :  { %11136 = vst [vmem:[#allocation115_spill] sm:$0xff] %v8715_v27 }
 0x4e2   :  { %3083 = vmatpush.msrb.mxu1 %v8703_v54  ;;  %3123 = vmatpush.msrb.mxu3 %v8706_v37  ;;  %11137 = vst [vmem:[#allocation116_spill] sm:$0xff] %v8718_v1  ;;  %v8721_v54 = vld [vmem:[#allocation7 + $0x690] sm:$0xff]  ;;  %v8724_v37 = vld [vmem:[#allocation7 + $0x698] sm:$0xff] }
 0x4e3   :  { %11138 = vst [vmem:[#allocation123_spill] sm:$0xff] %v8721_v54 }
 0x4e4   :  { %3084 = vmatpush.msrb.mxu1 %v8709_v3  ;;  %3124 = vmatpush.msrb.mxu3 %v8712_v2  ;;  %11139 = vst [vmem:[#allocation124_spill] sm:$0xff] %v8724_v37  ;;  %v8727_v3 = vld [vmem:[#allocation7 + $0x650] sm:$0xff]  ;;  %v8730_v2 = vld [vmem:[#allocation7 + $0x658] sm:$0xff] }
 0x4e5   :  { %11140 = vst [vmem:[#allocation127_spill] sm:$0xff] %v8727_v3 }
 0x4e6   :  { %3085 = vmatpush.msrb.mxu1 %v8715_v27  ;;  %3125 = vmatpush.msrb.mxu3 %v8718_v1  ;;  %11141 = vst [vmem:[#allocation128_spill] sm:$0xff] %v8730_v2  ;;  %v8733_v27 = vld [vmem:[#allocation7 + $0x610] sm:$0xff]  ;;  %v8736_v1 = vld [vmem:[#allocation7 + $0x618] sm:$0xff] }
 0x4e7   :  { %11142 = vst [vmem:[#allocation132_spill] sm:$0xff] %v8733_v27 }
 0x4e8   :  { %3086 = vmatpush.msrb.mxu1 %v8721_v54  ;;  %3126 = vmatpush.msrb.mxu3 %v8724_v37  ;;  %11143 = vst [vmem:[#allocation133_spill] sm:$0xff] %v8736_v1  ;;  %v8739_v54 = vld [vmem:[#allocation7 + $0x5d0] sm:$0xff]  ;;  %v8742_v37 = vld [vmem:[#allocation7 + $0x5d8] sm:$0xff] }
 0x4e9   :  { %11144 = vst [vmem:[#allocation137_spill] sm:$0xff] %v8739_v54 }
 0x4ea   :  { %3087 = vmatpush.msrb.mxu1 %v8727_v3  ;;  %3127 = vmatpush.msrb.mxu3 %v8730_v2  ;;  %11145 = vst [vmem:[#allocation138_spill] sm:$0xff] %v8742_v37  ;;  %v11146_v3 = vld [vmem:[#allocation160_spill] sm:$0xff]  ;;  %v11148_v2 = vld [vmem:[#allocation162_spill] sm:$0xff] }
 0x4ec   :  { %3088 = vmatpush.msrb.mxu1 %v8733_v27  ;;  %3128 = vmatpush.msrb.mxu3 %v8736_v1  ;;  %v11150_v27 = vld [vmem:[#allocation21_spill] sm:$0xff]  ;;  %v11152_v1 = vld [vmem:[#allocation22_spill] sm:$0xff] }
 0x4ee   :  { %3089 = vmatpush.msrb.mxu1 %v8739_v54  ;;  %3129 = vmatpush.msrb.mxu3 %v8742_v37  ;;  %v11154_v54 = vld [vmem:[#allocation24_spill] sm:$0xff]  ;;  %v2536_v37 = vpop.f32.mrf.mxu0 }
 0x4f0   :  { %3090 = vmatpush.msrb.mxu1 %v11146_v3  ;;  %3130 = vmatpush.msrb.mxu3 %v11147_v40  ;;  %v11157_v40 = vld [vmem:[#allocation15_spill] sm:$0xff] }
 0x4f1   :  { %v166_v34 = vadd.f32 %v11157_v40, %v11156_v45 }
 0x4f2   :  { %3091 = vmatpush.msrb.mxu1 %v11148_v2  ;;  %3131 = vmatpush.msrb.mxu3 %v11149_v49  ;;  %v11159_v49 = vld [vmem:[#allocation27_spill] sm:$0xff] }
 0x4f4   :  { %3092 = vmatpush.msrb.mxu1 %v11150_v27  ;;  %3132 = vmatpush.msrb.mxu3 %v11151_v46  ;;  %v11160_v46 = vld [vmem:[#allocation28_spill] sm:$0xff] }
 0x4f6   :  { %3093 = vmatpush.msrb.mxu1 %v11152_v1  ;;  %3133 = vmatpush.msrb.mxu3 %v11153_v25  ;;  %v11161_v1 = vld [vmem:[#allocation29_spill] sm:$0xff]  ;;  %v2576_v25 = vpop.f32.mrf.mxu2 }
 0x4f8   :  { %3094 = vmatpush.msrb.mxu1 %v11154_v54  ;;  %3134 = vmatpush.msrb.mxu3 %v11155_v10  ;;  %v2556_v3 = vpop.f32.mrf.mxu1  ;;  %v11163_v10 = vld [vmem:[#allocation112_spill] sm:$0xff] }
 0x4f9   :  { %v2557_v2 = vadd.f32 %v2556_v3, %v2536_v37  ;;  %v207_v22 = vadd.f32 %v11163_v10, %v11162_v24  ;;  %v11167_v10 = vld [vmem:[#allocation131_spill] sm:$0xff] }
 0x4fa   :  { %3095 = vmatpush.msrb.mxu1 %v11158_v7  ;;  %3135 = vmatpush.msrb.mxu3 %v11159_v49 }
 0x4fb   :  { %v2911_v27 = vadd.f32 %v2557_v2, %v166_v34  ;;  %v11164_v34 = vld [vmem:[#allocation18_spill] sm:$0xff] }
 0x4fc   :  { %3096 = vmatpush.msrb.mxu1 %v11160_v46  ;;  %3136 = vmatpush.msrb.mxu3 %v11161_v1  ;;  %v11165_v2 = vld [vmem:[#allocation122_spill] sm:$0xff] }
 0x4fd   :  { %v4255_v51 = vmul.f32 -1.442695, %v2911_v27  ;;  %v289_v46 = vadd.f32 %v11165_v2, %v11164_v34 }
 0x4fe   :  { %v2596_v54 = vpop.f32.mrf.mxu3  ;;  %v2656_v7 = vpop.f32.mrf.mxu2 }
 0x4ff   :  { %4441 = vpow2.f32 %v4255_v51  ;;  %v2597_v38 = vadd.f32 %v2596_v54, %v2576_v25  ;;  %v11166_v54 = vld [vmem:[#allocation20_spill] sm:$0xff] }
 0x500   :  { %v2636_v52 = vpop.f32.mrf.mxu1 }
 0x501   :  { %v2912_v31 = vadd.f32 %v2597_v38, %v207_v22  ;;  %v2616_v38 = vpop.f32.mrf.mxu0 }
 0x502   :  { %v2637_v22 = vadd.f32 %v2636_v52, %v2616_v38 }
 0x503   :  { %v4256_v40 = vmul.f32 -1.442695, %v2912_v31 }
 0x505   :  { %v4442_v37 = vpop.eup %4441  ;;  %4443 = vpow2.f32 %v4256_v40  ;;  %v248_v40 = vadd.f32 %v11167_v10, %v11166_v54 }
 0x506   :  { %v2918_v3 = vadd.f32 1.0, %v4442_v37  ;;  %v2676_v49 = vpop.f32.mrf.mxu3  ;;  %v2736_v52 = vpop.f32.mrf.mxu2 }
 0x507   :  { %v2677_v45 = vadd.f32 %v2676_v49, %v2656_v7  ;;  %v2913_v7 = vadd.f32 %v2637_v22, %v248_v40 }
 0x508   :  { %4445 = vrcp.f32 %v2918_v3  ;;  %vm2924_vm14 = vweird.f32 %v2918_v3 }
 0x509   :  { %v2914_v1 = vadd.f32 %v2677_v45, %v289_v46  ;;  %v2696_v38 = vpop.f32.mrf.mxu0 }
 0x50b   :  { %v4444_v27 = vpop.eup %4443  ;;  %v4257_v29 = vmul.f32 -1.442695, %v2914_v1  ;;  %v2930_v1 = vand.u32 2147483648, %v2918_v3 }
 0x50c   :  { %v2937_v26 = vadd.f32 1.0, %v4444_v27  ;;  %v2928_v27 = vand.u32 2147483647, %v2918_v3 }
 0x50d   :  { %4447 = vpow2.f32 %v4257_v29  ;;  %v2931_v10 = vor.u32 1.1754944e-38, %v2930_v1 }
 0x50e   :  { %v4446_v51 = vpop.eup %4445  ;;  %4449 = vrcp.f32 %v2937_v26  ;;  %v2949_v34 = vand.u32 2147483648, %v2937_v26  ;;  %vm2943_vm1 = vweird.f32 %v2937_v26  ;;  %vm2929_vm2 = vcmp.eq.f32.partialorder %v2928_v27, 8.507059e+37 }
 0x50f   :  { %v2920_v31 = vmul.f32 %v4446_v51, %v2918_v3  ;;  %vm2925_vm13 = vweird.f32 %v4446_v51 }
 0x510   :  { %vm8767_vm15 = vmor %vm2924_vm14, %vm2925_vm13 }
 0x511   :  { %v2921_v25 = vsub.f32 1.0, %v2920_v31 }
 0x513   :  { %v4448_v37 = vpop.eup %4447  ;;  %v2922_v24 = vmul.f32 %v4446_v51, %v2921_v25  ;;  %v2947_v25 = vand.u32 2147483647, %v2937_v26 }
 0x514   :  { %v4450_v2 = vpop.eup %4449  ;;  %v2957_v49 = vadd.f32 1.0, %v4448_v37 }
 0x515   :  { %v2939_v45 = vmul.f32 %v4450_v2, %v2937_v26  ;;  %v2923_v46 = vadd.f32 %v4446_v51, %v2922_v24  ;;  %vm2944_vm0 = vweird.f32 %v4450_v2  ;;  %vm2948_vm4 = vcmp.eq.f32.partialorder %v2947_v25, 8.507059e+37 }
 0x516   :  { %4451 = vrcp.f32 %v2957_v49  ;;  %vm2945_vm3 = vmor %vm2943_vm1, %vm2944_vm0  ;;  %vm2963_vm6 = vweird.f32 %v2957_v49  ;;  %v2967_v25 = vand.u32 2147483647, %v2957_v49 }
 0x517   :  { %v2940_v29 = vsub.f32 1.0, %v2939_v45  ;;  %4453 = vtanh.f32 %v2913_v7  ;;  %v2927_v22 = vsel %vm8767_vm15, %v4446_v51, %v2923_v46  ;;  %v2950_v45 = vor.u32 1.1754944e-38, %v2949_v34 }
 0x518   :  { %v2932_v54 = vsel %vm2929_vm2, %v2931_v10, %v2927_v22  ;;  %vm2968_vm8 = vcmp.eq.f32.partialorder %v2967_v25, 8.507059e+37  ;;  %v11183_v25 = vld [vmem:[#allocation43_spill] sm:$0xff] }
 0x519   :  { %v2941_v31 = vmul.f32 %v4450_v2, %v2940_v29  ;;  %v2716_v24 = vpop.f32.mrf.mxu1 }
 0x51a   :  { %v2717_v40 = vadd.f32 %v2716_v24, %v2696_v38 }
 0x51b   :  { %v2942_v37 = vadd.f32 %v4450_v2, %v2941_v31 }
 0x51c   :  { %v4452_v3 = vpop.eup %4451  ;;  %v2839_v57 = vadd.f32 %v2717_v40, %v6361_v43 }
 0x51d   :  { %v2946_v58 = vsel %vm2945_vm3, %v4450_v2, %v2942_v37  ;;  %v2959_v7 = vmul.f32 %v4452_v3, %v2957_v49  ;;  %v4454_v12 = vpop.eup %4453  ;;  %vm2964_vm5 = vweird.f32 %v4452_v3 }
 0x51e   :  { %v2951_v29 = vsel %vm2948_vm4, %v2950_v45, %v2946_v58  ;;  %v2974_v46 = vmul.f32 %v4454_v12, %v2932_v54  ;;  %v4252_v34 = vmul.f32 -1.442695, %v2839_v57  ;;  %v2969_v58 = vand.u32 2147483648, %v2957_v49  ;;  %vm2965_vm7 = vmor %vm2963_vm6, %vm2964_vm5  ;;  %v11170_v45 = vld [vmem:[#allocation30_spill] sm:$0xff] }
 0x51f   :  { %v2973_v51 = vmul.f32 %v2951_v29, %v8135_v8  ;;  %v2960_v1 = vsub.f32 1.0, %v2959_v7  ;;  %v2756_v38 = vpop.f32.mrf.mxu3  ;;  %v11171_v7 = vld [vmem:[#allocation31_spill] sm:$0xff]  ;;  %v11172_v29 = vld [vmem:[#allocation32_spill] sm:$0xff] }
 0x520   :  { %v2757_v26 = vadd.f32 %v2756_v38, %v2736_v52  ;;  %v2970_v12 = vor.u32 1.1754944e-38, %v2969_v58  ;;  %v11173_v52 = vld [vmem:[#allocation33_spill] sm:$0xff]  ;;  %v11182_v58 = vld [vmem:[#allocation42_spill] sm:$0xff] }
 0x521   :  { %v8775_v27 = vadd.f32 %v2974_v46, %v2973_v51  ;;  %v2961_v31 = vmul.f32 %v4452_v3, %v2960_v1  ;;  %v11178_v46 = vld [vmem:[#allocation38_spill] sm:$0xff]  ;;  %v11179_v1 = vld [vmem:[#allocation39_spill] sm:$0xff] }
 0x522   :  { %v2840_v2 = vadd.f32 %v2757_v26, %v6366_v32  ;;  %v11180_v26 = vld [vmem:[#allocation40_spill] sm:$0xff] }
 0x523   :  { %4455 = vtanh.f32 %v8775_v27  ;;  %v2962_v22 = vadd.f32 %v4452_v3, %v2961_v31  ;;  %v11181_v31 = vld [vmem:[#allocation41_spill] sm:$0xff] }
 0x524   :  { %v4253_v24 = vmul.f32 -1.442695, %v2840_v2  ;;  %4457 = vpow2.f32 %v4252_v34 }
 0x525   :  { %v2966_v8 = vsel %vm2965_vm7, %v4452_v3, %v2962_v22 }
 0x526   :  { %4459 = vpow2.f32 %v4253_v24  ;;  %v2971_v10 = vsel %vm2968_vm8, %v2970_v12, %v2966_v8  ;;  %v2776_v24 = vpop.f32.mrf.mxu0  ;;  %v2816_v8 = vpop.f32.mrf.mxu2 }
 0x529   :  { %v4456_v54 = vpop.eup %4455 }
 0x52a   :  { %v8779_v40 = vmul.f32 %v4456_v54, %v2971_v10  ;;  %v4458_v57 = vpop.eup %4457  ;;  %v11184_v54 = vld [vmem:[#allocation44_spill] sm:$0xff] }
 0x52b   :  { %v8785_v49 = vadd.f32 1.0, %v4458_v57 }
 0x52c   :  { %2997 = vmatmul.f32.vlgmr.msrb.gmra.mxu0 %v8779_v40  ;;  %3037 = vmatmul.f32.vlgmr.msra.gmra.mxu2 %v8779_v40  ;;  %v4460_v37 = vpop.eup %4459 }
 0x52d   :  { %3141 = vmatpush.msrb.mxu0 %v8143_v11  ;;  %3181 = vmatpush.msra.mxu2 %v8146_v61  ;;  %v8789_v3 = vadd.f32 1.0, %v4460_v37  ;;  %4461 = vrcp.f32 %v8785_v49  ;;  %v11174_v11 = vld [vmem:[#allocation34_spill] sm:$0xff]  ;;  %v11175_v61 = vld [vmem:[#allocation35_spill] sm:$0xff]  ;;  %vm2852_vm11 = vweird.f32 %v8785_v49 }
 0x52f   :  { %3142 = vmatpush.msrb.mxu0 %v8151_v14  ;;  %3182 = vmatpush.msra.mxu2 %v8154_v19  ;;  %4463 = vrcp.f32 %v8789_v3  ;;  %v11176_v14 = vld [vmem:[#allocation36_spill] sm:$0xff]  ;;  %v11177_v19 = vld [vmem:[#allocation37_spill] sm:$0xff]  ;;  %vm2871_vm12 = vweird.f32 %v8789_v3 }
 0x531   :  { %3143 = vmatpush.msrb.mxu0 %v11170_v45  ;;  %3183 = vmatpush.msra.mxu2 %v11171_v7  ;;  %v11185_v7 = vld [vmem:[#allocation156_spill] sm:$0xff] }
 0x533   :  { %3144 = vmatpush.msrb.mxu0 %v11172_v29  ;;  %3184 = vmatpush.msra.mxu2 %v11173_v52  ;;  %v8803_v51 = vpop.eup %4461  ;;  %v11186_v52 = vld [vmem:[#allocation45_spill] sm:$0xff] }
 0x534   :  { %3077 = vmatmul.f32.vlgmr.msra.gmra.mxu0 %v8779_v40  ;;  %3117 = vmatmul.f32.vlgmr.msrb.gmra.mxu2 %v8779_v40  ;;  %v2848_v34 = vmul.f32 %v8803_v51, %v8785_v49  ;;  %vm2853_vm9 = vweird.f32 %v8803_v51 }
 0x535   :  { %3145 = vmatpush.msrb.mxu0 %v11174_v11  ;;  %3185 = vmatpush.msra.mxu2 %v11175_v61  ;;  %v8807_v38 = vpop.eup %4463  ;;  %v11187_v11 = vld [vmem:[#allocation46_spill] sm:$0xff]  ;;  %v11188_v61 = vld [vmem:[#allocation157_spill] sm:$0xff]  ;;  %vm8841_vm13 = vmor %vm2852_vm11, %vm2853_vm9 }
 0x536   :  { %v2867_v2 = vmul.f32 %v8807_v38, %v8789_v3  ;;  %v2849_v37 = vsub.f32 1.0, %v2848_v34  ;;  %vm2872_vm10 = vweird.f32 %v8807_v38 }
 0x537   :  { %3146 = vmatpush.msrb.mxu0 %v11176_v14  ;;  %3186 = vmatpush.msra.mxu2 %v11177_v19  ;;  %vm8851_vm14 = vmor %vm2871_vm12, %vm2872_vm10 }
 0x538   :  { %v2868_v45 = vsub.f32 1.0, %v2867_v2  ;;  %v11193_v2 = vld [vmem:[#allocation51_spill] sm:$0xff] }
 0x539   :  { %3147 = vmatpush.msrb.mxu0 %v11178_v46  ;;  %3187 = vmatpush.msra.mxu2 %v11179_v1  ;;  %v2796_v22 = vpop.f32.mrf.mxu1  ;;  %v11189_v1 = vld [vmem:[#allocation47_spill] sm:$0xff] }
 0x53a   :  { %v2797_v10 = vadd.f32 %v2796_v22, %v2776_v24  ;;  %v2869_v46 = vmul.f32 %v8807_v38, %v2868_v45  ;;  %v11194_v22 = vld [vmem:[#allocation52_spill] sm:$0xff] }
 0x53b   :  { %3148 = vmatpush.msrb.mxu0 %v11180_v26  ;;  %3188 = vmatpush.msra.mxu2 %v11181_v31  ;;  %v11190_v26 = vld [vmem:[#allocation48_spill] sm:$0xff] }
 0x53c   :  { %v2841_v14 = vadd.f32 %v2797_v10, %v11188_v61  ;;  %v2870_v34 = vadd.f32 %v8807_v38, %v2869_v46  ;;  %v11198_v10 = vld [vmem:[#allocation54_spill] sm:$0xff]  ;;  %v11203_v46 = vld [vmem:[#allocation56_spill] sm:$0xff] }
 0x53d   :  { %3149 = vmatpush.msrb.mxu0 %v11182_v58  ;;  %3189 = vmatpush.msra.mxu2 %v11183_v25  ;;  %v2877_v58 = vand.u32 2147483648, %v8789_v3  ;;  %v2858_v25 = vand.u32 2147483648, %v8785_v49 }
 0x53f   :  { %v2836_v12 = vpop.f32.mrf.mxu3  ;;  %3150 = vmatpush.msrb.mxu0 %v11184_v54  ;;  %3190 = vmatpush.msra.mxu2 %v8216_v30  ;;  %v2850_v30 = vmul.f32 %v8803_v51, %v2849_v37  ;;  %v11197_v54 = vld [vmem:[#allocation53_spill] sm:$0xff] }
 0x540   :  { %v2837_v57 = vadd.f32 %v2836_v12, %v2816_v8  ;;  %v2856_v8 = vand.u32 2147483647, %v8785_v49  ;;  %v2875_v12 = vand.u32 2147483647, %v8789_v3  ;;  %v2874_v3 = vsel %vm8851_vm14, %v8807_v38, %v2870_v34  ;;  %v11209_v34 = vld [vmem:[#allocation65_spill] sm:$0xff] }
 0x541   :  { %3151 = vmatpush.msrb.mxu0 %v8219_v5  ;;  %3191 = vmatpush.msra.mxu2 %v8222_v63  ;;  %v11191_v5 = vld [vmem:[#allocation49_spill] sm:$0xff]  ;;  %v11192_v63 = vld [vmem:[#allocation50_spill] sm:$0xff]  ;;  %v2851_v31 = vadd.f32 %v8803_v51, %v2850_v30 }
 0x542   :  { %v2842_v29 = vadd.f32 %v2837_v57, %v11185_v7  ;;  %vm2857_vm15 = vcmp.eq.f32.partialorder %v2856_v8, 8.507059e+37  ;;  %vm2876_vm0 = vcmp.eq.f32.partialorder %v2875_v12, 8.507059e+37  ;;  %v11211_v8 = vld [vmem:[#allocation67_spill] sm:$0xff]  ;;  %v8943_v37 = vld [vmem:[#allocation7 + $0x660] sm:$0xff] }
 0x543   :  { %3152 = vmatpush.msrb.mxu0 %v11186_v52  ;;  %3192 = vmatpush.msra.mxu2 %v11187_v11  ;;  %v2855_v49 = vsel %vm8841_vm13, %v8803_v51, %v2851_v31  ;;  %v2878_v52 = vor.u32 1.1754944e-38, %v2877_v58  ;;  %v2859_v11 = vor.u32 1.1754944e-38, %v2858_v25  ;;  %v11208_v31 = vld [vmem:[#allocation64_spill] sm:$0xff]  ;;  %v11210_v58 = vld [vmem:[#allocation66_spill] sm:$0xff] }
 0x544   :  { %v4254_v19 = vmul.f32 -1.442695, %v2842_v29 }
 0x545   :  { %3153 = vmatpush.msrb.mxu0 %v11189_v1  ;;  %3193 = vmatpush.msra.mxu2 %v11190_v26  ;;  %v2860_v51 = vsel %vm2857_vm15, %v2859_v11, %v2855_v49  ;;  %v11204_v26 = vld [vmem:[#allocation58_spill] sm:$0xff] }
 0x546   :  { %4465 = vpow2.f32 %v4254_v19  ;;  %v8978_v49 = vld [vmem:[#allocation7 + $0x568] sm:$0xff] }
 0x547   :  { %3154 = vmatpush.msrb.mxu0 %v11191_v5  ;;  %3194 = vmatpush.msra.mxu2 %v11192_v63  ;;  %4467 = vtanh.f32 %v2841_v14  ;;  %v2879_v14 = vsel %vm2876_vm0, %v2878_v52, %v2874_v3  ;;  %v11206_v5 = vld [vmem:[#allocation61_spill] sm:$0xff]  ;;  %v11207_v63 = vld [vmem:[#allocation62_spill] sm:$0xff] }
 0x548   :  { %v8983_v3 = vld [vmem:[#allocation7 + $0x520] sm:$0xff]  ;;  %v8994_v11 = vld [vmem:[#allocation7 + $0x4e8] sm:$0xff] }
 0x549   :  { %3155 = vmatpush.msrb.mxu0 %v11193_v2  ;;  %3195 = vmatpush.msra.mxu2 %v11194_v22  ;;  %v8991_v52 = vld [vmem:[#allocation7 + $0x4e0] sm:$0xff] }
 0x54b   :  { %3156 = vmatpush.msrb.mxu0 %v11197_v54  ;;  %3196 = vmatpush.msra.mxu2 %v11198_v10 }
 0x54c   :  { %v4466_v57 = vpop.eup %4465  ;;  %3157 = vmatmul.f32.vlgmr.msrb.gmra.mxu0 %v8779_v40  ;;  %3197 = vmatmul.f32.vlgmr.msra.gmra.mxu2 %v8779_v40 }
 0x54d   :  { %v2885_v45 = vadd.f32 1.0, %v4466_v57  ;;  %3221 = vmatpush.msra.mxu0 %v8287_v13  ;;  %3261 = vmatpush.msrb.mxu2 %v8290_v55  ;;  %v4468_v29 = vpop.eup %4467  ;;  %v11201_v13 = vld [vmem:[#allocation57_spill] sm:$0xff]  ;;  %v11202_v55 = vld [vmem:[#allocation55_spill] sm:$0xff] }
 0x54e   :  { %v2902_v19 = vmul.f32 %v4468_v29, %v2860_v51  ;;  %v2901_v38 = vmul.f32 %v2879_v14, %v11201_v13  ;;  %v11216_v29 = vld [vmem:[#allocation74_spill] sm:$0xff]  ;;  %v11217_v51 = vld [vmem:[#allocation76_spill] sm:$0xff]  ;;  %v11218_v14 = vld [vmem:[#allocation77_spill] sm:$0xff] }
 0x54f   :  { %4469 = vrcp.f32 %v2885_v45  ;;  %3222 = vmatpush.msra.mxu0 %v8293_v60  ;;  %3262 = vmatpush.msrb.mxu2 %v8296_v17  ;;  %v11205_v60 = vld [vmem:[#allocation59_spill] sm:$0xff]  ;;  %v2895_v22 = vand.u32 2147483647, %v2885_v45  ;;  %vm2891_vm2 = vweird.f32 %v2885_v45  ;;  %v9002_v13 = vld [vmem:[#allocation7 + $0x4a8] sm:$0xff] }
 0x550   :  { %v8872_v1 = vadd.f32 %v2902_v19, %v2901_v38  ;;  %v8999_v19 = vld [vmem:[#allocation7 + $0x4a0] sm:$0xff]  ;;  %11220 = vst [vmem:[#allocation142_spill] sm:$0xff] %v9002_v13  ;;  %v11221_v38 = vld [vmem:[#allocation80_spill] sm:$0xff] }
 0x551   :  { %3223 = vmatpush.msra.mxu0 %v8299_v23  ;;  %3263 = vmatpush.msrb.mxu2 %v8302_v35  ;;  %v2897_v35 = vand.u32 2147483648, %v2885_v45  ;;  %vm2896_vm4 = vcmp.eq.f32.partialorder %v2895_v22, 8.507059e+37  ;;  %11219 = vst [vmem:[#allocation141_spill] sm:$0xff] %v8999_v19  ;;  %v11235_v22 = vld [vmem:[#allocation94_spill] sm:$0xff] }
 0x552   :  { %4471 = vtanh.f32 %v8872_v1 }
 0x553   :  { %3224 = vmatpush.msra.mxu0 %v11202_v55  ;;  %3264 = vmatpush.msrb.mxu2 %v11203_v46  ;;  %v2898_v24 = vor.u32 1.1754944e-38, %v2897_v35  ;;  %v11222_v55 = vld [vmem:[#allocation81_spill] sm:$0xff]  ;;  %v11231_v35 = vld [vmem:[#allocation90_spill] sm:$0xff] }
 0x554   :  { %v9007_v46 = vld [vmem:[#allocation7 + $0x460] sm:$0xff] }
 0x555   :  { %v4470_v30 = vpop.eup %4469  ;;  %3225 = vmatpush.msra.mxu0 %v11204_v26  ;;  %3265 = vmatpush.msrb.mxu2 %v11205_v60  ;;  %11223 = vst [vmem:[#allocation117_spill] sm:$0xff] %v9007_v46  ;;  %v11225_v26 = vld [vmem:[#allocation85_spill] sm:$0xff]  ;;  %v11226_v60 = vld [vmem:[#allocation86_spill] sm:$0xff] }
 0x556   :  { %v2887_v17 = vmul.f32 %v4470_v30, %v2885_v45  ;;  %vm2892_vm1 = vweird.f32 %v4470_v30  ;;  %v8986_v45 = vld [vmem:[#allocation7 + $0x528] sm:$0xff] }
 0x557   :  { %3226 = vmatpush.msra.mxu0 %v11206_v5  ;;  %3266 = vmatpush.msrb.mxu2 %v11207_v63  ;;  %vm2893_vm3 = vmor %vm2891_vm2, %vm2892_vm1  ;;  %v9018_v5 = vld [vmem:[#allocation7 + $0x428] sm:$0xff]  ;;  %v9023_v63 = vld [vmem:[#allocation7 + $0x7f0] sm:$0xff] }
 0x558   :  { %v2888_v23 = vsub.f32 1.0, %v2887_v17  ;;  %v4472_v54 = vpop.eup %4471  ;;  %v9015_v17 = vld [vmem:[#allocation7 + $0x420] sm:$0xff]  ;;  %11228 = vst [vmem:[#allocation68_spill] sm:$0xff] %v9018_v5 }
 0x559   :  { %3227 = vmatpush.msra.mxu0 %v11208_v31  ;;  %3267 = vmatpush.msrb.mxu2 %v11209_v34  ;;  %11227 = vst [vmem:[#allocation63_spill] sm:$0xff] %v9015_v17  ;;  %v11232_v31 = vld [vmem:[#allocation91_spill] sm:$0xff] }
 0x55a   :  { %v2889_v2 = vmul.f32 %v4470_v30, %v2888_v23  ;;  %11229 = vst [vmem:[#allocation158_spill] sm:$0xff] %v9023_v63  ;;  %v9026_v23 = vld [vmem:[#allocation7 + $0x7f8] sm:$0xff]  ;;  %v9031_v34 = vld [vmem:[#allocation7 + $0x7b0] sm:$0xff] }
 0x55b   :  { %3228 = vmatpush.msra.mxu0 %v11210_v58  ;;  %3268 = vmatpush.msrb.mxu2 %v8336_v56  ;;  %v8893_v56 = vld [vmem:[#allocation7 + $0x7e0] sm:$0xff]  ;;  %11230 = vst [vmem:[#allocation159_spill] sm:$0xff] %v9026_v23  ;;  %v11236_v58 = vld [vmem:[#allocation95_spill] sm:$0xff] }
 0x55c   :  { %v2890_v25 = vadd.f32 %v4470_v30, %v2889_v2  ;;  %11233 = vst [vmem:[#allocation160_spill] sm:$0xff] %v9031_v34  ;;  %v9034_v2 = vld [vmem:[#allocation7 + $0x7b8] sm:$0xff] }
 0x55d   :  { %3229 = vmatpush.msra.mxu0 %v11211_v8  ;;  %3269 = vmatpush.msrb.mxu2 %v8342_v62  ;;  %v8896_v62 = vld [vmem:[#allocation7 + $0x7e8] sm:$0xff]  ;;  %11234 = vst [vmem:[#allocation161_spill] sm:$0xff] %v9034_v2  ;;  %v11239_v8 = vld [vmem:[#allocation99_spill] sm:$0xff] }
 0x55e   :  { %v2894_v12 = vsel %vm2893_vm3, %v4470_v30, %v2890_v25  ;;  %v9010_v30 = vld [vmem:[#allocation7 + $0x468] sm:$0xff]  ;;  %v9039_v25 = vld [vmem:[#allocation7 + $0x770] sm:$0xff] }
 0x55f   :  { %v2899_v10 = vsel %vm2896_vm4, %v2898_v24, %v2894_v12  ;;  %3230 = vmatpush.msra.mxu0 %v8345_v0  ;;  %3270 = vmatpush.msrb.mxu2 %v8348_v6  ;;  %v8901_v0 = vld [vmem:[#allocation7 + $0x7a0] sm:$0xff]  ;;  %11224 = vst [vmem:[#allocation60_spill] sm:$0xff] %v9010_v30  ;;  %v9042_v24 = vld [vmem:[#allocation7 + $0x778] sm:$0xff] }
 0x560   :  { %v8887_v57 = vmul.f32 %v4472_v54, %v2899_v10  ;;  %v8909_v6 = vld [vmem:[#allocation7 + $0x760] sm:$0xff]  ;;  %11237 = vst [vmem:[#allocation162_spill] sm:$0xff] %v9039_v25  ;;  %v9047_v54 = vld [vmem:[#allocation7 + $0x730] sm:$0xff]  ;;  %v9050_v10 = vld [vmem:[#allocation7 + $0x738] sm:$0xff] }
 0x561   :  { %3231 = vmatpush.msra.mxu0 %v8353_v44  ;;  %3271 = vmatpush.msrb.mxu2 %v8356_v47  ;;  %v8904_v47 = vld [vmem:[#allocation7 + $0x7a8] sm:$0xff]  ;;  %11238 = vst [vmem:[#allocation163_spill] sm:$0xff] %v9042_v24  ;;  %v11240_v12 = vld [vmem:[#allocation165_spill] sm:$0xff] }
 0x562   :  { %3017 = vmatmul.f32.vlgmr.msra.gmra.mxu1 %v8887_v57  ;;  %3057 = vmatmul.f32.vlgmr.msra.gmra.mxu3 %v8887_v57  ;;  %v8912_v44 = vld [vmem:[#allocation7 + $0x768] sm:$0xff]  ;;  %11241 = vst [vmem:[#allocation21_spill] sm:$0xff] %v9047_v54 }
 0x563   :  { %3161 = vmatpush.msra.mxu1 %v8893_v56  ;;  %3201 = vmatpush.msra.mxu3 %v8896_v62  ;;  %11242 = vst [vmem:[#allocation164_spill] sm:$0xff] %v9050_v10 }
 0x564   :  { %3232 = vmatpush.msra.mxu0 %v8363_v50  ;;  %3272 = vmatpush.msrb.mxu2 %v8366_v9  ;;  %v8917_v50 = vld [vmem:[#allocation7 + $0x720] sm:$0xff]  ;;  %v8920_v9 = vld [vmem:[#allocation7 + $0x728] sm:$0xff] }
 0x565   :  { %3162 = vmatpush.msra.mxu1 %v8901_v0  ;;  %3202 = vmatpush.msra.mxu3 %v8904_v47 }
 0x566   :  { %3233 = vmatpush.msra.mxu0 %v8371_v39  ;;  %3273 = vmatpush.msrb.mxu2 %v8374_v4  ;;  %v8925_v39 = vld [vmem:[#allocation7 + $0x6e0] sm:$0xff]  ;;  %v8928_v4 = vld [vmem:[#allocation7 + $0x6e8] sm:$0xff] }
 0x567   :  { %3163 = vmatpush.msra.mxu1 %v8909_v6  ;;  %3203 = vmatpush.msra.mxu3 %v8912_v44 }
 0x568   :  { %3234 = vmatpush.msra.mxu0 %v8379_v59  ;;  %3274 = vmatpush.msrb.mxu2 %v8382_v16  ;;  %v8933_v59 = vld [vmem:[#allocation7 + $0x6a0] sm:$0xff]  ;;  %v8936_v16 = vld [vmem:[#allocation7 + $0x6a8] sm:$0xff] }
 0x569   :  { %3164 = vmatpush.msra.mxu1 %v8917_v50  ;;  %3204 = vmatpush.msra.mxu3 %v8920_v9 }
 0x56a   :  { %3097 = vmatmul.f32.vlgmr.msrb.gmra.mxu1 %v8887_v57  ;;  %3137 = vmatmul.f32.vlgmr.msrb.gmra.mxu3 %v8887_v57 }
 0x56b   :  { %3165 = vmatpush.msra.mxu1 %v8925_v39  ;;  %3205 = vmatpush.msra.mxu3 %v8928_v4 }
 0x56c   :  { %3235 = vmatpush.msra.mxu0 %v8391_v33  ;;  %3275 = vmatpush.msrb.mxu2 %v8394_v28  ;;  %v8946_v33 = vld [vmem:[#allocation7 + $0x668] sm:$0xff]  ;;  %v8951_v28 = vld [vmem:[#allocation7 + $0x620] sm:$0xff] }
 0x56d   :  { %3166 = vmatpush.msra.mxu1 %v8933_v59  ;;  %3206 = vmatpush.msra.mxu3 %v8936_v16 }
 0x56e   :  { %3236 = vmatpush.msra.mxu0 %v8399_v15  ;;  %3276 = vmatpush.msrb.mxu2 %v8402_v36  ;;  %v8954_v15 = vld [vmem:[#allocation7 + $0x628] sm:$0xff]  ;;  %v8959_v36 = vld [vmem:[#allocation7 + $0x5e0] sm:$0xff] }
 0x56f   :  { %3237 = vmatmul.f32.vlgmr.msra.gmra.mxu0 %v8779_v40  ;;  %3277 = vmatmul.f32.vlgmr.msrb.gmra.mxu2 %v8779_v40  ;;  %v8962_v40 = vld [vmem:[#allocation7 + $0x5e8] sm:$0xff] }
 0x570   :  { %3167 = vmatpush.msra.mxu1 %v8943_v37  ;;  %3207 = vmatpush.msra.mxu3 %v8946_v33 }
 0x571   :  { %3443 = vmatpush.msrb.mxu0 %v8409_v21  ;;  %3483 = vmatpush.msra.mxu2 %v8412_v20  ;;  %v8967_v21 = vld [vmem:[#allocation7 + $0x5a0] sm:$0xff]  ;;  %v8970_v20 = vld [vmem:[#allocation7 + $0x5a8] sm:$0xff] }
 0x572   :  { %3168 = vmatpush.msra.mxu1 %v8951_v28  ;;  %3208 = vmatpush.msra.mxu3 %v8954_v15 }
 0x573   :  { %3444 = vmatpush.msrb.mxu0 %v8417_v41  ;;  %3484 = vmatpush.msra.mxu2 %v8420_v53  ;;  %v11212_v41 = vld [vmem:[#allocation69_spill] sm:$0xff] }
 0x574   :  { %3169 = vmatpush.msra.mxu1 %v8959_v36  ;;  %3209 = vmatpush.msra.mxu3 %v8962_v40  ;;  %v8975_v53 = vld [vmem:[#allocation7 + $0x560] sm:$0xff] }
 0x575   :  { %3445 = vmatpush.msrb.mxu0 %v8425_v42  ;;  %3485 = vmatpush.msra.mxu2 %v8428_v48  ;;  %v11213_v42 = vld [vmem:[#allocation70_spill] sm:$0xff]  ;;  %v11214_v48 = vld [vmem:[#allocation72_spill] sm:$0xff] }
 0x576   :  { %3170 = vmatpush.msra.mxu1 %v8967_v21  ;;  %3210 = vmatpush.msra.mxu3 %v8970_v20 }
 0x577   :  { %3446 = vmatpush.msrb.mxu0 %v8433_v18  ;;  %3486 = vmatpush.msra.mxu2 %v11212_v41  ;;  %v11215_v18 = vld [vmem:[#allocation73_spill] sm:$0xff]  ;;  %v11243_v41 = vld [vmem:[#allocation166_spill] sm:$0xff] }
 0x578   :  { %3171 = vmatpush.msra.mxu1 %v8975_v53  ;;  %3211 = vmatpush.msra.mxu3 %v8978_v49 }
 0x579   :  { %3447 = vmatpush.msrb.mxu0 %v11213_v42  ;;  %3487 = vmatpush.msra.mxu2 %v11214_v48  ;;  %v11244_v42 = vld [vmem:[#allocation167_spill] sm:$0xff] }
 0x57a   :  { %3172 = vmatpush.msra.mxu1 %v8983_v3  ;;  %3212 = vmatpush.msra.mxu3 %v8986_v45  ;;  %v9055_v48 = vld [vmem:[#allocation7 + $0x6f0] sm:$0xff] }
 0x57b   :  { %3448 = vmatpush.msrb.mxu0 %v11215_v18  ;;  %3488 = vmatpush.msra.mxu2 %v11216_v29  ;;  %11245 = vst [vmem:[#allocation22_spill] sm:$0xff] %v9055_v48  ;;  %v9058_v18 = vld [vmem:[#allocation7 + $0x6f8] sm:$0xff] }
 0x57c   :  { %3173 = vmatpush.msra.mxu1 %v8991_v52  ;;  %3213 = vmatpush.msra.mxu3 %v8994_v11  ;;  %11246 = vst [vmem:[#allocation23_spill] sm:$0xff] %v9058_v18  ;;  %v11247_v29 = vld [vmem:[#allocation168_spill] sm:$0xff] }
 0x57d   :  { %3449 = vmatpush.msrb.mxu0 %v11217_v51  ;;  %3489 = vmatpush.msra.mxu2 %v11218_v14  ;;  %v11248_v51 = vld [vmem:[#allocation147_spill] sm:$0xff] }
 0x57e   :  { %3174 = vmatpush.msra.mxu1 %v8999_v19  ;;  %3214 = vmatpush.msra.mxu3 %v9002_v13  ;;  %v9063_v14 = vld [vmem:[#allocation7 + $0x6b0] sm:$0xff]  ;;  %v9294_v19 = vld [vmem:[#allocation7 + $0x120] sm:$0xff] }
 0x57f   :  { %3450 = vmatpush.msrb.mxu0 %v11221_v38  ;;  %3490 = vmatpush.msra.mxu2 %v11222_v55  ;;  %11249 = vst [vmem:[#allocation24_spill] sm:$0xff] %v9063_v14  ;;  %v9066_v38 = vld [vmem:[#allocation7 + $0x6b8] sm:$0xff]  ;;  %v11251_v55 = vld [vmem:[#allocation89_spill] sm:$0xff] }
 0x580   :  { %3175 = vmatpush.msra.mxu1 %v9007_v46  ;;  %3215 = vmatpush.msra.mxu3 %v9010_v30  ;;  %11250 = vst [vmem:[#allocation25_spill] sm:$0xff] %v9066_v38 }
 0x581   :  { %3451 = vmatpush.msrb.mxu0 %v11225_v26  ;;  %3491 = vmatpush.msra.mxu2 %v11226_v60  ;;  %v11252_v26 = vld [vmem:[#allocation98_spill] sm:$0xff]  ;;  %v9071_v60 = vld [vmem:[#allocation7 + $0x670] sm:$0xff]  ;;  %11343 = vst [vmem:[#allocation48_spill] sm:$0xff] %v9294_v19 }
 0x582   :  { %3176 = vmatpush.msra.mxu1 %v9015_v17  ;;  %3216 = vmatpush.msra.mxu3 %v9018_v5  ;;  %11253 = vst [vmem:[#allocation15_spill] sm:$0xff] %v9071_v60  ;;  %v9281_v5 = vld [vmem:[#allocation7 + $0x1a0] sm:$0xff]  ;;  %v9284_v17 = vld [vmem:[#allocation7 + $0x1a8] sm:$0xff] }
 0x583   :  { %3177 = vmatmul.f32.vlgmr.msra.gmra.mxu1 %v8887_v57  ;;  %3217 = vmatmul.f32.vlgmr.msra.gmra.mxu3 %v8887_v57  ;;  %11342 = vst [vmem:[#allocation47_spill] sm:$0xff] %v9281_v5 }
 0x584   :  { %3241 = vmatpush.msrb.mxu1 %v9023_v63  ;;  %3281 = vmatpush.msrb.mxu3 %v9026_v23 }
 0x585   :  { %3452 = vmatpush.msrb.mxu0 %v11231_v35  ;;  %3492 = vmatpush.msra.mxu2 %v11232_v31  ;;  %v9074_v35 = vld [vmem:[#allocation7 + $0x678] sm:$0xff]  ;;  %v11255_v31 = vld [vmem:[#allocation107_spill] sm:$0xff] }
 0x586   :  { %3242 = vmatpush.msrb.mxu1 %v9031_v34  ;;  %3282 = vmatpush.msrb.mxu3 %v9034_v2  ;;  %11254 = vst [vmem:[#allocation26_spill] sm:$0xff] %v9074_v35 }
 0x587   :  { %3453 = vmatpush.msrb.mxu0 %v11235_v22  ;;  %3493 = vmatpush.msra.mxu2 %v11236_v58  ;;  %v11256_v22 = vld [vmem:[#allocation100_spill] sm:$0xff]  ;;  %v9079_v58 = vld [vmem:[#allocation7 + $0x630] sm:$0xff] }
 0x588   :  { %3243 = vmatpush.msrb.mxu1 %v9039_v25  ;;  %3283 = vmatpush.msrb.mxu3 %v9042_v24  ;;  %11257 = vst [vmem:[#allocation27_spill] sm:$0xff] %v9079_v58 }
 0x589   :  { %3454 = vmatpush.msrb.mxu0 %v11239_v8  ;;  %3494 = vmatpush.msra.mxu2 %v11240_v12  ;;  %v9082_v8 = vld [vmem:[#allocation7 + $0x638] sm:$0xff]  ;;  %v11259_v12 = vld [vmem:[#allocation103_spill] sm:$0xff] }
 0x58a   :  { %3244 = vmatpush.msrb.mxu1 %v9047_v54  ;;  %3284 = vmatpush.msrb.mxu3 %v9050_v10  ;;  %11258 = vst [vmem:[#allocation28_spill] sm:$0xff] %v9082_v8 }
 0x58b   :  { %3455 = vmatpush.msrb.mxu0 %v11243_v41  ;;  %3495 = vmatpush.msra.mxu2 %v11244_v42  ;;  %v11260_v41 = vld [vmem:[#allocation104_spill] sm:$0xff]  ;;  %v9087_v42 = vld [vmem:[#allocation7 + $0x5f0] sm:$0xff] }
 0x58c   :  { %3245 = vmatpush.msrb.mxu1 %v9055_v48  ;;  %3285 = vmatpush.msrb.mxu3 %v9058_v18  ;;  %11261 = vst [vmem:[#allocation29_spill] sm:$0xff] %v9087_v42 }
 0x58d   :  { %3456 = vmatpush.msrb.mxu0 %v11247_v29  ;;  %3496 = vmatpush.msra.mxu2 %v11248_v51  ;;  %v9090_v29 = vld [vmem:[#allocation7 + $0x5f8] sm:$0xff] }
 0x58e   :  { %3246 = vmatpush.msrb.mxu1 %v9063_v14  ;;  %3286 = vmatpush.msrb.mxu3 %v9066_v38  ;;  %11262 = vst [vmem:[#allocation112_spill] sm:$0xff] %v9090_v29  ;;  %v11263_v51 = vld [vmem:[#allocation108_spill] sm:$0xff] }
 0x58f   :  { %3457 = vmatpush.msrb.mxu0 %v11251_v55  ;;  %3497 = vmatpush.msra.mxu2 %v11252_v26  ;;  %v11264_v55 = vld [vmem:[#allocation109_spill] sm:$0xff]  ;;  %v9095_v26 = vld [vmem:[#allocation7 + $0x5b0] sm:$0xff]  ;;  %v11329_v14 = vld [vmem:[#allocation16_spill] sm:$0xff] }
 0x590   :  { %3247 = vmatpush.msrb.mxu1 %v9071_v60  ;;  %3287 = vmatpush.msrb.mxu3 %v9074_v35  ;;  %11265 = vst [vmem:[#allocation122_spill] sm:$0xff] %v9095_v26  ;;  %v5275_v60 = vld [vmem:[#allocation7 + $0x450] sm:$0xff] }
 0x591   :  { %3458 = vmatpush.msrb.mxu0 %v11255_v31  ;;  %3498 = vmatpush.msra.mxu2 %v11256_v22  ;;  %v9098_v31 = vld [vmem:[#allocation7 + $0x5b8] sm:$0xff]  ;;  %v11267_v22 = vld [vmem:[#allocation113_spill] sm:$0xff] }
 0x592   :  { %3248 = vmatpush.msrb.mxu1 %v9079_v58  ;;  %3288 = vmatpush.msrb.mxu3 %v9082_v8  ;;  %11266 = vst [vmem:[#allocation131_spill] sm:$0xff] %v9098_v31  ;;  %v11296_v8 = vld [vmem:[#allocation144_spill] sm:$0xff]  ;;  %v11327_v58 = vld [vmem:[#allocation14_spill] sm:$0xff] }
 0x593   :  { %3523 = vmatpush.msra.mxu0 %v11259_v12  ;;  %3563 = vmatpush.msrb.mxu2 %v11260_v41  ;;  %v11268_v12 = vld [vmem:[#allocation114_spill] sm:$0xff]  ;;  %v9103_v41 = vld [vmem:[#allocation7 + $0x570] sm:$0xff] }
 0x594   :  { %3249 = vmatpush.msrb.mxu1 %v9087_v42  ;;  %3289 = vmatpush.msrb.mxu3 %v9090_v29  ;;  %11269 = vst [vmem:[#allocation30_spill] sm:$0xff] %v9103_v41  ;;  %v9106_v29 = vld [vmem:[#allocation7 + $0x578] sm:$0xff]  ;;  %v5238_v42 = vld [vmem:[#allocation7 + $0x788] sm:$0xff] }
 0x595   :  { %3524 = vmatpush.msra.mxu0 %v11263_v51  ;;  %3564 = vmatpush.msrb.mxu2 %v11264_v55  ;;  %11270 = vst [vmem:[#allocation31_spill] sm:$0xff] %v9106_v29  ;;  %v11271_v51 = vld [vmem:[#allocation118_spill] sm:$0xff]  ;;  %v11272_v55 = vld [vmem:[#allocation119_spill] sm:$0xff] }
 0x596   :  { %3250 = vmatpush.msrb.mxu1 %v9095_v26  ;;  %3290 = vmatpush.msrb.mxu3 %v9098_v31  ;;  %v9111_v26 = vld [vmem:[#allocation7 + $0x530] sm:$0xff]  ;;  %v9114_v31 = vld [vmem:[#allocation7 + $0x538] sm:$0xff] }
 0x597   :  { %3525 = vmatpush.msra.mxu0 %v11267_v22  ;;  %3565 = vmatpush.msrb.mxu2 %v11268_v12  ;;  %11273 = vst [vmem:[#allocation32_spill] sm:$0xff] %v9111_v26  ;;  %v11275_v22 = vld [vmem:[#allocation120_spill] sm:$0xff] }
 0x598   :  { %3251 = vmatpush.msrb.mxu1 %v9103_v41  ;;  %3291 = vmatpush.msrb.mxu3 %v9106_v29  ;;  %11274 = vst [vmem:[#allocation33_spill] sm:$0xff] %v9114_v31  ;;  %v11276_v12 = vld [vmem:[#allocation140_spill] sm:$0xff]  ;;  %v9119_v41 = vld [vmem:[#allocation7 + $0x4f0] sm:$0xff] }
 0x599   :  { %3526 = vmatpush.msra.mxu0 %v11271_v51  ;;  %3566 = vmatpush.msrb.mxu2 %v11272_v55  ;;  %11277 = vst [vmem:[#allocation34_spill] sm:$0xff] %v9119_v41  ;;  %v9122_v29 = vld [vmem:[#allocation7 + $0x4f8] sm:$0xff]  ;;  %v11279_v51 = vld [vmem:[#allocation121_spill] sm:$0xff] }
 0x59a   :  { %3252 = vmatpush.msrb.mxu1 %v9111_v26  ;;  %3292 = vmatpush.msrb.mxu3 %v9114_v31  ;;  %11278 = vst [vmem:[#allocation35_spill] sm:$0xff] %v9122_v29  ;;  %v11280_v55 = vld [vmem:[#allocation125_spill] sm:$0xff]  ;;  %v9127_v26 = vld [vmem:[#allocation7 + $0x4b0] sm:$0xff]  ;;  %v9130_v31 = vld [vmem:[#allocation7 + $0x4b8] sm:$0xff] }
 0x59b   :  { %3527 = vmatpush.msra.mxu0 %v11275_v22  ;;  %3567 = vmatpush.msrb.mxu2 %v11276_v12  ;;  %11281 = vst [vmem:[#allocation36_spill] sm:$0xff] %v9127_v26  ;;  %v11283_v22 = vld [vmem:[#allocation126_spill] sm:$0xff]  ;;  %v11284_v12 = vld [vmem:[#allocation129_spill] sm:$0xff] }
 0x59c   :  { %3253 = vmatpush.msrb.mxu1 %v9119_v41  ;;  %3293 = vmatpush.msrb.mxu3 %v9122_v29  ;;  %11282 = vst [vmem:[#allocation37_spill] sm:$0xff] %v9130_v31  ;;  %v9135_v41 = vld [vmem:[#allocation7 + $0x470] sm:$0xff]  ;;  %v9138_v29 = vld [vmem:[#allocation7 + $0x478] sm:$0xff] }
 0x59d   :  { %3528 = vmatpush.msra.mxu0 %v11279_v51  ;;  %3568 = vmatpush.msrb.mxu2 %v11280_v55  ;;  %11285 = vst [vmem:[#allocation38_spill] sm:$0xff] %v9135_v41  ;;  %v11287_v51 = vld [vmem:[#allocation71_spill] sm:$0xff] }
 0x59e   :  { %3254 = vmatpush.msrb.mxu1 %v9127_v26  ;;  %3294 = vmatpush.msrb.mxu3 %v9130_v31  ;;  %11286 = vst [vmem:[#allocation39_spill] sm:$0xff] %v9138_v29  ;;  %v11288_v55 = vld [vmem:[#allocation75_spill] sm:$0xff]  ;;  %v9146_v31 = vld [vmem:[#allocation7 + $0x438] sm:$0xff] }
 0x59f   :  { %3529 = vmatpush.msra.mxu0 %v11283_v22  ;;  %3569 = vmatpush.msrb.mxu2 %v11284_v12  ;;  %v9143_v26 = vld [vmem:[#allocation7 + $0x430] sm:$0xff]  ;;  %11290 = vst [vmem:[#allocation41_spill] sm:$0xff] %v9146_v31  ;;  %v11291_v22 = vld [vmem:[#allocation84_spill] sm:$0xff]  ;;  %v11292_v12 = vld [vmem:[#allocation130_spill] sm:$0xff] }
 0x5a0   :  { %3255 = vmatpush.msrb.mxu1 %v9135_v41  ;;  %3295 = vmatpush.msrb.mxu3 %v9138_v29  ;;  %11289 = vst [vmem:[#allocation40_spill] sm:$0xff] %v9143_v26  ;;  %v5235_v29 = vld [vmem:[#allocation7 + $0x7c0] sm:$0xff]  ;;  %v11294_v41 = vld [vmem:[#allocation135_spill] sm:$0xff] }
 0x5a1   :  { %3530 = vmatpush.msra.mxu0 %v11287_v51  ;;  %3570 = vmatpush.msrb.mxu2 %v11288_v55  ;;  %v5236_v51 = vld [vmem:[#allocation7 + $0x7c8] sm:$0xff] }
 0x5a2   :  { %3256 = vmatpush.msrb.mxu1 %v9143_v26  ;;  %3296 = vmatpush.msrb.mxu3 %v9146_v31  ;;  %v11293_v55 = vld [vmem:[#allocation134_spill] sm:$0xff]  ;;  %v5237_v26 = vld [vmem:[#allocation7 + $0x780] sm:$0xff]  ;;  %v11295_v31 = vld [vmem:[#allocation139_spill] sm:$0xff] }
 0x5a3   :  { %3257 = vmatmul.f32.vlgmr.msrb.gmra.mxu1 %v8887_v57  ;;  %3297 = vmatmul.f32.vlgmr.msrb.gmra.mxu3 %v8887_v57  ;;  %v5239_v57 = vld [vmem:[#allocation7 + $0x740] sm:$0xff] }
 0x5a4   :  { %3531 = vmatpush.msra.mxu0 %v11291_v22  ;;  %3571 = vmatpush.msrb.mxu2 %v11292_v12  ;;  %v5240_v22 = vld [vmem:[#allocation7 + $0x748] sm:$0xff]  ;;  %v11297_v12 = vld [vmem:[#allocation148_spill] sm:$0xff] }
 0x5a5   :  { %3463 = vmatpush.msra.mxu1 %v5235_v29  ;;  %3503 = vmatpush.msra.mxu3 %v5236_v51  ;;  %v11298_v29 = vld [vmem:[#allocation149_spill] sm:$0xff] }
 0x5a6   :  { %3532 = vmatpush.msra.mxu0 %v11293_v55  ;;  %3572 = vmatpush.msrb.mxu2 %v11294_v41  ;;  %v5241_v51 = vld [vmem:[#allocation7 + $0x700] sm:$0xff]  ;;  %v5242_v55 = vld [vmem:[#allocation7 + $0x708] sm:$0xff]  ;;  %v5243_v41 = vld [vmem:[#allocation7 + $0xd0] sm:$0xff] }
 0x5a7   :  { %3464 = vmatpush.msra.mxu1 %v5237_v26  ;;  %3504 = vmatpush.msra.mxu3 %v5238_v42  ;;  %v5244_v26 = vld [vmem:[#allocation7 + $0xd8] sm:$0xff]  ;;  %v5245_v42 = vld [vmem:[#allocation7 + $0x6c0] sm:$0xff] }
 0x5a8   :  { %3533 = vmatpush.msra.mxu0 %v11295_v31  ;;  %3573 = vmatpush.msrb.mxu2 %v11296_v8  ;;  %v5246_v31 = vld [vmem:[#allocation7 + $0x6c8] sm:$0xff]  ;;  %v5247_v8 = vld [vmem:[#allocation7 + $0x90] sm:$0xff] }
 0x5a9   :  { %3465 = vmatpush.msra.mxu1 %v5239_v57  ;;  %3505 = vmatpush.msra.mxu3 %v5240_v22  ;;  %v5248_v57 = vld [vmem:[#allocation7 + $0x98] sm:$0xff]  ;;  %v5249_v22 = vld [vmem:[#allocation7 + $0x680] sm:$0xff] }
 0x5aa   :  { %3534 = vmatpush.msra.mxu0 %v11297_v12  ;;  %3574 = vmatpush.msrb.mxu2 %v11298_v29  ;;  %v5250_v12 = vld [vmem:[#allocation7 + $0x688] sm:$0xff]  ;;  %v5251_v29 = vld [vmem:[#allocation7 + $0x50] sm:$0xff] }
 0x5ab   :  { %3466 = vmatpush.msra.mxu1 %v5241_v51  ;;  %3506 = vmatpush.msra.mxu3 %v5242_v55  ;;  %v5252_v51 = vld [vmem:[#allocation7 + $0x58] sm:$0xff]  ;;  %v5253_v55 = vld [vmem:[#allocation7 + $0x640] sm:$0xff] }
 0x5ac   :  { %3535 = vmatpush.msra.mxu0 %v5243_v41  ;;  %3575 = vmatpush.msrb.mxu2 %v5244_v26  ;;  %v5254_v41 = vld [vmem:[#allocation7 + $0x648] sm:$0xff]  ;;  %v5255_v26 = vld [vmem:[#allocation7 + $0x10] sm:$0xff] }
 0x5ad   :  { %3467 = vmatpush.msra.mxu1 %v5245_v42  ;;  %3507 = vmatpush.msra.mxu3 %v5246_v31  ;;  %v5256_v42 = vld [vmem:[#allocation7 + $0x18] sm:$0xff]  ;;  %v5257_v31 = vld [vmem:[#allocation7 + $0x600] sm:$0xff] }
 0x5ae   :  { %3536 = vmatpush.msra.mxu0 %v5247_v8  ;;  %3576 = vmatpush.msrb.mxu2 %v5248_v57  ;;  %v5258_v8 = vld [vmem:[#allocation7 + $0x608] sm:$0xff]  ;;  %v5259_v57 = vld [vmem:[#allocation7 + $0x5c0] sm:$0xff] }
 0x5af   :  { %3468 = vmatpush.msra.mxu1 %v5249_v22  ;;  %3508 = vmatpush.msra.mxu3 %v5250_v12  ;;  %v5260_v22 = vld [vmem:[#allocation7 + $0x5c8] sm:$0xff]  ;;  %v5261_v12 = vld [vmem:[#allocation7 + $0x580] sm:$0xff] }
 0x5b0   :  { %3537 = vmatpush.msra.mxu0 %v5251_v29  ;;  %3577 = vmatpush.msrb.mxu2 %v5252_v51  ;;  %v5262_v29 = vld [vmem:[#allocation7 + $0x588] sm:$0xff]  ;;  %v5263_v51 = vld [vmem:[#allocation7 + $0x540] sm:$0xff] }
 0x5b1   :  { %3469 = vmatpush.msra.mxu1 %v5253_v55  ;;  %3509 = vmatpush.msra.mxu3 %v5254_v41  ;;  %v5264_v55 = vld [vmem:[#allocation7 + $0x548] sm:$0xff]  ;;  %v11299_v41 = vld [vmem:[#allocation151_spill] sm:$0xff] }
 0x5b2   :  { %3538 = vmatpush.msra.mxu0 %v5255_v26  ;;  %3578 = vmatpush.msrb.mxu2 %v5256_v42  ;;  %v11300_v26 = vld [vmem:[#allocation152_spill] sm:$0xff]  ;;  %v11301_v42 = vld [vmem:[#allocation78_spill] sm:$0xff] }
 0x5b3   :  { %3470 = vmatpush.msra.mxu1 %v5257_v31  ;;  %3510 = vmatpush.msra.mxu3 %v5258_v8  ;;  %v11302_v31 = vld [vmem:[#allocation79_spill] sm:$0xff]  ;;  %v11303_v8 = vld [vmem:[#allocation82_spill] sm:$0xff] }
 0x5b5   :  { %3471 = vmatpush.msra.mxu1 %v5259_v57  ;;  %3511 = vmatpush.msra.mxu3 %v5260_v22  ;;  %v11304_v57 = vld [vmem:[#allocation83_spill] sm:$0xff] }
 0x5b6   :  { %v11305_v22 = vld [vmem:[#allocation87_spill] sm:$0xff] }
 0x5b7   :  { %3472 = vmatpush.msra.mxu1 %v5261_v12  ;;  %3512 = vmatpush.msra.mxu3 %v5262_v29  ;;  %v11306_v12 = vld [vmem:[#allocation88_spill] sm:$0xff] }
 0x5b8   :  { %v11307_v29 = vld [vmem:[#allocation92_spill] sm:$0xff] }
 0x5b9   :  { %3473 = vmatpush.msra.mxu1 %v5263_v51  ;;  %3513 = vmatpush.msra.mxu3 %v5264_v55  ;;  %v11308_v51 = vld [vmem:[#allocation93_spill] sm:$0xff]  ;;  %v11309_v55 = vld [vmem:[#allocation96_spill] sm:$0xff] }
 0x5bb   :  { %3474 = vmatpush.msra.mxu1 %v11299_v41  ;;  %3514 = vmatpush.msra.mxu3 %v11300_v26  ;;  %v11310_v41 = vld [vmem:[#allocation97_spill] sm:$0xff] }
 0x5bc   :  { %v11311_v26 = vld [vmem:[#allocation101_spill] sm:$0xff] }
 0x5bd   :  { %3475 = vmatpush.msra.mxu1 %v11301_v42  ;;  %3515 = vmatpush.msra.mxu3 %v11302_v31  ;;  %v11312_v42 = vld [vmem:[#allocation102_spill] sm:$0xff]  ;;  %v11313_v31 = vld [vmem:[#allocation105_spill] sm:$0xff] }
 0x5bf   :  { %3476 = vmatpush.msra.mxu1 %v11303_v8  ;;  %3516 = vmatpush.msra.mxu3 %v11304_v57  ;;  %v11314_v8 = vld [vmem:[#allocation106_spill] sm:$0xff] }
 0x5c0   :  { %v11315_v57 = vld [vmem:[#allocation110_spill] sm:$0xff] }
 0x5c1   :  { %3477 = vmatpush.msra.mxu1 %v11305_v22  ;;  %3517 = vmatpush.msra.mxu3 %v11306_v12  ;;  %v11316_v22 = vld [vmem:[#allocation111_spill] sm:$0xff] }
 0x5c2   :  { %v11317_v12 = vld [vmem:[#allocation115_spill] sm:$0xff] }
 0x5c3   :  { %3478 = vmatpush.msra.mxu1 %v11307_v29  ;;  %3518 = vmatpush.msra.mxu3 %v11308_v51  ;;  %v11318_v29 = vld [vmem:[#allocation116_spill] sm:$0xff]  ;;  %v11319_v51 = vld [vmem:[#allocation123_spill] sm:$0xff] }
 0x5c5   :  { %3543 = vmatpush.msrb.mxu1 %v11309_v55  ;;  %3583 = vmatpush.msrb.mxu3 %v11310_v41  ;;  %v11320_v55 = vld [vmem:[#allocation124_spill] sm:$0xff]  ;;  %v11321_v41 = vld [vmem:[#allocation127_spill] sm:$0xff] }
 0x5c7   :  { %3544 = vmatpush.msrb.mxu1 %v11311_v26  ;;  %3584 = vmatpush.msrb.mxu3 %v11312_v42  ;;  %v11322_v26 = vld [vmem:[#allocation128_spill] sm:$0xff] }
 0x5c8   :  { %v11323_v42 = vld [vmem:[#allocation132_spill] sm:$0xff] }
 0x5c9   :  { %3545 = vmatpush.msrb.mxu1 %v11313_v31  ;;  %3585 = vmatpush.msrb.mxu3 %v11314_v8  ;;  %v11324_v31 = vld [vmem:[#allocation133_spill] sm:$0xff] }
 0x5ca   :  { %v11325_v8 = vld [vmem:[#allocation137_spill] sm:$0xff] }
 0x5cb   :  { %3546 = vmatpush.msrb.mxu1 %v11315_v57  ;;  %3586 = vmatpush.msrb.mxu3 %v11316_v22  ;;  %v11326_v57 = vld [vmem:[#allocation138_spill] sm:$0xff]  ;;  %v5265_v22 = vld [vmem:[#allocation7 + $0x590] sm:$0xff] }
 0x5cd   :  { %3547 = vmatpush.msrb.mxu1 %v11317_v12  ;;  %3587 = vmatpush.msrb.mxu3 %v11318_v29  ;;  %v5266_v12 = vld [vmem:[#allocation7 + $0x598] sm:$0xff]  ;;  %v5267_v29 = vld [vmem:[#allocation7 + $0x550] sm:$0xff] }
 0x5cf   :  { %3548 = vmatpush.msrb.mxu1 %v11319_v51  ;;  %3588 = vmatpush.msrb.mxu3 %v11320_v55  ;;  %v5268_v51 = vld [vmem:[#allocation7 + $0x558] sm:$0xff]  ;;  %v5269_v55 = vld [vmem:[#allocation7 + $0x510] sm:$0xff] }
 0x5d1   :  { %3549 = vmatpush.msrb.mxu1 %v11321_v41  ;;  %3589 = vmatpush.msrb.mxu3 %v11322_v26  ;;  %v5270_v41 = vld [vmem:[#allocation7 + $0x518] sm:$0xff]  ;;  %v5271_v26 = vld [vmem:[#allocation7 + $0x4d0] sm:$0xff] }
 0x5d3   :  { %3550 = vmatpush.msrb.mxu1 %v11323_v42  ;;  %3590 = vmatpush.msrb.mxu3 %v11324_v31  ;;  %v5272_v42 = vld [vmem:[#allocation7 + $0x4d8] sm:$0xff]  ;;  %v5273_v31 = vld [vmem:[#allocation7 + $0x490] sm:$0xff] }
 0x5d5   :  { %3551 = vmatpush.msrb.mxu1 %v11325_v8  ;;  %3591 = vmatpush.msrb.mxu3 %v11326_v57  ;;  %v5274_v8 = vld [vmem:[#allocation7 + $0x498] sm:$0xff]  ;;  %v2998_v57 = vpop.f32.mrf.mxu0 }
 0x5d7   :  { %3552 = vmatpush.msrb.mxu1 %v5265_v22  ;;  %3592 = vmatpush.msrb.mxu3 %v5266_v12  ;;  %v11328_v12 = vld [vmem:[#allocation19_spill] sm:$0xff] }
 0x5d8   :  { %v169_v35 = vadd.f32 %v11328_v12, %v11327_v58 }
 0x5d9   :  { %3553 = vmatpush.msrb.mxu1 %v5267_v29  ;;  %3593 = vmatpush.msrb.mxu3 %v5268_v51  ;;  %v5276_v51 = vld [vmem:[#allocation7 + $0x458] sm:$0xff] }
 0x5db   :  { %3554 = vmatpush.msrb.mxu1 %v5269_v55  ;;  %3594 = vmatpush.msrb.mxu3 %v5270_v41  ;;  %v5277_v41 = vld [vmem:[#allocation7 + $0x410] sm:$0xff] }
 0x5dd   :  { %3555 = vmatpush.msrb.mxu1 %v5271_v26  ;;  %3595 = vmatpush.msrb.mxu3 %v5272_v42  ;;  %v5278_v26 = vld [vmem:[#allocation7 + $0x418] sm:$0xff]  ;;  %v3038_v42 = vpop.f32.mrf.mxu2 }
 0x5df   :  { %3556 = vmatpush.msrb.mxu1 %v5273_v31  ;;  %3596 = vmatpush.msrb.mxu3 %v5274_v8  ;;  %v3018_v22 = vpop.f32.mrf.mxu1  ;;  %v11330_v8 = vld [vmem:[#allocation136_spill] sm:$0xff] }
 0x5e0   :  { %v3019_v29 = vadd.f32 %v3018_v22, %v2998_v57  ;;  %v210_v18 = vadd.f32 %v11330_v8, %v11329_v14  ;;  %v11334_v8 = vld [vmem:[#allocation145_spill] sm:$0xff] }
 0x5e1   :  { %3557 = vmatpush.msrb.mxu1 %v5275_v60  ;;  %3597 = vmatpush.msrb.mxu3 %v5276_v51 }
 0x5e2   :  { %v3373_v55 = vadd.f32 %v3019_v29, %v169_v35  ;;  %v11331_v35 = vld [vmem:[#allocation18_spill] sm:$0xff]  ;;  %v11332_v29 = vld [vmem:[#allocation143_spill] sm:$0xff] }
 0x5e3   :  { %3558 = vmatpush.msrb.mxu1 %v5277_v41  ;;  %3598 = vmatpush.msrb.mxu3 %v5278_v26  ;;  %v292_v41 = vadd.f32 %v11332_v29, %v11331_v35 }
 0x5e4   :  { %v4261_v38 = vmul.f32 -1.442695, %v3373_v55 }
 0x5e5   :  { %v3058_v31 = vpop.f32.mrf.mxu3  ;;  %v3118_v60 = vpop.f32.mrf.mxu2 }
 0x5e6   :  { %4473 = vpow2.f32 %v4261_v38  ;;  %v3059_v48 = vadd.f32 %v3058_v31, %v3038_v42  ;;  %v11333_v31 = vld [vmem:[#allocation20_spill] sm:$0xff] }
 0x5e7   :  { %v3098_v25 = vpop.f32.mrf.mxu1 }
 0x5e8   :  { %v3374_v10 = vadd.f32 %v3059_v48, %v210_v18  ;;  %v3078_v48 = vpop.f32.mrf.mxu0 }
 0x5e9   :  { %v3099_v18 = vadd.f32 %v3098_v25, %v3078_v48 }
 0x5ea   :  { %v4262_v12 = vmul.f32 -1.442695, %v3374_v10 }
 0x5ec   :  { %v4474_v57 = vpop.eup %4473  ;;  %4475 = vpow2.f32 %v4262_v12  ;;  %v251_v12 = vadd.f32 %v11334_v8, %v11333_v31 }
 0x5ed   :  { %v3380_v22 = vadd.f32 1.0, %v4474_v57  ;;  %v3138_v51 = vpop.f32.mrf.mxu3  ;;  %v3198_v25 = vpop.f32.mrf.mxu2 }
 0x5ee   :  { %v3139_v58 = vadd.f32 %v3138_v51, %v3118_v60  ;;  %v3375_v60 = vadd.f32 %v3099_v18, %v251_v12 }
 0x5ef   :  { %4477 = vrcp.f32 %v3380_v22  ;;  %vm3386_vm6 = vweird.f32 %v3380_v22 }
 0x5f0   :  { %v3376_v26 = vadd.f32 %v3139_v58, %v292_v41  ;;  %v3158_v48 = vpop.f32.mrf.mxu0 }
 0x5f2   :  { %v4476_v55 = vpop.eup %4475  ;;  %v4263_v54 = vmul.f32 -1.442695, %v3376_v26  ;;  %v3392_v26 = vand.u32 2147483648, %v3380_v22 }
 0x5f3   :  { %v3399_v24 = vadd.f32 1.0, %v4476_v55  ;;  %v3390_v55 = vand.u32 2147483647, %v3380_v22 }
 0x5f4   :  { %4479 = vpow2.f32 %v4263_v54  ;;  %v3393_v8 = vor.u32 1.1754944e-38, %v3392_v26 }
 0x5f5   :  { %v4478_v38 = vpop.eup %4477  ;;  %4481 = vrcp.f32 %v3399_v24  ;;  %v3411_v35 = vand.u32 2147483648, %v3399_v24  ;;  %vm3405_vm9 = vweird.f32 %v3399_v24  ;;  %vm3391_vm10 = vcmp.eq.f32.partialorder %v3390_v55, 8.507059e+37 }
 0x5f6   :  { %v3382_v10 = vmul.f32 %v4478_v38, %v3380_v22  ;;  %vm3387_vm5 = vweird.f32 %v4478_v38 }
 0x5f7   :  { %vm9195_vm7 = vmor %vm3386_vm6, %vm3387_vm5 }
 0x5f8   :  { %v3383_v42 = vsub.f32 1.0, %v3382_v10 }
 0x5fa   :  { %v4480_v57 = vpop.eup %4479  ;;  %v3384_v14 = vmul.f32 %v4478_v38, %v3383_v42  ;;  %v3409_v42 = vand.u32 2147483647, %v3399_v24 }
 0x5fb   :  { %v4482_v29 = vpop.eup %4481  ;;  %v3419_v51 = vadd.f32 1.0, %v4480_v57 }
 0x5fc   :  { %v3401_v58 = vmul.f32 %v4482_v29, %v3399_v24  ;;  %v3385_v41 = vadd.f32 %v4478_v38, %v3384_v14  ;;  %vm3406_vm8 = vweird.f32 %v4482_v29  ;;  %vm3410_vm12 = vcmp.eq.f32.partialorder %v3409_v42, 8.507059e+37 }
 0x5fd   :  { %4483 = vrcp.f32 %v3419_v51  ;;  %vm3407_vm11 = vmor %vm3405_vm9, %vm3406_vm8  ;;  %vm3425_vm14 = vweird.f32 %v3419_v51  ;;  %v3429_v42 = vand.u32 2147483647, %v3419_v51 }
 0x5fe   :  { %v3402_v54 = vsub.f32 1.0, %v3401_v58  ;;  %4485 = vtanh.f32 %v3375_v60  ;;  %v3389_v18 = vsel %vm9195_vm7, %v4478_v38, %v3385_v41  ;;  %v3412_v58 = vor.u32 1.1754944e-38, %v3411_v35 }
 0x5ff   :  { %v3394_v31 = vsel %vm3391_vm10, %v3393_v8, %v3389_v18  ;;  %vm3430_vm0 = vcmp.eq.f32.partialorder %v3429_v42, 8.507059e+37  ;;  %v9260_v42 = vld [vmem:[#allocation7 + $0x268] sm:$0xff] }
 0x600   :  { %v3403_v10 = vmul.f32 %v4482_v29, %v3402_v54  ;;  %v3178_v14 = vpop.f32.mrf.mxu1 }
 0x601   :  { %v3179_v12 = vadd.f32 %v3178_v14, %v3158_v48 }
 0x602   :  { %v3404_v57 = vadd.f32 %v4482_v29, %v3403_v10 }
 0x603   :  { %v4484_v22 = vpop.eup %4483  ;;  %v3301_v23 = vadd.f32 %v3179_v12, %v6361_v43  ;;  %v3278_v43 = vpop.f32.mrf.mxu2 }
 0x604   :  { %v3408_v2 = vsel %vm3407_vm11, %v4482_v29, %v3404_v57  ;;  %v3421_v60 = vmul.f32 %v4484_v22, %v3419_v51  ;;  %v4486_v34 = vpop.eup %4485  ;;  %vm3426_vm13 = vweird.f32 %v4484_v22 }
 0x605   :  { %v3413_v54 = vsel %vm3410_vm12, %v3412_v58, %v3408_v2  ;;  %v3436_v41 = vmul.f32 %v4486_v34, %v3394_v31  ;;  %v4258_v35 = vmul.f32 -1.442695, %v3301_v23  ;;  %v3431_v2 = vand.u32 2147483648, %v3419_v51  ;;  %vm3427_vm15 = vmor %vm3425_vm14, %vm3426_vm13  ;;  %v9211_v58 = vld [vmem:[#allocation7 + $0x3e0] sm:$0xff]  ;;  %v9214_v51 = vld [vmem:[#allocation7 + $0x3e8] sm:$0xff] }
 0x606   :  { %v3435_v38 = vmul.f32 %v3413_v54, %v8775_v27  ;;  %v3422_v26 = vsub.f32 1.0, %v3421_v60  ;;  %v3218_v48 = vpop.f32.mrf.mxu3  ;;  %v9219_v60 = vld [vmem:[#allocation7 + $0x3a0] sm:$0xff]  ;;  %v9222_v54 = vld [vmem:[#allocation7 + $0x3a8] sm:$0xff] }
 0x607   :  { %v3219_v24 = vadd.f32 %v3218_v48, %v3198_v25  ;;  %v3432_v34 = vor.u32 1.1754944e-38, %v3431_v2  ;;  %v9237_v48 = vld [vmem:[#allocation7 + $0x328] sm:$0xff]  ;;  %v9257_v2 = vld [vmem:[#allocation7 + $0x260] sm:$0xff] }
 0x608   :  { %v9203_v55 = vadd.f32 %v3436_v41, %v3435_v38  ;;  %v3423_v10 = vmul.f32 %v4484_v22, %v3422_v26  ;;  %v9227_v38 = vld [vmem:[#allocation7 + $0x360] sm:$0xff]  ;;  %v9230_v41 = vld [vmem:[#allocation7 + $0x368] sm:$0xff] }
 0x609   :  { %v3302_v29 = vadd.f32 %v3219_v24, %v6366_v32  ;;  %v9234_v26 = vld [vmem:[#allocation7 + $0x320] sm:$0xff]  ;;  %v9278_v32 = vld [vmem:[#allocation7 + $0x1e8] sm:$0xff] }
 0x60a   :  { %11337 = vst [vmem:[#allocation42_spill] sm:$0xff] %v9203_v55  ;;  %4487 = vtanh.f32 %v9203_v55  ;;  %v3424_v18 = vadd.f32 %v4484_v22, %v3423_v10  ;;  %v9243_v24 = vld [vmem:[#allocation7 + $0x2e0] sm:$0xff]  ;;  %v9246_v10 = vld [vmem:[#allocation7 + $0x2e8] sm:$0xff]  ;;  %v3238_v55 = vpop.f32.mrf.mxu0 }
 0x60b   :  { %v4259_v14 = vmul.f32 -1.442695, %v3302_v29  ;;  %4489 = vpow2.f32 %v4258_v35  ;;  %v9249_v35 = vld [vmem:[#allocation7 + $0x2a0] sm:$0xff]  ;;  %v9252_v29 = vld [vmem:[#allocation7 + $0x2a8] sm:$0xff]  ;;  %11341 = vst [vmem:[#allocation46_spill] sm:$0xff] %v9278_v32 }
 0x60c   :  { %v3428_v27 = vsel %vm3427_vm15, %v4484_v22, %v3424_v18 }
 0x60d   :  { %4491 = vpow2.f32 %v4259_v14  ;;  %v3433_v8 = vsel %vm3430_vm0, %v3432_v34, %v3428_v27  ;;  %v9265_v27 = vld [vmem:[#allocation7 + $0x220] sm:$0xff]  ;;  %v9268_v34 = vld [vmem:[#allocation7 + $0x228] sm:$0xff] }
 0x60e   :  { %11338 = vst [vmem:[#allocation43_spill] sm:$0xff] %v9265_v27 }
 0x60f   :  { %11339 = vst [vmem:[#allocation44_spill] sm:$0xff] %v9268_v34 }
 0x610   :  { %v4488_v31 = vpop.eup %4487 }
 0x611   :  { %v9207_v12 = vmul.f32 %v4488_v31, %v3433_v8  ;;  %v4490_v23 = vpop.eup %4489 }
 0x612   :  { %v9217_v22 = vadd.f32 1.0, %v4490_v23 }
 0x613   :  { %3459 = vmatmul.f32.vlgmr.msrb.gmra.mxu0 %v9207_v12  ;;  %3499 = vmatmul.f32.vlgmr.msra.gmra.mxu2 %v9207_v12  ;;  %v4492_v57 = vpop.eup %4491 }
 0x614   :  { %3603 = vmatpush.msrb.mxu0 %v9211_v58  ;;  %3643 = vmatpush.msra.mxu2 %v9214_v51  ;;  %v9225_v25 = vadd.f32 1.0, %v4492_v57  ;;  %4493 = vrcp.f32 %v9217_v22  ;;  %v9275_v57 = vld [vmem:[#allocation7 + $0x1e0] sm:$0xff]  ;;  %vm3314_vm3 = vweird.f32 %v9217_v22 }
 0x615   :  { %11340 = vst [vmem:[#allocation45_spill] sm:$0xff] %v9275_v57 }
 0x616   :  { %3604 = vmatpush.msrb.mxu0 %v9219_v60  ;;  %3644 = vmatpush.msra.mxu2 %v9222_v54  ;;  %4495 = vrcp.f32 %v9225_v25  ;;  %vm3333_vm4 = vweird.f32 %v9225_v25 }
 0x618   :  { %3605 = vmatpush.msrb.mxu0 %v9227_v38  ;;  %3645 = vmatpush.msra.mxu2 %v9230_v41 }
 0x61a   :  { %3606 = vmatpush.msrb.mxu0 %v9234_v26  ;;  %3646 = vmatpush.msra.mxu2 %v9237_v48  ;;  %v9255_v18 = vpop.eup %4493 }
 0x61b   :  { %3539 = vmatmul.f32.vlgmr.msra.gmra.mxu0 %v9207_v12  ;;  %3579 = vmatmul.f32.vlgmr.msrb.gmra.mxu2 %v9207_v12  ;;  %v3310_v31 = vmul.f32 %v9255_v18, %v9217_v22  ;;  %vm3315_vm1 = vweird.f32 %v9255_v18 }
 0x61c   :  { %3607 = vmatpush.msrb.mxu0 %v9243_v24  ;;  %3647 = vmatpush.msra.mxu2 %v9246_v10  ;;  %v9263_v14 = vpop.eup %4495  ;;  %vm9329_vm5 = vmor %vm3314_vm3, %vm3315_vm1 }
 0x61d   :  { %v3329_v8 = vmul.f32 %v9263_v14, %v9225_v25  ;;  %vm3334_vm2 = vweird.f32 %v9263_v14 }
 0x61e   :  { %3608 = vmatpush.msrb.mxu0 %v9249_v35  ;;  %3648 = vmatpush.msra.mxu2 %v9252_v29  ;;  %vm9343_vm6 = vmor %vm3333_vm4, %vm3334_vm2 }
 0x620   :  { %3609 = vmatpush.msrb.mxu0 %v9257_v2  ;;  %3649 = vmatpush.msra.mxu2 %v9260_v42  ;;  %v3258_v23 = vpop.f32.mrf.mxu1 }
 0x621   :  { %v3259_v30 = vadd.f32 %v3258_v23, %v3238_v55  ;;  %v9309_v23 = vld [vmem:[#allocation7 + $0xa0] sm:$0xff] }
 0x622   :  { %3610 = vmatpush.msrb.mxu0 %v9265_v27  ;;  %3650 = vmatpush.msra.mxu2 %v9268_v34  ;;  %v3311_v34 = vsub.f32 1.0, %v3310_v31  ;;  %v3330_v27 = vsub.f32 1.0, %v3329_v8  ;;  %v9303_v8 = vld [vmem:[#allocation7 + $0xe0] sm:$0xff]  ;;  %11347 = vst [vmem:[#allocation52_spill] sm:$0xff] %v9309_v23 }
 0x623   :  { %11345 = vst [vmem:[#allocation50_spill] sm:$0xff] %v9303_v8 }
 0x624   :  { %3611 = vmatpush.msrb.mxu0 %v9275_v57  ;;  %3651 = vmatpush.msra.mxu2 %v9278_v32  ;;  %v9287_v57 = vld [vmem:[#allocation7 + $0x160] sm:$0xff]  ;;  %v9290_v32 = vld [vmem:[#allocation7 + $0x168] sm:$0xff]  ;;  %v3331_v55 = vmul.f32 %v9263_v14, %v3330_v27  ;;  %v3312_v31 = vmul.f32 %v9255_v18, %v3311_v34 }
 0x625   :  { %v9319_v27 = vld [vmem:[#allocation7 + $0x60] sm:$0xff]  ;;  %v9322_v34 = vld [vmem:[#allocation7 + $0x68] sm:$0xff] }
 0x626   :  { %v3298_v63 = vpop.f32.mrf.mxu3  ;;  %3612 = vmatpush.msrb.mxu0 %v9281_v5  ;;  %3652 = vmatpush.msra.mxu2 %v9284_v17  ;;  %v9297_v5 = vld [vmem:[#allocation7 + $0x128] sm:$0xff]  ;;  %11349 = vst [vmem:[#allocation54_spill] sm:$0xff] %v9319_v27 }
 0x627   :  { %v3299_v46 = vadd.f32 %v3298_v63, %v3278_v43  ;;  %11344 = vst [vmem:[#allocation49_spill] sm:$0xff] %v9297_v5  ;;  %v3303_v43 = vadd.f32 %v3259_v30, %v11188_v61  ;;  %v3332_v30 = vadd.f32 %v9263_v14, %v3331_v55  ;;  %v3318_v55 = vand.u32 2147483647, %v9217_v22 }
 0x628   :  { %3613 = vmatpush.msrb.mxu0 %v9287_v57  ;;  %3653 = vmatpush.msra.mxu2 %v9290_v32  ;;  %11350 = vst [vmem:[#allocation57_spill] sm:$0xff] %v9322_v34  ;;  %v3337_v61 = vand.u32 2147483647, %v9225_v25 }
 0x629   :  { %v3304_v13 = vadd.f32 %v3299_v46, %v11185_v7  ;;  %v9306_v46 = vld [vmem:[#allocation7 + $0xe8] sm:$0xff]  ;;  %vm3319_vm7 = vcmp.eq.f32.partialorder %v3318_v55, 8.507059e+37  ;;  %v9385_v55 = vld [vmem:[#allocation7 + $0x2f8] sm:$0xff] }
 0x62a   :  { %3614 = vmatpush.msrb.mxu0 %v9294_v19  ;;  %3654 = vmatpush.msra.mxu2 %v9297_v5  ;;  %11346 = vst [vmem:[#allocation51_spill] sm:$0xff] %v9306_v46  ;;  %v9312_v7 = vld [vmem:[#allocation7 + $0xa8] sm:$0xff]  ;;  %vm3338_vm8 = vcmp.eq.f32.partialorder %v3337_v61, 8.507059e+37 }
 0x62b   :  { %v4260_v63 = vmul.f32 -1.442695, %v3304_v13  ;;  %11348 = vst [vmem:[#allocation53_spill] sm:$0xff] %v9312_v7  ;;  %v3313_v13 = vadd.f32 %v9255_v18, %v3312_v31  ;;  %v9377_v31 = vld [vmem:[#allocation7 + $0x338] sm:$0xff] }
 0x62c   :  { %3615 = vmatpush.msrb.mxu0 %v9303_v8  ;;  %3655 = vmatpush.msra.mxu2 %v9306_v46  ;;  %v9358_v46 = vld [vmem:[#allocation7 + $0x3f8] sm:$0xff]  ;;  %11358 = vst [vmem:[#allocation59_spill] sm:$0xff] %v9377_v31 }
 0x62d   :  { %4497 = vpow2.f32 %v4260_v63  ;;  %v3339_v63 = vand.u32 2147483648, %v9225_v25  ;;  %v3336_v25 = vsel %vm9343_vm6, %v9263_v14, %v3332_v30  ;;  %v9364_v14 = vld [vmem:[#allocation7 + $0x3b8] sm:$0xff]  ;;  %v9367_v30 = vld [vmem:[#allocation7 + $0x370] sm:$0xff]  ;;  %11361 = vst [vmem:[#allocation64_spill] sm:$0xff] %v9385_v55 }
 0x62e   :  { %3616 = vmatpush.msrb.mxu0 %v9309_v23  ;;  %3656 = vmatpush.msra.mxu2 %v9312_v7  ;;  %4499 = vtanh.f32 %v3303_v43  ;;  %v3320_v43 = vand.u32 2147483648, %v9217_v22  ;;  %v3317_v22 = vsel %vm9329_vm5, %v9255_v18, %v3313_v13  ;;  %v9361_v18 = vld [vmem:[#allocation7 + $0x3b0] sm:$0xff] }
 0x62f   :  { %v3340_v5 = vor.u32 1.1754944e-38, %v3339_v63  ;;  %v9370_v63 = vld [vmem:[#allocation7 + $0x378] sm:$0xff] }
 0x630   :  { %3617 = vmatpush.msrb.mxu0 %v9319_v27  ;;  %3657 = vmatpush.msra.mxu2 %v9322_v34  ;;  %v9335_v27 = vld [vmem:[#allocation7 + $0x20] sm:$0xff]  ;;  %v9338_v34 = vld [vmem:[#allocation7 + $0x28] sm:$0xff]  ;;  %v3321_v19 = vor.u32 1.1754944e-38, %v3320_v43  ;;  %v9374_v43 = vld [vmem:[#allocation7 + $0x330] sm:$0xff] }
 0x631   :  { %11353 = vst [vmem:[#allocation55_spill] sm:$0xff] %v9335_v27  ;;  %v3341_v23 = vsel %vm3338_vm8, %v3340_v5, %v3336_v25  ;;  %v9391_v25 = vld [vmem:[#allocation7 + $0x2b8] sm:$0xff] }
 0x632   :  { %3618 = vmatpush.msrb.mxu0 %v9335_v27  ;;  %11354 = vst [vmem:[#allocation56_spill] sm:$0xff] %v9338_v34  ;;  %3658 = vmatpush.msra.mxu2 %v9338_v34  ;;  %v9355_v27 = vld [vmem:[#allocation7 + $0x3f0] sm:$0xff]  ;;  %v3363_v61 = vmul.f32 %v3341_v23, %v8872_v1 }
 0x633   :  { %v4498_v7 = vpop.eup %4497  ;;  %3619 = vmatmul.f32.vlgmr.msrb.gmra.mxu0 %v9207_v12  ;;  %3659 = vmatmul.f32.vlgmr.msra.gmra.mxu2 %v9207_v12  ;;  %11357 = vst [vmem:[#allocation58_spill] sm:$0xff] %v9374_v43 }
 0x634   :  { %v3347_v34 = vadd.f32 1.0, %v4498_v7  ;;  %3683 = vmatpush.msra.mxu0 %v9355_v27  ;;  %3723 = vmatpush.msrb.mxu2 %v9358_v46  ;;  %v4500_v8 = vpop.eup %4499  ;;  %v3322_v7 = vsel %vm3319_vm7, %v3321_v19, %v3317_v22  ;;  %v9388_v22 = vld [vmem:[#allocation7 + $0x2b0] sm:$0xff]  ;;  %11363 = vst [vmem:[#allocation66_spill] sm:$0xff] %v9391_v25 }
 0x635   :  { %v3364_v13 = vmul.f32 %v4500_v8, %v3322_v7  ;;  %v9382_v8 = vld [vmem:[#allocation7 + $0x2f0] sm:$0xff]  ;;  %11362 = vst [vmem:[#allocation65_spill] sm:$0xff] %v9388_v22 }
 0x636   :  { %4501 = vrcp.f32 %v3347_v34  ;;  %3684 = vmatpush.msra.mxu0 %v9361_v18  ;;  %3724 = vmatpush.msrb.mxu2 %v9364_v14  ;;  %11360 = vst [vmem:[#allocation62_spill] sm:$0xff] %v9382_v8  ;;  %v3359_v23 = vand.u32 2147483648, %v3347_v34  ;;  %vm3353_vm10 = vweird.f32 %v3347_v34 }
 0x637   :  { %v9380_v5 = vadd.f32 %v3364_v13, %v3363_v61  ;;  %v9395_v13 = vld [vmem:[#allocation7 + $0x270] sm:$0xff]  ;;  %v9398_v61 = vld [vmem:[#allocation7 + $0x278] sm:$0xff] }
 0x638   :  { %3685 = vmatpush.msra.mxu0 %v9367_v30  ;;  %3725 = vmatpush.msrb.mxu2 %v9370_v63  ;;  %11364 = vst [vmem:[#allocation67_spill] sm:$0xff] %v9395_v13 }
 0x639   :  { %11359 = vst [vmem:[#allocation61_spill] sm:$0xff] %v9380_v5  ;;  %4503 = vtanh.f32 %v9380_v5  ;;  %v3360_v5 = vor.u32 1.1754944e-38, %v3359_v23  ;;  %v9421_v23 = vld [vmem:[#allocation7 + $0x170] sm:$0xff] }
 0x63a   :  { %3686 = vmatpush.msra.mxu0 %v9374_v43  ;;  %3726 = vmatpush.msrb.mxu2 %v9377_v31  ;;  %11365 = vst [vmem:[#allocation69_spill] sm:$0xff] %v9398_v61  ;;  %v9413_v43 = vld [vmem:[#allocation7 + $0x1b0] sm:$0xff] }
 0x63c   :  { %v4502_v19 = vpop.eup %4501  ;;  %3687 = vmatpush.msra.mxu0 %v9382_v8  ;;  %3727 = vmatpush.msrb.mxu2 %v9385_v55  ;;  %v3357_v8 = vand.u32 2147483647, %v3347_v34 }
 0x63d   :  { %v3349_v1 = vmul.f32 %v4502_v19, %v3347_v34  ;;  %vm3354_vm9 = vweird.f32 %v4502_v19 }
 0x63e   :  { %3688 = vmatpush.msra.mxu0 %v9388_v22  ;;  %3728 = vmatpush.msrb.mxu2 %v9391_v25  ;;  %v9401_v22 = vld [vmem:[#allocation7 + $0x230] sm:$0xff]  ;;  %v9404_v25 = vld [vmem:[#allocation7 + $0x238] sm:$0xff]  ;;  %vm3355_vm11 = vmor %vm3353_vm10, %vm3354_vm9  ;;  %vm3358_vm12 = vcmp.eq.f32.partialorder %v3357_v8, 8.507059e+37 }
 0x63f   :  { %v3350_v7 = vsub.f32 1.0, %v3349_v1  ;;  %11366 = vst [vmem:[#allocation70_spill] sm:$0xff] %v9401_v22  ;;  %v4504_v31 = vpop.eup %4503  ;;  %v9442_v8 = vld [vmem:[#allocation7 + $0xf8] sm:$0xff] }
 0x640   :  { %3689 = vmatpush.msra.mxu0 %v9395_v13  ;;  %3729 = vmatpush.msrb.mxu2 %v9398_v61  ;;  %v9407_v13 = vld [vmem:[#allocation7 + $0x1f0] sm:$0xff]  ;;  %v9410_v61 = vld [vmem:[#allocation7 + $0x1f8] sm:$0xff] }
 0x641   :  { %v3351_v55 = vmul.f32 %v4502_v19, %v3350_v7  ;;  %11367 = vst [vmem:[#allocation72_spill] sm:$0xff] %v9407_v13 }
 0x642   :  { %3690 = vmatpush.msra.mxu0 %v9401_v22  ;;  %3730 = vmatpush.msrb.mxu2 %v9404_v25 }
 0x643   :  { %v3352_v1 = vadd.f32 %v4502_v19, %v3351_v55  ;;  %v9416_v55 = vld [vmem:[#allocation7 + $0x1b8] sm:$0xff] }
 0x644   :  { %3691 = vmatpush.msra.mxu0 %v9407_v13  ;;  %3731 = vmatpush.msrb.mxu2 %v9410_v61  ;;  %v9424_v13 = vld [vmem:[#allocation7 + $0x178] sm:$0xff] }
 0x645   :  { %v3356_v7 = vsel %vm3355_vm11, %v4502_v19, %v3352_v1  ;;  %v9431_v19 = vld [vmem:[#allocation7 + $0x130] sm:$0xff]  ;;  %v11407_v1 = vld [vmem:[#allocation122_spill] sm:$0xff] }
 0x646   :  { %v3361_v22 = vsel %vm3358_vm12, %v3360_v5, %v3356_v7  ;;  %3692 = vmatpush.msra.mxu0 %v9413_v43  ;;  %3732 = vmatpush.msrb.mxu2 %v9416_v55  ;;  %v9439_v5 = vld [vmem:[#allocation7 + $0xf0] sm:$0xff] }
 0x647   :  { %v9419_v34 = vmul.f32 %v4504_v31, %v3361_v22  ;;  %v9434_v31 = vld [vmem:[#allocation7 + $0x138] sm:$0xff]  ;;  %v11408_v7 = vld [vmem:[#allocation131_spill] sm:$0xff] }
 0x648   :  { %3693 = vmatpush.msra.mxu0 %v9421_v23  ;;  %3733 = vmatpush.msrb.mxu2 %v9424_v13  ;;  %v11406_v22 = vld [vmem:[#allocation112_spill] sm:$0xff] }
 0x649   :  { %3479 = vmatmul.f32.vlgmr.msra.gmra.mxu1 %v9419_v34  ;;  %3519 = vmatmul.f32.vlgmr.msra.gmra.mxu3 %v9419_v34 }
 0x64a   :  { %3623 = vmatpush.msra.mxu1 %v8893_v56  ;;  %3663 = vmatpush.msra.mxu3 %v8896_v62  ;;  %v9447_v56 = vld [vmem:[#allocation7 + $0xb0] sm:$0xff]  ;;  %v9450_v62 = vld [vmem:[#allocation7 + $0xb8] sm:$0xff] }
 0x64b   :  { %3694 = vmatpush.msra.mxu0 %v9431_v19  ;;  %3734 = vmatpush.msrb.mxu2 %v9434_v31 }
 0x64c   :  { %3624 = vmatpush.msra.mxu1 %v8901_v0  ;;  %3664 = vmatpush.msra.mxu3 %v8904_v47  ;;  %v9459_v0 = vld [vmem:[#allocation7 + $0x70] sm:$0xff]  ;;  %v9462_v47 = vld [vmem:[#allocation7 + $0x78] sm:$0xff] }
 0x64d   :  { %3695 = vmatpush.msra.mxu0 %v9439_v5  ;;  %3735 = vmatpush.msrb.mxu2 %v9442_v8 }
 0x64e   :  { %3625 = vmatpush.msra.mxu1 %v8909_v6  ;;  %3665 = vmatpush.msra.mxu3 %v8912_v44  ;;  %v9467_v6 = vld [vmem:[#allocation7 + $0x30] sm:$0xff]  ;;  %v9470_v44 = vld [vmem:[#allocation7 + $0x38] sm:$0xff] }
 0x64f   :  { %3696 = vmatpush.msra.mxu0 %v9447_v56  ;;  %3736 = vmatpush.msrb.mxu2 %v9450_v62 }
 0x650   :  { %3626 = vmatpush.msra.mxu1 %v8917_v50  ;;  %3666 = vmatpush.msra.mxu3 %v8920_v9  ;;  %v11368_v50 = vld [vmem:[#allocation141_spill] sm:$0xff]  ;;  %v11369_v9 = vld [vmem:[#allocation142_spill] sm:$0xff] }
 0x651   :  { %3559 = vmatmul.f32.vlgmr.msrb.gmra.mxu1 %v9419_v34  ;;  %3599 = vmatmul.f32.vlgmr.msrb.gmra.mxu3 %v9419_v34 }
 0x652   :  { %3627 = vmatpush.msra.mxu1 %v8925_v39  ;;  %3667 = vmatpush.msra.mxu3 %v8928_v4  ;;  %v11370_v39 = vld [vmem:[#allocation43_spill] sm:$0xff]  ;;  %v11371_v4 = vld [vmem:[#allocation44_spill] sm:$0xff] }
 0x653   :  { %3697 = vmatpush.msra.mxu0 %v9459_v0  ;;  %3737 = vmatpush.msrb.mxu2 %v9462_v47 }
 0x654   :  { %3628 = vmatpush.msra.mxu1 %v8933_v59  ;;  %3668 = vmatpush.msra.mxu3 %v8936_v16  ;;  %v11372_v59 = vld [vmem:[#allocation117_spill] sm:$0xff]  ;;  %v11373_v16 = vld [vmem:[#allocation60_spill] sm:$0xff] }
 0x655   :  { %3698 = vmatpush.msra.mxu0 %v9467_v6  ;;  %3738 = vmatpush.msrb.mxu2 %v9470_v44 }
 0x656   :  { %3699 = vmatmul.f32.vlgmr.msra.gmra.mxu0 %v9207_v12  ;;  %3739 = vmatmul.f32.vlgmr.msrb.gmra.mxu2 %v9207_v12  ;;  %v11388_v12 = vld [vmem:[#allocation164_spill] sm:$0xff] }
 0x657   :  { %3629 = vmatpush.msra.mxu1 %v8943_v37  ;;  %3669 = vmatpush.msra.mxu3 %v8946_v33  ;;  %v11374_v37 = vld [vmem:[#allocation45_spill] sm:$0xff]  ;;  %v11375_v33 = vld [vmem:[#allocation46_spill] sm:$0xff] }
 0x658   :  { %3905 = vmatpush.msrb.mxu0 %v9211_v58  ;;  %3945 = vmatpush.msra.mxu2 %v9214_v51  ;;  %v11390_v58 = vld [vmem:[#allocation51_spill] sm:$0xff]  ;;  %v11391_v51 = vld [vmem:[#allocation22_spill] sm:$0xff] }
 0x659   :  { %3630 = vmatpush.msra.mxu1 %v8951_v28  ;;  %3670 = vmatpush.msra.mxu3 %v8954_v15  ;;  %v11376_v28 = vld [vmem:[#allocation63_spill] sm:$0xff]  ;;  %v11377_v15 = vld [vmem:[#allocation68_spill] sm:$0xff] }
 0x65a   :  { %3906 = vmatpush.msrb.mxu0 %v9219_v60  ;;  %3946 = vmatpush.msra.mxu2 %v9222_v54  ;;  %v11392_v60 = vld [vmem:[#allocation23_spill] sm:$0xff]  ;;  %v11394_v54 = vld [vmem:[#allocation53_spill] sm:$0xff] }
 0x65b   :  { %3631 = vmatpush.msra.mxu1 %v8959_v36  ;;  %3671 = vmatpush.msra.mxu3 %v8962_v40  ;;  %v11378_v36 = vld [vmem:[#allocation158_spill] sm:$0xff]  ;;  %v11379_v40 = vld [vmem:[#allocation159_spill] sm:$0xff] }
 0x65c   :  { %3907 = vmatpush.msrb.mxu0 %v9227_v38  ;;  %3947 = vmatpush.msra.mxu2 %v9230_v41  ;;  %v11395_v38 = vld [vmem:[#allocation24_spill] sm:$0xff]  ;;  %v11396_v41 = vld [vmem:[#allocation25_spill] sm:$0xff] }
 0x65d   :  { %3632 = vmatpush.msra.mxu1 %v8967_v21  ;;  %3672 = vmatpush.msra.mxu3 %v8970_v20  ;;  %v11380_v21 = vld [vmem:[#allocation47_spill] sm:$0xff]  ;;  %v11381_v20 = vld [vmem:[#allocation160_spill] sm:$0xff] }
 0x65e   :  { %3908 = vmatpush.msrb.mxu0 %v9234_v26  ;;  %3948 = vmatpush.msra.mxu2 %v9237_v48  ;;  %v11397_v26 = vld [vmem:[#allocation54_spill] sm:$0xff]  ;;  %v11398_v48 = vld [vmem:[#allocation57_spill] sm:$0xff] }
 0x65f   :  { %3633 = vmatpush.msra.mxu1 %v8975_v53  ;;  %3673 = vmatpush.msra.mxu3 %v8978_v49  ;;  %v11382_v53 = vld [vmem:[#allocation161_spill] sm:$0xff]  ;;  %v11383_v49 = vld [vmem:[#allocation162_spill] sm:$0xff] }
 0x660   :  { %3909 = vmatpush.msrb.mxu0 %v9243_v24  ;;  %3949 = vmatpush.msra.mxu2 %v9246_v10  ;;  %v11399_v24 = vld [vmem:[#allocation15_spill] sm:$0xff]  ;;  %v11400_v10 = vld [vmem:[#allocation26_spill] sm:$0xff] }
 0x661   :  { %3634 = vmatpush.msra.mxu1 %v8983_v3  ;;  %3674 = vmatpush.msra.mxu3 %v8986_v45  ;;  %v11384_v3 = vld [vmem:[#allocation163_spill] sm:$0xff]  ;;  %v11385_v45 = vld [vmem:[#allocation48_spill] sm:$0xff] }
 0x662   :  { %3910 = vmatpush.msrb.mxu0 %v9249_v35  ;;  %3950 = vmatpush.msra.mxu2 %v9252_v29  ;;  %v11401_v35 = vld [vmem:[#allocation55_spill] sm:$0xff]  ;;  %v11402_v29 = vld [vmem:[#allocation56_spill] sm:$0xff] }
 0x663   :  { %3635 = vmatpush.msra.mxu1 %v8991_v52  ;;  %3675 = vmatpush.msra.mxu3 %v8994_v11  ;;  %v11386_v52 = vld [vmem:[#allocation49_spill] sm:$0xff] }
 0x664   :  { %3911 = vmatpush.msrb.mxu0 %v9257_v2  ;;  %3951 = vmatpush.msra.mxu2 %v9260_v42  ;;  %v11387_v11 = vld [vmem:[#allocation21_spill] sm:$0xff]  ;;  %v11403_v2 = vld [vmem:[#allocation27_spill] sm:$0xff]  ;;  %v11404_v42 = vld [vmem:[#allocation28_spill] sm:$0xff] }
 0x665   :  { %3636 = vmatpush.msra.mxu1 %v11368_v50  ;;  %3676 = vmatpush.msra.mxu3 %v11369_v9  ;;  %v11409_v50 = vld [vmem:[#allocation30_spill] sm:$0xff]  ;;  %v11412_v9 = vld [vmem:[#allocation59_spill] sm:$0xff] }
 0x666   :  { %3912 = vmatpush.msrb.mxu0 %v11370_v39  ;;  %3952 = vmatpush.msra.mxu2 %v11371_v4  ;;  %v11413_v39 = vld [vmem:[#allocation32_spill] sm:$0xff] }
 0x667   :  { %3637 = vmatpush.msra.mxu1 %v11372_v59  ;;  %3677 = vmatpush.msra.mxu3 %v11373_v16  ;;  %v11416_v4 = vld [vmem:[#allocation64_spill] sm:$0xff]  ;;  %v11417_v59 = vld [vmem:[#allocation34_spill] sm:$0xff] }
 0x668   :  { %3913 = vmatpush.msrb.mxu0 %v11374_v37  ;;  %3953 = vmatpush.msra.mxu2 %v11375_v33  ;;  %v11420_v16 = vld [vmem:[#allocation66_spill] sm:$0xff]  ;;  %v11421_v37 = vld [vmem:[#allocation36_spill] sm:$0xff]  ;;  %v11422_v33 = vld [vmem:[#allocation37_spill] sm:$0xff] }
 0x669   :  { %3638 = vmatpush.msra.mxu1 %v11376_v28  ;;  %3678 = vmatpush.msra.mxu3 %v11377_v15  ;;  %v11423_v28 = vld [vmem:[#allocation67_spill] sm:$0xff]  ;;  %v11424_v15 = vld [vmem:[#allocation69_spill] sm:$0xff] }
 0x66a   :  { %3639 = vmatmul.f32.vlgmr.msra.gmra.mxu1 %v9419_v34  ;;  %3679 = vmatmul.f32.vlgmr.msra.gmra.mxu3 %v9419_v34 }
 0x66b   :  { %3703 = vmatpush.msrb.mxu1 %v11378_v36  ;;  %3743 = vmatpush.msrb.mxu3 %v11379_v40  ;;  %v11425_v36 = vld [vmem:[#allocation38_spill] sm:$0xff]  ;;  %v11426_v40 = vld [vmem:[#allocation39_spill] sm:$0xff] }
 0x66c   :  { %3914 = vmatpush.msrb.mxu0 %v11380_v21  ;;  %3954 = vmatpush.msra.mxu2 %v9284_v17  ;;  %v11389_v17 = vld [vmem:[#allocation50_spill] sm:$0xff] }
 0x66d   :  { %3704 = vmatpush.msrb.mxu1 %v11381_v20  ;;  %3744 = vmatpush.msrb.mxu3 %v11382_v53  ;;  %v11427_v21 = vld [vmem:[#allocation70_spill] sm:$0xff]  ;;  %v11428_v20 = vld [vmem:[#allocation40_spill] sm:$0xff]  ;;  %v11429_v53 = vld [vmem:[#allocation41_spill] sm:$0xff] }
 0x66e   :  { %3915 = vmatpush.msrb.mxu0 %v9287_v57  ;;  %3955 = vmatpush.msra.mxu2 %v9290_v32  ;;  %v11393_v32 = vld [vmem:[#allocation52_spill] sm:$0xff]  ;;  %v11405_v57 = vld [vmem:[#allocation29_spill] sm:$0xff] }
 0x66f   :  { %3705 = vmatpush.msrb.mxu1 %v11383_v49  ;;  %3745 = vmatpush.msrb.mxu3 %v11384_v3  ;;  %v11430_v49 = vld [vmem:[#allocation72_spill] sm:$0xff]  ;;  %v5343_v3 = vld [vmem:[#allocation7 + $0x7e0] sm:$0xff] }
 0x670   :  { %3916 = vmatpush.msrb.mxu0 %v11385_v45  ;;  %3956 = vmatpush.msra.mxu2 %v11386_v52  ;;  %v5344_v45 = vld [vmem:[#allocation7 + $0x7e8] sm:$0xff] }
 0x671   :  { %3706 = vmatpush.msrb.mxu1 %v11387_v11  ;;  %3746 = vmatpush.msrb.mxu3 %v11388_v12  ;;  %v5346_v52 = vld [vmem:[#allocation7 + $0x7a8] sm:$0xff] }
 0x672   :  { %3917 = vmatpush.msrb.mxu0 %v11389_v17  ;;  %3957 = vmatpush.msra.mxu2 %v11390_v58  ;;  %v5348_v11 = vld [vmem:[#allocation7 + $0x768] sm:$0xff]  ;;  %v5361_v17 = vld [vmem:[#allocation7 + $0x5a0] sm:$0xff] }
 0x673   :  { %3707 = vmatpush.msrb.mxu1 %v11391_v51  ;;  %3747 = vmatpush.msrb.mxu3 %v11392_v60  ;;  %v5360_v12 = vld [vmem:[#allocation7 + $0x5e8] sm:$0xff]  ;;  %v5365_v51 = vld [vmem:[#allocation7 + $0x520] sm:$0xff] }
 0x674   :  { %3918 = vmatpush.msrb.mxu0 %v11393_v32  ;;  %3958 = vmatpush.msra.mxu2 %v11394_v54  ;;  %v5364_v58 = vld [vmem:[#allocation7 + $0x568] sm:$0xff]  ;;  %v5369_v32 = vld [vmem:[#allocation7 + $0x4a0] sm:$0xff] }
 0x675   :  { %3708 = vmatpush.msrb.mxu1 %v11395_v38  ;;  %3748 = vmatpush.msrb.mxu3 %v11396_v41  ;;  %v5368_v60 = vld [vmem:[#allocation7 + $0x4e8] sm:$0xff]  ;;  %v5371_v38 = vld [vmem:[#allocation7 + $0x460] sm:$0xff] }
 0x676   :  { %3919 = vmatpush.msrb.mxu0 %v11397_v26  ;;  %3959 = vmatpush.msra.mxu2 %v11398_v48  ;;  %v5370_v54 = vld [vmem:[#allocation7 + $0x4a8] sm:$0xff]  ;;  %v5373_v26 = vld [vmem:[#allocation7 + $0x420] sm:$0xff] }
 0x677   :  { %3709 = vmatpush.msrb.mxu1 %v11399_v24  ;;  %3749 = vmatpush.msrb.mxu3 %v11400_v10  ;;  %v5372_v41 = vld [vmem:[#allocation7 + $0x468] sm:$0xff]  ;;  %v5375_v24 = vld [vmem:[#allocation7 + $0x7f0] sm:$0xff]  ;;  %v5376_v10 = vld [vmem:[#allocation7 + $0x7f8] sm:$0xff] }
 0x678   :  { %3920 = vmatpush.msrb.mxu0 %v11401_v35  ;;  %3960 = vmatpush.msra.mxu2 %v11402_v29  ;;  %v5374_v48 = vld [vmem:[#allocation7 + $0x428] sm:$0xff]  ;;  %v5377_v35 = vld [vmem:[#allocation7 + $0x7b0] sm:$0xff]  ;;  %v5378_v29 = vld [vmem:[#allocation7 + $0x7b8] sm:$0xff] }
 0x679   :  { %3710 = vmatpush.msrb.mxu1 %v11403_v2  ;;  %3750 = vmatpush.msrb.mxu3 %v11404_v42  ;;  %v5379_v2 = vld [vmem:[#allocation7 + $0x770] sm:$0xff]  ;;  %v5380_v42 = vld [vmem:[#allocation7 + $0x778] sm:$0xff] }
 0x67a   :  { %3985 = vmatpush.msra.mxu0 %v9355_v27  ;;  %4025 = vmatpush.msrb.mxu2 %v9358_v46  ;;  %v11410_v27 = vld [vmem:[#allocation31_spill] sm:$0xff]  ;;  %v11411_v46 = vld [vmem:[#allocation58_spill] sm:$0xff] }
 0x67b   :  { %3711 = vmatpush.msrb.mxu1 %v11405_v57  ;;  %3751 = vmatpush.msrb.mxu3 %v11406_v22  ;;  %v5381_v57 = vld [vmem:[#allocation7 + $0x730] sm:$0xff]  ;;  %v5382_v22 = vld [vmem:[#allocation7 + $0x738] sm:$0xff] }
 0x67c   :  { %3986 = vmatpush.msra.mxu0 %v9361_v18  ;;  %4026 = vmatpush.msrb.mxu2 %v9364_v14  ;;  %v11414_v18 = vld [vmem:[#allocation33_spill] sm:$0xff]  ;;  %v11415_v14 = vld [vmem:[#allocation62_spill] sm:$0xff] }
 0x67d   :  { %3712 = vmatpush.msrb.mxu1 %v11407_v1  ;;  %3752 = vmatpush.msrb.mxu3 %v11408_v7  ;;  %v5383_v1 = vld [vmem:[#allocation7 + $0x6f0] sm:$0xff]  ;;  %v5384_v7 = vld [vmem:[#allocation7 + $0x6f8] sm:$0xff] }
 0x67e   :  { %3987 = vmatpush.msra.mxu0 %v9367_v30  ;;  %4027 = vmatpush.msrb.mxu2 %v9370_v63  ;;  %v11418_v30 = vld [vmem:[#allocation35_spill] sm:$0xff]  ;;  %v11419_v63 = vld [vmem:[#allocation65_spill] sm:$0xff] }
 0x67f   :  { %3713 = vmatpush.msrb.mxu1 %v11409_v50  ;;  %3753 = vmatpush.msrb.mxu3 %v11410_v27  ;;  %v5385_v50 = vld [vmem:[#allocation7 + $0x6b0] sm:$0xff]  ;;  %v5386_v27 = vld [vmem:[#allocation7 + $0x6b8] sm:$0xff] }
 0x680   :  { %3988 = vmatpush.msra.mxu0 %v11411_v46  ;;  %4028 = vmatpush.msrb.mxu2 %v11412_v9  ;;  %v5387_v46 = vld [vmem:[#allocation7 + $0x670] sm:$0xff]  ;;  %v5388_v9 = vld [vmem:[#allocation7 + $0x678] sm:$0xff] }
 0x681   :  { %3714 = vmatpush.msrb.mxu1 %v11413_v39  ;;  %3754 = vmatpush.msrb.mxu3 %v11414_v18  ;;  %v5389_v39 = vld [vmem:[#allocation7 + $0x630] sm:$0xff]  ;;  %v5390_v18 = vld [vmem:[#allocation7 + $0x638] sm:$0xff] }
 0x682   :  { %3989 = vmatpush.msra.mxu0 %v11415_v14  ;;  %4029 = vmatpush.msrb.mxu2 %v11416_v4  ;;  %v5391_v14 = vld [vmem:[#allocation7 + $0x5f0] sm:$0xff]  ;;  %v5392_v4 = vld [vmem:[#allocation7 + $0x5f8] sm:$0xff] }
 0x683   :  { %3715 = vmatpush.msrb.mxu1 %v11417_v59  ;;  %3755 = vmatpush.msrb.mxu3 %v11418_v30  ;;  %v5393_v59 = vld [vmem:[#allocation7 + $0x5b0] sm:$0xff]  ;;  %v5394_v30 = vld [vmem:[#allocation7 + $0x5b8] sm:$0xff] }
 0x684   :  { %3990 = vmatpush.msra.mxu0 %v11419_v63  ;;  %4030 = vmatpush.msrb.mxu2 %v11420_v16  ;;  %v5395_v63 = vld [vmem:[#allocation7 + $0x570] sm:$0xff]  ;;  %v5396_v16 = vld [vmem:[#allocation7 + $0x578] sm:$0xff] }
 0x685   :  { %3716 = vmatpush.msrb.mxu1 %v11421_v37  ;;  %3756 = vmatpush.msrb.mxu3 %v11422_v33  ;;  %v5397_v37 = vld [vmem:[#allocation7 + $0x530] sm:$0xff]  ;;  %v5398_v33 = vld [vmem:[#allocation7 + $0x538] sm:$0xff] }
 0x686   :  { %3991 = vmatpush.msra.mxu0 %v11423_v28  ;;  %4031 = vmatpush.msrb.mxu2 %v11424_v15  ;;  %v5399_v28 = vld [vmem:[#allocation7 + $0x4f0] sm:$0xff]  ;;  %v5400_v15 = vld [vmem:[#allocation7 + $0x4f8] sm:$0xff] }
 0x687   :  { %3717 = vmatpush.msrb.mxu1 %v11425_v36  ;;  %3757 = vmatpush.msrb.mxu3 %v11426_v40  ;;  %v5401_v36 = vld [vmem:[#allocation7 + $0x4b0] sm:$0xff]  ;;  %v5402_v40 = vld [vmem:[#allocation7 + $0x4b8] sm:$0xff] }
 0x688   :  { %3992 = vmatpush.msra.mxu0 %v11427_v21  ;;  %4032 = vmatpush.msrb.mxu2 %v9404_v25  ;;  %v5345_v25 = vld [vmem:[#allocation7 + $0x7a0] sm:$0xff] }
 0x689   :  { %3718 = vmatpush.msrb.mxu1 %v11428_v20  ;;  %3758 = vmatpush.msrb.mxu3 %v11429_v53  ;;  %v11431_v53 = vld [vmem:[#allocation14_spill] sm:$0xff] }
 0x68a   :  { %3719 = vmatmul.f32.vlgmr.msrb.gmra.mxu1 %v9419_v34  ;;  %3759 = vmatmul.f32.vlgmr.msrb.gmra.mxu3 %v9419_v34  ;;  %v5347_v34 = vld [vmem:[#allocation7 + $0x760] sm:$0xff] }
 0x68b   :  { %3993 = vmatpush.msra.mxu0 %v11430_v49  ;;  %4033 = vmatpush.msrb.mxu2 %v9410_v61  ;;  %v5349_v61 = vld [vmem:[#allocation7 + $0x720] sm:$0xff] }
 0x68c   :  { %3925 = vmatpush.msra.mxu1 %v5343_v3  ;;  %3965 = vmatpush.msra.mxu3 %v5344_v45  ;;  %v11432_v49 = vld [vmem:[#allocation17_spill] sm:$0xff] }
 0x68d   :  { %3994 = vmatpush.msra.mxu0 %v9413_v43  ;;  %4034 = vmatpush.msrb.mxu2 %v9416_v55  ;;  %v5350_v43 = vld [vmem:[#allocation7 + $0x728] sm:$0xff]  ;;  %v5351_v55 = vld [vmem:[#allocation7 + $0x6e0] sm:$0xff]  ;;  %v172_v3 = vadd.f32 %v11432_v49, %v11431_v53 }
 0x68e   :  { %3926 = vmatpush.msra.mxu1 %v5345_v25  ;;  %3966 = vmatpush.msra.mxu3 %v5346_v52  ;;  %v5403_v25 = vld [vmem:[#allocation7 + $0x470] sm:$0xff]  ;;  %v5404_v52 = vld [vmem:[#allocation7 + $0x478] sm:$0xff] }
 0x68f   :  { %3995 = vmatpush.msra.mxu0 %v9421_v23  ;;  %4035 = vmatpush.msrb.mxu2 %v9424_v13  ;;  %v5352_v23 = vld [vmem:[#allocation7 + $0x6e8] sm:$0xff]  ;;  %v5353_v13 = vld [vmem:[#allocation7 + $0x6a0] sm:$0xff] }
 0x690   :  { %3927 = vmatpush.msra.mxu1 %v5347_v34  ;;  %3967 = vmatpush.msra.mxu3 %v5348_v11  ;;  %v3460_v21 = vpop.f32.mrf.mxu0  ;;  %v5405_v11 = vld [vmem:[#allocation7 + $0x430] sm:$0xff] }
 0x691   :  { %3996 = vmatpush.msra.mxu0 %v9431_v19  ;;  %4036 = vmatpush.msrb.mxu2 %v9434_v31  ;;  %v5354_v19 = vld [vmem:[#allocation7 + $0x6a8] sm:$0xff]  ;;  %v5355_v31 = vld [vmem:[#allocation7 + $0x660] sm:$0xff] }
 0x692   :  { %3928 = vmatpush.msra.mxu1 %v5349_v61  ;;  %3968 = vmatpush.msra.mxu3 %v5350_v43  ;;  %v5406_v61 = vld [vmem:[#allocation7 + $0x438] sm:$0xff] }
 0x693   :  { %3997 = vmatpush.msra.mxu0 %v9439_v5  ;;  %4037 = vmatpush.msrb.mxu2 %v9442_v8  ;;  %v5356_v5 = vld [vmem:[#allocation7 + $0x668] sm:$0xff]  ;;  %v5357_v8 = vld [vmem:[#allocation7 + $0x620] sm:$0xff] }
 0x694   :  { %3929 = vmatpush.msra.mxu1 %v5351_v55  ;;  %3969 = vmatpush.msra.mxu3 %v5352_v23 }
 0x695   :  { %3998 = vmatpush.msra.mxu0 %v9447_v56  ;;  %4038 = vmatpush.msrb.mxu2 %v9450_v62  ;;  %v5358_v56 = vld [vmem:[#allocation7 + $0x628] sm:$0xff]  ;;  %v5359_v62 = vld [vmem:[#allocation7 + $0x5e0] sm:$0xff] }
 0x696   :  { %3930 = vmatpush.msra.mxu1 %v5353_v13  ;;  %3970 = vmatpush.msra.mxu3 %v5354_v19  ;;  %v3500_v43 = vpop.f32.mrf.mxu2  ;;  %v11433_v13 = vld [vmem:[#allocation16_spill] sm:$0xff]  ;;  %v11434_v19 = vld [vmem:[#allocation146_spill] sm:$0xff] }
 0x697   :  { %3999 = vmatpush.msra.mxu0 %v9459_v0  ;;  %4039 = vmatpush.msrb.mxu2 %v9462_v47  ;;  %v5362_v0 = vld [vmem:[#allocation7 + $0x5a8] sm:$0xff]  ;;  %v5363_v47 = vld [vmem:[#allocation7 + $0x560] sm:$0xff] }
 0x698   :  { %3931 = vmatpush.msra.mxu1 %v5355_v31  ;;  %3971 = vmatpush.msra.mxu3 %v5356_v5  ;;  %v213_v31 = vadd.f32 %v11434_v19, %v11433_v13 }
 0x699   :  { %4000 = vmatpush.msra.mxu0 %v9467_v6  ;;  %4040 = vmatpush.msrb.mxu2 %v9470_v44  ;;  %v5366_v6 = vld [vmem:[#allocation7 + $0x528] sm:$0xff]  ;;  %v5367_v44 = vld [vmem:[#allocation7 + $0x4e0] sm:$0xff] }
 0x69a   :  { %3932 = vmatpush.msra.mxu1 %v5357_v8  ;;  %3972 = vmatpush.msra.mxu3 %v5358_v56 }
 0x69c   :  { %3933 = vmatpush.msra.mxu1 %v5359_v62  ;;  %3973 = vmatpush.msra.mxu3 %v5360_v12 }
 0x69e   :  { %3934 = vmatpush.msra.mxu1 %v5361_v17  ;;  %3974 = vmatpush.msra.mxu3 %v5362_v0  ;;  %v3580_v12 = vpop.f32.mrf.mxu2 }
 0x6a0   :  { %3935 = vmatpush.msra.mxu1 %v5363_v47  ;;  %3975 = vmatpush.msra.mxu3 %v5364_v58  ;;  %v11435_v47 = vld [vmem:[#allocation18_spill] sm:$0xff] }
 0x6a1   :  { %v11436_v58 = vld [vmem:[#allocation150_spill] sm:$0xff] }
 0x6a2   :  { %3936 = vmatpush.msra.mxu1 %v5365_v51  ;;  %3976 = vmatpush.msra.mxu3 %v5366_v6  ;;  %v295_v51 = vadd.f32 %v11436_v58, %v11435_v47 }
 0x6a4   :  { %3937 = vmatpush.msra.mxu1 %v5367_v44  ;;  %3977 = vmatpush.msra.mxu3 %v5368_v60 }
 0x6a6   :  { %3938 = vmatpush.msra.mxu1 %v5369_v32  ;;  %3978 = vmatpush.msra.mxu3 %v5370_v54 }
 0x6a8   :  { %3939 = vmatpush.msra.mxu1 %v5371_v38  ;;  %3979 = vmatpush.msra.mxu3 %v5372_v41 }
 0x6aa   :  { %3940 = vmatpush.msra.mxu1 %v5373_v26  ;;  %3980 = vmatpush.msra.mxu3 %v5374_v48  ;;  %v3540_v26 = vpop.f32.mrf.mxu0 }
 0x6ac   :  { %4005 = vmatpush.msrb.mxu1 %v5375_v24  ;;  %4045 = vmatpush.msrb.mxu3 %v5376_v10 }
 0x6ae   :  { %4006 = vmatpush.msrb.mxu1 %v5377_v35  ;;  %4046 = vmatpush.msrb.mxu3 %v5378_v29  ;;  %v11437_v35 = vld [vmem:[#allocation20_spill] sm:$0xff]  ;;  %v11438_v29 = vld [vmem:[#allocation153_spill] sm:$0xff] }
 0x6b0   :  { %4007 = vmatpush.msrb.mxu1 %v5379_v2  ;;  %4047 = vmatpush.msrb.mxu3 %v5380_v42  ;;  %v254_v2 = vadd.f32 %v11438_v29, %v11437_v35 }
 0x6b2   :  { %4008 = vmatpush.msrb.mxu1 %v5381_v57  ;;  %4048 = vmatpush.msrb.mxu3 %v5382_v22 }
 0x6b4   :  { %4009 = vmatpush.msrb.mxu1 %v5383_v1  ;;  %4049 = vmatpush.msrb.mxu3 %v5384_v7 }
 0x6b6   :  { %4010 = vmatpush.msrb.mxu1 %v5385_v50  ;;  %4050 = vmatpush.msrb.mxu3 %v5386_v27 }
 0x6b8   :  { %4011 = vmatpush.msrb.mxu1 %v5387_v46  ;;  %4051 = vmatpush.msrb.mxu3 %v5388_v9 }
 0x6ba   :  { %4012 = vmatpush.msrb.mxu1 %v5389_v39  ;;  %4052 = vmatpush.msrb.mxu3 %v5390_v18 }
 0x6bc   :  { %4013 = vmatpush.msrb.mxu1 %v5391_v14  ;;  %4053 = vmatpush.msrb.mxu3 %v5392_v4  ;;  %v3620_v4 = vpop.f32.mrf.mxu0 }
 0x6be   :  { %4014 = vmatpush.msrb.mxu1 %v5393_v59  ;;  %4054 = vmatpush.msrb.mxu3 %v5394_v30 }
 0x6c0   :  { %4015 = vmatpush.msrb.mxu1 %v5395_v63  ;;  %4055 = vmatpush.msrb.mxu3 %v5396_v16 }
 0x6c2   :  { %4016 = vmatpush.msrb.mxu1 %v5397_v37  ;;  %4056 = vmatpush.msrb.mxu3 %v5398_v33 }
 0x6c4   :  { %4017 = vmatpush.msrb.mxu1 %v5399_v28  ;;  %4057 = vmatpush.msrb.mxu3 %v5400_v15 }
 0x6c6   :  { %4018 = vmatpush.msrb.mxu1 %v5401_v36  ;;  %4058 = vmatpush.msrb.mxu3 %v5402_v40  ;;  %v3480_v20 = vpop.f32.mrf.mxu1 }
 0x6c7   :  { %v3481_v45 = vadd.f32 %v3480_v20, %v3460_v21 }
 0x6c8   :  { %4019 = vmatpush.msrb.mxu1 %v5403_v25  ;;  %4059 = vmatpush.msrb.mxu3 %v5404_v52  ;;  %v3660_v25 = vpop.f32.mrf.mxu2  ;;  %v11442_v52 = vld [vmem:[#allocation42_spill] sm:$0xff] }
 0x6c9   :  { %v3835_v34 = vadd.f32 %v3481_v45, %v172_v3  ;;  %v11441_v3 = vld [vmem:[#allocation154_spill] sm:$0xff] }
 0x6ca   :  { %4020 = vmatpush.msrb.mxu1 %v5405_v11  ;;  %4060 = vmatpush.msrb.mxu3 %v5406_v61 }
 0x6cb   :  { %v4267_v55 = vmul.f32 -1.442695, %v3835_v34 }
 0x6cc   :  { %v3520_v23 = vpop.f32.mrf.mxu3 }
 0x6cd   :  { %4505 = vpow2.f32 %v4267_v55  ;;  %v3521_v5 = vadd.f32 %v3520_v23, %v3500_v43 }
 0x6ce   :  { %v3560_v38 = vpop.f32.mrf.mxu1 }
 0x6cf   :  { %v3836_v8 = vadd.f32 %v3521_v5, %v213_v31  ;;  %v3561_v24 = vadd.f32 %v3560_v38, %v3540_v26  ;;  %v11443_v31 = vld [vmem:[#allocation155_spill] sm:$0xff] }
 0x6d1   :  { %v4268_v56 = vmul.f32 -1.442695, %v3836_v8  ;;  %v3837_v1 = vadd.f32 %v3561_v24, %v254_v2 }
 0x6d3   :  { %v4506_v62 = vpop.eup %4505  ;;  %4507 = vpow2.f32 %v4268_v56  ;;  %v3700_v24 = vpop.f32.mrf.mxu0 }
 0x6d4   :  { %v3842_v17 = vadd.f32 1.0, %v4506_v62  ;;  %v3600_v0 = vpop.f32.mrf.mxu3 }
 0x6d5   :  { %v3601_v6 = vadd.f32 %v3600_v0, %v3580_v12 }
 0x6d6   :  { %4509 = vrcp.f32 %v3842_v17  ;;  %v3854_v46 = vand.u32 2147483648, %v3842_v17  ;;  %vm3848_vm14 = vweird.f32 %v3842_v17  ;;  %v3852_v39 = vand.u32 2147483647, %v3842_v17 }
 0x6d7   :  { %v3838_v44 = vadd.f32 %v3601_v6, %v295_v51 }
 0x6d8   :  { %v3855_v37 = vor.u32 1.1754944e-38, %v3854_v46  ;;  %vm3853_vm2 = vcmp.eq.f32.partialorder %v3852_v39, 8.507059e+37 }
 0x6d9   :  { %v4508_v60 = vpop.eup %4507  ;;  %v4269_v32 = vmul.f32 -1.442695, %v3838_v44 }
 0x6da   :  { %v3861_v54 = vadd.f32 1.0, %v4508_v60 }
 0x6db   :  { %4511 = vpow2.f32 %v4269_v32 }
 0x6dc   :  { %v4510_v41 = vpop.eup %4509  ;;  %4513 = vrcp.f32 %v3861_v54  ;;  %v3873_v18 = vand.u32 2147483648, %v3861_v54  ;;  %v3871_v63 = vand.u32 2147483647, %v3861_v54  ;;  %vm3867_vm1 = vweird.f32 %v3861_v54 }
 0x6dd   :  { %v3844_v48 = vmul.f32 %v4510_v41, %v3842_v17  ;;  %vm3849_vm13 = vweird.f32 %v4510_v41 }
 0x6de   :  { %vm9603_vm15 = vmor %vm3848_vm14, %vm3849_vm13  ;;  %v3874_v36 = vor.u32 1.1754944e-38, %v3873_v18  ;;  %vm3872_vm4 = vcmp.eq.f32.partialorder %v3871_v63, 8.507059e+37 }
 0x6df   :  { %v3845_v10 = vsub.f32 1.0, %v3844_v48 }
 0x6e1   :  { %v4512_v42 = vpop.eup %4511  ;;  %v3846_v57 = vmul.f32 %v4510_v41, %v3845_v10  ;;  %v3740_v10 = vpop.f32.mrf.mxu2 }
 0x6e2   :  { %v4514_v22 = vpop.eup %4513  ;;  %v3881_v7 = vadd.f32 1.0, %v4512_v42 }
 0x6e3   :  { %v3863_v50 = vmul.f32 %v4514_v22, %v3861_v54  ;;  %v3847_v27 = vadd.f32 %v4510_v41, %v3846_v57  ;;  %vm3868_vm0 = vweird.f32 %v4514_v22 }
 0x6e4   :  { %4515 = vrcp.f32 %v3881_v7  ;;  %vm3869_vm3 = vmor %vm3867_vm1, %vm3868_vm0  ;;  %v3893_v8 = vand.u32 2147483648, %v3881_v7  ;;  %vm3887_vm6 = vweird.f32 %v3881_v7  ;;  %v3891_v12 = vand.u32 2147483647, %v3881_v7 }
 0x6e5   :  { %v3864_v9 = vsub.f32 1.0, %v3863_v50  ;;  %4517 = vtanh.f32 %v3837_v1  ;;  %v3851_v30 = vsel %vm9603_vm15, %v4510_v41, %v3847_v27 }
 0x6e6   :  { %v3856_v40 = vsel %vm3853_vm2, %v3855_v37, %v3851_v30  ;;  %v3894_v0 = vor.u32 1.1754944e-38, %v3893_v8  ;;  %vm3892_vm8 = vcmp.eq.f32.partialorder %v3891_v12, 8.507059e+37  ;;  %v4147_v12 = vld [vmem:[#allocation9 + $0x68] sm:$0xff] }
 0x6e7   :  { %v3865_v59 = vmul.f32 %v4514_v22, %v3864_v9  ;;  %v3640_v16 = vpop.f32.mrf.mxu1 }
 0x6e8   :  { %v3641_v33 = vadd.f32 %v3640_v16, %v3620_v4 }
 0x6e9   :  { %v3866_v28 = vadd.f32 %v4514_v22, %v3865_v59 }
 0x6ea   :  { %v4516_v15 = vpop.eup %4515  ;;  %v3763_v45 = vadd.f32 %v3641_v33, %v11441_v3 }
 0x6eb   :  { %v3870_v21 = vsel %vm3869_vm3, %v4514_v22, %v3866_v28  ;;  %v3883_v20 = vmul.f32 %v4516_v15, %v3881_v7  ;;  %v4518_v53 = vpop.eup %4517  ;;  %vm3888_vm5 = vweird.f32 %v4516_v15  ;;  %v11444_v22 = vld [vmem:[#allocation156_spill] sm:$0xff]  ;;  %v11445_v7 = vld [vmem:[#allocation157_spill] sm:$0xff] }
 0x6ec   :  { %v3875_v49 = vsel %vm3872_vm4, %v3874_v36, %v3870_v21  ;;  %v3898_v11 = vmul.f32 %v4518_v53, %v3856_v40  ;;  %v4264_v19 = vmul.f32 -1.442695, %v3763_v45  ;;  %vm3889_vm7 = vmor %vm3887_vm6, %vm3888_vm5  ;;  %v11446_v53 = vld [vmem:[#allocation61_spill] sm:$0xff] }
 0x6ed   :  { %v3897_v34 = vmul.f32 %v3875_v49, %v11442_v52  ;;  %v3884_v61 = vsub.f32 1.0, %v3883_v20  ;;  %v3680_v43 = vpop.f32.mrf.mxu3 }
 0x6ee   :  { %v3681_v55 = vadd.f32 %v3680_v43, %v3660_v25 }
 0x6ef   :  { %v3899_v23 = vadd.f32 %v3898_v11, %v3897_v34  ;;  %v3885_v13 = vmul.f32 %v4516_v15, %v3884_v61 }
 0x6f0   :  { %v3764_v5 = vadd.f32 %v3681_v55, %v11443_v31 }
 0x6f1   :  { %4519 = vtanh.f32 %v3899_v23  ;;  %v3886_v56 = vadd.f32 %v4516_v15, %v3885_v13 }
 0x6f2   :  { %v4265_v62 = vmul.f32 -1.442695, %v3764_v5  ;;  %4521 = vpow2.f32 %v4264_v19 }
 0x6f3   :  { %v3890_v17 = vsel %vm3889_vm7, %v4516_v15, %v3886_v56  ;;  %v4149_v56 = vld [vmem:[#allocation9 + $0x78] sm:$0xff] }
 0x6f4   :  { %4523 = vpow2.f32 %v4265_v62  ;;  %v3895_v58 = vsel %vm3892_vm8, %v3894_v0, %v3890_v17  ;;  %v4148_v62 = vld [vmem:[#allocation9 + $0x70] sm:$0xff]  ;;  %v4146_v17 = vld [vmem:[#allocation9 + $0x60] sm:$0xff]  ;;  %v4145_v0 = vld [vmem:[#allocation9 + $0x58] sm:$0xff] }
 0x6f7   :  { %v4520_v47 = vpop.eup %4519 }
 0x6f8   :  { %v3901_v51 = vmul.f32 %v4520_v47, %v3895_v58  ;;  %v4522_v6 = vpop.eup %4521  ;;  %v4144_v47 = vld [vmem:[#allocation9 + $0x50] sm:$0xff] }
 0x6f9   :  { %v3770_v60 = vadd.f32 1.0, %v4522_v6 }
 0x6fa   :  { %3921 = vmatmul.f32.vlgmr.msrb.gmra.mxu0 %v3901_v51  ;;  %3961 = vmatmul.f32.vlgmr.msra.gmra.mxu2 %v3901_v51  ;;  %v4524_v44 = vpop.eup %4523 }
 0x6fb   :  { %v3789_v32 = vadd.f32 1.0, %v4524_v44  ;;  %4525 = vrcp.f32 %v3770_v60  ;;  %vm3776_vm11 = vweird.f32 %v3770_v60  ;;  %v3782_v4 = vand.u32 2147483648, %v3770_v60  ;;  %4154 = vmatpush.msrb.mxu0 %v4149_v56  ;;  %v4143_v44 = vld [vmem:[#allocation9 + $0x48] sm:$0xff] }
 0x6fc   :  { %v3780_v59 = vand.u32 2147483647, %v3770_v60 }
 0x6fd   :  { %4527 = vrcp.f32 %v3789_v32  ;;  %v3801_v14 = vand.u32 2147483648, %v3789_v32  ;;  %vm3795_vm12 = vweird.f32 %v3789_v32  ;;  %v3799_v30 = vand.u32 2147483647, %v3789_v32  ;;  %4155 = vmatpush.msrb.mxu0 %v4148_v62 }
 0x6fe   :  { %v3783_v36 = vor.u32 1.1754944e-38, %v3782_v4  ;;  %vm3781_vm15 = vcmp.eq.f32.partialorder %v3780_v59, 8.507059e+37 }
 0x6ff   :  { %v3802_v15 = vor.u32 1.1754944e-38, %v3801_v14  ;;  %vm3800_vm0 = vcmp.eq.f32.partialorder %v3799_v30, 8.507059e+37  ;;  %4156 = vmatpush.msrb.mxu0 %v4147_v12 }
 0x701   :  { %v4526_v54 = vpop.eup %4525  ;;  %4157 = vmatpush.msrb.mxu0 %v4146_v17 }
 0x702   :  { %4001 = vmatmul.f32.vlgmr.msra.gmra.mxu0 %v3901_v51  ;;  %4041 = vmatmul.f32.vlgmr.msrb.gmra.mxu2 %v3901_v51  ;;  %v3772_v41 = vmul.f32 %v4526_v54, %v3770_v60  ;;  %vm3777_vm9 = vweird.f32 %v4526_v54 }
 0x703   :  { %v4528_v38 = vpop.eup %4527  ;;  %vm3778_vm13 = vmor %vm3776_vm11, %vm3777_vm9  ;;  %4158 = vmatpush.msrb.mxu0 %v4145_v0 }
 0x704   :  { %v3791_v26 = vmul.f32 %v4528_v38, %v3789_v32  ;;  %v3773_v42 = vsub.f32 1.0, %v3772_v41  ;;  %vm3796_vm10 = vweird.f32 %v4528_v38  ;;  %v4142_v32 = vld [vmem:[#allocation9 + $0x40] sm:$0xff]  ;;  %v4141_v41 = vld [vmem:[#allocation9 + $0x38] sm:$0xff] }
 0x705   :  { %vm3797_vm14 = vmor %vm3795_vm12, %vm3796_vm10  ;;  %4159 = vmatpush.msrb.mxu0 %v4144_v47 }
 0x706   :  { %v3792_v57 = vsub.f32 1.0, %v3791_v26  ;;  %v3774_v9 = vmul.f32 %v4526_v54, %v3773_v42  ;;  %v4137_v42 = vld [vmem:[#allocation9 + $0x18] sm:$0xff] }
 0x707   :  { %v3720_v48 = vpop.f32.mrf.mxu1  ;;  %4160 = vmatpush.msrb.mxu0 %v4143_v44 }
 0x708   :  { %v3721_v29 = vadd.f32 %v3720_v48, %v3700_v24  ;;  %v3793_v46 = vmul.f32 %v4528_v38, %v3792_v57  ;;  %v3775_v39 = vadd.f32 %v4526_v54, %v3774_v9  ;;  %v4140_v24 = vld [vmem:[#allocation9 + $0x30] sm:$0xff]  ;;  %v4135_v9 = vld [vmem:[#allocation9 + $0x8] sm:$0xff] }
 0x709   :  { %4161 = vmatpush.msrb.mxu0 %v4142_v32  ;;  %v4136_v57 = vld [vmem:[#allocation9 + $0x10] sm:$0xff] }
 0x70a   :  { %v3765_v50 = vadd.f32 %v3721_v29, %v11445_v7  ;;  %v3794_v18 = vadd.f32 %v4528_v38, %v3793_v46  ;;  %v3779_v16 = vsel %vm3778_vm13, %v4526_v54, %v3775_v39 }
 0x70b   :  { %v3784_v40 = vsel %vm3781_vm15, %v3783_v36, %v3779_v16  ;;  %4162 = vmatpush.msrb.mxu0 %v4141_v41 }
 0x70c   :  { %v3798_v37 = vsel %vm3797_vm14, %v4528_v38, %v3794_v18 }
 0x70d   :  { %v3760_v35 = vpop.f32.mrf.mxu3  ;;  %v3803_v21 = vsel %vm3800_vm0, %v3802_v15, %v3798_v37  ;;  %4163 = vmatpush.msrb.mxu0 %v4140_v24 }
 0x70e   :  { %v3761_v2 = vadd.f32 %v3760_v35, %v3740_v10  ;;  %v3825_v49 = vmul.f32 %v3803_v21, %v11446_v53  ;;  %v4139_v35 = vld [vmem:[#allocation9 + $0x28] sm:$0xff] }
 0x70f   :  { %4164 = vmatpush.msrb.mxu0 %v4139_v35 }
 0x710   :  { %v3766_v1 = vadd.f32 %v3761_v2, %v11444_v22  ;;  %v4138_v2 = vld [vmem:[#allocation9 + $0x20] sm:$0xff] }
 0x711   :  { %4165 = vmatpush.msrb.mxu0 %v4138_v2 }
 0x712   :  { %v4266_v27 = vmul.f32 -1.442695, %v3766_v1 }
 0x713   :  { %4166 = vmatpush.msrb.mxu0 %v4137_v42 }
 0x714   :  { %4529 = vpow2.f32 %v4266_v27 }
 0x715   :  { %4531 = vtanh.f32 %v3765_v50  ;;  %4167 = vmatpush.msrb.mxu0 %v4136_v57 }
 0x717   :  { %4168 = vmatpush.msrb.mxu0 %v4135_v9 }
 0x71a   :  { %v4530_v63 = vpop.eup %4529 }
 0x71b   :  { %v3809_v33 = vadd.f32 1.0, %v4530_v63  ;;  %v4532_v28 = vpop.eup %4531 }
 0x71c   :  { %v3826_v20 = vmul.f32 %v4532_v28, %v3784_v40 }
 0x71d   :  { %4533 = vrcp.f32 %v3809_v33  ;;  %v3821_v11 = vand.u32 2147483648, %v3809_v33  ;;  %v3819_v43 = vand.u32 2147483647, %v3809_v33  ;;  %vm3815_vm2 = vweird.f32 %v3809_v33 }
 0x71e   :  { %v9615_v25 = vadd.f32 %v3826_v20, %v3825_v49 }
 0x71f   :  { %v3822_v23 = vor.u32 1.1754944e-38, %v3821_v11  ;;  %vm3820_vm4 = vcmp.eq.f32.partialorder %v3819_v43, 8.507059e+37 }
 0x720   :  { %4535 = vtanh.f32 %v9615_v25 }
 0x723   :  { %v4534_v45 = vpop.eup %4533 }
 0x724   :  { %v3811_v52 = vmul.f32 %v4534_v45, %v3809_v33  ;;  %vm3816_vm1 = vweird.f32 %v4534_v45 }
 0x725   :  { %vm3817_vm3 = vmor %vm3815_vm2, %vm3816_vm1 }
 0x726   :  { %v3812_v34 = vsub.f32 1.0, %v3811_v52  ;;  %v4536_v19 = vpop.eup %4535 }
 0x728   :  { %v3813_v61 = vmul.f32 %v4534_v45, %v3812_v34 }
 0x72a   :  { %v3814_v55 = vadd.f32 %v4534_v45, %v3813_v61 }
 0x72c   :  { %v3818_v13 = vsel %vm3817_vm3, %v4534_v45, %v3814_v55 }
 0x72d   :  { %v3823_v5 = vsel %vm3820_vm4, %v3822_v23, %v3818_v13 }
 0x72e   :  { %v3829_v8 = vmul.f32 %v4536_v19, %v3823_v5 }
 0x730   :  { %3941 = vmatmul.f32.vlgmr.msra.gmra.mxu1 %v3829_v8  ;;  %3981 = vmatmul.f32.vlgmr.msra.gmra.mxu3 %v3829_v8 }
 0x738   :  { %4021 = vmatmul.f32.vlgmr.msrb.gmra.mxu1 %v3829_v8  ;;  %4061 = vmatmul.f32.vlgmr.msrb.gmra.mxu3 %v3829_v8 }
 0x777   :  { %v3922_v58 = vpop.f32.mrf.mxu0 }
 0x77d   :  { %v3962_v54 = vpop.f32.mrf.mxu2 }
 0x77f   :  { %v4002_v63 = vpop.f32.mrf.mxu0 }
 0x785   :  { %v4042_v1 = vpop.f32.mrf.mxu2 }
 0x7ad   :  { %v3942_v51 = vpop.f32.mrf.mxu1 }
 0x7ae   :  { %v3943_v6 = vadd.f32 %v3942_v51, %v3922_v58 }
 0x7b0   :  { %v4065_v60 = vadd.f32 %v3943_v6, %v11441_v3 }
 0x7b2   :  { %v4270_v38 = vmul.f32 -1.442695, %v4065_v60 }
 0x7b3   :  { %v3982_v26 = vpop.f32.mrf.mxu3 }
 0x7b4   :  { %4537 = vpow2.f32 %v4270_v38  ;;  %v3983_v48 = vadd.f32 %v3982_v26, %v3962_v54 }
 0x7b5   :  { %v4022_v59 = vpop.f32.mrf.mxu1 }
 0x7b6   :  { %v4066_v10 = vadd.f32 %v3983_v48, %v11443_v31  ;;  %v4134_v31 = vld [vmem:[#allocation9] sm:$0xff]  ;;  %v4023_v37 = vadd.f32 %v4022_v59, %v4002_v63 }
 0x7b7   :  { %4169 = vmatpush.msrb.mxu0 %v4134_v31 }
 0x7b8   :  { %v4271_v29 = vmul.f32 -1.442695, %v4066_v10  ;;  %v4067_v40 = vadd.f32 %v4023_v37, %v11445_v7 }
 0x7ba   :  { %v4538_v3 = vpop.eup %4537  ;;  %4539 = vpow2.f32 %v4271_v29 }
 0x7bb   :  { %v4072_v50 = vadd.f32 1.0, %v4538_v3  ;;  %v4062_v27 = vpop.f32.mrf.mxu3 }
 0x7bc   :  { %v4063_v46 = vadd.f32 %v4062_v27, %v4042_v1 }
 0x7bd   :  { %4541 = vrcp.f32 %v4072_v50  ;;  %v4084_v53 = vand.u32 2147483648, %v4072_v50  ;;  %vm4078_vm6 = vweird.f32 %v4072_v50  ;;  %v4082_v45 = vand.u32 2147483647, %v4072_v50 }
 0x7be   :  { %v4068_v39 = vadd.f32 %v4063_v46, %v11444_v22 }
 0x7bf   :  { %v4085_v43 = vor.u32 1.1754944e-38, %v4084_v53  ;;  %vm4083_vm10 = vcmp.eq.f32.partialorder %v4082_v45, 8.507059e+37 }
 0x7c0   :  { %v4540_v18 = vpop.eup %4539  ;;  %v4272_v14 = vmul.f32 -1.442695, %v4068_v39 }
 0x7c1   :  { %v4091_v4 = vadd.f32 1.0, %v4540_v18 }
 0x7c2   :  { %4543 = vpow2.f32 %v4272_v14 }
 0x7c3   :  { %v4542_v30 = vpop.eup %4541  ;;  %4545 = vrcp.f32 %v4091_v4  ;;  %v4103_v52 = vand.u32 2147483648, %v4091_v4  ;;  %v4101_v61 = vand.u32 2147483647, %v4091_v4  ;;  %vm4097_vm9 = vweird.f32 %v4091_v4 }
 0x7c4   :  { %v4074_v16 = vmul.f32 %v4542_v30, %v4072_v50  ;;  %vm4079_vm5 = vweird.f32 %v4542_v30 }
 0x7c5   :  { %vm4080_vm7 = vmor %vm4078_vm6, %vm4079_vm5  ;;  %v4104_v23 = vor.u32 1.1754944e-38, %v4103_v52  ;;  %vm4102_vm12 = vcmp.eq.f32.partialorder %v4101_v61, 8.507059e+37 }
 0x7c6   :  { %v4075_v33 = vsub.f32 1.0, %v4074_v16 }
 0x7c8   :  { %v4544_v28 = vpop.eup %4543  ;;  %v4076_v15 = vmul.f32 %v4542_v30, %v4075_v33 }
 0x7c9   :  { %v4546_v36 = vpop.eup %4545  ;;  %v4111_v22 = vadd.f32 1.0, %v4544_v28 }
 0x7ca   :  { %v4093_v21 = vmul.f32 %v4546_v36, %v4091_v4  ;;  %v4077_v20 = vadd.f32 %v4542_v30, %v4076_v15  ;;  %vm4098_vm8 = vweird.f32 %v4546_v36 }
 0x7cb   :  { %4547 = vrcp.f32 %v4111_v22  ;;  %vm4099_vm11 = vmor %vm4097_vm9, %vm4098_vm8  ;;  %v4123_v58 = vand.u32 2147483648, %v4111_v22  ;;  %vm4117_vm14 = vweird.f32 %v4111_v22  ;;  %v4121_v6 = vand.u32 2147483647, %v4111_v22 }
 0x7cc   :  { %v4094_v49 = vsub.f32 1.0, %v4093_v21  ;;  %4549 = vtanh.f32 %v4067_v40  ;;  %v4081_v11 = vsel %vm4080_vm7, %v4542_v30, %v4077_v20 }
 0x7cd   :  { %v4086_v13 = vsel %vm4083_vm10, %v4085_v43, %v4081_v11  ;;  %v4124_v60 = vor.u32 1.1754944e-38, %v4123_v58  ;;  %vm4122_vm0 = vcmp.eq.f32.partialorder %v4121_v6, 8.507059e+37 }
 0x7ce   :  { %v4095_v34 = vmul.f32 %v4546_v36, %v4094_v49 }
 0x7d0   :  { %v4096_v7 = vadd.f32 %v4546_v36, %v4095_v34 }
 0x7d1   :  { %v4548_v55 = vpop.eup %4547 }
 0x7d2   :  { %v4100_v19 = vsel %vm4099_vm11, %v4546_v36, %v4096_v7  ;;  %v4113_v5 = vmul.f32 %v4548_v55, %v4111_v22  ;;  %v4550_v8 = vpop.eup %4549  ;;  %vm4118_vm13 = vweird.f32 %v4548_v55 }
 0x7d3   :  { %v4105_v56 = vsel %vm4102_vm12, %v4104_v23, %v4100_v19  ;;  %v4128_v12 = vmul.f32 %v4550_v8, %v4086_v13  ;;  %vm4119_vm15 = vmor %vm4117_vm14, %vm4118_vm13 }
 0x7d4   :  { %v4127_v62 = vmul.f32 %v4105_v56, %v9615_v25  ;;  %v4114_v17 = vsub.f32 1.0, %v4113_v5  ;;  %v4296_v25 = vld [vmem:[%s9635_s6] ss:$0 sm:$0xff] }
 0x7d6   :  { %v4129_v0 = vadd.f32 %v4128_v12, %v4127_v62  ;;  %v4115_v47 = vmul.f32 %v4548_v55, %v4114_v17 }
 0x7d8   :  { %4551 = vtanh.f32 %v4129_v0  ;;  %v4116_v51 = vadd.f32 %v4548_v55, %v4115_v47 }
 0x7da   :  { %v4120_v44 = vsel %vm4119_vm15, %v4548_v55, %v4116_v51 }
 0x7db   :  { %v4125_v54 = vsel %vm4122_vm0, %v4124_v60, %v4120_v44 }
 0x7de   :  { %v4552_v32 = vpop.eup %4551 }
 0x7df   :  { %v4131_v38 = vmul.f32 %v4552_v32, %v4125_v54 }
 0x7e1   :  { %4170 = vmatmul.f32.vlgmr.msrb.gmra.mxu0 %v4131_v38 }
 0x85e   :  { %v4171_v41 = vpop.f32.mrf.mxu0 }
 0x85f   :  { %v4172_v26 = vadd.f32 %v4296_v25, %v4171_v41 }
 0x861   :  { %4174 = vst [vmem:[#allocation10] sm:$0xff] %v4172_v26 }
 0x862   :  { %4185 = dma.vmem_to_hbm [thread:$0]  %s4181_s15, 128, %s4183_s18, [#allocation6]  }
 0x863   :  { %5507 = dma.done.wait [#allocation6], 128  }
 0x864   :  { %5508 = vsyncadd [#allocation6], 4294967168 }
 0x865   :  { %4190 = vsyncpa [#allocation5], 1 }
 0x866   :  { %4191 = vsyncpa [#allocation8], 1 }
 0x867   :  { %4192 = vsyncpa [#allocation6], 1 }

</bundles_post_ra>
